<compile_context>
chip_gen: v7x
topology: tpu7x:2x2x1
jax: 0.10.0
libtpu: 0.0.40
codegen_flags: <defaults>
</compile_context>

<pallas_src>
from functools import partial

import numpy as np
import jax
import jax.numpy as jnp
from jax import lax
from jax.experimental import pallas as pl
from jax.experimental.pallas import tpu as pltpu

EPS = 1e-5


# ------------------------------ Pallas kernel --------------------------------

def _cnn_kernel(l1_ref, w1_ref, sc1_ref, sh1_ref, w2_ref, sc2_ref, sh2_ref,
                wfc_ref, bfc_ref, o_ref, acc2_ref, *, BT):
    m1 = 14 * BT          # layer-1 pooled rows in this tile
    m2 = 7 * BT           # layer-2 pooled rows in this tile

    # ---------------- layer 1: conv1 + BN + ReLU + 2x2 pool -----------------
    # l1 rows: (pooled-row parity p, pooled row q) major, image i minor.
    acc1 = jnp.dot(l1_ref[...], w1_ref[...],
                   preferred_element_type=jnp.float32)         # (14BT, 1024)
    aff1 = acc1 * sc1_ref[...] + sh1_ref[...]
    p1 = jnp.maximum(
        jnp.maximum(jnp.maximum(aff1[:, 0:256], aff1[:, 256:512]),
                    jnp.maximum(aff1[:, 512:768], aff1[:, 768:1024])),
        0.0)                                                   # (14BT, 256)
    # p1 rows [0, 7BT)  : even pooled rows e_q, row = q*BT + i
    # p1 rows [7BT,14BT): odd  pooled rows o_q, row = 7BT + q*BT + i

    # ---------------- layer 2: conv2 + BN + ReLU + 2x2 pool ------------------
    def mm(lo, hi, widx):
        return jnp.dot(p1[lo:hi, :].astype(jnp.bfloat16), w2_ref[widx],
                       preferred_element_type=jnp.float32)

    # output row m = py2*BT + i; the three vertical tap groups are row shifts.
    acc2_ref[...] = mm(0, m2, 1) + mm(m2, m1, 4)                     # shift  0
    acc2_ref[BT:m2, :] = acc2_ref[BT:m2, :] \
        + mm(0, m2 - BT, 0) + mm(m2, m1 - BT, 3)                     # shift -1
    acc2_ref[0:m2 - BT, :] = acc2_ref[0:m2 - BT, :] \
        + mm(BT, m2, 2) + mm(m2 + BT, m1, 5)                         # shift +1

    aff2 = acc2_ref[...] * sc2_ref[...] + sh2_ref[...]
    p2 = jnp.maximum(
        jnp.maximum(jnp.maximum(aff2[:, 0:256], aff2[:, 256:512]),
                    jnp.maximum(aff2[:, 512:768], aff2[:, 768:1024])),
        0.0)                                                   # (7BT, 256)

    # ------------------------ FC: Linear(1568 -> 10) -------------------------
    # gather each image's 7 pooled rows into the lane dim -> one matmul.
    lfc = jnp.concatenate([p2[k * BT:(k + 1) * BT, :] for k in range(7)],
                          axis=1).astype(jnp.bfloat16)         # (BT, 1792)
    out = jnp.dot(lfc, wfc_ref[...], preferred_element_type=jnp.float32)
    o_ref[...] = out + bfc_ref[...]


def _cnn_pallas(l1, w1, sc1, sh1, w2, sc2, sh2, wfc, bfc, *, BT, nb):
    kernel = partial(_cnn_kernel, BT=BT)
    return pl.pallas_call(
        kernel,
        out_shape=jax.ShapeDtypeStruct((nb * BT, 10), jnp.float32),
        grid_spec=pltpu.PrefetchScalarGridSpec(
            num_scalar_prefetch=0,
            grid=(nb,),
            in_specs=[
                pl.BlockSpec((14 * BT, 192), lambda b: (b, 0)),
                pl.BlockSpec((192, 1024), lambda b: (0, 0)),
                pl.BlockSpec((1, 1024), lambda b: (0, 0)),
                pl.BlockSpec((1, 1024), lambda b: (0, 0)),
                pl.BlockSpec((6, 256, 1024), lambda b: (0, 0, 0)),
                pl.BlockSpec((1, 1024), lambda b: (0, 0)),
                pl.BlockSpec((1, 1024), lambda b: (0, 0)),
                pl.BlockSpec((1792, 10), lambda b: (0, 0)),
                pl.BlockSpec((1, 10), lambda b: (0, 0)),
            ],
            out_specs=pl.BlockSpec((BT, 10), lambda b: (b, 0)),
            scratch_shapes=[pltpu.VMEM((7 * BT, 1024), jnp.float32)],
        ),
        compiler_params=pltpu.CompilerParams(
            dimension_semantics=("parallel",)),
    )(l1, w1, sc1, sh1, w2, sc2, sh2, wfc, bfc)


# -------------------- host-side parameter preprocessing ----------------------
# (done once; turns the PyTorch conv/BN/FC parameters into banded GEMM weights)

def _fold_bn(bias, gamma, beta, mean, var):
    s = gamma / np.sqrt(var + EPS)
    t = (bias - mean) * s + beta
    return s.astype(np.float32), t.astype(np.float32)


def _lane_affine(s_c, t_c, n_ch, n_px):
    """Per-lane folded BN scale/shift on the 1024-wide conv accumulator layout
    lane = half*512 + xpar*256 + px*n_ch + co; pad lanes stay exactly 0."""
    sc = np.zeros((1, 1024), np.float32)
    sh = np.zeros((1, 1024), np.float32)
    for half in range(2):
        for xpar in range(2):
            for px in range(n_px):
                base = half * 512 + xpar * 256 + px * n_ch
                sc[0, base:base + n_ch] = s_c
                sh[0, base:base + n_ch] = t_c
    return sc, sh


def _build_w1(w1):
    """Banded conv1 weight, both conv-row parities side by side.
    K = r*32 + j   (r = 0..5 window row of the pooled output row, j = padded
                    input column)
    N = half*512 + xpar*256 + px*16 + co  (conv row y = 2*py + half,
                                           conv col x = 2*px + xpar)."""
    w1 = np.asarray(w1, np.float32)
    W = np.zeros((192, 1024), np.float32)
    for r in range(6):
        for half in range(2):
            dy = r - half
            if not 0 <= dy <= 4:
                continue
            for xpar in range(2):
                for px in range(14):
                    x = 2 * px + xpar
                    base = half * 512 + xpar * 256 + px * 16
                    for dx in range(5):
                        W[r * 32 + x + dx, base:base + 16] = w1[:, 0, dy, dx]
    return W


def _build_w2(w2):
    """Banded conv2 weights on the raw pooled layer-1 lane layout
    (K = j*16 + ci, j = pooled column 0..13; rows 224..255 stay zero),
    grouped by the row shift of the pooled layer-1 rows they consume:
      0..2: even-parity pooled rows, shift -1 / 0 / +1
      3..5: odd-parity  pooled rows, shift -1 / 0 / +1
    N = half*512 + xpar*256 + px2*32 + co (half = conv-row parity)."""
    w2 = np.asarray(w2, np.float32)
    T = np.zeros((5, 256, 512), np.float32)        # per vertical tap dy
    for dy in range(5):
        for xpar in range(2):
            for px2 in range(7):
                x2 = 2 * px2 + xpar
                base = xpar * 256 + px2 * 32
                for dx in range(5):
                    j = x2 + dx - 2
                    if 0 <= j < 14:
                        for ci in range(16):
                            T[dy, j * 16 + ci, base:base + 32] = w2[:, ci, dy, dx]
    Z = np.zeros((256, 512), np.float32)
    cat = lambda a, b: np.concatenate([a, b], axis=1)
    return np.stack([cat(T[0], Z),      # even rows, shift -1
                     cat(T[2], T[1]),   # even rows, shift  0
                     cat(T[4], T[3]),   # even rows, shift +1
                     cat(T[1], T[0]),   # odd  rows, shift -1
                     cat(T[3], T[2]),   # odd  rows, shift  0
                     cat(Z, T[4])])     # odd  rows, shift +1


def _build_wfc(wfc):
    """FC weight on the kernel's (BT, 1792) flattened activation:
    row = py2*256 + px2*32 + co (rows 224..255 of every 256-block are zero),
    matching the PyTorch NCHW flatten index co*49 + py2*7 + px2."""
    wfc = np.asarray(wfc, np.float32)
    W = np.zeros((1792, 10), np.float32)
    for py2 in range(7):
        for px2 in range(7):
            for co in range(32):
                W[py2 * 256 + px2 * 32 + co, :] = wfc[:, co * 49 + py2 * 7 + px2]
    return W


def prepare_params(raw):
    (w1, b1, g1, be1, mu1, v1, w2, b2, g2, be2, mu2, v2, wfc, bfc) = [
        np.asarray(a, np.float32) for a in raw]
    s1, t1 = _fold_bn(b1, g1, be1, mu1, v1)
    s2, t2 = _fold_bn(b2, g2, be2, mu2, v2)
    sc1, sh1 = _lane_affine(s1, t1, 16, 14)
    sc2, sh2 = _lane_affine(s2, t2, 32, 7)
    return (jnp.asarray(_build_w1(w1), jnp.bfloat16),
            jnp.asarray(sc1), jnp.asarray(sh1),
            jnp.asarray(_build_w2(w2), jnp.bfloat16),
            jnp.asarray(sc2), jnp.asarray(sh2),
            jnp.asarray(_build_wfc(wfc), jnp.bfloat16),
            jnp.asarray(bfc.reshape(1, 10)))


# --------------------------------- forward -----------------------------------

def _pick_bt(B):
    if B <= 16:
        return 8
    if B <= 64:
        return 16
    return 32


@partial(jax.jit, static_argnums=(2,))
def _cnn_forward_impl(x, params, BT):
    (w1, sc1, sh1, w2, sc2, sh2, wfc, bfc) = params
    B = x.shape[0]
    Bp = ((B + BT - 1) // BT) * BT
    nb = Bp // BT

    # Unfold the padded input rows into the layer-1 GEMM LHS (cheap XLA glue
    # on the raw input only; everything downstream stays inside the kernel).
    # Row order: batch-block major, (pooled-row parity p, pooled row q) next,
    # image within block minor -> all kernel slices are 8-row aligned.
    xpad = jnp.pad(x[:, 0], ((0, Bp - B), (2, 2), (2, 2)))        # (Bp, 32, 32)
    halves = []
    for p in range(2):                                            # pooled-row parity
        taps = [xpad[:, 2 * p + r: 2 * p + r + 25: 4, :] for r in range(6)]
        halves.append(jnp.concatenate(taps, axis=-1))             # (Bp, 7, 192)
    l1 = jnp.concatenate(halves, axis=1)                          # (Bp, 14, 192)
    l1 = l1.reshape(nb, BT, 14, 192).transpose(0, 2, 1, 3)
    l1 = l1.reshape(nb * 14 * BT, 192).astype(jnp.bfloat16)

    out = _cnn_pallas(l1, w1, sc1, sh1, w2, sc2, sh2, wfc, bfc, BT=BT, nb=nb)
    return out[:B]


def cnn_forward(x, params):
    return _cnn_forward_impl(x, params, _pick_bt(x.shape[0]))


# ---------------------------- pure-JAX reference ------------------------------

def reference(x, raw):
    (w1, b1, g1, be1, mu1, v1, w2, b2, g2, be2, mu2, v2, wfc, bfc) = raw

    def block(x, w, b, g, be, mu, v):
        y = lax.conv_general_dilated(
            x, w, (1, 1), ((2, 2), (2, 2)),
            dimension_numbers=('NCHW', 'OIHW', 'NCHW'),
            precision=lax.Precision.HIGHEST)
        y = y + b[None, :, None, None]
        s = g / jnp.sqrt(v + EPS)
        y = (y - mu[None, :, None, None]) * s[None, :, None, None] \
            + be[None, :, None, None]
        y = jnp.maximum(y, 0.0)
        return lax.reduce_window(y, -jnp.inf, lax.max,
                                 (1, 1, 2, 2), (1, 1, 2, 2), 'VALID')

    y = block(x, w1, b1, g1, be1, mu1, v1)
    y = block(y, w2, b2, g2, be2, mu2, v2)
    return jnp.dot(y.reshape(x.shape[0], -1), wfc.T,
                   precision=lax.Precision.HIGHEST) + bfc


# ------------------------------------ main ------------------------------------

if __name__ == "__main__":
    key = jax.random.PRNGKey(0)
    ks = jax.random.split(key, 16)

    B = 2
    x = jax.random.normal(ks[0], (B, 1, 28, 28), jnp.float32)  # NCHW like PyTorch

    # Conv2d(1,16,5) + BatchNorm2d(16)
    w1 = 0.1 * jax.random.normal(ks[1], (16, 1, 5, 5), jnp.float32)
    b1 = 0.1 * jax.random.normal(ks[2], (16,), jnp.float32)
    g1 = 1.0 + 0.1 * jax.random.normal(ks[3], (16,), jnp.float32)
    be1 = 0.1 * jax.random.normal(ks[4], (16,), jnp.float32)
    mu1 = 0.1 * jax.random.normal(ks[5], (16,), jnp.float32)
    v1 = 1.0 + 0.1 * jax.random.uniform(ks[6], (16,), jnp.float32)

    # Conv2d(16,32,5) + BatchNorm2d(32)
    w2 = 0.05 * jax.random.normal(ks[7], (32, 16, 5, 5), jnp.float32)
    b2 = 0.1 * jax.random.normal(ks[8], (32,), jnp.float32)
    g2 = 1.0 + 0.1 * jax.random.normal(ks[9], (32,), jnp.float32)
    be2 = 0.1 * jax.random.normal(ks[10], (32,), jnp.float32)
    mu2 = 0.1 * jax.random.normal(ks[11], (32,), jnp.float32)
    v2 = 1.0 + 0.1 * jax.random.uniform(ks[12], (32,), jnp.float32)

    # Linear(7*7*32, 10)
    wfc = 0.05 * jax.random.normal(ks[13], (10, 7 * 7 * 32), jnp.float32)
    bfc = 0.05 * jax.random.normal(ks[14], (10,), jnp.float32)

    raw = (w1, b1, g1, be1, mu1, v1, w2, b2, g2, be2, mu2, v2, wfc, bfc)
    params = prepare_params(raw)

    out = cnn_forward(x, params)
    out = jax.block_until_ready(out)
    assert out.shape == (B, 10) and out.dtype == jnp.float32

    ref = reference(x, raw)
    # bf16 MXU inputs / activations vs. an f32/HIGHEST reference: expected
    # deviation ~1e-2 on O(1) logits, so compare at 5e-2.
    np.testing.assert_allclose(np.asarray(out), np.asarray(ref),
                               rtol=5e-2, atol=5e-2)

    print("KERNEL_OK")
</pallas_src>

<mosaic_0001>
module attributes {stable_mosaic.version = 11 : i64} {
  func.func @_cnn_kernel(%arg0: i32, %arg1: memref<112x192xbf16, #tpu.memory_space<vmem>>, %arg2: memref<192x1024xbf16, #tpu.memory_space<vmem>>, %arg3: memref<1x1024xf32, #tpu.memory_space<vmem>>, %arg4: memref<1x1024xf32, #tpu.memory_space<vmem>>, %arg5: memref<6x256x1024xbf16, #tpu.memory_space<vmem>>, %arg6: memref<1x1024xf32, #tpu.memory_space<vmem>>, %arg7: memref<1x1024xf32, #tpu.memory_space<vmem>>, %arg8: memref<1792x10xbf16, #tpu.memory_space<vmem>>, %arg9: memref<1x10xf32, #tpu.memory_space<vmem>>, %arg10: memref<8x10xf32, #tpu.memory_space<vmem>>, %arg11: memref<56x1024xf32, #tpu.memory_space<vmem>>) attributes {dimension_semantics = [#tpu.dimension_semantics<parallel>], iteration_bounds = array<i64: 1>, scalar_prefetch = 0 : i64, scratch_operands = 1 : i64, tpu.core_type = #tpu.core_type<tc>, window_params = [{transform_indices = @transform_0, window_bounds = array<i64: 112, 192>}, {pipeline_mode = #tpu.pipeline_mode<synchronous>, transform_indices = @transform_1, window_bounds = array<i64: 192, 1024>}, {pipeline_mode = #tpu.pipeline_mode<synchronous>, transform_indices = @transform_2, window_bounds = array<i64: 1, 1024>}, {pipeline_mode = #tpu.pipeline_mode<synchronous>, transform_indices = @transform_3, window_bounds = array<i64: 1, 1024>}, {pipeline_mode = #tpu.pipeline_mode<synchronous>, transform_indices = @transform_4, window_bounds = array<i64: 6, 256, 1024>}, {pipeline_mode = #tpu.pipeline_mode<synchronous>, transform_indices = @transform_5, window_bounds = array<i64: 1, 1024>}, {pipeline_mode = #tpu.pipeline_mode<synchronous>, transform_indices = @transform_6, window_bounds = array<i64: 1, 1024>}, {pipeline_mode = #tpu.pipeline_mode<synchronous>, transform_indices = @transform_7, window_bounds = array<i64: 1792, 10>}, {pipeline_mode = #tpu.pipeline_mode<synchronous>, transform_indices = @transform_8, window_bounds = array<i64: 1, 10>}, {transform_indices = @transform_9, window_bounds = array<i64: 8, 10>}]} {
    %c0 = arith.constant 0 : index
    %c0_0 = arith.constant 0 : index
    %0 = vector.load %arg1[%c0, %c0_0] : memref<112x192xbf16, #tpu.memory_space<vmem>>, vector<112x192xbf16>
    %c0_1 = arith.constant 0 : index
    %c0_2 = arith.constant 0 : index
    %1 = vector.load %arg2[%c0_1, %c0_2] : memref<192x1024xbf16, #tpu.memory_space<vmem>>, vector<192x1024xbf16>
    %cst = arith.constant dense<0.000000e+00> : vector<112x1024xf32>
    %2 = tpu.matmul %0, %1, %cst {dimension_numbers = #tpu.dot_dimension_numbers<[1], [0], [0], [1], [0, 0, 1, 1], [], []>} : vector<112x192xbf16>, vector<192x1024xbf16>, vector<112x1024xf32> -> vector<112x1024xf32>
    %c0_3 = arith.constant 0 : index
    %c0_4 = arith.constant 0 : index
    %3 = vector.load %arg3[%c0_3, %c0_4] : memref<1x1024xf32, #tpu.memory_space<vmem>>, vector<1x1024xf32>
    %4 = vector.broadcast %3 : vector<1x1024xf32> to vector<112x1024xf32>
    %5 = arith.mulf %2, %4 : vector<112x1024xf32>
    %c0_5 = arith.constant 0 : index
    %c0_6 = arith.constant 0 : index
    %6 = vector.load %arg4[%c0_5, %c0_6] : memref<1x1024xf32, #tpu.memory_space<vmem>>, vector<1x1024xf32>
    %7 = vector.broadcast %6 : vector<1x1024xf32> to vector<112x1024xf32>
    %8 = arith.addf %5, %7 : vector<112x1024xf32>
    %9 = vector.extract_strided_slice %8 {offsets = [0, 0], sizes = [112, 256], strides = [1, 1]} : vector<112x1024xf32> to vector<112x256xf32>
    %10 = vector.extract_strided_slice %8 {offsets = [0, 256], sizes = [112, 256], strides = [1, 1]} : vector<112x1024xf32> to vector<112x256xf32>
    %11 = arith.maximumf %9, %10 : vector<112x256xf32>
    %12 = vector.extract_strided_slice %8 {offsets = [0, 512], sizes = [112, 256], strides = [1, 1]} : vector<112x1024xf32> to vector<112x256xf32>
    %13 = vector.extract_strided_slice %8 {offsets = [0, 768], sizes = [112, 256], strides = [1, 1]} : vector<112x1024xf32> to vector<112x256xf32>
    %14 = arith.maximumf %12, %13 : vector<112x256xf32>
    %15 = arith.maximumf %11, %14 : vector<112x256xf32>
    %cst_7 = arith.constant 0.000000e+00 : f32
    %16 = vector.broadcast %cst_7 : f32 to vector<112x256xf32>
    %17 = arith.maximumf %15, %16 : vector<112x256xf32>
    %18 = vector.extract_strided_slice %17 {offsets = [0, 0], sizes = [56, 256], strides = [1, 1]} : vector<112x256xf32> to vector<56x256xf32>
    %19 = arith.truncf %18 : vector<56x256xf32> to vector<56x256xbf16>
    %c1 = arith.constant 1 : index
    %c0_8 = arith.constant 0 : index
    %c0_9 = arith.constant 0 : index
    %20 = vector.load %arg5[%c1, %c0_8, %c0_9] : memref<6x256x1024xbf16, #tpu.memory_space<vmem>>, vector<1x256x1024xbf16>
    %21 = vector.shape_cast %20 : vector<1x256x1024xbf16> to vector<256x1024xbf16>
    %cst_10 = arith.constant dense<0.000000e+00> : vector<56x1024xf32>
    %22 = tpu.matmul %19, %21, %cst_10 {dimension_numbers = #tpu.dot_dimension_numbers<[1], [0], [0], [1], [0, 0, 1, 1], [], []>} : vector<56x256xbf16>, vector<256x1024xbf16>, vector<56x1024xf32> -> vector<56x1024xf32>
    %23 = vector.extract_strided_slice %17 {offsets = [56, 0], sizes = [56, 256], strides = [1, 1]} : vector<112x256xf32> to vector<56x256xf32>
    %24 = arith.truncf %23 : vector<56x256xf32> to vector<56x256xbf16>
    %c4 = arith.constant 4 : index
    %c0_11 = arith.constant 0 : index
    %c0_12 = arith.constant 0 : index
    %25 = vector.load %arg5[%c4, %c0_11, %c0_12] : memref<6x256x1024xbf16, #tpu.memory_space<vmem>>, vector<1x256x1024xbf16>
    %26 = vector.shape_cast %25 : vector<1x256x1024xbf16> to vector<256x1024xbf16>
    %cst_13 = arith.constant dense<0.000000e+00> : vector<56x1024xf32>
    %27 = tpu.matmul %24, %26, %cst_13 {dimension_numbers = #tpu.dot_dimension_numbers<[1], [0], [0], [1], [0, 0, 1, 1], [], []>} : vector<56x256xbf16>, vector<256x1024xbf16>, vector<56x1024xf32> -> vector<56x1024xf32>
    %28 = arith.addf %22, %27 : vector<56x1024xf32>
    %c0_14 = arith.constant 0 : index
    %c0_15 = arith.constant 0 : index
    %29 = vector.load %arg11[%c0_14, %c0_15] : memref<56x1024xf32, #tpu.memory_space<vmem>>, vector<56x1024xf32>
    tpu.vector_store %arg11[%c0_14, %c0_15], %28 {strides = array<i32>} : memref<56x1024xf32, #tpu.memory_space<vmem>>, vector<56x1024xf32>,
    %c8 = arith.constant 8 : index
    %c0_16 = arith.constant 0 : index
    %30 = vector.load %arg11[%c8, %c0_16] : memref<56x1024xf32, #tpu.memory_space<vmem>>, vector<48x1024xf32>
    %31 = vector.extract_strided_slice %17 {offsets = [0, 0], sizes = [48, 256], strides = [1, 1]} : vector<112x256xf32> to vector<48x256xf32>
    %32 = arith.truncf %31 : vector<48x256xf32> to vector<48x256xbf16>
    %c0_17 = arith.constant 0 : index
    %c0_18 = arith.constant 0 : index
    %c0_19 = arith.constant 0 : index
    %33 = vector.load %arg5[%c0_17, %c0_18, %c0_19] : memref<6x256x1024xbf16, #tpu.memory_space<vmem>>, vector<1x256x1024xbf16>
    %34 = vector.shape_cast %33 : vector<1x256x1024xbf16> to vector<256x1024xbf16>
    %cst_20 = arith.constant dense<0.000000e+00> : vector<48x1024xf32>
    %35 = tpu.matmul %32, %34, %cst_20 {dimension_numbers = #tpu.dot_dimension_numbers<[1], [0], [0], [1], [0, 0, 1, 1], [], []>} : vector<48x256xbf16>, vector<256x1024xbf16>, vector<48x1024xf32> -> vector<48x1024xf32>
    %36 = arith.addf %30, %35 : vector<48x1024xf32>
    %37 = vector.extract_strided_slice %17 {offsets = [56, 0], sizes = [48, 256], strides = [1, 1]} : vector<112x256xf32> to vector<48x256xf32>
    %38 = arith.truncf %37 : vector<48x256xf32> to vector<48x256xbf16>
    %c3 = arith.constant 3 : index
    %c0_21 = arith.constant 0 : index
    %c0_22 = arith.constant 0 : index
    %39 = vector.load %arg5[%c3, %c0_21, %c0_22] : memref<6x256x1024xbf16, #tpu.memory_space<vmem>>, vector<1x256x1024xbf16>
    %40 = vector.shape_cast %39 : vector<1x256x1024xbf16> to vector<256x1024xbf16>
    %cst_23 = arith.constant dense<0.000000e+00> : vector<48x1024xf32>
    %41 = tpu.matmul %38, %40, %cst_23 {dimension_numbers = #tpu.dot_dimension_numbers<[1], [0], [0], [1], [0, 0, 1, 1], [], []>} : vector<48x256xbf16>, vector<256x1024xbf16>, vector<48x1024xf32> -> vector<48x1024xf32>
    %42 = arith.addf %36, %41 : vector<48x1024xf32>
    %c8_24 = arith.constant 8 : index
    %c0_25 = arith.constant 0 : index
    %43 = vector.load %arg11[%c8_24, %c0_25] : memref<56x1024xf32, #tpu.memory_space<vmem>>, vector<48x1024xf32>
    tpu.vector_store %arg11[%c8_24, %c0_25], %42 {strides = array<i32>} : memref<56x1024xf32, #tpu.memory_space<vmem>>, vector<48x1024xf32>,
    %c0_26 = arith.constant 0 : index
    %c0_27 = arith.constant 0 : index
    %44 = vector.load %arg11[%c0_26, %c0_27] : memref<56x1024xf32, #tpu.memory_space<vmem>>, vector<48x1024xf32>
    %45 = vector.extract_strided_slice %17 {offsets = [8, 0], sizes = [48, 256], strides = [1, 1]} : vector<112x256xf32> to vector<48x256xf32>
    %46 = arith.truncf %45 : vector<48x256xf32> to vector<48x256xbf16>
    %c2 = arith.constant 2 : index
    %c0_28 = arith.constant 0 : index
    %c0_29 = arith.constant 0 : index
    %47 = vector.load %arg5[%c2, %c0_28, %c0_29] : memref<6x256x1024xbf16, #tpu.memory_space<vmem>>, vector<1x256x1024xbf16>
    %48 = vector.shape_cast %47 : vector<1x256x1024xbf16> to vector<256x1024xbf16>
    %cst_30 = arith.constant dense<0.000000e+00> : vector<48x1024xf32>
    %49 = tpu.matmul %46, %48, %cst_30 {dimension_numbers = #tpu.dot_dimension_numbers<[1], [0], [0], [1], [0, 0, 1, 1], [], []>} : vector<48x256xbf16>, vector<256x1024xbf16>, vector<48x1024xf32> -> vector<48x1024xf32>
    %50 = arith.addf %44, %49 : vector<48x1024xf32>
    %51 = vector.extract_strided_slice %17 {offsets = [64, 0], sizes = [48, 256], strides = [1, 1]} : vector<112x256xf32> to vector<48x256xf32>
    %52 = arith.truncf %51 : vector<48x256xf32> to vector<48x256xbf16>
    %c5 = arith.constant 5 : index
    %c0_31 = arith.constant 0 : index
    %c0_32 = arith.constant 0 : index
    %53 = vector.load %arg5[%c5, %c0_31, %c0_32] : memref<6x256x1024xbf16, #tpu.memory_space<vmem>>, vector<1x256x1024xbf16>
    %54 = vector.shape_cast %53 : vector<1x256x1024xbf16> to vector<256x1024xbf16>
    %cst_33 = arith.constant dense<0.000000e+00> : vector<48x1024xf32>
    %55 = tpu.matmul %52, %54, %cst_33 {dimension_numbers = #tpu.dot_dimension_numbers<[1], [0], [0], [1], [0, 0, 1, 1], [], []>} : vector<48x256xbf16>, vector<256x1024xbf16>, vector<48x1024xf32> -> vector<48x1024xf32>
    %56 = arith.addf %50, %55 : vector<48x1024xf32>
    %c0_34 = arith.constant 0 : index
    %c0_35 = arith.constant 0 : index
    %57 = vector.load %arg11[%c0_34, %c0_35] : memref<56x1024xf32, #tpu.memory_space<vmem>>, vector<48x1024xf32>
    tpu.vector_store %arg11[%c0_34, %c0_35], %56 {strides = array<i32>} : memref<56x1024xf32, #tpu.memory_space<vmem>>, vector<48x1024xf32>,
    %c0_36 = arith.constant 0 : index
    %c0_37 = arith.constant 0 : index
    %58 = vector.load %arg11[%c0_36, %c0_37] : memref<56x1024xf32, #tpu.memory_space<vmem>>, vector<56x1024xf32>
    %c0_38 = arith.constant 0 : index
    %c0_39 = arith.constant 0 : index
    %59 = vector.load %arg6[%c0_38, %c0_39] : memref<1x1024xf32, #tpu.memory_space<vmem>>, vector<1x1024xf32>
    %60 = vector.broadcast %59 : vector<1x1024xf32> to vector<56x1024xf32>
    %61 = arith.mulf %58, %60 : vector<56x1024xf32>
    %c0_40 = arith.constant 0 : index
    %c0_41 = arith.constant 0 : index
    %62 = vector.load %arg7[%c0_40, %c0_41] : memref<1x1024xf32, #tpu.memory_space<vmem>>, vector<1x1024xf32>
    %63 = vector.broadcast %62 : vector<1x1024xf32> to vector<56x1024xf32>
    %64 = arith.addf %61, %63 : vector<56x1024xf32>
    %65 = vector.extract_strided_slice %64 {offsets = [0, 0], sizes = [56, 256], strides = [1, 1]} : vector<56x1024xf32> to vector<56x256xf32>
    %66 = vector.extract_strided_slice %64 {offsets = [0, 256], sizes = [56, 256], strides = [1, 1]} : vector<56x1024xf32> to vector<56x256xf32>
    %67 = arith.maximumf %65, %66 : vector<56x256xf32>
    %68 = vector.extract_strided_slice %64 {offsets = [0, 512], sizes = [56, 256], strides = [1, 1]} : vector<56x1024xf32> to vector<56x256xf32>
    %69 = vector.extract_strided_slice %64 {offsets = [0, 768], sizes = [56, 256], strides = [1, 1]} : vector<56x1024xf32> to vector<56x256xf32>
    %70 = arith.maximumf %68, %69 : vector<56x256xf32>
    %71 = arith.maximumf %67, %70 : vector<56x256xf32>
    %cst_42 = arith.constant 0.000000e+00 : f32
    %72 = vector.broadcast %cst_42 : f32 to vector<56x256xf32>
    %73 = arith.maximumf %71, %72 : vector<56x256xf32>
    %74 = vector.extract_strided_slice %73 {offsets = [0, 0], sizes = [8, 256], strides = [1, 1]} : vector<56x256xf32> to vector<8x256xf32>
    %75 = vector.extract_strided_slice %73 {offsets = [8, 0], sizes = [8, 256], strides = [1, 1]} : vector<56x256xf32> to vector<8x256xf32>
    %76 = vector.extract_strided_slice %73 {offsets = [16, 0], sizes = [8, 256], strides = [1, 1]} : vector<56x256xf32> to vector<8x256xf32>
    %77 = vector.extract_strided_slice %73 {offsets = [24, 0], sizes = [8, 256], strides = [1, 1]} : vector<56x256xf32> to vector<8x256xf32>
    %78 = vector.extract_strided_slice %73 {offsets = [32, 0], sizes = [8, 256], strides = [1, 1]} : vector<56x256xf32> to vector<8x256xf32>
    %79 = vector.extract_strided_slice %73 {offsets = [40, 0], sizes = [8, 256], strides = [1, 1]} : vector<56x256xf32> to vector<8x256xf32>
    %80 = vector.extract_strided_slice %73 {offsets = [48, 0], sizes = [8, 256], strides = [1, 1]} : vector<56x256xf32> to vector<8x256xf32>
    %81 = tpu.concatenate %74, %75, %76, %77, %78, %79, %80 in 1 : vector<8x256xf32>, vector<8x256xf32>, vector<8x256xf32>, vector<8x256xf32>, vector<8x256xf32>, vector<8x256xf32>, vector<8x256xf32> -> vector<8x1792xf32>
    %82 = arith.truncf %81 : vector<8x1792xf32> to vector<8x1792xbf16>
    %c0_43 = arith.constant 0 : index
    %c0_44 = arith.constant 0 : index
    %83 = vector.load %arg8[%c0_43, %c0_44] : memref<1792x10xbf16, #tpu.memory_space<vmem>>, vector<1792x10xbf16>
    %cst_45 = arith.constant dense<0.000000e+00> : vector<8x10xf32>
    %84 = tpu.matmul %82, %83, %cst_45 {dimension_numbers = #tpu.dot_dimension_numbers<[1], [0], [0], [1], [0, 0, 1, 1], [], []>} : vector<8x1792xbf16>, vector<1792x10xbf16>, vector<8x10xf32> -> vector<8x10xf32>
    %c0_46 = arith.constant 0 : index
    %c0_47 = arith.constant 0 : index
    %85 = vector.load %arg9[%c0_46, %c0_47] : memref<1x10xf32, #tpu.memory_space<vmem>>, vector<1x10xf32>
    %86 = vector.broadcast %85 : vector<1x10xf32> to vector<8x10xf32>
    %87 = arith.addf %84, %86 : vector<8x10xf32>
    %c0_48 = arith.constant 0 : index
    %c0_49 = arith.constant 0 : index
    %88 = vector.load %arg10[%c0_48, %c0_49] : memref<8x10xf32, #tpu.memory_space<vmem>>, vector<8x10xf32>
    tpu.vector_store %arg10[%c0_48, %c0_49], %87 {strides = array<i32>} : memref<8x10xf32, #tpu.memory_space<vmem>>, vector<8x10xf32>,
    return
  }
  func.func @transform_0(%arg0: i32) -> (i32, i32) {
    %c0_i32 = arith.constant 0 : i32
    %c0_i32_0 = arith.constant 0 : i32
    return %arg0, %c0_i32 : i32, i32
  }
  func.func @transform_1(%arg0: i32) -> (i32, i32) {
    %c0_i32 = arith.constant 0 : i32
    %c0_i32_0 = arith.constant 0 : i32
    %c0_i32_1 = arith.constant 0 : i32
    return %c0_i32, %c0_i32_0 : i32, i32
  }
  func.func @transform_2(%arg0: i32) -> (i32, i32) {
    %c0_i32 = arith.constant 0 : i32
    %c0_i32_0 = arith.constant 0 : i32
    %c0_i32_1 = arith.constant 0 : i32
    return %c0_i32, %c0_i32_0 : i32, i32
  }
  func.func @transform_3(%arg0: i32) -> (i32, i32) {
    %c0_i32 = arith.constant 0 : i32
    %c0_i32_0 = arith.constant 0 : i32
    %c0_i32_1 = arith.constant 0 : i32
    return %c0_i32, %c0_i32_0 : i32, i32
  }
  func.func @transform_4(%arg0: i32) -> (i32, i32, i32) {
    %c0_i32 = arith.constant 0 : i32
    %c0_i32_0 = arith.constant 0 : i32
    %c0_i32_1 = arith.constant 0 : i32
    %c0_i32_2 = arith.constant 0 : i32
    return %c0_i32, %c0_i32_0, %c0_i32_1 : i32, i32, i32
  }
  func.func @transform_5(%arg0: i32) -> (i32, i32) {
    %c0_i32 = arith.constant 0 : i32
    %c0_i32_0 = arith.constant 0 : i32
    %c0_i32_1 = arith.constant 0 : i32
    return %c0_i32, %c0_i32_0 : i32, i32
  }
  func.func @transform_6(%arg0: i32) -> (i32, i32) {
    %c0_i32 = arith.constant 0 : i32
    %c0_i32_0 = arith.constant 0 : i32
    %c0_i32_1 = arith.constant 0 : i32
    return %c0_i32, %c0_i32_0 : i32, i32
  }
  func.func @transform_7(%arg0: i32) -> (i32, i32) {
    %c0_i32 = arith.constant 0 : i32
    %c0_i32_0 = arith.constant 0 : i32
    %c0_i32_1 = arith.constant 0 : i32
    return %c0_i32, %c0_i32_0 : i32, i32
  }
  func.func @transform_8(%arg0: i32) -> (i32, i32) {
    %c0_i32 = arith.constant 0 : i32
    %c0_i32_0 = arith.constant 0 : i32
    %c0_i32_1 = arith.constant 0 : i32
    return %c0_i32, %c0_i32_0 : i32, i32
  }
  func.func @transform_9(%arg0: i32) -> (i32, i32) {
    %c0_i32 = arith.constant 0 : i32
    %c0_i32_0 = arith.constant 0 : i32
    return %arg0, %c0_i32 : i32, i32
  }
}

</mosaic_0001>

<bundles_post_ra>
// kernel: _cnn_forward_impl.1
= control target key start
LH: loop header
LB: loop body
LE: loop exit
PB: predicated region body
PF: predicated region fallthrough
CT: control target
= control target key end

     0   :  { %14 = vsyncpa [#allocation4], 0  ;;  %s13919_s0 = inlined_call_operand.vmem [shape: bf16[112,192], index: 0, kind: input, shape index: {}]   ;;  %s13920_s1 = inlined_call_operand.hbm [shape: bf16[192,1024], index: 1, kind: input, shape index: {}]   ;;  %s13921_s2 = inlined_call_operand.hbm [shape: f32[1,1024], index: 2, kind: input, shape index: {}]   ;;  %s13922_s3 = inlined_call_operand.hbm [shape: f32[1,1024], index: 3, kind: input, shape index: {}]   ;;  %s13923_s4 = inlined_call_operand.hbm [shape: bf16[6,256,1024], index: 4, kind: input, shape index: {}]   ;;  %s13924_s5 = inlined_call_operand.hbm [shape: f32[1,1024], index: 5, kind: input, shape index: {}]   ;;  %s13925_s6 = inlined_call_operand.hbm [shape: f32[1,1024], index: 6, kind: input, shape index: {}]   ;;  %s13926_s7 = inlined_call_operand.vmem [shape: bf16[1792,10], index: 7, kind: input, shape index: {}]   ;;  %s13927_s8 = inlined_call_operand.hbm [shape: f32[1,10], index: 8, kind: input, shape index: {}]   ;;  %s13928_s9 = inlined_call_operand.vmem [shape: f32[8,10], index: 9, kind: output, shape index: {}]  }
   0x1   :  { %15 = vsyncpa [#allocation6], 0 }
   0x2   :  { %16 = vsyncpa [#allocation9], 0 }
   0x3   :  { %17 = vsyncpa [#allocation12], 0  ;;  %s11338_s30 = smov [#allocation5]   ;;  %s11176_s13 = scalar_lea.hbm %s13921_s2, 128 }
   0x4   :  { %s38_s10 = sshll.u32 %s11338_s30, 4  ;;  %p11177_p0 = scmp.ne.s32.totalorder %s13921_s2, %s11176_s13  ;;  %s39_s10 = int_to_ptr.vmem [resolvable:$true] %s38_s10 }
   0x5   :  { %p11180_p1 = scmp.lt.u32.totalorder %s11176_s13, %s13921_s2 }
   0x7   :  { %p11182_p2 = pnand %p11180_p1, %p11177_p0 }
   0x9   :  { %11185 = shalt.err (!%p11182_p2)
}
   0xa   :  { %s11186_s18 = scalar_lea.vmem %s39_s10, 128  ;;  %p11191_p4 = scmp.lt.s32.totalorder %s39_s10, %s39_s10 }
   0xb   :  { %p11187_p3 = scmp.ne.s32.totalorder %s39_s10, %s11186_s18  ;;  %p11192_p5 = scmp.lt.s32.totalorder %s11186_s18, %s11186_s18 }
   0xd   :  { %p11193_p6 = por %p11192_p5, %p11191_p4 }
   0xf   :  { %p11194_p7 = pnand %p11193_p6, %p11187_p3 }
  0x11   :  { %11197 = shalt.err (!%p11194_p7)
}
  0x12   :  { %41 = dma.hbm_to_vmem [thread:$0]  %s13921_s2, 128, %s39_s10, [#allocation6]  }
  0x13   :  { %s11339_s21 = smov [#allocation8]   ;;  %s11340_s23 = smov [#allocation11]  }
  0x14   :  { %s57_s22 = sshll.u32 %s11339_s21, 4  ;;  %s80_s24 = sshll.u32 %s11340_s23, 4  ;;  %s58_s22 = int_to_ptr.vmem [resolvable:$true] %s57_s22  ;;  %s81_s24 = int_to_ptr.vmem [resolvable:$true] %s80_s24 }
  0x15   :  { %s11198_s27 = scalar_lea.hbm %s13923_s4, 98304 }
  0x16   :  { %p11199_p8 = scmp.ne.s32.totalorder %s13923_s4, %s11198_s27  ;;  %p11202_p9 = scmp.lt.u32.totalorder %s11198_s27, %s13923_s4 }
  0x18   :  { %p11204_p10 = pnand %p11202_p9, %p11199_p8 }
  0x1a   :  { %11207 = shalt.err (!%p11204_p10)
}
  0x1b   :  { %s11208_s2 = scalar_lea.vmem %s58_s22, 98304  ;;  %p11213_p12 = scmp.lt.s32.totalorder %s58_s22, %s58_s22 }
  0x1c   :  { %p11209_p11 = scmp.ne.s32.totalorder %s58_s22, %s11208_s2  ;;  %p11214_p13 = scmp.lt.s32.totalorder %s11208_s2, %s11208_s2 }
  0x1e   :  { %p11215_p0 = por %p11214_p13, %p11213_p12 }
  0x20   :  { %p11216_p1 = pnand %p11215_p0, %p11209_p11 }
  0x22   :  { %11219 = shalt.err (!%p11216_p1)
}
  0x23   :  { %s11341_s10 = smov 512   ;;  %s11342_s12 = smov 32  }
  0x24   :  { %63 = dma.hbm_to_vmem [thread:$0]  %s13923_s4, 98304, %s58_s22, [#allocation9], %s11341_s10, %s11341_s10, %s11342_s12  }
  0x25   :  { %s11220_s17 = scalar_lea.hbm %s13925_s6, 128 }
  0x26   :  { %p11221_p2 = scmp.ne.s32.totalorder %s13925_s6, %s11220_s17  ;;  %p11224_p3 = scmp.lt.u32.totalorder %s11220_s17, %s13925_s6 }
  0x28   :  { %p11226_p4 = pnand %p11224_p3, %p11221_p2 }
  0x2a   :  { %11229 = shalt.err (!%p11226_p4)
}
  0x2b   :  { %s11230_s23 = scalar_lea.vmem %s81_s24, 128  ;;  %p11235_p6 = scmp.lt.s32.totalorder %s81_s24, %s81_s24 }
  0x2c   :  { %p11231_p5 = scmp.ne.s32.totalorder %s81_s24, %s11230_s23  ;;  %p11236_p7 = scmp.lt.s32.totalorder %s11230_s23, %s11230_s23 }
  0x2e   :  { %p11237_p8 = por %p11236_p7, %p11235_p6 }
  0x30   :  { %p11238_p9 = pnand %p11237_p8, %p11231_p5 }
  0x32   :  { %11241 = shalt.err (!%p11238_p9)
}
  0x33   :  { %83 = dma.hbm_to_vmem [thread:$0]  %s13925_s6, 128, %s81_s24, [#allocation12]  }
  0x34   :  { %s11343_s25 = smov [#allocation3]   ;;  %s11344_s27 = smov [#allocation7]  }
  0x35   :  { %s25_s26 = sshll.u32 %s11343_s25, 4  ;;  %s48_s28 = sshll.u32 %s11344_s27, 4  ;;  %s26_s26 = int_to_ptr.vmem [resolvable:$true] %s25_s26  ;;  %s49_s28 = int_to_ptr.vmem [resolvable:$true] %s48_s28 }
  0x36   :  { %s11242_s11 = scalar_lea.hbm %s13920_s1, 12288 }
  0x37   :  { %p11243_p10 = scmp.ne.s32.totalorder %s13920_s1, %s11242_s11  ;;  %p11246_p11 = scmp.lt.u32.totalorder %s11242_s11, %s13920_s1 }
  0x39   :  { %p11248_p12 = pnand %p11246_p11, %p11243_p10 }
  0x3b   :  { %11251 = shalt.err (!%p11248_p12)
}
  0x3c   :  { %s11252_s6 = scalar_lea.vmem %s26_s26, 12288  ;;  %p11257_p0 = scmp.lt.s32.totalorder %s26_s26, %s26_s26 }
  0x3d   :  { %p11253_p13 = scmp.ne.s32.totalorder %s26_s26, %s11252_s6  ;;  %p11258_p1 = scmp.lt.s32.totalorder %s11252_s6, %s11252_s6 }
  0x3f   :  { %p11259_p2 = por %p11258_p1, %p11257_p0 }
  0x41   :  { %p11260_p3 = pnand %p11259_p2, %p11253_p13 }
  0x43   :  { %11263 = shalt.err (!%p11260_p3)
}
  0x44   :  { %31 = dma.hbm_to_vmem [thread:$0]  %s13920_s1, 12288, %s26_s26, [#allocation4], %s11341_s10, %s11341_s10, %s11342_s12  }
  0x45   :  { %s11264_s19 = scalar_lea.hbm %s13922_s3, 128 }
  0x46   :  { %p11265_p4 = scmp.ne.s32.totalorder %s13922_s3, %s11264_s19  ;;  %p11268_p5 = scmp.lt.u32.totalorder %s11264_s19, %s13922_s3 }
  0x48   :  { %p11270_p6 = pnand %p11268_p5, %p11265_p4 }
  0x4a   :  { %11273 = shalt.err (!%p11270_p6)
}
  0x4b   :  { %s11274_s22 = scalar_lea.vmem %s49_s28, 128  ;;  %p11279_p8 = scmp.lt.s32.totalorder %s49_s28, %s49_s28 }
  0x4c   :  { %p11275_p7 = scmp.ne.s32.totalorder %s49_s28, %s11274_s22  ;;  %p11280_p9 = scmp.lt.s32.totalorder %s11274_s22, %s11274_s22 }
  0x4e   :  { %p11281_p10 = por %p11280_p9, %p11279_p8 }
  0x50   :  { %p11282_p11 = pnand %p11281_p10, %p11275_p7 }
  0x52   :  { %11285 = shalt.err (!%p11282_p11)
}
  0x53   :  { %51 = dma.hbm_to_vmem [thread:$0]  %s13922_s3, 128, %s49_s28, [#allocation6]  }
  0x54   :  { %s11345_s12 = smov [#allocation10]   ;;  %s11346_s26 = smov [#allocation13]  }
  0x55   :  { %s70_s25 = sshll.u32 %s11345_s12, 4  ;;  %s92_s27 = sshll.u32 %s11346_s26, 4  ;;  %s71_s25 = int_to_ptr.vmem [resolvable:$true] %s70_s25  ;;  %s93_s27 = int_to_ptr.vmem [resolvable:$true] %s92_s27 }
  0x56   :  { %s11286_s11 = scalar_lea.hbm %s13924_s5, 128 }
  0x57   :  { %p11287_p12 = scmp.ne.s32.totalorder %s13924_s5, %s11286_s11  ;;  %p11290_p13 = scmp.lt.u32.totalorder %s11286_s11, %s13924_s5 }
  0x59   :  { %p11292_p0 = pnand %p11290_p13, %p11287_p12 }
  0x5b   :  { %11295 = shalt.err (!%p11292_p0)
}
  0x5c   :  { %s11296_s3 = scalar_lea.vmem %s71_s25, 128  ;;  %p11301_p2 = scmp.lt.s32.totalorder %s71_s25, %s71_s25 }
  0x5d   :  { %p11297_p1 = scmp.ne.s32.totalorder %s71_s25, %s11296_s3  ;;  %p11302_p3 = scmp.lt.s32.totalorder %s11296_s3, %s11296_s3 }
  0x5f   :  { %p11303_p4 = por %p11302_p3, %p11301_p2 }
  0x61   :  { %p11304_p5 = pnand %p11303_p4, %p11297_p1 }
  0x63   :  { %11307 = shalt.err (!%p11304_p5)
}
  0x64   :  { %73 = dma.hbm_to_vmem [thread:$0]  %s13924_s5, 128, %s71_s25, [#allocation9]  }
  0x65   :  { %s11308_s17 = scalar_lea.hbm %s13927_s8, 16 }
  0x66   :  { %p11309_p6 = scmp.ne.s32.totalorder %s13927_s8, %s11308_s17  ;;  %p11312_p7 = scmp.lt.u32.totalorder %s11308_s17, %s13927_s8 }
  0x68   :  { %p11314_p8 = pnand %p11312_p7, %p11309_p6 }
  0x6a   :  { %11317 = shalt.err (!%p11314_p8)
}
  0x6b   :  { %s11318_s23 = scalar_lea.vmem %s93_s27, 16  ;;  %s11322_s4 = scalar_lea.vmem %s93_s27, 32 }
  0x6c   :  { %p11319_p9 = scmp.ne.s32.totalorder %s93_s27, %s11318_s23  ;;  %p11323_p10 = scmp.lt.s32.totalorder %s93_s27, %s93_s27 }
  0x6d   :  { %p11324_p11 = scmp.lt.s32.totalorder %s11322_s4, %s11318_s23 }
  0x6f   :  { %p11325_p12 = por %p11324_p11, %p11323_p10 }
  0x71   :  { %p11326_p13 = pnand %p11325_p12, %p11319_p9 }
  0x73   :  { %11329 = shalt.err (!%p11326_p13)
}
  0x74   :  { %95 = dma.hbm_to_vmem [thread:$0]  %s13927_s8, 16, %s93_s27, [#allocation12]  }
  0x75   :  { %11330 = dma.done.wait [#allocation4], 12288  }
  0x76   :  { %11331 = vsyncadd [#allocation4], 4294955008 }
  0x77   :  { %11332 = dma.done.wait [#allocation6], 256  }
  0x78   :  { %11333 = vsyncadd [#allocation6], 4294967040 }
  0x79   :  { %11334 = dma.done.wait [#allocation9], 98432  }
  0x7a   :  { %11335 = vsyncadd [#allocation9], 4294868864 }
  0x7b   :  { %11336 = dma.done.wait [#allocation12], 144  }
  0x7c   :  { %11337 = vsyncadd [#allocation12], 4294967152  ;;  %v132_v0 = vld [vmem:[#allocation3] sm:$0xff]  ;;  %v133_v2 = vld [vmem:[#allocation3 + $0x8] sm:$0xff]  ;;  %vm771_vm0 = vcmask 523264   ;;  %vm9787_vm1 = vcmask 80896  }
  0x7d   :  { %v136_v1 = vld [vmem:[#allocation3 + $0x20] sm:$0xff]  ;;  %v137_v4 = vld [vmem:[#allocation3 + $0x28] sm:$0xff] }
  0x7e   :  { %v9812_v3 = vcombine.high %v132_v0, %v136_v1  ;;  %v9811_v5 = vcombine.low %v132_v0, %v136_v1  ;;  %v140_v6 = vld [vmem:[#allocation3 + $0x40] sm:$0xff]  ;;  %v9814_v8 = vcombine.high %v133_v2, %v137_v4  ;;  %v9813_v9 = vcombine.low %v133_v2, %v137_v4  ;;  %v141_v11 = vld [vmem:[#allocation3 + $0x48] sm:$0xff] }
  0x7f   :  { %v144_v7 = vld [vmem:[#allocation3 + $0x60] sm:$0xff]  ;;  %v145_v12 = vld [vmem:[#allocation3 + $0x68] sm:$0xff] }
  0x80   :  { %v9820_v10 = vcombine.high %v140_v6, %v144_v7  ;;  %v148_v13 = vld [vmem:[#allocation3 + $0x80] sm:$0xff]  ;;  %793 = vmatprep.subr.bf16.mxu0 %v9812_v3  ;;  %v9822_v14 = vcombine.high %v141_v11, %v145_v12  ;;  %v149_v16 = vld [vmem:[#allocation3 + $0x88] sm:$0xff]  ;;  %896 = vmatprep.subr.bf16.mxu1 %v9814_v8  ;;  %v9819_v18 = vcombine.low %v140_v6, %v144_v7 }
  0x81   :  { %v152_v15 = vld [vmem:[#allocation3 + $0xa0] sm:$0xff]  ;;  %v153_v17 = vld [vmem:[#allocation3 + $0xa8] sm:$0xff]  ;;  %794 = vmatpush1.bf16.msra.mxu0 %v9811_v5  ;;  %897 = vmatpush1.bf16.msra.mxu1 %v9813_v9  ;;  %v9821_v19 = vcombine.low %v141_v11, %v145_v12 }
  0x82   :  { %795 = vmatprep.subr.bf16.mxu0 %v9820_v10  ;;  %v9828_v20 = vcombine.high %v148_v13, %v152_v15  ;;  %898 = vmatprep.subr.bf16.mxu1 %v9822_v14  ;;  %v9830_v21 = vcombine.high %v149_v16, %v153_v17  ;;  %v156_v22 = vld [vmem:[#allocation3 + $0xc0] sm:$0xff]  ;;  %v157_v24 = vld [vmem:[#allocation3 + $0xc8] sm:$0xff]  ;;  %v9827_v26 = vcombine.low %v148_v13, %v152_v15 }
  0x83   :  { %v160_v23 = vld [vmem:[#allocation3 + $0xe0] sm:$0xff]  ;;  %v161_v25 = vld [vmem:[#allocation3 + $0xe8] sm:$0xff]  ;;  %v9829_v27 = vcombine.low %v149_v16, %v153_v17 }
  0x84   :  { %v9836_v28 = vcombine.high %v156_v22, %v160_v23  ;;  %v9838_v29 = vcombine.high %v157_v24, %v161_v25  ;;  %v164_v30 = vld [vmem:[#allocation3 + $0x100] sm:$0xff]  ;;  %v165_v32 = vld [vmem:[#allocation3 + $0x108] sm:$0xff]  ;;  %v9835_v34 = vcombine.low %v156_v22, %v160_v23  ;;  %v9837_v35 = vcombine.low %v157_v24, %v161_v25 }
  0x85   :  { %796 = vmatpush1.bf16.msra.mxu0 %v9819_v18  ;;  %899 = vmatpush1.bf16.msra.mxu1 %v9821_v19  ;;  %v168_v31 = vld [vmem:[#allocation3 + $0x120] sm:$0xff]  ;;  %v169_v33 = vld [vmem:[#allocation3 + $0x128] sm:$0xff] }
  0x86   :  { %797 = vmatprep.subr.bf16.mxu0 %v9828_v20  ;;  %900 = vmatprep.subr.bf16.mxu1 %v9830_v21  ;;  %v9844_v36 = vcombine.high %v164_v30, %v168_v31  ;;  %v9846_v37 = vcombine.high %v165_v32, %v169_v33  ;;  %v172_v38 = vld [vmem:[#allocation3 + $0x140] sm:$0xff]  ;;  %v173_v40 = vld [vmem:[#allocation3 + $0x148] sm:$0xff]  ;;  %v9843_v42 = vcombine.low %v164_v30, %v168_v31 }
  0x87   :  { %v176_v39 = vld [vmem:[#allocation3 + $0x160] sm:$0xff]  ;;  %v177_v41 = vld [vmem:[#allocation3 + $0x168] sm:$0xff]  ;;  %v9845_v44 = vcombine.low %v165_v32, %v169_v33  ;;  %v135_v32 = vld [vmem:[#allocation3 + $0x18] sm:$0xff] }
  0x88   :  { %v11490_v43 = vld [vmem:[%s13919_s0 + $0x4] ss:$8 sps:$4 sm:$0xff]   ;;  %v9852_v45 = vcombine.high %v172_v38, %v176_v39  ;;  %v9854_v46 = vcombine.high %v173_v40, %v177_v41  ;;  %v9851_v51 = vcombine.low %v172_v38, %v176_v39  ;;  %v9853_v52 = vcombine.low %v173_v40, %v177_v41  ;;  %v139_v33 = vld [vmem:[#allocation3 + $0x38] sm:$0xff]  ;;  %v11499_v39 = vld [vmem:[%s13919_s0] ss:$8 sps:$4 sm:$0xff]  }
  0x89   :  { %798 = vmatpush1.bf16.msra.mxu0 %v9827_v26  ;;  %901 = vmatpush1.bf16.msra.mxu1 %v9829_v27  ;;  %v180_v47 = vld [vmem:[#allocation3 + $0x180] sm:$0xff]  ;;  %v181_v49 = vld [vmem:[#allocation3 + $0x188] sm:$0xff]  ;;  %v143_v41 = vld [vmem:[#allocation3 + $0x58] sm:$0xff] }
  0x8a   :  { %799 = vmatprep.subr.bf16.mxu0 %v9836_v28  ;;  %902 = vmatprep.subr.bf16.mxu1 %v9838_v29  ;;  %v184_v48 = vld [vmem:[#allocation3 + $0x1a0] sm:$0xff]  ;;  %v185_v50 = vld [vmem:[#allocation3 + $0x1a8] sm:$0xff]  ;;  %v134_v28 = vld [vmem:[#allocation3 + $0x10] sm:$0xff] }
  0x8b   :  { %9907 = vmatprep.mubr.msk.bf16.mxu0 %vm771_vm0, %v11490_v43  ;;  %9914 = vmatprep.mubr.msk.bf16.mxu1 %vm771_vm0, %v11490_v43  ;;  %v9860_v53 = vcombine.high %v180_v47, %v184_v48  ;;  %v9862_v54 = vcombine.high %v181_v49, %v185_v50  ;;  %v188_v55 = vld [vmem:[#allocation3 + $0x1c0] sm:$0xff]  ;;  %v189_v57 = vld [vmem:[#allocation3 + $0x1c8] sm:$0xff]  ;;  %v9859_v59 = vcombine.low %v180_v47, %v184_v48  ;;  %v138_v29 = vld [vmem:[#allocation3 + $0x30] sm:$0xff] }
  0x8c   :  { %v192_v56 = vld [vmem:[#allocation3 + $0x1e0] sm:$0xff]  ;;  %v193_v58 = vld [vmem:[#allocation3 + $0x1e8] sm:$0xff]  ;;  %v9861_v60 = vcombine.low %v181_v49, %v185_v50  ;;  %v9816_v40 = vcombine.high %v134_v28, %v138_v29  ;;  %v150_v47 = vld [vmem:[#allocation3 + $0x90] sm:$0xff]  ;;  %v9817_v49 = vcombine.low %v135_v32, %v139_v33 }
  0x8d   :  { %800 = vmatpush1.bf16.msra.mxu0 %v9835_v34  ;;  %903 = vmatpush1.bf16.msra.mxu1 %v9837_v35  ;;  %v9868_v61 = vcombine.high %v188_v55, %v192_v56  ;;  %v9870_v62 = vcombine.high %v189_v57, %v193_v58  ;;  %v196_v63 = vld [vmem:[#allocation3 + $0x200] sm:$0xff]  ;;  %v197_v1 = vld [vmem:[#allocation3 + $0x208] sm:$0xff]  ;;  %v9867_v3 = vcombine.low %v188_v55, %v192_v56  ;;  %v154_v48 = vld [vmem:[#allocation3 + $0xb0] sm:$0xff] }
  0x8e   :  { %801 = vmatprep.subr.bf16.mxu0 %v9844_v36  ;;  %904 = vmatprep.subr.bf16.mxu1 %v9846_v37  ;;  %v200_v0 = vld [vmem:[#allocation3 + $0x220] sm:$0xff]  ;;  %v201_v2 = vld [vmem:[#allocation3 + $0x228] sm:$0xff]  ;;  %v9869_v4 = vcombine.low %v189_v57, %v193_v58  ;;  %v142_v36 = vld [vmem:[#allocation3 + $0x50] sm:$0xff] }
  0x8f   :  { %v9876_v5 = vcombine.high %v196_v63, %v200_v0  ;;  %v9878_v6 = vcombine.high %v197_v1, %v201_v2  ;;  %v204_v7 = vld [vmem:[#allocation3 + $0x240] sm:$0xff]  ;;  %v205_v9 = vld [vmem:[#allocation3 + $0x248] sm:$0xff]  ;;  %v9875_v11 = vcombine.low %v196_v63, %v200_v0  ;;  %v9877_v12 = vcombine.low %v197_v1, %v201_v2  ;;  %v146_v37 = vld [vmem:[#allocation3 + $0x70] sm:$0xff] }
  0x90   :  { %v208_v8 = vld [vmem:[#allocation3 + $0x260] sm:$0xff]  ;;  %v209_v10 = vld [vmem:[#allocation3 + $0x268] sm:$0xff]  ;;  %v9824_v50 = vcombine.high %v142_v36, %v146_v37  ;;  %v158_v55 = vld [vmem:[#allocation3 + $0xd0] sm:$0xff]  ;;  %v9831_v63 = vcombine.low %v150_v47, %v154_v48 }
  0x91   :  { %802 = vmatpush1.bf16.msra.mxu0 %v9843_v42  ;;  %905 = vmatpush1.bf16.msra.mxu1 %v9845_v44  ;;  %v9884_v13 = vcombine.high %v204_v7, %v208_v8  ;;  %v9886_v14 = vcombine.high %v205_v9, %v209_v10  ;;  %v212_v15 = vld [vmem:[#allocation3 + $0x280] sm:$0xff]  ;;  %v213_v17 = vld [vmem:[#allocation3 + $0x288] sm:$0xff]  ;;  %v9883_v19 = vcombine.low %v204_v7, %v208_v8  ;;  %v147_v42 = vld [vmem:[#allocation3 + $0x78] sm:$0xff] }
  0x92   :  { %803 = vmatprep.subr.bf16.mxu0 %v9852_v45  ;;  %906 = vmatprep.subr.bf16.mxu1 %v9854_v46  ;;  %v216_v16 = vld [vmem:[#allocation3 + $0x2a0] sm:$0xff]  ;;  %v217_v18 = vld [vmem:[#allocation3 + $0x2a8] sm:$0xff]  ;;  %v9885_v20 = vcombine.low %v205_v9, %v209_v10  ;;  %v9818_v44 = vcombine.high %v135_v32, %v139_v33  ;;  %v9815_v45 = vcombine.low %v134_v28, %v138_v29  ;;  %v11504_v46 = vld [vmem:[%s13919_s0 + $0x14] ss:$8 sps:$4 sm:$0xff]  }
  0x93   :  { %v9892_v21 = vcombine.high %v212_v15, %v216_v16  ;;  %v9894_v22 = vcombine.high %v213_v17, %v217_v18  ;;  %v220_v23 = vld [vmem:[#allocation3 + $0x2c0] sm:$0xff]  ;;  %v221_v25 = vld [vmem:[#allocation3 + $0x2c8] sm:$0xff]  ;;  %v9891_v27 = vcombine.low %v212_v15, %v216_v16  ;;  %v9893_v30 = vcombine.low %v213_v17, %v217_v18  ;;  %v162_v56 = vld [vmem:[#allocation3 + $0xf0] sm:$0xff] }
  0x94   :  { %v224_v24 = vld [vmem:[#allocation3 + $0x2e0] sm:$0xff]  ;;  %v225_v26 = vld [vmem:[#allocation3 + $0x2e8] sm:$0xff]  ;;  %v9825_v57 = vcombine.low %v143_v41, %v147_v42  ;;  %v11511_v58 = vld [vmem:[%s13919_s0 + $0x10] ss:$8 sps:$4 sm:$0xff]   ;;  %v9839_v8 = vcombine.low %v158_v55, %v162_v56 }
  0x95   :  { %804 = vmatpush1.bf16.msra.mxu0 %v9851_v51  ;;  %907 = vmatpush1.bf16.msra.mxu1 %v9853_v52  ;;  %v9900_v31 = vcombine.high %v220_v23, %v224_v24  ;;  %v9902_v34 = vcombine.high %v221_v25, %v225_v26  ;;  %v9899_v35 = vcombine.low %v220_v23, %v224_v24  ;;  %v151_v51 = vld [vmem:[#allocation3 + $0x98] sm:$0xff]  ;;  %v11520_v0 = vld [vmem:[%s13919_s0 + $0x24] ss:$8 sps:$4 sm:$0xff]   ;;  %v166_v1 = vld [vmem:[#allocation3 + $0x110] sm:$0xff] }
  0x96   :  { %805 = vmatprep.subr.bf16.mxu0 %v9860_v53  ;;  %908 = vmatprep.subr.bf16.mxu1 %v9862_v54  ;;  %v9901_v38 = vcombine.low %v221_v25, %v225_v26  ;;  %v155_v52 = vld [vmem:[#allocation3 + $0xb8] sm:$0xff]  ;;  %v9826_v53 = vcombine.high %v143_v41, %v147_v42  ;;  %v9823_v54 = vcombine.low %v142_v36, %v146_v37  ;;  %v170_v2 = vld [vmem:[#allocation3 + $0x130] sm:$0xff]  ;;  %v11527_v10 = vld [vmem:[%s13919_s0 + $0x20] ss:$8 sps:$4 sm:$0xff]  }
  0x97   :  { %v175_v15 = vld [vmem:[#allocation3 + $0x158] sm:$0xff]  ;;  %v9847_v18 = vcombine.low %v166_v1, %v170_v2  ;;  %v198_v37 = vld [vmem:[#allocation3 + $0x210] sm:$0xff] }
  0x98   :  { %v179_v16 = vld [vmem:[#allocation3 + $0x178] sm:$0xff] }
  0x99   :  { %806 = vmatpush1.bf16.msra.mxu0 %v9859_v59  ;;  %909 = vmatpush1.bf16.msra.mxu1 %v9861_v60  ;;  %v9832_v59 = vcombine.high %v150_v47, %v154_v48  ;;  %v159_v60 = vld [vmem:[#allocation3 + $0xd8] sm:$0xff]  ;;  %v9858_v25 = vcombine.high %v175_v15, %v179_v16  ;;  %v9857_v28 = vcombine.low %v175_v15, %v179_v16  ;;  %v11561_v48 = vld [vmem:[%s13919_s0 + $0x40] ss:$8 sps:$4 sm:$0xff]  }
  0x9a   :  { %807 = vmatprep.subr.bf16.mxu0 %v9868_v61  ;;  %910 = vmatprep.subr.bf16.mxu1 %v9870_v62  ;;  %v163_v61 = vld [vmem:[#allocation3 + $0xf8] sm:$0xff]  ;;  %v9834_v62 = vcombine.high %v151_v51, %v155_v52 }
  0x9b   :  { %v9842_v7 = vcombine.high %v159_v60, %v163_v61  ;;  %v9841_v9 = vcombine.low %v159_v60, %v163_v61  ;;  %v11536_v17 = vld [vmem:[%s13919_s0 + $0x34] ss:$8 sps:$4 sm:$0xff]  }
  0x9c   :  { %v187_v23 = vld [vmem:[#allocation3 + $0x1b8] sm:$0xff]  ;;  %v218_v60 = vld [vmem:[#allocation3 + $0x2b0] sm:$0xff] }
  0x9d   :  { %808 = vmatpush1.bf16.msra.mxu0 %v9867_v3  ;;  %911 = vmatpush1.bf16.msra.mxu1 %v9869_v4  ;;  %v9833_v3 = vcombine.low %v151_v51, %v155_v52  ;;  %v9840_v4 = vcombine.high %v158_v55, %v162_v56  ;;  %v191_v33 = vld [vmem:[#allocation3 + $0x1d8] sm:$0xff]  ;;  %v206_v51 = vld [vmem:[#allocation3 + $0x250] sm:$0xff] }
  0x9e   :  { %809 = vmatprep.subr.bf16.mxu0 %v9876_v5  ;;  %912 = vmatprep.subr.bf16.mxu1 %v9878_v6  ;;  %v167_v5 = vld [vmem:[#allocation3 + $0x118] sm:$0xff]  ;;  %v210_v52 = vld [vmem:[#allocation3 + $0x270] sm:$0xff] }
  0x9f   :  { %v171_v6 = vld [vmem:[#allocation3 + $0x138] sm:$0xff] }
  0xa0   :  { %v199_v41 = vld [vmem:[#allocation3 + $0x218] sm:$0xff] }
  0xa1   :  { %810 = vmatpush1.bf16.msra.mxu0 %v9875_v11  ;;  %913 = vmatpush1.bf16.msra.mxu1 %v9877_v12  ;;  %v9848_v11 = vcombine.high %v166_v1, %v170_v2  ;;  %v174_v12 = vld [vmem:[#allocation3 + $0x150] sm:$0xff]  ;;  %v203_v42 = vld [vmem:[#allocation3 + $0x238] sm:$0xff] }
  0xa2   :  { %811 = vmatprep.subr.bf16.mxu0 %v9884_v13  ;;  %914 = vmatprep.subr.bf16.mxu1 %v9886_v14  ;;  %v178_v13 = vld [vmem:[#allocation3 + $0x170] sm:$0xff]  ;;  %v9850_v14 = vcombine.high %v167_v5, %v171_v6  ;;  %v207_v55 = vld [vmem:[#allocation3 + $0x258] sm:$0xff]  ;;  %v9881_v61 = vcombine.low %v199_v41, %v203_v42 }
  0xa3   :  { %v9856_v24 = vcombine.high %v174_v12, %v178_v13  ;;  %v9855_v26 = vcombine.low %v174_v12, %v178_v13  ;;  %v211_v56 = vld [vmem:[#allocation3 + $0x278] sm:$0xff] }
  0xa4   :  { %v219_v1 = vld [vmem:[#allocation3 + $0x2b8] sm:$0xff]  ;;  %v9890_v2 = vcombine.high %v207_v55, %v211_v56 }
  0xa5   :  { %812 = vmatpush1.bf16.msra.mxu0 %v9883_v19  ;;  %915 = vmatpush1.bf16.msra.mxu1 %v9885_v20  ;;  %v182_v19 = vld [vmem:[#allocation3 + $0x190] sm:$0xff]  ;;  %v227_v12 = vld [vmem:[#allocation3 + $0x2f8] sm:$0xff] }
  0xa6   :  { %813 = vmatprep.subr.bf16.mxu0 %v9892_v21  ;;  %916 = vmatprep.subr.bf16.mxu1 %v9894_v22  ;;  %v186_v20 = vld [vmem:[#allocation3 + $0x1b0] sm:$0xff]  ;;  %v9849_v21 = vcombine.low %v167_v5, %v171_v6  ;;  %v183_v22 = vld [vmem:[#allocation3 + $0x198] sm:$0xff] }
  0xa7   :  { %v9864_v29 = vcombine.high %v182_v19, %v186_v20  ;;  %v9866_v32 = vcombine.high %v183_v22, %v187_v23  ;;  %v9863_v36 = vcombine.low %v182_v19, %v186_v20  ;;  %v222_v5 = vld [vmem:[#allocation3 + $0x2d0] sm:$0xff]  ;;  %v11063_v19 = vld [vmem:[%s13919_s0 + $0x60] ss:$8 sps:$4 sm:$0xff]  }
  0xa8   :  { %v226_v6 = vld [vmem:[#allocation3 + $0x2f0] sm:$0xff] }
  0xa9   :  { %814 = vmatpush1.bf16.msra.mxu0 %v9891_v27  ;;  %917 = vmatpush1.bf16.msra.mxu1 %v9893_v30  ;;  %v11545_v27 = vld [vmem:[%s13919_s0 + $0x30] ss:$8 sps:$4 sm:$0xff]   ;;  %v9904_v16 = vcombine.high %v222_v5, %v226_v6  ;;  %v9903_v20 = vcombine.low %v222_v5, %v226_v6 }
  0xaa   :  { %815 = vmatprep.subr.bf16.mxu0 %v9900_v31  ;;  %918 = vmatprep.subr.bf16.mxu1 %v9902_v34  ;;  %v190_v30 = vld [vmem:[#allocation3 + $0x1d0] sm:$0xff]  ;;  %v195_v34 = vld [vmem:[#allocation3 + $0x1f8] sm:$0xff] }
  0xab   :  { %v194_v31 = vld [vmem:[#allocation3 + $0x1f0] sm:$0xff]  ;;  %v1820_v6 = vld [vmem:[#allocation8 + $0x1188] sm:$0xff] }
  0xac   :  { %v9871_v47 = vcombine.low %v190_v30, %v194_v31  ;;  %v1823_v5 = vld [vmem:[#allocation8 + $0x11a0] sm:$0xff] }
  0xad   :  { %816 = vmatpush1.bf16.msra.mxu0 %v9899_v35  ;;  %919 = vmatpush1.bf16.msra.mxu1 %v9901_v38  ;;  %v11552_v35 = vld [vmem:[%s13919_s0 + $0x44] ss:$8 sps:$4 sm:$0xff]   ;;  %v202_v38 = vld [vmem:[#allocation3 + $0x230] sm:$0xff] }
  0xae   :  { %999 = vmatprep.subr.bf16.mxu0 %v9816_v40  ;;  %1102 = vmatprep.subr.bf16.mxu1 %v9818_v44  ;;  %v9865_v40 = vcombine.low %v183_v22, %v187_v23  ;;  %v9872_v44 = vcombine.high %v190_v30, %v194_v31  ;;  %v1779_v23 = vld [vmem:[#allocation8 + $0x1040] sm:$0xff] }
  0xaf   :  { %v1787_v31 = vld [vmem:[#allocation8 + $0x1080] sm:$0xff] }
  0xb0   :  { %826 = vmatmul.mubr.bf16.vlgmr.msra.gmra.mrb[0].mxu0 %v11499_v39  ;;  %929 = vmatmul.mubr.bf16.vlgmr.msra.gmra.mrb[0].mxu1 %v11499_v39 }
  0xb1   :  { %1000 = vmatpush1.bf16.msra.mxu0 %v9815_v45  ;;  %1103 = vmatpush1.bf16.msra.mxu1 %v9817_v49  ;;  %v9874_v45 = vcombine.high %v191_v33, %v195_v34  ;;  %v9873_v49 = vcombine.low %v191_v33, %v195_v34  ;;  %v1788_v33 = vld [vmem:[#allocation8 + $0x1088] sm:$0xff] }
  0xb2   :  { %1001 = vmatprep.subr.bf16.mxu0 %v9824_v50  ;;  %1104 = vmatprep.subr.bf16.mxu1 %v9826_v53  ;;  %v9880_v50 = vcombine.high %v198_v37, %v202_v38  ;;  %v9882_v53 = vcombine.high %v199_v41, %v203_v42  ;;  %v1799_v41 = vld [vmem:[#allocation8 + $0x10e0] sm:$0xff]  ;;  %v1796_v42 = vld [vmem:[#allocation8 + $0x10c8] sm:$0xff] }
  0xb3   :  { %9908 = vmatprep.mubr.msk.bf16.mxu0 %vm771_vm0, %v11504_v46  ;;  %9915 = vmatprep.mubr.msk.bf16.mxu1 %vm771_vm0, %v11504_v46 }
  0xb5   :  { %1002 = vmatpush1.bf16.msra.mxu0 %v9823_v54  ;;  %1105 = vmatpush1.bf16.msra.mxu1 %v9825_v57  ;;  %v11568_v54 = vld [vmem:[%s13919_s0 + $0x54] ss:$8 sps:$4 sm:$0xff]   ;;  %v9879_v57 = vcombine.low %v198_v37, %v202_v38 }
  0xb6   :  { %1003 = vmatprep.subr.bf16.mxu0 %v9832_v59  ;;  %1106 = vmatprep.subr.bf16.mxu1 %v9834_v62  ;;  %v214_v59 = vld [vmem:[#allocation3 + $0x290] sm:$0xff]  ;;  %v9888_v62 = vcombine.high %v206_v51, %v210_v52 }
  0xb8   :  { %836 = vmatmul.mubr.bf16.gmra.mrb[4].mxu0 %v11511_v58  ;;  %939 = vmatmul.mubr.bf16.gmra.mrb[4].mxu1 %v11511_v58 }
  0xb9   :  { %1004 = vmatpush1.bf16.msra.mxu0 %v9831_v63  ;;  %1107 = vmatpush1.bf16.msra.mxu1 %v9833_v3  ;;  %v215_v63 = vld [vmem:[#allocation3 + $0x298] sm:$0xff] }
  0xba   :  { %1005 = vmatprep.subr.bf16.mxu0 %v9840_v4  ;;  %1108 = vmatprep.subr.bf16.mxu1 %v9842_v7  ;;  %v11060_v3 = vld [vmem:[%s13919_s0 + $0x50] ss:$8 sps:$4 sm:$0xff]   ;;  %v9887_v4 = vcombine.low %v206_v51, %v210_v52  ;;  %v9889_v7 = vcombine.low %v207_v55, %v211_v56  ;;  %v9898_v13 = vcombine.high %v215_v63, %v219_v1 }
  0xbb   :  { %9909 = vmatprep.mubr.msk.bf16.mxu0 %vm771_vm0, %v11520_v0  ;;  %9916 = vmatprep.mubr.msk.bf16.mxu1 %vm771_vm0, %v11520_v0  ;;  %v9897_v15 = vcombine.low %v215_v63, %v219_v1  ;;  %v1807_v51 = vld [vmem:[#allocation8 + $0x1120] sm:$0xff]  ;;  %v1804_v52 = vld [vmem:[#allocation8 + $0x1108] sm:$0xff] }
  0xbd   :  { %1006 = vmatpush1.bf16.msra.mxu0 %v9839_v8  ;;  %1109 = vmatpush1.bf16.msra.mxu1 %v9841_v9  ;;  %v11061_v8 = vld [vmem:[%s13919_s0 + $0x64] ss:$8 sps:$4 sm:$0xff]   ;;  %v9896_v9 = vcombine.high %v214_v59, %v218_v60 }
  0xbe   :  { %1007 = vmatprep.subr.bf16.mxu0 %v9848_v11  ;;  %1110 = vmatprep.subr.bf16.mxu1 %v9850_v14  ;;  %v223_v11 = vld [vmem:[#allocation3 + $0x2d8] sm:$0xff]  ;;  %v9895_v14 = vcombine.low %v214_v59, %v218_v60  ;;  %v1811_v59 = vld [vmem:[#allocation8 + $0x1140] sm:$0xff] }
  0xbf   :  { %v1815_v60 = vld [vmem:[#allocation8 + $0x1160] sm:$0xff] }
  0xc0   :  { %846 = vmatmul.mubr.bf16.gmra.mrb[8].mxu0 %v11527_v10  ;;  %949 = vmatmul.mubr.bf16.gmra.mrb[8].mxu1 %v11527_v10  ;;  %v9975_v63 = vcombine.low %v1811_v59, %v1815_v60  ;;  %v9976_v1 = vcombine.high %v1811_v59, %v1815_v60  ;;  %v1875_v59 = vld [vmem:[#allocation8 + $0x1340] sm:$0xff] }
  0xc1   :  { %1008 = vmatpush1.bf16.msra.mxu0 %v9847_v18  ;;  %1111 = vmatpush1.bf16.msra.mxu1 %v9849_v21  ;;  %v9906_v18 = vcombine.high %v223_v11, %v227_v12  ;;  %v9905_v21 = vcombine.low %v223_v11, %v227_v12  ;;  %v1879_v60 = vld [vmem:[#allocation8 + $0x1360] sm:$0xff] }
  0xc2   :  { %9910 = vmatprep.mubr.msk.bf16.mxu0 %vm771_vm0, %v11536_v17  ;;  %9917 = vmatprep.mubr.msk.bf16.mxu1 %vm771_vm0, %v11536_v17 }
  0xc3   :  { %1009 = vmatprep.subr.bf16.mxu0 %v9856_v24  ;;  %1112 = vmatprep.subr.bf16.mxu1 %v9858_v25  ;;  %v1783_v24 = vld [vmem:[#allocation8 + $0x1060] sm:$0xff]  ;;  %v1780_v25 = vld [vmem:[#allocation8 + $0x1048] sm:$0xff] }
  0xc5   :  { %1010 = vmatpush1.bf16.msra.mxu0 %v9855_v26  ;;  %1113 = vmatpush1.bf16.msra.mxu1 %v9857_v28  ;;  %v9944_v26 = vcombine.high %v1779_v23, %v1783_v24  ;;  %v9943_v28 = vcombine.low %v1779_v23, %v1783_v24  ;;  %v1843_v23 = vld [vmem:[#allocation8 + $0x1240] sm:$0xff] }
  0xc6   :  { %1011 = vmatprep.subr.bf16.mxu0 %v9864_v29  ;;  %1114 = vmatprep.subr.bf16.mxu1 %v9866_v32  ;;  %v1791_v32 = vld [vmem:[#allocation8 + $0x10a0] sm:$0xff] }
  0xc7   :  { %v9952_v34 = vcombine.high %v1787_v31, %v1791_v32  ;;  %v1847_v24 = vld [vmem:[#allocation8 + $0x1260] sm:$0xff] }
  0xc8   :  { %856 = vmatmul.mubr.bf16.gmra.mrb[12].mxu0 %v11545_v27  ;;  %959 = vmatmul.mubr.bf16.gmra.mrb[12].mxu1 %v11545_v27 }
  0xc9   :  { %1012 = vmatpush1.bf16.msra.mxu0 %v9863_v36  ;;  %1115 = vmatpush1.bf16.msra.mxu1 %v9865_v40  ;;  %v9951_v36 = vcombine.low %v1787_v31, %v1791_v32  ;;  %v1795_v40 = vld [vmem:[#allocation8 + $0x10c0] sm:$0xff] }
  0xca   :  { %9911 = vmatprep.mubr.msk.bf16.mxu0 %vm771_vm0, %v11552_v35  ;;  %9918 = vmatprep.mubr.msk.bf16.mxu1 %vm771_vm0, %v11552_v35  ;;  %v1851_v31 = vld [vmem:[#allocation8 + $0x1280] sm:$0xff] }
  0xcb   :  { %1013 = vmatprep.subr.bf16.mxu0 %v9872_v44  ;;  %1116 = vmatprep.subr.bf16.mxu1 %v9874_v45  ;;  %v9960_v44 = vcombine.high %v1795_v40, %v1799_v41  ;;  %v1800_v45 = vld [vmem:[#allocation8 + $0x10e8] sm:$0xff]  ;;  %v1855_v32 = vld [vmem:[#allocation8 + $0x12a0] sm:$0xff] }
  0xcd   :  { %1014 = vmatpush1.bf16.msra.mxu0 %v9871_v47  ;;  %1117 = vmatpush1.bf16.msra.mxu1 %v9873_v49  ;;  %v9959_v47 = vcombine.low %v1795_v40, %v1799_v41  ;;  %v9962_v49 = vcombine.high %v1796_v42, %v1800_v45  ;;  %v1859_v40 = vld [vmem:[#allocation8 + $0x12c0] sm:$0xff] }
  0xce   :  { %1015 = vmatprep.subr.bf16.mxu0 %v9880_v50  ;;  %1118 = vmatprep.subr.bf16.mxu1 %v9882_v53  ;;  %v1803_v50 = vld [vmem:[#allocation8 + $0x1100] sm:$0xff] }
  0xcf   :  { %v9968_v53 = vcombine.high %v1803_v50, %v1807_v51  ;;  %v9967_v55 = vcombine.low %v1803_v50, %v1807_v51  ;;  %v1863_v41 = vld [vmem:[#allocation8 + $0x12e0] sm:$0xff] }
  0xd0   :  { %866 = vmatmul.mubr.bf16.gmra.mrb[16].mxu0 %v11561_v48  ;;  %969 = vmatmul.mubr.bf16.gmra.mrb[16].mxu1 %v11561_v48  ;;  %v1867_v50 = vld [vmem:[#allocation8 + $0x1300] sm:$0xff] }
  0xd1   :  { %9912 = vmatprep.mubr.msk.bf16.mxu0 %vm771_vm0, %v11568_v54  ;;  %9919 = vmatprep.mubr.msk.bf16.mxu1 %vm771_vm0, %v11568_v54  ;;  %v1871_v51 = vld [vmem:[#allocation8 + $0x1320] sm:$0xff] }
  0xd2   :  { %1016 = vmatpush1.bf16.msra.mxu0 %v9879_v57  ;;  %1119 = vmatpush1.bf16.msra.mxu1 %v9881_v61  ;;  %v1812_v61 = vld [vmem:[#allocation8 + $0x1148] sm:$0xff] }
  0xd3   :  { %1017 = vmatprep.subr.bf16.mxu0 %v9888_v62  ;;  %1120 = vmatprep.subr.bf16.mxu1 %v9890_v2  ;;  %v1816_v62 = vld [vmem:[#allocation8 + $0x1168] sm:$0xff] }
  0xd4   :  { %v9977_v2 = vcombine.low %v1812_v61, %v1816_v62 }
  0xd6   :  { %1018 = vmatpush1.bf16.msra.mxu0 %v9887_v4  ;;  %1121 = vmatpush1.bf16.msra.mxu1 %v9889_v7  ;;  %v1819_v4 = vld [vmem:[#allocation8 + $0x1180] sm:$0xff] }
  0xd7   :  { %1019 = vmatprep.subr.bf16.mxu0 %v9896_v9  ;;  %1122 = vmatprep.subr.bf16.mxu1 %v9898_v13  ;;  %v9984_v7 = vcombine.high %v1819_v4, %v1823_v5  ;;  %v9983_v9 = vcombine.low %v1819_v4, %v1823_v5  ;;  %v1827_v13 = vld [vmem:[#allocation8 + $0x11c0] sm:$0xff] }
  0xd8   :  { %876 = vmatmul.mubr.bf16.gmra.mrb[20].mxu0 %v11060_v3  ;;  %979 = vmatmul.mubr.bf16.gmra.mrb[20].mxu1 %v11060_v3  ;;  %v1883_v4 = vld [vmem:[#allocation8 + $0x1380] sm:$0xff] }
  0xd9   :  { %9913 = vmatprep.mubr.msk.bf16.mxu0 %vm771_vm0, %v11061_v8  ;;  %9920 = vmatprep.mubr.msk.bf16.mxu1 %vm771_vm0, %v11061_v8  ;;  %v1887_v5 = vld [vmem:[#allocation8 + $0x13a0] sm:$0xff] }
  0xda   :  { %1020 = vmatpush1.bf16.msra.mxu0 %v9895_v14  ;;  %1123 = vmatpush1.bf16.msra.mxu1 %v9897_v15  ;;  %v1831_v14 = vld [vmem:[#allocation8 + $0x11e0] sm:$0xff]  ;;  %v1828_v15 = vld [vmem:[#allocation8 + $0x11c8] sm:$0xff] }
  0xdb   :  { %1021 = vmatprep.subr.bf16.mxu0 %v9904_v16  ;;  %1124 = vmatprep.subr.bf16.mxu1 %v9906_v18  ;;  %v9992_v16 = vcombine.high %v1827_v13, %v1831_v14  ;;  %v1832_v18 = vld [vmem:[#allocation8 + $0x11e8] sm:$0xff] }
  0xde   :  { %1022 = vmatpush1.bf16.msra.mxu0 %v9903_v20  ;;  %1125 = vmatpush1.bf16.msra.mxu1 %v9905_v21  ;;  %v9993_v20 = vcombine.low %v1828_v15, %v1832_v18  ;;  %v9994_v21 = vcombine.high %v1828_v15, %v1832_v18  ;;  %v1892_v15 = vld [vmem:[#allocation8 + $0x13c8] sm:$0xff] }
  0xdf   :  { %v1896_v18 = vld [vmem:[#allocation8 + $0x13e8] sm:$0xff] }
  0xe0   :  { %886 = vmatmul.mubr.bf16.gmra.mrb[24].mxu0 %v11063_v19  ;;  %989 = vmatmul.mubr.bf16.gmra.mrb[24].mxu1 %v11063_v19 }
  0xe1   :  { %9921 = vmatprep.mubr.msk.bf16.mxu0 %vm771_vm0, %v11490_v43  ;;  %9928 = vmatprep.mubr.msk.bf16.mxu1 %vm771_vm0, %v11490_v43  ;;  %v1771_v43 = vld [vmem:[#allocation8 + $0x1000] sm:$0xff] }
  0xe8   :  { %1032 = vmatmul.mubr.bf16.vlgmr.msra.gmra.mrb[28].mxu0 %v11499_v39  ;;  %1135 = vmatmul.mubr.bf16.vlgmr.msra.gmra.mrb[28].mxu1 %v11499_v39  ;;  %v1775_v39 = vld [vmem:[#allocation8 + $0x1020] sm:$0xff] }
  0xe9   :  { %9922 = vmatprep.mubr.msk.bf16.mxu0 %vm771_vm0, %v11504_v46  ;;  %9929 = vmatprep.mubr.msk.bf16.mxu1 %vm771_vm0, %v11504_v46  ;;  %v1772_v46 = vld [vmem:[#allocation8 + $0x1008] sm:$0xff] }
  0xf0   :  { %1042 = vmatmul.mubr.bf16.gmra.mrb[32].mxu0 %v11511_v58  ;;  %1145 = vmatmul.mubr.bf16.gmra.mrb[32].mxu1 %v11511_v58  ;;  %v9936_v58 = vcombine.high %v1771_v43, %v1775_v39 }
  0xf1   :  { %9923 = vmatprep.mubr.msk.bf16.mxu0 %vm771_vm0, %v11520_v0  ;;  %9930 = vmatprep.mubr.msk.bf16.mxu1 %vm771_vm0, %v11520_v0  ;;  %v1776_v0 = vld [vmem:[#allocation8 + $0x1028] sm:$0xff] }
  0xf2   :  { %v9938_v22 = vcombine.high %v1772_v46, %v1776_v0  ;;  %2539 = vmatprep.subr.bf16.mxu0 %v9936_v58 }
  0xf4   :  { %2610 = vmatprep.subr.bf16.mxu1 %v9938_v22 }
  0xf8   :  { %1052 = vmatmul.mubr.bf16.gmra.mrb[36].mxu0 %v11527_v10  ;;  %1155 = vmatmul.mubr.bf16.gmra.mrb[36].mxu1 %v11527_v10  ;;  %v9935_v10 = vcombine.low %v1771_v43, %v1775_v39  ;;  %v1835_v43 = vld [vmem:[#allocation8 + $0x1200] sm:$0xff] }
  0xf9   :  { %9924 = vmatprep.mubr.msk.bf16.mxu0 %vm771_vm0, %v11536_v17  ;;  %9931 = vmatprep.mubr.msk.bf16.mxu1 %vm771_vm0, %v11536_v17  ;;  %v9937_v17 = vcombine.low %v1772_v46, %v1776_v0  ;;  %v1839_v39 = vld [vmem:[#allocation8 + $0x1220] sm:$0xff]  ;;  %v1836_v46 = vld [vmem:[#allocation8 + $0x1208] sm:$0xff] }
  0xfa   :  { %2540 = vmatpush1.bf16.msra.mxu0 %v9935_v10  ;;  %v10000_v58 = vcombine.high %v1835_v43, %v1839_v39  ;;  %v1840_v0 = vld [vmem:[#allocation8 + $0x1228] sm:$0xff]  ;;  %v9999_v10 = vcombine.low %v1835_v43, %v1839_v39  ;;  %v11623_v43 = vld [vmem:[#allocation8 + $0x1010] sm:$0xff] }
  0xfb   :  { %2611 = vmatpush1.bf16.msra.mxu1 %v9937_v17  ;;  %2541 = vmatprep.subr.bf16.mxu0 %v9944_v26  ;;  %v10001_v17 = vcombine.low %v1836_v46, %v1840_v0  ;;  %v10002_v22 = vcombine.high %v1836_v46, %v1840_v0  ;;  %v10008_v26 = vcombine.high %v1843_v23, %v1847_v24  ;;  %v11625_v39 = vld [vmem:[#allocation8 + $0x1030] sm:$0xff]  ;;  %v11627_v46 = vld [vmem:[#allocation8 + $0x1018] sm:$0xff] }
  0xfc   :  { %14011 = vst [vmem:[#allocation18_spill] sm:$0xff] %v11623_v43  ;;  %14012 = vst [vmem:[#allocation19_spill] sm:$0xff] %v11625_v39  ;;  %v11631_v0 = vld [vmem:[#allocation8 + $0x1038] sm:$0xff] }
  0xfd   :  { %14013 = vst [vmem:[#allocation20_spill] sm:$0xff] %v11627_v46  ;;  %14014 = vst [vmem:[#allocation21_spill] sm:$0xff] %v11631_v0 }
  0xfe   :  { %2542 = vmatpush1.bf16.msra.mxu0 %v9943_v28  ;;  %v10007_v28 = vcombine.low %v1843_v23, %v1847_v24  ;;  %v1207_v23 = vlaneseq }
  0xff   :  { %2543 = vmatprep.subr.bf16.mxu0 %v9952_v34  ;;  %v10016_v34 = vcombine.high %v1851_v31, %v1855_v32 }
 0x100   :  { %1062 = vmatmul.mubr.bf16.gmra.mrb[40].mxu0 %v11545_v27  ;;  %1165 = vmatmul.mubr.bf16.gmra.mrb[40].mxu1 %v11545_v27  ;;  %v1784_v27 = vld [vmem:[#allocation8 + $0x1068] sm:$0xff]  ;;  %v11639_v24 = vshrl.u32 %v1207_v23, 7 }
 0x101   :  { %9925 = vmatprep.mubr.msk.bf16.mxu0 %vm771_vm0, %v11552_v35  ;;  %9932 = vmatprep.mubr.msk.bf16.mxu1 %vm771_vm0, %v11552_v35  ;;  %v9945_v29 = vcombine.low %v1780_v25, %v1784_v27  ;;  %v9946_v30 = vcombine.high %v1780_v25, %v1784_v27  ;;  %v1792_v35 = vld [vmem:[#allocation8 + $0x10a8] sm:$0xff] }
 0x102   :  { %v9953_v37 = vcombine.low %v1788_v33, %v1792_v35  ;;  %v9954_v38 = vcombine.high %v1788_v33, %v1792_v35  ;;  %2544 = vmatpush1.bf16.msra.mxu0 %v9951_v36  ;;  %v1844_v25 = vld [vmem:[#allocation8 + $0x1248] sm:$0xff]  ;;  %v10015_v36 = vcombine.low %v1851_v31, %v1855_v32 }
 0x103   :  { %2612 = vmatprep.subr.bf16.mxu1 %v9946_v30  ;;  %2545 = vmatprep.subr.bf16.mxu0 %v9960_v44  ;;  %v1848_v27 = vld [vmem:[#allocation8 + $0x1268] sm:$0xff]  ;;  %v10024_v44 = vcombine.high %v1859_v40, %v1863_v41 }
 0x104   :  { %2613 = vmatpush1.bf16.msra.mxu1 %v9945_v29  ;;  %v10009_v29 = vcombine.low %v1844_v25, %v1848_v27  ;;  %v10010_v30 = vcombine.high %v1844_v25, %v1848_v27  ;;  %v1852_v33 = vld [vmem:[#allocation8 + $0x1288] sm:$0xff]  ;;  %v11642_v25 = vsub.s32 0, %v11639_v24  ;;  %v11647_v27 = vsub.s32 2, %v11639_v24 }
 0x105   :  { %2614 = vmatprep.subr.bf16.mxu1 %v9954_v38  ;;  %v1856_v35 = vld [vmem:[#allocation8 + $0x12a8] sm:$0xff] }
 0x106   :  { %2546 = vmatpush1.bf16.msra.mxu0 %v9959_v47  ;;  %v10018_v38 = vcombine.high %v1852_v33, %v1856_v35  ;;  %v10023_v47 = vcombine.low %v1859_v40, %v1863_v41  ;;  %14015 = vst [vmem:[#allocation22_spill] sm:$0xff] %v11642_v25  ;;  %14016 = vst [vmem:[#allocation23_spill] sm:$0xff] %v11647_v27 }
 0x107   :  { %2547 = vmatprep.subr.bf16.mxu0 %v9968_v53  ;;  %v10032_v53 = vcombine.high %v1867_v50, %v1871_v51 }
 0x108   :  { %1072 = vmatmul.mubr.bf16.gmra.mrb[44].mxu0 %v11561_v48  ;;  %1175 = vmatmul.mubr.bf16.gmra.mrb[44].mxu1 %v11561_v48  ;;  %v9961_v48 = vcombine.low %v1796_v42, %v1800_v45  ;;  %v1860_v42 = vld [vmem:[#allocation8 + $0x12c8] sm:$0xff] }
 0x109   :  { %9926 = vmatprep.mubr.msk.bf16.mxu0 %vm771_vm0, %v11568_v54  ;;  %9933 = vmatprep.mubr.msk.bf16.mxu1 %vm771_vm0, %v11568_v54  ;;  %v1808_v54 = vld [vmem:[#allocation8 + $0x1128] sm:$0xff] }
 0x10a   :  { %2615 = vmatpush1.bf16.msra.mxu1 %v9953_v37  ;;  %v9969_v56 = vcombine.low %v1804_v52, %v1808_v54  ;;  %v9970_v57 = vcombine.high %v1804_v52, %v1808_v54  ;;  %2548 = vmatpush1.bf16.msra.mxu0 %v9967_v55  ;;  %v10017_v37 = vcombine.low %v1852_v33, %v1856_v35  ;;  %v1864_v45 = vld [vmem:[#allocation8 + $0x12e8] sm:$0xff] }
 0x10b   :  { %2616 = vmatprep.subr.bf16.mxu1 %v9962_v49  ;;  %2549 = vmatprep.subr.bf16.mxu0 %v9976_v1  ;;  %v10026_v49 = vcombine.high %v1860_v42, %v1864_v45  ;;  %v1868_v52 = vld [vmem:[#allocation8 + $0x1308] sm:$0xff]  ;;  %v10031_v55 = vcombine.low %v1867_v50, %v1871_v51  ;;  %v10039_v1 = vcombine.low %v1875_v59, %v1879_v60 }
 0x10c   :  { %v1872_v54 = vld [vmem:[#allocation8 + $0x1328] sm:$0xff] }
 0x10e   :  { %2617 = vmatpush1.bf16.msra.mxu1 %v9961_v48  ;;  %2550 = vmatpush1.bf16.msra.mxu0 %v9975_v63  ;;  %v10025_v48 = vcombine.low %v1860_v42, %v1864_v45  ;;  %v1880_v63 = vld [vmem:[#allocation8 + $0x1368] sm:$0xff] }
 0x10f   :  { %2618 = vmatprep.subr.bf16.mxu1 %v9970_v57  ;;  %2551 = vmatprep.subr.bf16.mxu0 %v9984_v7  ;;  %v10034_v57 = vcombine.high %v1868_v52, %v1872_v54  ;;  %v10048_v7 = vcombine.high %v1883_v4, %v1887_v5 }
 0x110   :  { %1082 = vmatmul.mubr.bf16.gmra.mrb[48].mxu0 %v11060_v3  ;;  %1185 = vmatmul.mubr.bf16.gmra.mrb[48].mxu1 %v11060_v3  ;;  %v9978_v3 = vcombine.high %v1812_v61, %v1816_v62  ;;  %v1876_v61 = vld [vmem:[#allocation8 + $0x1348] sm:$0xff]  ;;  %v10040_v62 = vcombine.high %v1875_v59, %v1879_v60 }
 0x111   :  { %9927 = vmatprep.mubr.msk.bf16.mxu0 %vm771_vm0, %v11061_v8  ;;  %9934 = vmatprep.mubr.msk.bf16.mxu1 %vm771_vm0, %v11061_v8  ;;  %v1824_v8 = vld [vmem:[#allocation8 + $0x11a8] sm:$0xff] }
 0x112   :  { %2619 = vmatpush1.bf16.msra.mxu1 %v9969_v56  ;;  %v9985_v11 = vcombine.low %v1820_v6, %v1824_v8  ;;  %v9986_v12 = vcombine.high %v1820_v6, %v1824_v8  ;;  %2552 = vmatpush1.bf16.msra.mxu0 %v9983_v9  ;;  %v10033_v56 = vcombine.low %v1868_v52, %v1872_v54  ;;  %v1884_v6 = vld [vmem:[#allocation8 + $0x1388] sm:$0xff] }
 0x113   :  { %2620 = vmatprep.subr.bf16.mxu1 %v9978_v3  ;;  %2553 = vmatprep.subr.bf16.mxu0 %v9992_v16  ;;  %v10042_v3 = vcombine.high %v1876_v61, %v1880_v63  ;;  %v1888_v8 = vld [vmem:[#allocation8 + $0x13a8] sm:$0xff]  ;;  %v10047_v9 = vcombine.low %v1883_v4, %v1887_v5 }
 0x116   :  { %2621 = vmatpush1.bf16.msra.mxu1 %v9977_v2  ;;  %v10041_v2 = vcombine.low %v1876_v61, %v1880_v63 }
 0x117   :  { %2622 = vmatprep.subr.bf16.mxu1 %v9986_v12  ;;  %v10050_v12 = vcombine.high %v1884_v6, %v1888_v8 }
 0x118   :  { %1092 = vmatmul.mubr.bf16.gmra.mrb[52].mxu0 %v11063_v19  ;;  %1195 = vmatmul.mubr.bf16.gmra.mrb[52].mxu1 %v11063_v19  ;;  %v9991_v19 = vcombine.low %v1827_v13, %v1831_v14  ;;  %v1891_v13 = vld [vmem:[#allocation8 + $0x13c0] sm:$0xff] }
 0x119   :  { %v1895_v14 = vld [vmem:[#allocation8 + $0x13e0] sm:$0xff] }
 0x11a   :  { %2623 = vmatpush1.bf16.msra.mxu1 %v9985_v11  ;;  %2554 = vmatpush1.bf16.msra.mxu0 %v9991_v19  ;;  %v10049_v11 = vcombine.low %v1884_v6, %v1888_v8  ;;  %v10056_v16 = vcombine.high %v1891_v13, %v1895_v14  ;;  %v10055_v19 = vcombine.low %v1891_v13, %v1895_v14 }
 0x11b   :  { %2624 = vmatprep.subr.bf16.mxu1 %v9994_v21  ;;  %2555 = vmatprep.subr.bf16.mxu0 %v10000_v58  ;;  %v10058_v21 = vcombine.high %v1892_v15, %v1896_v18  ;;  %v9940_v58 = vcombine.high %v11623_v43, %v11625_v39 }
 0x11e   :  { %2625 = vmatpush1.bf16.msra.mxu1 %v9993_v20  ;;  %2556 = vmatpush1.bf16.msra.mxu0 %v9999_v10  ;;  %v10057_v20 = vcombine.low %v1892_v15, %v1896_v18 }
 0x11f   :  { %2626 = vmatprep.subr.bf16.mxu1 %v10002_v22  ;;  %2557 = vmatprep.subr.bf16.mxu0 %v10008_v26  ;;  %v9942_v22 = vcombine.high %v11627_v46, %v11631_v0  ;;  %v11644_v26 = vld [vmem:[#allocation5] sm:$0xff] }
 0x120   :  { %v11659_v31 = vrot.slane %v11644_v26, %v11642_v25  ;;  %v11663_v32 = vrot.slane %v11644_v26, %v11647_v27 }
 0x122   :  { %2627 = vmatpush1.bf16.msra.mxu1 %v10001_v17  ;;  %2558 = vmatpush1.bf16.msra.mxu0 %v10007_v28  ;;  %v11650_v28 = vsub.s32 1, %v11639_v24 }
 0x123   :  { %2628 = vmatprep.subr.bf16.mxu1 %v10010_v30  ;;  %2559 = vmatprep.subr.bf16.mxu0 %v10016_v34  ;;  %v11655_v30 = vld [vmem:[#allocation7] sm:$0xff] }
 0x124   :  { %14017 = vst [vmem:[#allocation24_spill] sm:$0xff] %v11650_v28  ;;  %v11667_v33 = vrot.slane %v11644_v26, %v11650_v28  ;;  %v11671_v34 = vrot.slane %v11655_v30, %v11642_v25 }
 0x126   :  { %2629 = vmatpush1.bf16.msra.mxu1 %v10009_v29  ;;  %2560 = vmatpush1.bf16.msra.mxu0 %v10015_v36  ;;  %v11653_v29 = vsub.s32 3, %v11639_v24 }
 0x127   :  { %2630 = vmatprep.subr.bf16.mxu1 %v10018_v38  ;;  %2561 = vmatprep.subr.bf16.mxu0 %v10024_v44  ;;  %v11683_v38 = vrot.slane %v11655_v30, %v11650_v28 }
 0x128   :  { %14018 = vst [vmem:[#allocation25_spill] sm:$0xff] %v11653_v29  ;;  %v11675_v35 = vrot.slane %v11644_v26, %v11653_v29  ;;  %v11688_v44 = vrot.slane %v11655_v30, %v11653_v29 }
 0x12a   :  { %2631 = vmatpush1.bf16.msra.mxu1 %v10017_v37  ;;  %2562 = vmatpush1.bf16.msra.mxu0 %v10023_v47  ;;  %v11679_v37 = vrot.slane %v11655_v30, %v11647_v27 }
 0x12b   :  { %2632 = vmatprep.subr.bf16.mxu1 %v10026_v49  ;;  %2563 = vmatprep.subr.bf16.mxu0 %v10032_v53 }
 0x12e   :  { %2633 = vmatpush1.bf16.msra.mxu1 %v10025_v48  ;;  %2564 = vmatpush1.bf16.msra.mxu0 %v10031_v55 }
 0x12f   :  { %2634 = vmatprep.subr.bf16.mxu1 %v10034_v57  ;;  %2565 = vmatprep.subr.bf16.mxu0 %v10040_v62 }
 0x132   :  { %2635 = vmatpush1.bf16.msra.mxu1 %v10033_v56  ;;  %2566 = vmatpush1.bf16.msra.mxu0 %v10039_v1 }
 0x133   :  { %2636 = vmatprep.subr.bf16.mxu1 %v10042_v3  ;;  %2567 = vmatprep.subr.bf16.mxu0 %v10048_v7 }
 0x136   :  { %2637 = vmatpush1.bf16.msra.mxu1 %v10041_v2  ;;  %2568 = vmatpush1.bf16.msra.mxu0 %v10047_v9 }
 0x137   :  { %2638 = vmatprep.subr.bf16.mxu1 %v10050_v12  ;;  %2569 = vmatprep.subr.bf16.mxu0 %v10056_v16 }
 0x13a   :  { %2639 = vmatpush1.bf16.msra.mxu1 %v10049_v11  ;;  %2570 = vmatpush1.bf16.msra.mxu0 %v10055_v19 }
 0x13b   :  { %2640 = vmatprep.subr.bf16.mxu1 %v10058_v21  ;;  %2681 = vmatprep.subr.bf16.mxu0 %v9940_v58 }
 0x13e   :  { %2641 = vmatpush1.bf16.msra.mxu1 %v10057_v20 }
 0x13f   :  { %2752 = vmatprep.subr.bf16.mxu1 %v9942_v22 }
 0x183   :  { %v827_v36 = vpop.f32.mrb[0].mxu0  ;;  %v930_v41 = vpop.f32.mrb[0].mxu1 }
 0x184   :  { %v1247_v40 = vmul.f32 %v11659_v31, %v827_v36  ;;  %v829_v42 = vpop.f32.mrb[1].mxu0  ;;  %v1249_v45 = vmul.f32 %v11663_v32, %v930_v41  ;;  %v932_v48 = vpop.f32.mrb[1].mxu1 }
 0x185   :  { %v1248_v47 = vmul.f32 %v11667_v33, %v829_v42  ;;  %v831_v49 = vpop.f32.mrb[2].mxu0  ;;  %v1250_v51 = vmul.f32 %v11675_v35, %v932_v48  ;;  %v934_v53 = vpop.f32.mrb[2].mxu1 }
 0x186   :  { %v11693_v50 = vadd.f32 %v11671_v34, %v1247_v40  ;;  %v1255_v52 = vmul.f32 %v11659_v31, %v831_v49  ;;  %v833_v54 = vpop.f32.mrb[3].mxu0  ;;  %v11698_v55 = vadd.f32 %v11679_v37, %v1249_v45  ;;  %v1257_v57 = vmul.f32 %v11663_v32, %v934_v53  ;;  %v936_v60 = vpop.f32.mrb[3].mxu1 }
 0x187   :  { %v11701_v56 = vadd.f32 %v11683_v38, %v1248_v47  ;;  %v1256_v59 = vmul.f32 %v11667_v33, %v833_v54  ;;  %v11706_v61 = vadd.f32 %v11688_v44, %v1250_v51  ;;  %v1258_v63 = vmul.f32 %v11675_v35, %v936_v60 }
 0x188   :  { %v11709_v62 = vadd.f32 %v11671_v34, %v1255_v52  ;;  %v11715_v2 = vadd.f32 %v11679_v37, %v1257_v57 }
 0x189   :  { %v11718_v3 = vadd.f32 %v11683_v38, %v1256_v59  ;;  %v11723_v5 = vadd.f32 %v11688_v44, %v1258_v63 }
 0x18b   :  { %v837_v7 = vpop.f32.mrb[4].mxu0  ;;  %v940_v11 = vpop.f32.mrb[4].mxu1 }
 0x18c   :  { %v1263_v9 = vmul.f32 %v11659_v31, %v837_v7  ;;  %v839_v12 = vpop.f32.mrb[5].mxu0  ;;  %v1265_v13 = vmul.f32 %v11663_v32, %v940_v11  ;;  %v942_v15 = vpop.f32.mrb[5].mxu1 }
 0x18d   :  { %v1264_v14 = vmul.f32 %v11667_v33, %v839_v12  ;;  %v841_v16 = vpop.f32.mrb[6].mxu0  ;;  %v1266_v19 = vmul.f32 %v11675_v35, %v942_v15  ;;  %v944_v21 = vpop.f32.mrb[6].mxu1 }
 0x18e   :  { %v11733_v18 = vadd.f32 %v11671_v34, %v1263_v9  ;;  %v1271_v20 = vmul.f32 %v11659_v31, %v841_v16  ;;  %v843_v58 = vpop.f32.mrb[7].mxu0  ;;  %v11738_v22 = vadd.f32 %v11679_v37, %v1265_v13  ;;  %v1273_v36 = vmul.f32 %v11663_v32, %v944_v21  ;;  %v946_v41 = vpop.f32.mrb[7].mxu1 }
 0x18f   :  { %v11741_v23 = vadd.f32 %v11683_v38, %v1264_v14  ;;  %v1272_v40 = vmul.f32 %v11667_v33, %v843_v58  ;;  %v11746_v42 = vadd.f32 %v11688_v44, %v1266_v19  ;;  %v1274_v47 = vmul.f32 %v11675_v35, %v946_v41 }
 0x190   :  { %v11749_v45 = vadd.f32 %v11671_v34, %v1271_v20  ;;  %v11755_v49 = vadd.f32 %v11679_v37, %v1273_v36 }
 0x191   :  { %v11758_v51 = vadd.f32 %v11683_v38, %v1272_v40  ;;  %v11763_v53 = vadd.f32 %v11688_v44, %v1274_v47 }
 0x193   :  { %v847_v57 = vpop.f32.mrb[8].mxu0  ;;  %v950_v63 = vpop.f32.mrb[8].mxu1 }
 0x194   :  { %v1279_v60 = vmul.f32 %v11659_v31, %v847_v57  ;;  %v849_v7 = vpop.f32.mrb[9].mxu0  ;;  %v1281_v9 = vmul.f32 %v11663_v32, %v950_v63  ;;  %v952_v12 = vpop.f32.mrb[9].mxu1 }
 0x195   :  { %v1280_v11 = vmul.f32 %v11667_v33, %v849_v7  ;;  %v851_v13 = vpop.f32.mrb[10].mxu0  ;;  %v1282_v15 = vmul.f32 %v11675_v35, %v952_v12  ;;  %v954_v19 = vpop.f32.mrb[10].mxu1 }
 0x196   :  { %v11773_v14 = vadd.f32 %v11671_v34, %v1279_v60  ;;  %v1287_v16 = vmul.f32 %v11659_v31, %v851_v13  ;;  %v853_v20 = vpop.f32.mrb[11].mxu0  ;;  %v11778_v21 = vadd.f32 %v11679_v37, %v1281_v9  ;;  %v1289_v36 = vmul.f32 %v11663_v32, %v954_v19  ;;  %v956_v41 = vpop.f32.mrb[11].mxu1 }
 0x197   :  { %v11781_v58 = vadd.f32 %v11683_v38, %v1280_v11  ;;  %v1288_v40 = vmul.f32 %v11667_v33, %v853_v20  ;;  %v11786_v47 = vadd.f32 %v11688_v44, %v1282_v15  ;;  %v1290_v60 = vmul.f32 %v11675_v35, %v956_v41 }
 0x198   :  { %v11789_v57 = vadd.f32 %v11671_v34, %v1287_v16  ;;  %v11795_v7 = vadd.f32 %v11679_v37, %v1289_v36 }
 0x199   :  { %v11798_v9 = vadd.f32 %v11683_v38, %v1288_v40  ;;  %v11803_v12 = vadd.f32 %v11688_v44, %v1290_v60 }
 0x19b   :  { %v857_v15 = vpop.f32.mrb[12].mxu0  ;;  %v960_v20 = vpop.f32.mrb[12].mxu1 }
 0x19c   :  { %v1295_v19 = vmul.f32 %v11659_v31, %v857_v15  ;;  %v859_v36 = vpop.f32.mrb[13].mxu0  ;;  %v1297_v40 = vmul.f32 %v11663_v32, %v960_v20  ;;  %v962_v17 = vpop.f32.mrb[13].mxu1 }
 0x19d   :  { %v1296_v41 = vmul.f32 %v11667_v33, %v859_v36  ;;  %v861_v10 = vpop.f32.mrb[14].mxu0  ;;  %v1298_v11 = vmul.f32 %v11675_v35, %v962_v17  ;;  %v964_v63 = vpop.f32.mrb[14].mxu1 }
 0x19e   :  { %v11813_v60 = vadd.f32 %v11671_v34, %v1295_v19  ;;  %v1303_v13 = vmul.f32 %v11659_v31, %v861_v10  ;;  %v863_v59 = vpop.f32.mrb[15].mxu0  ;;  %v11818_v16 = vadd.f32 %v11679_v37, %v1297_v40  ;;  %v1305_v20 = vmul.f32 %v11663_v32, %v964_v63  ;;  %v966_v54 = vpop.f32.mrb[15].mxu1 }
 0x19f   :  { %v11821_v15 = vadd.f32 %v11683_v38, %v1296_v41  ;;  %v1304_v36 = vmul.f32 %v11667_v33, %v863_v59  ;;  %v11826_v19 = vadd.f32 %v11688_v44, %v1298_v11  ;;  %v1306_v10 = vmul.f32 %v11675_v35, %v966_v54 }
 0x1a0   :  { %v11829_v17 = vadd.f32 %v11671_v34, %v1303_v13  ;;  %v11835_v52 = vadd.f32 %v11679_v37, %v1305_v20 }
 0x1a1   :  { %v11838_v41 = vadd.f32 %v11683_v38, %v1304_v36  ;;  %v11843_v63 = vadd.f32 %v11688_v44, %v1306_v10 }
 0x1a3   :  { %v867_v13 = vpop.f32.mrb[16].mxu0  ;;  %v970_v20 = vpop.f32.mrb[16].mxu1 }
 0x1a4   :  { %v1311_v40 = vmul.f32 %v11659_v31, %v867_v13  ;;  %v869_v48 = vpop.f32.mrb[17].mxu0  ;;  %v1313_v36 = vmul.f32 %v11663_v32, %v970_v20  ;;  %v972_v6 = vpop.f32.mrb[17].mxu1 }
 0x1a5   :  { %v1312_v8 = vmul.f32 %v11667_v33, %v869_v48  ;;  %v871_v59 = vpop.f32.mrb[18].mxu0  ;;  %v1314_v4 = vmul.f32 %v11675_v35, %v972_v6  ;;  %v974_v1 = vpop.f32.mrb[18].mxu1 }
 0x1a6   :  { %v11853_v10 = vadd.f32 %v11671_v34, %v1311_v40  ;;  %v1319_v11 = vmul.f32 %v11659_v31, %v871_v59  ;;  %v873_v29 = vpop.f32.mrb[19].mxu0  ;;  %v11858_v54 = vadd.f32 %v11679_v37, %v1313_v36  ;;  %v1321_v20 = vmul.f32 %v11663_v32, %v974_v1  ;;  %v976_v28 = vpop.f32.mrb[19].mxu1 }
 0x1a7   :  { %v11861_v13 = vadd.f32 %v11683_v38, %v1312_v8  ;;  %v1320_v48 = vmul.f32 %v11667_v33, %v873_v29  ;;  %v11866_v40 = vadd.f32 %v11688_v44, %v1314_v4  ;;  %v1322_v59 = vmul.f32 %v11675_v35, %v976_v28 }
 0x1a8   :  { %v11869_v6 = vadd.f32 %v11671_v34, %v1319_v11  ;;  %v11875_v27 = vadd.f32 %v11679_v37, %v1321_v20 }
 0x1a9   :  { %14019 = vst [vmem:[#allocation26_spill] sm:$0xff] %v11866_v40  ;;  %v11878_v8 = vadd.f32 %v11683_v38, %v1320_v48  ;;  %v11883_v1 = vadd.f32 %v11688_v44, %v1322_v59 }
 0x1aa   :  { %14020 = vst [vmem:[#allocation27_spill] sm:$0xff] %v11869_v6  ;;  %14021 = vst [vmem:[#allocation28_spill] sm:$0xff] %v11875_v27  ;;  %v11939_v6 = vsub.s32 5, %v11639_v24 }
 0x1ab   :  { %14022 = vst [vmem:[#allocation29_spill] sm:$0xff] %v11878_v8  ;;  %14023 = vst [vmem:[#allocation30_spill] sm:$0xff] %v11883_v1  ;;  %v877_v11 = vpop.f32.mrb[20].mxu0  ;;  %v980_v20 = vpop.f32.mrb[20].mxu1 }
 0x1ac   :  { %v1327_v36 = vmul.f32 %v11659_v31, %v877_v11  ;;  %v879_v25 = vpop.f32.mrb[21].mxu0  ;;  %v1329_v48 = vmul.f32 %v11663_v32, %v980_v20  ;;  %v982_v46 = vpop.f32.mrb[21].mxu1  ;;  %14034 = vst [vmem:[#allocation41_spill] sm:$0xff] %v11939_v6 }
 0x1ad   :  { %v1328_v0 = vmul.f32 %v11667_v33, %v879_v25  ;;  %v881_v29 = vpop.f32.mrb[22].mxu0  ;;  %v1330_v39 = vmul.f32 %v11675_v35, %v982_v46  ;;  %v984_v43 = vpop.f32.mrb[22].mxu1 }
 0x1ae   :  { %v11893_v59 = vadd.f32 %v11671_v34, %v1327_v36  ;;  %v1335_v4 = vmul.f32 %v11659_v31, %v881_v29  ;;  %v883_v27 = vpop.f32.mrb[23].mxu0  ;;  %v11898_v28 = vadd.f32 %v11679_v37, %v1329_v48  ;;  %v1337_v20 = vmul.f32 %v11663_v32, %v984_v43  ;;  %v986_v1 = vpop.f32.mrb[23].mxu1 }
 0x1af   :  { %v11901_v11 = vadd.f32 %v11683_v38, %v1328_v0  ;;  %v1336_v25 = vmul.f32 %v11667_v33, %v883_v27  ;;  %v11906_v36 = vadd.f32 %v11688_v44, %v1330_v39  ;;  %v1338_v29 = vmul.f32 %v11675_v35, %v986_v1 }
 0x1b0   :  { %14024 = vst [vmem:[#allocation31_spill] sm:$0xff] %v11893_v59  ;;  %14025 = vst [vmem:[#allocation32_spill] sm:$0xff] %v11898_v28  ;;  %v11909_v46 = vadd.f32 %v11671_v34, %v1335_v4  ;;  %v11915_v8 = vadd.f32 %v11679_v37, %v1337_v20  ;;  %v11926_v27 = vsub.s32 4, %v11639_v24  ;;  %v11934_v59 = vsub.s32 6, %v11639_v24 }
 0x1b1   :  { %14026 = vst [vmem:[#allocation33_spill] sm:$0xff] %v11901_v11  ;;  %14027 = vst [vmem:[#allocation34_spill] sm:$0xff] %v11906_v36  ;;  %v11918_v0 = vadd.f32 %v11683_v38, %v1336_v25  ;;  %v11923_v39 = vadd.f32 %v11688_v44, %v1338_v29  ;;  %v11942_v1 = vsub.s32 7, %v11639_v24 }
 0x1b2   :  { %14028 = vst [vmem:[#allocation35_spill] sm:$0xff] %v11909_v46  ;;  %14029 = vst [vmem:[#allocation36_spill] sm:$0xff] %v11915_v8 }
 0x1b3   :  { %14030 = vst [vmem:[#allocation37_spill] sm:$0xff] %v11918_v0  ;;  %14031 = vst [vmem:[#allocation38_spill] sm:$0xff] %v11923_v39  ;;  %v887_v4 = vpop.f32.mrb[24].mxu0  ;;  %v990_v25 = vpop.f32.mrb[24].mxu1 }
 0x1b4   :  { %14032 = vst [vmem:[#allocation39_spill] sm:$0xff] %v11926_v27  ;;  %v1343_v48 = vmul.f32 %v11659_v31, %v887_v4  ;;  %v889_v28 = vpop.f32.mrb[25].mxu0  ;;  %14033 = vst [vmem:[#allocation40_spill] sm:$0xff] %v11934_v59  ;;  %v1345_v29 = vmul.f32 %v11663_v32, %v990_v25  ;;  %v992_v36 = vpop.f32.mrb[25].mxu1 }
 0x1b5   :  { %v1344_v43 = vmul.f32 %v11667_v33, %v889_v28  ;;  %v891_v11 = vpop.f32.mrb[26].mxu0  ;;  %14035 = vst [vmem:[#allocation42_spill] sm:$0xff] %v11942_v1  ;;  %v1346_v4 = vmul.f32 %v11675_v35, %v992_v36  ;;  %v994_v0 = vpop.f32.mrb[26].mxu1  ;;  %v11951_v28 = vrot.slane %v11644_v26, %v11926_v27 }
 0x1b6   :  { %v11945_v20 = vadd.f32 %v11671_v34, %v1343_v48  ;;  %v1351_v39 = vmul.f32 %v11659_v31, %v891_v11  ;;  %v893_v8 = vpop.f32.mrb[27].mxu0  ;;  %v11954_v25 = vadd.f32 %v11679_v37, %v1345_v29  ;;  %v1353_v24 = vmul.f32 %v11663_v32, %v994_v0  ;;  %v996_v40 = vpop.f32.mrb[27].mxu1 }
 0x1b7   :  { %v11957_v46 = vadd.f32 %v11683_v38, %v1344_v43  ;;  %v1352_v48 = vmul.f32 %v11667_v33, %v893_v8  ;;  %v11962_v36 = vadd.f32 %v11688_v44, %v1346_v4  ;;  %v1354_v11 = vmul.f32 %v11675_v35, %v996_v40 }
 0x1b8   :  { %14036 = vst [vmem:[#allocation43_spill] sm:$0xff] %v11945_v20  ;;  %14037 = vst [vmem:[#allocation44_spill] sm:$0xff] %v11954_v25  ;;  %v11965_v31 = vadd.f32 %v11671_v34, %v1351_v39  ;;  %v11970_v29 = vrot.slane %v11644_v26, %v11934_v59  ;;  %v11975_v32 = vadd.f32 %v11679_v37, %v1353_v24 }
 0x1b9   :  { %14038 = vst [vmem:[#allocation45_spill] sm:$0xff] %v11957_v46  ;;  %14039 = vst [vmem:[#allocation46_spill] sm:$0xff] %v11962_v36  ;;  %v11978_v33 = vadd.f32 %v11683_v38, %v1352_v48  ;;  %v11982_v8 = vrot.slane %v11644_v26, %v11939_v6  ;;  %v11987_v35 = vadd.f32 %v11688_v44, %v1354_v11 }
 0x1ba   :  { %14040 = vst [vmem:[#allocation47_spill] sm:$0xff] %v11965_v31  ;;  %14041 = vst [vmem:[#allocation48_spill] sm:$0xff] %v11975_v32  ;;  %v11991_v40 = vrot.slane %v11655_v30, %v11926_v27  ;;  %v11995_v37 = vrot.slane %v11644_v26, %v11942_v1  ;;  %v12001_v39 = vrot.slane %v11655_v30, %v11934_v59 }
 0x1bb   :  { %14042 = vst [vmem:[#allocation49_spill] sm:$0xff] %v11978_v33  ;;  %14043 = vst [vmem:[#allocation50_spill] sm:$0xff] %v11987_v35  ;;  %v1033_v0 = vpop.f32.mrb[28].mxu0  ;;  %v12005_v44 = vrot.slane %v11655_v30, %v11939_v6  ;;  %v1136_v48 = vpop.f32.mrb[28].mxu1  ;;  %v12012_v11 = vrot.slane %v11655_v30, %v11942_v1 }
 0x1bc   :  { %v1251_v24 = vmul.f32 %v11951_v28, %v1033_v0  ;;  %v1035_v26 = vpop.f32.mrb[29].mxu0  ;;  %v1253_v38 = vmul.f32 %v11970_v29, %v1136_v48  ;;  %v1138_v43 = vpop.f32.mrb[29].mxu1 }
 0x1bd   :  { %v1252_v34 = vmul.f32 %v11982_v8, %v1035_v26  ;;  %v1037_v59 = vpop.f32.mrb[30].mxu0  ;;  %v1254_v27 = vmul.f32 %v11995_v37, %v1138_v43  ;;  %v1140_v35 = vpop.f32.mrb[30].mxu1 }
 0x1be   :  { %v1405_v6 = vadd.f32 %v11991_v40, %v1251_v24  ;;  %v1259_v4 = vmul.f32 %v11951_v28, %v1037_v59  ;;  %v1039_v0 = vpop.f32.mrb[31].mxu0  ;;  %v1407_v33 = vadd.f32 %v12001_v39, %v1253_v38  ;;  %v1261_v30 = vmul.f32 %v11970_v29, %v1140_v35  ;;  %v1142_v1 = vpop.f32.mrb[31].mxu1 }
 0x1bf   :  { %v1406_v32 = vadd.f32 %v12005_v44, %v1252_v34  ;;  %v1260_v48 = vmul.f32 %v11982_v8, %v1039_v0  ;;  %v1408_v26 = vadd.f32 %v12012_v11, %v1254_v27  ;;  %v1262_v24 = vmul.f32 %v11995_v37, %v1142_v1 }
 0x1c0   :  { %v1413_v31 = vadd.f32 %v11991_v40, %v1259_v4  ;;  %v1541_v43 = vmax.f32 %v1405_v6, %v1407_v33  ;;  %v1415_v59 = vadd.f32 %v12001_v39, %v1261_v30  ;;  %v14044_v34 = vmax.f32 %v11693_v50, %v11698_v55 }
 0x1c1   :  { %v1414_v36 = vadd.f32 %v12005_v44, %v1260_v48  ;;  %v1542_v46 = vmax.f32 %v1406_v32, %v1408_v26  ;;  %v1416_v38 = vadd.f32 %v12012_v11, %v1262_v24  ;;  %v14045_v27 = vmax.f32 %v11701_v56, %v11706_v61 }
 0x1c2   :  { %v1569_v35 = vmax.f32 %v14044_v34, %v1541_v43  ;;  %v1543_v0 = vmax.f32 %v1413_v31, %v1415_v59  ;;  %v14046_v32 = vmax.f32 %v11709_v62, %v11715_v2  ;;  %v14047_v56 = vmax.f32 %v11718_v3, %v11723_v5 }
 0x1c3   :  { %v1043_v25 = vpop.f32.mrb[32].mxu0  ;;  %v1570_v4 = vmax.f32 %v14045_v27, %v1542_v46  ;;  %v1544_v20 = vmax.f32 %v1414_v36, %v1416_v38  ;;  %v1146_v1 = vpop.f32.mrb[32].mxu1 }
 0x1c4   :  { %v1267_v6 = vmul.f32 %v11951_v28, %v1043_v25  ;;  %v1045_v33 = vpop.f32.mrb[33].mxu0  ;;  %v1597_v30 = vmax.f32 %v1569_v35, 0.0  ;;  %v1571_v48 = vmax.f32 %v14046_v32, %v1543_v0  ;;  %v1269_v26 = vmul.f32 %v11970_v29, %v1146_v1  ;;  %v1148_v55 = vpop.f32.mrb[33].mxu1  ;;  %v12059_v1 = vld [vmem:[#allocation8 + $0x1050] sm:$0xff] }
 0x1c5   :  { %v1268_v50 = vmul.f32 %v11982_v8, %v1045_v33  ;;  %v1047_v31 = vpop.f32.mrb[34].mxu0  ;;  %v1598_v24 = vmax.f32 %v1570_v4, 0.0  ;;  %v12044_v61 = vmax.f32 %v14047_v56, %v1544_v20  ;;  %v1270_v25 = vmul.f32 %v11995_v37, %v1148_v55  ;;  %v1150_v36 = vpop.f32.mrb[34].mxu1  ;;  %v12061_v33 = vld [vmem:[#allocation8 + $0x1070] sm:$0xff] }
 0x1c6   :  { %v1421_v46 = vadd.f32 %v11991_v40, %v1267_v6  ;;  %v1049_v43 = vpop.f32.mrb[35].mxu0  ;;  %v1599_v62 = vmax.f32 %v1571_v48, 0.0  ;;  %v1423_v2 = vadd.f32 %v12001_v39, %v1269_v26  ;;  %v1275_v38 = vmul.f32 %v11951_v28, %v1047_v31  ;;  %v1152_v34 = vpop.f32.mrb[35].mxu1 }
 0x1c7   :  { %v1422_v59 = vadd.f32 %v12005_v44, %v1268_v50  ;;  %v13977_v35 = vmax.f32 %v12044_v61, 0.0  ;;  %v1424_v3 = vadd.f32 %v12012_v11, %v1270_v25  ;;  %v1277_v5 = vmul.f32 %v11970_v29, %v1150_v36 }
 0x1c8   :  { %v1276_v20 = vmul.f32 %v11982_v8, %v1049_v43  ;;  %v12055_v0 = vpack.c.bf16 %v1599_v62, %v1597_v30  ;;  %v1545_v27 = vmax.f32 %v1421_v46, %v1423_v2  ;;  %v1429_v4 = vadd.f32 %v11991_v40, %v1275_v38 }
 0x1c9   :  { %v1278_v6 = vmul.f32 %v11995_v37, %v1152_v34  ;;  %v12065_v32 = vpack.c.bf16 %v13977_v35, %v1598_v24  ;;  %v1546_v48 = vmax.f32 %v1422_v59, %v1424_v3  ;;  %v1431_v26 = vadd.f32 %v12001_v39, %v1277_v5 }
 0x1ca   :  { %v1430_v50 = vadd.f32 %v12005_v44, %v1276_v20  ;;  %v14048_v30 = vmax.f32 %v11733_v18, %v11738_v22  ;;  %v14049_v46 = vmax.f32 %v11741_v23, %v11746_v42  ;;  %v14050_v42 = vmax.f32 %v11749_v45, %v11755_v49 }
 0x1cb   :  { %v1432_v31 = vadd.f32 %v12012_v11, %v1278_v6  ;;  %v1053_v56 = vpop.f32.mrb[36].mxu0  ;;  %v1547_v36 = vmax.f32 %v1429_v4, %v1431_v26  ;;  %v1156_v43 = vpop.f32.mrb[36].mxu1 }
 0x1cc   :  { %v1573_v55 = vmax.f32 %v14048_v30, %v1545_v27  ;;  %v12076_v25 = vmax.f32 %v14049_v46, %v1546_v48  ;;  %v1283_v24 = vmul.f32 %v11951_v28, %v1053_v56  ;;  %v1055_v2 = vpop.f32.mrb[37].mxu0  ;;  %v1285_v18 = vmul.f32 %v11970_v29, %v1156_v43  ;;  %v1158_v3 = vpop.f32.mrb[37].mxu1 }
 0x1cd   :  { %v1548_v34 = vmax.f32 %v1430_v50, %v1432_v31  ;;  %v1284_v22 = vmul.f32 %v11982_v8, %v1055_v2  ;;  %v1057_v5 = vpop.f32.mrb[38].mxu0  ;;  %v12087_v20 = vmax.f32 %v14050_v42, %v1547_v36  ;;  %v1286_v4 = vmul.f32 %v11995_v37, %v1158_v3  ;;  %v1160_v6 = vpop.f32.mrb[38].mxu1 }
 0x1ce   :  { %v1601_v38 = vmax.f32 %v1573_v55, 0.0  ;;  %v13976_v23 = vmax.f32 %v12076_v25, 0.0  ;;  %v1437_v27 = vadd.f32 %v11991_v40, %v1283_v24  ;;  %v1059_v48 = vpop.f32.mrb[39].mxu0  ;;  %v14052_v50 = vmax.f32 %v11758_v51, %v11763_v53  ;;  %v1162_v45 = vpop.f32.mrb[39].mxu1 }
 0x1cf   :  { %v1439_v55 = vadd.f32 %v12001_v39, %v1285_v18  ;;  %v1438_v31 = vadd.f32 %v12005_v44, %v1284_v22  ;;  %v13973_v49 = vmax.f32 %v12087_v20, 0.0  ;;  %v1440_v56 = vadd.f32 %v12012_v11, %v1286_v4 }
 0x1d0   :  { %v12091_v26 = vpack.c.bf16 %v1601_v38, %v1599_v62  ;;  %v12096_v30 = vmax.f32 %v14052_v50, %v1548_v34  ;;  %v1291_v46 = vmul.f32 %v11951_v28, %v1057_v5  ;;  %v1293_v36 = vmul.f32 %v11970_v29, %v1160_v6 }
 0x1d1   :  { %v1549_v24 = vmax.f32 %v1437_v27, %v1439_v55  ;;  %v1292_v51 = vmul.f32 %v11982_v8, %v1059_v48  ;;  %v1294_v53 = vmul.f32 %v11995_v37, %v1162_v45  ;;  %v12109_v43 = vpack.c.bf16 %v13973_v49, %v1601_v38 }
 0x1d2   :  { %14051 = vst [vmem:[#allocation51_spill] sm:$0xff] %v12091_v26  ;;  %v13975_v62 = vmax.f32 %v12096_v30, 0.0  ;;  %v1550_v2 = vmax.f32 %v1438_v31, %v1440_v56  ;;  %v1445_v34 = vadd.f32 %v11991_v40, %v1291_v46  ;;  %v1447_v18 = vadd.f32 %v12001_v39, %v1293_v36 }
 0x1d3   :  { %v14053_v3 = vmax.f32 %v11773_v14, %v11778_v21  ;;  %v1446_v42 = vadd.f32 %v12005_v44, %v1292_v51  ;;  %v1448_v38 = vadd.f32 %v12012_v11, %v1294_v53  ;;  %v1063_v27 = vpop.f32.mrb[40].mxu0  ;;  %v14054_v4 = vmax.f32 %v11781_v58, %v11786_v47  ;;  %v1166_v55 = vpop.f32.mrb[40].mxu1 }
 0x1d4   :  { %v12117_v22 = vpack.c.bf16 %v13975_v62, %v13976_v23  ;;  %v1551_v48 = vmax.f32 %v1445_v34, %v1447_v18  ;;  %v1299_v50 = vmul.f32 %v11951_v28, %v1063_v27  ;;  %v1065_v31 = vpop.f32.mrb[41].mxu0  ;;  %v1301_v56 = vmul.f32 %v11970_v29, %v1166_v55  ;;  %v1168_v36 = vpop.f32.mrb[41].mxu1 }
 0x1d5   :  { %v12122_v5 = vmax.f32 %v14053_v3, %v1549_v24  ;;  %v12129_v6 = vmax.f32 %v14054_v4, %v1550_v2  ;;  %v1552_v45 = vmax.f32 %v1446_v42, %v1448_v38  ;;  %v1300_v46 = vmul.f32 %v11982_v8, %v1065_v31  ;;  %v1067_v24 = vpop.f32.mrb[42].mxu0  ;;  %v1170_v34 = vpop.f32.mrb[42].mxu1  ;;  %v12157_v31 = vld [vmem:[#allocation8 + $0x1058] sm:$0xff] }
 0x1d6   :  { %v14055_v47 = vmax.f32 %v11789_v57, %v11795_v7  ;;  %v1453_v53 = vadd.f32 %v11991_v40, %v1299_v50  ;;  %v1302_v2 = vmul.f32 %v11995_v37, %v1168_v36  ;;  %v1069_v18 = vpop.f32.mrb[43].mxu0  ;;  %v14056_v3 = vmax.f32 %v11798_v9, %v11803_v12  ;;  %v1172_v57 = vpop.f32.mrb[43].mxu1  ;;  %v12159_v9 = vld [vmem:[#allocation8 + $0x1078] sm:$0xff] }
 0x1d7   :  { %v13972_v21 = vmax.f32 %v12122_v5, 0.0  ;;  %v13974_v58 = vmax.f32 %v12129_v6, 0.0  ;;  %v1455_v38 = vadd.f32 %v12001_v39, %v1301_v56  ;;  %v1454_v27 = vadd.f32 %v12005_v44, %v1300_v46 }
 0x1d8   :  { %v12141_v51 = vmax.f32 %v14055_v47, %v1551_v48  ;;  %v12148_v42 = vmax.f32 %v14056_v3, %v1552_v45  ;;  %v1307_v4 = vmul.f32 %v11951_v28, %v1067_v24  ;;  %v1456_v48 = vadd.f32 %v12012_v11, %v1302_v2 }
 0x1d9   :  { %v1309_v50 = vmul.f32 %v11970_v29, %v1170_v34  ;;  %v1308_v55 = vmul.f32 %v11982_v8, %v1069_v18  ;;  %v1553_v45 = vmax.f32 %v1453_v53, %v1455_v38  ;;  %v1310_v46 = vmul.f32 %v11995_v37, %v1172_v57  ;;  %v12172_v34 = vld [vmem:[#allocation8 + $0x1090] sm:$0xff]  ;;  %v14067_v57 = vld [vmem:[#allocation28_spill] sm:$0xff] }
 0x1da   :  { %v13970_v7 = vmax.f32 %v12141_v51, 0.0  ;;  %v13971_v12 = vmax.f32 %v12148_v42, 0.0  ;;  %v1461_v56 = vadd.f32 %v11991_v40, %v1307_v4  ;;  %v1554_v24 = vmax.f32 %v1454_v27, %v1456_v48  ;;  %v12174_v18 = vld [vmem:[#allocation8 + $0x10b0] sm:$0xff] }
 0x1db   :  { %v1463_v47 = vadd.f32 %v12001_v39, %v1309_v50  ;;  %v1462_v2 = vadd.f32 %v12005_v44, %v1308_v55  ;;  %v14059_v3 = vmax.f32 %v11813_v60, %v11818_v16  ;;  %v1464_v27 = vadd.f32 %v12012_v11, %v1310_v46  ;;  %v1073_v4 = vpop.f32.mrb[44].mxu0 }
 0x1dc   :  { %v12168_v36 = vpack.c.bf16 %v13970_v7, %v13972_v21  ;;  %v12180_v53 = vpack.c.bf16 %v13971_v12, %v13974_v58  ;;  %v14060_v48 = vmax.f32 %v11821_v15, %v11826_v19  ;;  %v1315_v7 = vmul.f32 %v11951_v28, %v1073_v4  ;;  %v1176_v12 = vpop.f32.mrb[44].mxu1  ;;  %v1075_v21 = vpop.f32.mrb[45].mxu0  ;;  %v12202_v19 = vld [vmem:[#allocation8 + $0x1098] sm:$0xff] }
 0x1dd   :  { %v12185_v38 = vmax.f32 %v14059_v3, %v1553_v45  ;;  %v1555_v55 = vmax.f32 %v1461_v56, %v1463_v47  ;;  %v1556_v60 = vmax.f32 %v1462_v2, %v1464_v27  ;;  %v1317_v45 = vmul.f32 %v11970_v29, %v1176_v12  ;;  %v1178_v3 = vpop.f32.mrb[45].mxu1  ;;  %v1077_v49 = vpop.f32.mrb[46].mxu0  ;;  %v12204_v56 = vld [vmem:[#allocation8 + $0x10b8] sm:$0xff] }
 0x1de   :  { %14057 = vst [vmem:[#allocation52_spill] sm:$0xff] %v12168_v36  ;;  %14058 = vst [vmem:[#allocation53_spill] sm:$0xff] %v12180_v53  ;;  %v12193_v50 = vmax.f32 %v14060_v48, %v1554_v24  ;;  %v1316_v46 = vmul.f32 %v11982_v8, %v1075_v21  ;;  %v14061_v24 = vmax.f32 %v11829_v17, %v11835_v52  ;;  %v1180_v12 = vpop.f32.mrb[46].mxu1  ;;  %v1079_v27 = vpop.f32.mrb[47].mxu0  ;;  %v14091_v36 = vld [vmem:[#allocation37_spill] sm:$0xff]  ;;  %v14092_v53 = vld [vmem:[#allocation38_spill] sm:$0xff] }
 0x1df   :  { %v1469_v4 = vadd.f32 %v11991_v40, %v1315_v7  ;;  %v1318_v2 = vmul.f32 %v11995_v37, %v1178_v3  ;;  %v14062_v48 = vmax.f32 %v11838_v41, %v11843_v63  ;;  %v1471_v62 = vadd.f32 %v12001_v39, %v1317_v45  ;;  %v1182_v17 = vpop.f32.mrb[47].mxu1  ;;  %v12221_v7 = vld [vmem:[#allocation8 + $0x10f0] sm:$0xff] }
 0x1e0   :  { %v1583_v47 = vmax.f32 %v14061_v24, %v1555_v55  ;;  %v1470_v23 = vadd.f32 %v12005_v44, %v1316_v46  ;;  %v1323_v52 = vmul.f32 %v11951_v28, %v1077_v49  ;;  %v12219_v55 = vld [vmem:[#allocation8 + $0x10d0] sm:$0xff]  ;;  %v1325_v24 = vmul.f32 %v11970_v29, %v1180_v12 }
 0x1e1   :  { %v1584_v58 = vmax.f32 %v14062_v48, %v1556_v60  ;;  %v1472_v3 = vadd.f32 %v12012_v11, %v1318_v2  ;;  %v1324_v35 = vmul.f32 %v11982_v8, %v1079_v27  ;;  %v1557_v63 = vmax.f32 %v1469_v4, %v1471_v62 }
 0x1e2   :  { %v1477_v60 = vadd.f32 %v11991_v40, %v1323_v52  ;;  %v1326_v45 = vmul.f32 %v11995_v37, %v1182_v17  ;;  %v1479_v48 = vadd.f32 %v12001_v39, %v1325_v24  ;;  %v1611_v27 = vmax.f32 %v1583_v47, 0.0  ;;  %v14066_v17 = vld [vmem:[#allocation27_spill] sm:$0xff] }
 0x1e3   :  { %v1558_v46 = vmax.f32 %v1470_v23, %v1472_v3  ;;  %v1478_v2 = vadd.f32 %v12005_v44, %v1324_v35  ;;  %v14063_v41 = vmax.f32 %v11853_v10, %v11858_v54  ;;  %v1083_v52 = vpop.f32.mrb[48].mxu0  ;;  %v1612_v21 = vmax.f32 %v1584_v58, 0.0  ;;  %v14064_v23 = vld [vmem:[#allocation26_spill] sm:$0xff]  ;;  %v1186_v47 = vpop.f32.mrb[48].mxu1 }
 0x1e4   :  { %v1480_v4 = vadd.f32 %v12012_v11, %v1326_v45  ;;  %v14065_v3 = vmax.f32 %v11861_v13, %v14064_v23  ;;  %v1559_v35 = vmax.f32 %v1477_v60, %v1479_v48  ;;  %v1331_v12 = vmul.f32 %v11951_v28, %v1083_v52  ;;  %v1085_v49 = vpop.f32.mrb[49].mxu0 }
 0x1e5   :  { %v1585_v62 = vmax.f32 %v14063_v41, %v1557_v63  ;;  %v1333_v10 = vmul.f32 %v11970_v29, %v1186_v47  ;;  %v1332_v41 = vmul.f32 %v11982_v8, %v1085_v49  ;;  %v1188_v63 = vpop.f32.mrb[49].mxu1  ;;  %v1087_v45 = vpop.f32.mrb[50].mxu0  ;;  %v14068_v13 = vmax.f32 %v14066_v17, %v14067_v57  ;;  %v14069_v49 = vld [vmem:[#allocation29_spill] sm:$0xff] }
 0x1e6   :  { %v12245_v24 = vmax.f32 %v14065_v3, %v1558_v46  ;;  %v1560_v54 = vmax.f32 %v1478_v2, %v1480_v4  ;;  %v1485_v60 = vadd.f32 %v11991_v40, %v1331_v12  ;;  %v1334_v48 = vmul.f32 %v11995_v37, %v1188_v63  ;;  %v1190_v52 = vpop.f32.mrb[50].mxu1  ;;  %v1089_v23 = vpop.f32.mrb[51].mxu0  ;;  %v12258_v2 = vld [vmem:[#allocation8 + $0x10f8] sm:$0xff] }
 0x1e7   :  { %v1613_v15 = vmax.f32 %v1585_v62, 0.0  ;;  %v1587_v46 = vmax.f32 %v14068_v13, %v1559_v35  ;;  %v12256_v62 = vld [vmem:[#allocation8 + $0x10d8] sm:$0xff]  ;;  %v1487_v57 = vadd.f32 %v12001_v39, %v1333_v10  ;;  %v1486_v17 = vadd.f32 %v12005_v44, %v1332_v41  ;;  %v1192_v12 = vpop.f32.mrb[51].mxu1 }
 0x1e8   :  { %v13978_v58 = vmax.f32 %v12245_v24, 0.0  ;;  %v14070_v3 = vld [vmem:[#allocation30_spill] sm:$0xff]  ;;  %v1488_v13 = vadd.f32 %v12012_v11, %v1334_v48  ;;  %v1341_v59 = vmul.f32 %v11970_v29, %v1190_v52  ;;  %v14074_v48 = vld [vmem:[#allocation32_spill] sm:$0xff] }
 0x1e9   :  { %v12260_v4 = vpack.c.bf16 %v1613_v15, %v1611_v27  ;;  %v14071_v47 = vmax.f32 %v14069_v49, %v14070_v3  ;;  %v1615_v63 = vmax.f32 %v1587_v46, 0.0  ;;  %v1339_v27 = vmul.f32 %v11951_v28, %v1087_v45  ;;  %v14073_v46 = vld [vmem:[#allocation31_spill] sm:$0xff] }
 0x1ea   :  { %v12271_v35 = vpack.c.bf16 %v13978_v58, %v1612_v21  ;;  %v1561_v16 = vmax.f32 %v1485_v60, %v1487_v57  ;;  %v1562_v41 = vmax.f32 %v1486_v17, %v1488_v13  ;;  %v1342_v21 = vmul.f32 %v11995_v37, %v1192_v12  ;;  %v14076_v57 = vld [vmem:[#allocation33_spill] sm:$0xff]  ;;  %v14077_v17 = vld [vmem:[#allocation34_spill] sm:$0xff] }
 0x1eb   :  { %v12265_v14 = vmax.f32 %v14071_v47, %v1560_v54  ;;  %v1340_v54 = vmul.f32 %v11982_v8, %v1089_v23  ;;  %v12279_v49 = vpack.c.bf16 %v1615_v63, %v1613_v15  ;;  %v1493_v3 = vadd.f32 %v11991_v40, %v1339_v27  ;;  %v1093_v15 = vpop.f32.mrb[52].mxu0  ;;  %v14082_v47 = vld [vmem:[#allocation20_spill] sm:$0xff] }
 0x1ec   :  { %2571 = vmatprep.mubr.bf16.mxu0 %v12271_v35  ;;  %v14075_v45 = vmax.f32 %v14073_v46, %v14074_v48  ;;  %v1495_v52 = vadd.f32 %v12001_v39, %v1341_v59  ;;  %2642 = vmatprep.mubr.bf16.mxu1 %v12271_v35  ;;  %v14078_v12 = vmax.f32 %v14076_v57, %v14077_v17  ;;  %v14080_v59 = vld [vmem:[#allocation19_spill] sm:$0xff]  ;;  %v1196_v48 = vpop.f32.mrb[52].mxu1 }
 0x1ed   :  { %14072 = vst [vmem:[#allocation26_spill] sm:$0xff] %v12279_v49  ;;  %v1494_v23 = vadd.f32 %v12005_v44, %v1340_v54  ;;  %2572 = vmatmul.mubr.bf16.vlgmr.msra.gmra.mrb[56].mxu0 %v12260_v4  ;;  %v1496_v27 = vadd.f32 %v12012_v11, %v1342_v21  ;;  %2643 = vmatmul.mubr.bf16.vlgmr.msra.gmra.mrb[56].mxu1 %v12260_v4  ;;  %v14083_v49 = vld [vmem:[#allocation21_spill] sm:$0xff]  ;;  %v1198_v17 = vpop.f32.mrb[53].mxu1 }
 0x1ee   :  { %v12287_v60 = vmax.f32 %v14075_v45, %v1561_v16  ;;  %v12297_v13 = vmax.f32 %v14078_v12, %v1562_v41  ;;  %v14079_v16 = vld [vmem:[#allocation18_spill] sm:$0xff]  ;;  %v1347_v54 = vmul.f32 %v11951_v28, %v1093_v15  ;;  %v1095_v45 = vpop.f32.mrb[53].mxu0  ;;  %v1563_v10 = vmax.f32 %v1493_v3, %v1495_v52  ;;  %v1200_v52 = vpop.f32.mrb[54].mxu1 }
 0x1ef   :  { %v14081_v46 = vcombine.low %v14079_v16, %v14080_v59  ;;  %v14084_v57 = vcombine.low %v14082_v47, %v14083_v49  ;;  %v1349_v41 = vmul.f32 %v11970_v29, %v1196_v48  ;;  %v1348_v21 = vmul.f32 %v11982_v8, %v1095_v45  ;;  %v1097_v12 = vpop.f32.mrb[54].mxu0  ;;  %v14087_v45 = vld [vmem:[#allocation35_spill] sm:$0xff] }
 0x1f0   :  { %v13983_v58 = vmax.f32 %v12287_v60, 0.0  ;;  %v14085_v16 = vcombine.high %v12059_v1, %v12061_v33  ;;  %v1618_v15 = vmax.f32 %v12297_v13, 0.0  ;;  %v1564_v59 = vmax.f32 %v1494_v23, %v1496_v27  ;;  %v1099_v47 = vpop.f32.mrb[55].mxu0 }
 0x1f1   :  { %2682 = vmatpush1.bf16.msra.mxu0 %v14081_v46  ;;  %2753 = vmatpush1.bf16.msra.mxu1 %v14084_v57  ;;  %v1501_v46 = vadd.f32 %v11991_v40, %v1347_v54  ;;  %v1350_v3 = vmul.f32 %v11995_v37, %v1198_v17  ;;  %v14086_v49 = vcombine.high %v12157_v31, %v12159_v9  ;;  %v14088_v57 = vld [vmem:[#allocation36_spill] sm:$0xff]  ;;  %v1202_v54 = vpop.f32.mrb[55].mxu1  ;;  %v14090_v17 = vmax.f32 %v12265_v14, 0.0 }
 0x1f2   :  { %2683 = vmatprep.subr.bf16.mxu0 %v14085_v16  ;;  %v12322_v48 = vpack.c.bf16 %v13983_v58, %v1615_v63  ;;  %v14089_v16 = vmax.f32 %v14087_v45, %v14088_v57  ;;  %v1503_v23 = vadd.f32 %v12001_v39, %v1349_v41  ;;  %v1502_v27 = vadd.f32 %v12005_v44, %v1348_v21 }
 0x1f3   :  { %2754 = vmatprep.subr.bf16.mxu1 %v14086_v49  ;;  %v12335_v49 = vpack.c.bf16 %v1618_v15, %v14090_v17  ;;  %v14093_v63 = vmax.f32 %v14091_v36, %v14092_v53  ;;  %v1504_v45 = vadd.f32 %v12012_v11, %v1350_v3  ;;  %v14094_v41 = vcombine.low %v12059_v1, %v12061_v33  ;;  %v1809_v1 = vld [vmem:[#allocation8 + $0x1130] sm:$0xff]  ;;  %v14098_v33 = vld [vmem:[#allocation44_spill] sm:$0xff] }
 0x1f4   :  { %v12327_v26 = vmax.f32 %v14089_v16, %v1563_v10  ;;  %v1355_v10 = vmul.f32 %v11951_v28, %v1097_v12  ;;  %v1565_v21 = vmax.f32 %v1501_v46, %v1503_v23  ;;  %v1357_v57 = vmul.f32 %v11970_v29, %v1200_v52  ;;  %v1805_v29 = vld [vmem:[#allocation8 + $0x1110] sm:$0xff] }
 0x1f5   :  { %v12340_v58 = vmax.f32 %v14093_v63, %v1564_v59  ;;  %2684 = vmatpush1.bf16.msra.mxu0 %v14094_v41  ;;  %v1356_v16 = vmul.f32 %v11982_v8, %v1099_v47  ;;  %v14095_v17 = vcombine.low %v12157_v31, %v12159_v9  ;;  %v14096_v36 = vcombine.high %v12172_v34, %v12174_v18  ;;  %v14097_v8 = vld [vmem:[#allocation43_spill] sm:$0xff]  ;;  %v14102_v3 = vld [vmem:[#allocation46_spill] sm:$0xff] }
 0x1f6   :  { %v1566_v53 = vmax.f32 %v1502_v27, %v1504_v45  ;;  %v1509_v28 = vadd.f32 %v11991_v40, %v1355_v10  ;;  %v1358_v12 = vmul.f32 %v11995_v37, %v1202_v54  ;;  %2581 = vmatprep.mubr.bf16.mxu0 %v12335_v49  ;;  %2652 = vmatprep.mubr.bf16.mxu1 %v12335_v49  ;;  %v14101_v37 = vld [vmem:[#allocation45_spill] sm:$0xff]  ;;  %v1806_v27 = vld [vmem:[#allocation8 + $0x1118] sm:$0xff]  ;;  %v1619_v63 = vmax.f32 %v12327_v26, 0.0 }
 0x1f7   :  { %2755 = vmatpush1.bf16.msra.mxu1 %v14095_v17  ;;  %2685 = vmatprep.subr.bf16.mxu0 %v14096_v36  ;;  %v14099_v59 = vmax.f32 %v14097_v8, %v14098_v33  ;;  %v1511_v9 = vadd.f32 %v12001_v39, %v1357_v57  ;;  %v1510_v46 = vadd.f32 %v12005_v44, %v1356_v16  ;;  %v1810_v54 = vld [vmem:[#allocation8 + $0x1138] sm:$0xff]  ;;  %v1813_v17 = vld [vmem:[#allocation8 + $0x1150] sm:$0xff] }
 0x1f8   :  { %v14100_v40 = vcombine.high %v12202_v19, %v12204_v56  ;;  %2582 = vmatmul.mubr.bf16.gmra.mrb[60].mxu0 %v12322_v48  ;;  %v14103_v52 = vmax.f32 %v14101_v37, %v14102_v3  ;;  %v1512_v23 = vadd.f32 %v12012_v11, %v1358_v12  ;;  %2653 = vmatmul.mubr.bf16.gmra.mrb[60].mxu1 %v12322_v48  ;;  %v1817_v36 = vld [vmem:[#allocation8 + $0x1170] sm:$0xff]  ;;  %v1814_v37 = vld [vmem:[#allocation8 + $0x1158] sm:$0xff] }
 0x1f9   :  { %v12362_v31 = vmax.f32 %v14099_v59, %v1565_v21  ;;  %v14104_v39 = vcombine.low %v12172_v34, %v12174_v18  ;;  %v9965_v44 = vcombine.low %v12256_v62, %v12258_v2  ;;  %v1567_v10 = vmax.f32 %v1509_v28, %v1511_v9  ;;  %v1818_v3 = vld [vmem:[#allocation8 + $0x1178] sm:$0xff] }
 0x1fa   :  { %2756 = vmatprep.subr.bf16.mxu1 %v14100_v40  ;;  %v12373_v47 = vmax.f32 %v14103_v52, %v1566_v53  ;;  %v14105_v41 = vcombine.low %v12202_v19, %v12204_v56  ;;  %v14106_v11 = vcombine.high %v12219_v55, %v12221_v7  ;;  %v9972_v34 = vcombine.high %v1805_v29, %v1809_v1  ;;  %v14108_v56 = vld [vmem:[#allocation47_spill] sm:$0xff]  ;;  %v14109_v53 = vld [vmem:[#allocation48_spill] sm:$0xff] }
 0x1fb   :  { %2686 = vmatpush1.bf16.msra.mxu0 %v14104_v39  ;;  %v1621_v45 = vmax.f32 %v12362_v31, 0.0  ;;  %v1620_v18 = vmax.f32 %v12340_v58, 0.0  ;;  %v1568_v57 = vmax.f32 %v1510_v46, %v1512_v23  ;;  %v14107_v16 = vcombine.high %v12256_v62, %v12258_v2  ;;  %v14111_v62 = vld [vmem:[#allocation49_spill] sm:$0xff]  ;;  %v14112_v2 = vld [vmem:[#allocation50_spill] sm:$0xff] }
 0x1fc   :  { %2757 = vmatpush1.bf16.msra.mxu1 %v14105_v41  ;;  %2687 = vmatprep.subr.bf16.mxu0 %v14106_v11  ;;  %v1622_v21 = vmax.f32 %v12373_v47, 0.0  ;;  %v14110_v28 = vmax.f32 %v14108_v56, %v14109_v53  ;;  %v9974_v8 = vcombine.high %v1806_v27, %v1810_v54  ;;  %v14113_v59 = vmax.f32 %v14111_v62, %v14112_v2  ;;  %v1825_v41 = vld [vmem:[#allocation8 + $0x11b0] sm:$0xff]  ;;  %v1830_v53 = vld [vmem:[#allocation8 + $0x11d8] sm:$0xff] }
 0x1fd   :  { %2758 = vmatprep.subr.bf16.mxu1 %v14107_v16  ;;  %v12399_v19 = vpack.c.bf16 %v1621_v45, %v1619_v63  ;;  %v14114_v46 = vcombine.low %v12219_v55, %v12221_v7  ;;  %v9971_v40 = vcombine.low %v1805_v29, %v1809_v1  ;;  %v9973_v52 = vcombine.low %v1806_v27, %v1810_v54  ;;  %v1822_v7 = vld [vmem:[#allocation8 + $0x1198] sm:$0xff]  ;;  %v1833_v16 = vld [vmem:[#allocation8 + $0x11f0] sm:$0xff] }
 0x1fe   :  { %v1595_v12 = vmax.f32 %v14110_v28, %v1567_v10  ;;  %v12408_v33 = vpack.c.bf16 %v1622_v21, %v1620_v18  ;;  %v1596_v9 = vmax.f32 %v14113_v59, %v1568_v57  ;;  %v9980_v23 = vcombine.high %v1813_v17, %v1817_v36  ;;  %v1821_v10 = vld [vmem:[#allocation8 + $0x1190] sm:$0xff]  ;;  %v1826_v29 = vld [vmem:[#allocation8 + $0x11b8] sm:$0xff] }
 0x1ff   :  { %2688 = vmatpush1.bf16.msra.mxu0 %v14114_v46  ;;  %v9982_v55 = vcombine.high %v1814_v37, %v1818_v3  ;;  %v9981_v54 = vcombine.low %v1814_v37, %v1818_v3  ;;  %v9988_v11 = vcombine.high %v1821_v10, %v1825_v41  ;;  %v1829_v57 = vld [vmem:[#allocation8 + $0x11d0] sm:$0xff]  ;;  %v9987_v56 = vcombine.low %v1821_v10, %v1825_v41  ;;  %v1834_v28 = vld [vmem:[#allocation8 + $0x11f8] sm:$0xff] }
 0x200   :  { %2759 = vmatpush1.bf16.msra.mxu1 %v9965_v44  ;;  %2689 = vmatprep.subr.bf16.mxu0 %v9972_v34  ;;  %v12416_v39 = vmax.f32 %v1596_v9, 0.0  ;;  %v9979_v44 = vcombine.low %v1813_v17, %v1817_v36  ;;  %v12426_v27 = vmax.f32 %v1595_v12, 0.0  ;;  %v9990_v34 = vcombine.high %v1822_v7, %v1826_v29  ;;  %v1841_v62 = vld [vmem:[#allocation8 + $0x1230] sm:$0xff]  ;;  %v1838_v59 = vld [vmem:[#allocation8 + $0x1218] sm:$0xff] }
 0x201   :  { %2591 = vmatprep.mubr.bf16.mxu0 %v12408_v33  ;;  %2662 = vmatprep.mubr.bf16.mxu1 %v12408_v33  ;;  %v9989_v17 = vcombine.low %v1822_v7, %v1826_v29  ;;  %v9996_v12 = vcombine.high %v1829_v57, %v1833_v16  ;;  %v9998_v2 = vcombine.high %v1830_v53, %v1834_v28  ;;  %v1842_v9 = vld [vmem:[#allocation8 + $0x1238] sm:$0xff]  ;;  %v1845_v3 = vld [vmem:[#allocation8 + $0x1250] sm:$0xff] }
 0x202   :  { %2760 = vmatprep.subr.bf16.mxu1 %v9974_v8  ;;  %2592 = vmatmul.mubr.bf16.gmra.mrb[64].mxu0 %v12399_v19  ;;  %v12424_v1 = vpack.c.bf16 %v12416_v39, %v12416_v39  ;;  %v12432_v36 = vpack.c.bf16 %v12426_v27, %v12426_v27  ;;  %v1837_v8 = vld [vmem:[#allocation8 + $0x1210] sm:$0xff]  ;;  %v9995_v46 = vcombine.low %v1829_v57, %v1833_v16  ;;  %v1850_v7 = vld [vmem:[#allocation8 + $0x1278] sm:$0xff]  ;;  %v14117_v57 = vmax.f32 %v12096_v30, 0.0 }
 0x203   :  { %2663 = vmatmul.mubr.bf16.gmra.mrb[64].mxu1 %v12399_v19  ;;  %2690 = vmatpush1.bf16.msra.mxu0 %v9971_v40  ;;  %v9997_v40 = vcombine.low %v1830_v53, %v1834_v28  ;;  %v10004_v37 = vcombine.high %v1837_v8, %v1841_v62  ;;  %v10006_v10 = vcombine.high %v1838_v59, %v1842_v9  ;;  %v1849_v41 = vld [vmem:[#allocation8 + $0x1270] sm:$0xff]  ;;  %v14118_v16 = vmax.f32 %v12129_v6, 0.0  ;;  %v1866_v47 = vld [vmem:[#allocation8 + $0x12f8] sm:$0xff] }
 0x204   :  { %2761 = vmatpush1.bf16.msra.mxu1 %v9973_v52  ;;  %2691 = vmatprep.subr.bf16.mxu0 %v9980_v23  ;;  %v12438_v52 = vmax.f32 %v12185_v38, 0.0  ;;  %v12441_v23 = vmax.f32 %v12193_v50, 0.0  ;;  %v10003_v29 = vcombine.low %v1837_v8, %v1841_v62  ;;  %v10012_v50 = vcombine.high %v1845_v3, %v1849_v41  ;;  %v1853_v53 = vld [vmem:[#allocation8 + $0x1290] sm:$0xff] }
 0x205   :  { %2601 = vmatprep.mubr.bf16.mxu0 %v12424_v1  ;;  %2672 = vmatprep.mubr.bf16.mxu1 %v12424_v1  ;;  %v1857_v28 = vld [vmem:[#allocation8 + $0x12b0] sm:$0xff]  ;;  %v14122_v30 = vmax.f32 %v12141_v51, 0.0  ;;  %v14123_v62 = vmax.f32 %v12245_v24, 0.0  ;;  %v12498_v24 = vpack.c.bf16 %v12426_v27, %v1621_v45  ;;  %v10011_v58 = vcombine.low %v1845_v3, %v1849_v41 }
 0x206   :  { %2762 = vmatprep.subr.bf16.mxu1 %v9982_v55  ;;  %v1846_v55 = vld [vmem:[#allocation8 + $0x1258] sm:$0xff]  ;;  %v1869_v27 = vld [vmem:[#allocation8 + $0x1310] sm:$0xff] }
 0x207   :  { %2692 = vmatpush1.bf16.msra.mxu0 %v9979_v44  ;;  %v10005_v44 = vcombine.low %v1838_v59, %v1842_v9  ;;  %v12470_v6 = vpack.c.bf16 %v12438_v52, %v14122_v30  ;;  %v14127_v9 = vmax.f32 %v12287_v60, 0.0  ;;  %14130 = vst [vmem:[#allocation31_spill] sm:$0xff] %v12498_v24  ;;  %v10013_v13 = vcombine.low %v1846_v55, %v1850_v7 }
 0x208   :  { %2763 = vmatpush1.bf16.msra.mxu1 %v9981_v54  ;;  %2693 = vmatprep.subr.bf16.mxu0 %v9988_v11  ;;  %v14115_v54 = vmax.f32 %v12044_v61, 0.0  ;;  %v14116_v11 = vmax.f32 %v12076_v25, 0.0  ;;  %v14120_v61 = vmax.f32 %v12122_v5, 0.0  ;;  %v1858_v5 = vld [vmem:[#allocation8 + $0x12b8] sm:$0xff]  ;;  %v10020_v60 = vcombine.high %v1853_v53, %v1857_v28 }
 0x209   :  { %2764 = vmatprep.subr.bf16.mxu1 %v9990_v34  ;;  %v10014_v34 = vcombine.high %v1846_v55, %v1850_v7  ;;  %v12488_v51 = vpack.c.bf16 %v1619_v63, %v14127_v9  ;;  %v1865_v63 = vld [vmem:[#allocation8 + $0x12f0] sm:$0xff]  ;;  %v1898_v9 = vld [vmem:[#allocation8 + $0x13f8] sm:$0xff] }
 0x20a   :  { %2602 = vmatmul.mubr.bf16.gmra.mrb[68].mxu0 %v12432_v36  ;;  %v12448_v38 = vpack.c.bf16 %v14116_v11, %v14115_v54  ;;  %v1877_v7 = vld [vmem:[#allocation8 + $0x1350] sm:$0xff]  ;;  %v1882_v54 = vld [vmem:[#allocation8 + $0x1378] sm:$0xff] }
 0x20b   :  { %2673 = vmatmul.mubr.bf16.gmra.mrb[68].mxu1 %v12432_v36  ;;  %2694 = vmatpush1.bf16.msra.mxu0 %v9987_v56  ;;  %v12454_v56 = vpack.c.bf16 %v14118_v16, %v14117_v57  ;;  %14128 = vst [vmem:[#allocation29_spill] sm:$0xff] %v12488_v51  ;;  %v1885_v16 = vld [vmem:[#allocation8 + $0x1390] sm:$0xff] }
 0x20c   :  { %2765 = vmatpush1.bf16.msra.mxu1 %v9989_v17  ;;  %2713 = vmatprep.mubr.bf16.mxu0 %v12271_v35  ;;  %v14119_v17 = vmax.f32 %v12087_v20, 0.0  ;;  %v1854_v20 = vld [vmem:[#allocation8 + $0x1298] sm:$0xff] }
 0x20d   :  { %2784 = vmatprep.mubr.bf16.mxu1 %v12271_v35  ;;  %2695 = vmatprep.subr.bf16.mxu0 %v9996_v12  ;;  %v14121_v12 = vmax.f32 %v12148_v42, 0.0  ;;  %v12482_v42 = vpack.c.bf16 %v1620_v18, %v1618_v15  ;;  %v10022_v26 = vcombine.high %v1854_v20, %v1858_v5  ;;  %v1861_v15 = vld [vmem:[#allocation8 + $0x12d0] sm:$0xff]  ;;  %v1862_v18 = vld [vmem:[#allocation8 + $0x12d8] sm:$0xff]  ;;  %v10021_v31 = vcombine.low %v1854_v20, %v1858_v5 }
 0x20e   :  { %2766 = vmatprep.subr.bf16.mxu1 %v9998_v2  ;;  %v12460_v25 = vpack.c.bf16 %v14120_v61, %v14119_v17  ;;  %v14124_v2 = vmax.f32 %v12265_v14, 0.0  ;;  %v12493_v14 = vpack.c.bf16 %v12416_v39, %v1622_v21  ;;  %v10019_v21 = vcombine.low %v1853_v53, %v1857_v28  ;;  %v1889_v53 = vld [vmem:[#allocation8 + $0x13b0] sm:$0xff]  ;;  %v1886_v28 = vld [vmem:[#allocation8 + $0x1398] sm:$0xff] }
 0x20f   :  { %2696 = vmatpush1.bf16.msra.mxu0 %v9995_v46  ;;  %v12465_v8 = vpack.c.bf16 %v12441_v23, %v14121_v12  ;;  %14126 = vst [vmem:[#allocation28_spill] sm:$0xff] %v12482_v42  ;;  %v10028_v39 = vcombine.high %v1861_v15, %v1865_v63  ;;  %v10030_v45 = vcombine.high %v1862_v18, %v1866_v47  ;;  %v1873_v46 = vld [vmem:[#allocation8 + $0x1330] sm:$0xff]  ;;  %v1890_v17 = vld [vmem:[#allocation8 + $0x13b8] sm:$0xff] }
 0x210   :  { %2767 = vmatpush1.bf16.msra.mxu1 %v9997_v40  ;;  %2697 = vmatprep.subr.bf16.mxu0 %v10004_v37  ;;  %v12476_v59 = vpack.c.bf16 %v14124_v2, %v14123_v62  ;;  %14129 = vst [vmem:[#allocation30_spill] sm:$0xff] %v12493_v14  ;;  %v1870_v40 = vld [vmem:[#allocation8 + $0x1318] sm:$0xff]  ;;  %v10027_v3 = vcombine.low %v1861_v15, %v1865_v63  ;;  %v1893_v2 = vld [vmem:[#allocation8 + $0x13d0] sm:$0xff]  ;;  %v1634_v15 = vld [vmem:[#allocation8 + $0x400] sm:$0xff] }
 0x211   :  { %2768 = vmatprep.subr.bf16.mxu1 %v10006_v10  ;;  %v1874_v37 = vld [vmem:[#allocation8 + $0x1338] sm:$0xff]  ;;  %v10029_v10 = vcombine.low %v1862_v18, %v1866_v47  ;;  %v10036_v41 = vcombine.high %v1869_v27, %v1873_v46  ;;  %v10035_v11 = vcombine.low %v1869_v27, %v1873_v46  ;;  %v10052_v30 = vcombine.high %v1885_v16, %v1889_v53  ;;  %v1897_v20 = vld [vmem:[#allocation8 + $0x13f0] sm:$0xff]  ;;  %v1638_v63 = vld [vmem:[#allocation8 + $0x420] sm:$0xff] }
 0x212   :  { %14125 = vst [vmem:[#allocation27_spill] sm:$0xff] %v12476_v59  ;;  %v10038_v55 = vcombine.high %v1870_v40, %v1874_v37  ;;  %v10054_v62 = vcombine.high %v1886_v28, %v1890_v17  ;;  %v1894_v5 = vld [vmem:[#allocation8 + $0x13d8] sm:$0xff]  ;;  %v1635_v18 = vld [vmem:[#allocation8 + $0x408] sm:$0xff]  ;;  %v1642_v27 = vld [vmem:[#allocation8 + $0x440] sm:$0xff] }
 0x213   :  { %2698 = vmatpush1.bf16.msra.mxu0 %v10003_v29  ;;  %v1881_v29 = vld [vmem:[#allocation8 + $0x1370] sm:$0xff]  ;;  %v1639_v47 = vld [vmem:[#allocation8 + $0x428] sm:$0xff]  ;;  %v1646_v46 = vld [vmem:[#allocation8 + $0x460] sm:$0xff] }
 0x214   :  { %2769 = vmatpush1.bf16.msra.mxu1 %v10005_v44  ;;  %2699 = vmatprep.subr.bf16.mxu0 %v10012_v50  ;;  %v1878_v44 = vld [vmem:[#allocation8 + $0x1358] sm:$0xff]  ;;  %v10037_v50 = vcombine.low %v1870_v40, %v1874_v37  ;;  %v10043_v61 = vcombine.low %v1877_v7, %v1881_v29  ;;  %v1643_v40 = vld [vmem:[#allocation8 + $0x448] sm:$0xff]  ;;  %v4994_v42 = vld [vmem:[#allocation8 + $0xe50] sm:$0xff] }
 0x215   :  { %2770 = vmatprep.subr.bf16.mxu1 %v10014_v34  ;;  %v10044_v34 = vcombine.high %v1877_v7, %v1881_v29  ;;  %v10046_v57 = vcombine.high %v1878_v44, %v1882_v54  ;;  %v10045_v12 = vcombine.low %v1878_v44, %v1882_v54  ;;  %v1647_v37 = vld [vmem:[#allocation8 + $0x468] sm:$0xff]  ;;  %v1650_v7 = vld [vmem:[#allocation8 + $0x480] sm:$0xff]  ;;  %v4991_v14 = vld [vmem:[#allocation8 + $0xe38] sm:$0xff] }
 0x216   :  { %v1654_v29 = vld [vmem:[#allocation8 + $0x4a0] sm:$0xff]  ;;  %v1651_v44 = vld [vmem:[#allocation8 + $0x488] sm:$0xff]  ;;  %v4998_v59 = vld [vmem:[#allocation8 + $0xe70] sm:$0xff] }
 0x217   :  { %2700 = vmatpush1.bf16.msra.mxu0 %v10011_v58  ;;  %v10051_v58 = vcombine.low %v1885_v16, %v1889_v53  ;;  %v1655_v54 = vld [vmem:[#allocation8 + $0x4a8] sm:$0xff]  ;;  %v1658_v16 = vld [vmem:[#allocation8 + $0x4c0] sm:$0xff] }
 0x218   :  { %2771 = vmatpush1.bf16.msra.mxu1 %v10013_v13  ;;  %2701 = vmatprep.subr.bf16.mxu0 %v10020_v60  ;;  %v10053_v13 = vcombine.low %v1886_v28, %v1890_v17  ;;  %v10060_v60 = vcombine.high %v1893_v2, %v1897_v20  ;;  %v1662_v53 = vld [vmem:[#allocation8 + $0x4e0] sm:$0xff]  ;;  %v1659_v28 = vld [vmem:[#allocation8 + $0x4c8] sm:$0xff] }
 0x219   :  { %2772 = vmatprep.subr.bf16.mxu1 %v10022_v26  ;;  %v10062_v26 = vcombine.high %v1894_v5, %v1898_v9  ;;  %v1663_v17 = vld [vmem:[#allocation8 + $0x4e8] sm:$0xff] }
 0x21b   :  { %2702 = vmatpush1.bf16.msra.mxu0 %v10019_v21  ;;  %v10059_v21 = vcombine.low %v1893_v2, %v1897_v20  ;;  %v1666_v2 = vld [vmem:[#allocation8 + $0x500] sm:$0xff] }
 0x21c   :  { %2773 = vmatpush1.bf16.msra.mxu1 %v10021_v31  ;;  %2703 = vmatprep.subr.bf16.mxu0 %v10028_v39  ;;  %v10061_v31 = vcombine.low %v1894_v5, %v1898_v9  ;;  %v10064_v39 = vcombine.high %v1634_v15, %v1638_v63  ;;  %v1670_v20 = vld [vmem:[#allocation8 + $0x520] sm:$0xff]  ;;  %v1667_v5 = vld [vmem:[#allocation8 + $0x508] sm:$0xff] }
 0x21d   :  { %2774 = vmatprep.subr.bf16.mxu1 %v10030_v45  ;;  %v10066_v45 = vcombine.high %v1635_v18, %v1639_v47  ;;  %v1671_v9 = vld [vmem:[#allocation8 + $0x528] sm:$0xff] }
 0x21f   :  { %2704 = vmatpush1.bf16.msra.mxu0 %v10027_v3  ;;  %v10063_v3 = vcombine.low %v1634_v15, %v1638_v63  ;;  %v1674_v15 = vld [vmem:[#allocation8 + $0x540] sm:$0xff] }
 0x220   :  { %2775 = vmatpush1.bf16.msra.mxu1 %v10029_v10  ;;  %2705 = vmatprep.subr.bf16.mxu0 %v10036_v41  ;;  %v10065_v10 = vcombine.low %v1635_v18, %v1639_v47  ;;  %v10072_v41 = vcombine.high %v1642_v27, %v1646_v46  ;;  %v1678_v63 = vld [vmem:[#allocation8 + $0x560] sm:$0xff]  ;;  %v1675_v18 = vld [vmem:[#allocation8 + $0x548] sm:$0xff] }
 0x221   :  { %2776 = vmatprep.subr.bf16.mxu1 %v10038_v55  ;;  %v10074_v55 = vcombine.high %v1643_v40, %v1647_v37  ;;  %v1679_v47 = vld [vmem:[#allocation8 + $0x568] sm:$0xff] }
 0x223   :  { %2706 = vmatpush1.bf16.msra.mxu0 %v10035_v11  ;;  %v10071_v11 = vcombine.low %v1642_v27, %v1646_v46  ;;  %v1682_v27 = vld [vmem:[#allocation8 + $0x580] sm:$0xff] }
 0x224   :  { %2777 = vmatpush1.bf16.msra.mxu1 %v10037_v50  ;;  %2707 = vmatprep.subr.bf16.mxu0 %v10044_v34  ;;  %v10073_v50 = vcombine.low %v1643_v40, %v1647_v37  ;;  %v10080_v34 = vcombine.high %v1650_v7, %v1654_v29  ;;  %v1686_v46 = vld [vmem:[#allocation8 + $0x5a0] sm:$0xff]  ;;  %v1683_v40 = vld [vmem:[#allocation8 + $0x588] sm:$0xff] }
 0x225   :  { %2778 = vmatprep.subr.bf16.mxu1 %v10046_v57  ;;  %v10082_v57 = vcombine.high %v1651_v44, %v1655_v54  ;;  %v1687_v37 = vld [vmem:[#allocation8 + $0x5a8] sm:$0xff] }
 0x227   :  { %2708 = vmatpush1.bf16.msra.mxu0 %v10043_v61  ;;  %v10079_v61 = vcombine.low %v1650_v7, %v1654_v29  ;;  %v1690_v7 = vld [vmem:[#allocation8 + $0x5c0] sm:$0xff] }
 0x228   :  { %2779 = vmatpush1.bf16.msra.mxu1 %v10045_v12  ;;  %2709 = vmatprep.subr.bf16.mxu0 %v10052_v30  ;;  %v10081_v12 = vcombine.low %v1651_v44, %v1655_v54  ;;  %v10088_v30 = vcombine.high %v1658_v16, %v1662_v53  ;;  %v1694_v29 = vld [vmem:[#allocation8 + $0x5e0] sm:$0xff]  ;;  %v1691_v44 = vld [vmem:[#allocation8 + $0x5c8] sm:$0xff] }
 0x229   :  { %2780 = vmatprep.subr.bf16.mxu1 %v10054_v62  ;;  %v10090_v62 = vcombine.high %v1659_v28, %v1663_v17  ;;  %v1695_v54 = vld [vmem:[#allocation8 + $0x5e8] sm:$0xff] }
 0x22b   :  { %2710 = vmatpush1.bf16.msra.mxu0 %v10051_v58  ;;  %v10087_v58 = vcombine.low %v1658_v16, %v1662_v53  ;;  %v1702_v16 = vld [vmem:[#allocation8 + $0x620] sm:$0xff]  ;;  %v1699_v53 = vld [vmem:[#allocation8 + $0x608] sm:$0xff] }
 0x22c   :  { %2781 = vmatpush1.bf16.msra.mxu1 %v10053_v13  ;;  %2711 = vmatprep.subr.bf16.mxu0 %v10060_v60  ;;  %v10089_v13 = vcombine.low %v1659_v28, %v1663_v17  ;;  %v10096_v60 = vcombine.high %v1666_v2, %v1670_v20  ;;  %v1703_v28 = vld [vmem:[#allocation8 + $0x628] sm:$0xff]  ;;  %v10119_v17 = vcombine.low %v1690_v7, %v1694_v29 }
 0x22d   :  { %2782 = vmatprep.subr.bf16.mxu1 %v10062_v26  ;;  %v10098_v26 = vcombine.high %v1667_v5, %v1671_v9 }
 0x22f   :  { %2712 = vmatpush1.bf16.msra.mxu0 %v10059_v21  ;;  %v10095_v21 = vcombine.low %v1666_v2, %v1670_v20  ;;  %v1710_v2 = vld [vmem:[#allocation8 + $0x660] sm:$0xff]  ;;  %v1707_v20 = vld [vmem:[#allocation8 + $0x648] sm:$0xff] }
 0x230   :  { %2783 = vmatpush1.bf16.msra.mxu1 %v10061_v31  ;;  %3463 = vmatprep.subr.bf16.mxu0 %v10064_v39  ;;  %v10097_v31 = vcombine.low %v1667_v5, %v1671_v9  ;;  %v10104_v39 = vcombine.high %v1674_v15, %v1678_v63  ;;  %v1711_v5 = vld [vmem:[#allocation8 + $0x668] sm:$0xff]  ;;  %v10129_v9 = vcombine.low %v1699_v53, %v1703_v28 }
 0x231   :  { %3534 = vmatprep.subr.bf16.mxu1 %v10066_v45  ;;  %v10106_v45 = vcombine.high %v1675_v18, %v1679_v47 }
 0x232   :  { %2714 = vmatmul.mubr.bf16.vlgmr.msra.gmra.mrb[72].mxu0 %v12260_v4 }
 0x233   :  { %2785 = vmatmul.mubr.bf16.vlgmr.msra.gmra.mrb[72].mxu1 %v12260_v4  ;;  %2723 = vmatprep.mubr.bf16.mxu0 %v12335_v49 }
 0x234   :  { %2794 = vmatprep.mubr.bf16.mxu1 %v12335_v49  ;;  %3464 = vmatpush1.bf16.msra.mxu0 %v10063_v3  ;;  %v10103_v3 = vcombine.low %v1674_v15, %v1678_v63  ;;  %v1715_v15 = vld [vmem:[#allocation8 + $0x688] sm:$0xff] }
 0x235   :  { %3535 = vmatpush1.bf16.msra.mxu1 %v10065_v10  ;;  %3465 = vmatprep.subr.bf16.mxu0 %v10072_v41  ;;  %v10105_v10 = vcombine.low %v1675_v18, %v1679_v47  ;;  %v10112_v41 = vcombine.high %v1682_v27, %v1686_v46  ;;  %v1719_v63 = vld [vmem:[#allocation8 + $0x6a8] sm:$0xff]  ;;  %v10137_v47 = vcombine.low %v1707_v20, %v1711_v5 }
 0x236   :  { %3536 = vmatprep.subr.bf16.mxu1 %v10074_v55  ;;  %v10114_v55 = vcombine.high %v1683_v40, %v1687_v37 }
 0x238   :  { %3466 = vmatpush1.bf16.msra.mxu0 %v10071_v11  ;;  %v10111_v11 = vcombine.low %v1682_v27, %v1686_v46  ;;  %v1723_v27 = vld [vmem:[#allocation8 + $0x6c8] sm:$0xff] }
 0x239   :  { %3537 = vmatpush1.bf16.msra.mxu1 %v10073_v50  ;;  %3467 = vmatprep.subr.bf16.mxu0 %v10080_v34  ;;  %v10113_v50 = vcombine.low %v1683_v40, %v1687_v37  ;;  %v10120_v34 = vcombine.high %v1690_v7, %v1694_v29  ;;  %v1727_v46 = vld [vmem:[#allocation8 + $0x6e8] sm:$0xff]  ;;  %v10145_v37 = vcombine.low %v1715_v15, %v1719_v63 }
 0x23a   :  { %2724 = vmatmul.mubr.bf16.gmra.mrb[76].mxu0 %v12322_v48  ;;  %3538 = vmatprep.subr.bf16.mxu1 %v10082_v57  ;;  %v1698_v57 = vld [vmem:[#allocation8 + $0x600] sm:$0xff]  ;;  %v1731_v7 = vld [vmem:[#allocation8 + $0x708] sm:$0xff] }
 0x23b   :  { %2795 = vmatmul.mubr.bf16.gmra.mrb[76].mxu1 %v12322_v48  ;;  %2733 = vmatprep.mubr.bf16.mxu0 %v12408_v33  ;;  %v1735_v29 = vld [vmem:[#allocation8 + $0x728] sm:$0xff] }
 0x23c   :  { %2804 = vmatprep.mubr.bf16.mxu1 %v12408_v33  ;;  %3468 = vmatpush1.bf16.msra.mxu0 %v10079_v61  ;;  %v10121_v61 = vcombine.low %v1691_v44, %v1695_v54 }
 0x23d   :  { %3539 = vmatpush1.bf16.msra.mxu1 %v10081_v12  ;;  %3469 = vmatprep.subr.bf16.mxu0 %v10088_v30  ;;  %v10128_v12 = vcombine.high %v1698_v57, %v1702_v16  ;;  %v10130_v30 = vcombine.high %v1699_v53, %v1703_v28  ;;  %v10161_v28 = vcombine.low %v1731_v7, %v1735_v29 }
 0x23e   :  { %3540 = vmatprep.subr.bf16.mxu1 %v10090_v62  ;;  %v1706_v62 = vld [vmem:[#allocation8 + $0x640] sm:$0xff] }
 0x23f   :  { %v10135_v18 = vcombine.low %v1706_v62, %v1710_v2 }
 0x240   :  { %3470 = vmatpush1.bf16.msra.mxu0 %v10087_v58  ;;  %v10136_v58 = vcombine.high %v1706_v62, %v1710_v2  ;;  %v1747_v62 = vld [vmem:[#allocation8 + $0x788] sm:$0xff] }
 0x241   :  { %3541 = vmatpush1.bf16.msra.mxu1 %v10089_v13  ;;  %3471 = vmatprep.subr.bf16.mxu0 %v10096_v60  ;;  %v10138_v13 = vcombine.high %v1707_v20, %v1711_v5  ;;  %v1714_v60 = vld [vmem:[#allocation8 + $0x680] sm:$0xff]  ;;  %v1751_v2 = vld [vmem:[#allocation8 + $0x7a8] sm:$0xff] }
 0x242   :  { %2734 = vmatmul.mubr.bf16.gmra.mrb[80].mxu0 %v12399_v19  ;;  %3542 = vmatprep.subr.bf16.mxu1 %v10098_v26  ;;  %v1718_v26 = vld [vmem:[#allocation8 + $0x6a0] sm:$0xff] }
 0x243   :  { %2805 = vmatmul.mubr.bf16.gmra.mrb[80].mxu1 %v12399_v19  ;;  %2743 = vmatprep.mubr.bf16.mxu0 %v12424_v1  ;;  %v10143_v40 = vcombine.low %v1714_v60, %v1718_v26 }
 0x244   :  { %2814 = vmatprep.mubr.bf16.mxu1 %v12424_v1  ;;  %3472 = vmatpush1.bf16.msra.mxu0 %v10095_v21  ;;  %v10122_v1 = vcombine.high %v1691_v44, %v1695_v54  ;;  %v10144_v21 = vcombine.high %v1714_v60, %v1718_v26  ;;  %v10153_v54 = vcombine.low %v1723_v27, %v1727_v46  ;;  %v1755_v60 = vld [vmem:[#allocation8 + $0x7c8] sm:$0xff] }
 0x245   :  { %3543 = vmatpush1.bf16.msra.mxu1 %v10097_v31  ;;  %3473 = vmatprep.subr.bf16.mxu0 %v10104_v39  ;;  %v10146_v31 = vcombine.high %v1715_v15, %v1719_v63  ;;  %v1722_v39 = vld [vmem:[#allocation8 + $0x6c0] sm:$0xff]  ;;  %v1759_v26 = vld [vmem:[#allocation8 + $0x7e8] sm:$0xff]  ;;  %v10177_v63 = vcombine.low %v1747_v62, %v1751_v2 }
 0x246   :  { %3544 = vmatprep.subr.bf16.mxu1 %v10106_v45  ;;  %v1726_v45 = vld [vmem:[#allocation8 + $0x6e0] sm:$0xff] }
 0x247   :  { %v10151_v44 = vcombine.low %v1722_v39, %v1726_v45 }
 0x248   :  { %3474 = vmatpush1.bf16.msra.mxu0 %v10103_v3  ;;  %v10152_v3 = vcombine.high %v1722_v39, %v1726_v45  ;;  %v1637_v39 = vld [vmem:[#allocation8 + $0x418] sm:$0xff] }
 0x249   :  { %3545 = vmatpush1.bf16.msra.mxu1 %v10105_v10  ;;  %3475 = vmatprep.subr.bf16.mxu0 %v10112_v41  ;;  %v10154_v10 = vcombine.high %v1723_v27, %v1727_v46  ;;  %v1730_v41 = vld [vmem:[#allocation8 + $0x700] sm:$0xff]  ;;  %v1641_v45 = vld [vmem:[#allocation8 + $0x438] sm:$0xff]  ;;  %v10185_v46 = vcombine.low %v1755_v60, %v1759_v26 }
 0x24a   :  { %2744 = vmatmul.mubr.bf16.gmra.mrb[84].mxu0 %v12432_v36  ;;  %3546 = vmatprep.subr.bf16.mxu1 %v10114_v55  ;;  %v1734_v55 = vld [vmem:[#allocation8 + $0x720] sm:$0xff] }
 0x24b   :  { %2815 = vmatmul.mubr.bf16.gmra.mrb[84].mxu1 %v12432_v36  ;;  %3495 = vmatprep.mubr.bf16.mxu0 %v12065_v32  ;;  %v10127_v36 = vcombine.low %v1698_v57, %v1702_v16  ;;  %v1739_v57 = vld [vmem:[#allocation8 + $0x748] sm:$0xff]  ;;  %v10159_v53 = vcombine.low %v1730_v41, %v1734_v55 }
 0x24c   :  { %3476 = vmatpush1.bf16.msra.mxu0 %v10111_v11  ;;  %3566 = vmatprep.mubr.bf16.mxu1 %v12065_v32  ;;  %v10160_v11 = vcombine.high %v1730_v41, %v1734_v55  ;;  %v1743_v16 = vld [vmem:[#allocation8 + $0x768] sm:$0xff]  ;;  %v1645_v41 = vld [vmem:[#allocation8 + $0x458] sm:$0xff] }
 0x24d   :  { %3547 = vmatpush1.bf16.msra.mxu1 %v10113_v50  ;;  %3477 = vmatprep.subr.bf16.mxu0 %v10120_v34  ;;  %v10162_v50 = vcombine.high %v1731_v7, %v1735_v29  ;;  %v1738_v34 = vld [vmem:[#allocation8 + $0x740] sm:$0xff]  ;;  %v10169_v5 = vcombine.low %v1739_v57, %v1743_v16  ;;  %v1649_v55 = vld [vmem:[#allocation8 + $0x478] sm:$0xff]  ;;  %v10069_v29 = vcombine.low %v1637_v39, %v1641_v45 }
 0x24e   :  { %3548 = vmatprep.subr.bf16.mxu1 %v10122_v1  ;;  %v1742_v1 = vld [vmem:[#allocation8 + $0x760] sm:$0xff] }
 0x24f   :  { %v10167_v20 = vcombine.low %v1738_v34, %v1742_v1 }
 0x250   :  { %3478 = vmatpush1.bf16.msra.mxu0 %v10119_v17  ;;  %v10168_v17 = vcombine.high %v1738_v34, %v1742_v1  ;;  %v1653_v34 = vld [vmem:[#allocation8 + $0x498] sm:$0xff] }
 0x251   :  { %3549 = vmatpush1.bf16.msra.mxu1 %v10121_v61  ;;  %3479 = vmatprep.subr.bf16.mxu0 %v10128_v12  ;;  %v10170_v61 = vcombine.high %v1739_v57, %v1743_v16  ;;  %v1746_v12 = vld [vmem:[#allocation8 + $0x780] sm:$0xff]  ;;  %v1657_v1 = vld [vmem:[#allocation8 + $0x4b8] sm:$0xff]  ;;  %v10077_v16 = vcombine.low %v1645_v41, %v1649_v55 }
 0x252   :  { %3550 = vmatprep.subr.bf16.mxu1 %v10130_v30  ;;  %v1750_v30 = vld [vmem:[#allocation8 + $0x7a0] sm:$0xff] }
 0x253   :  { %v10175_v15 = vcombine.low %v1746_v12, %v1750_v30 }
 0x254   :  { %3480 = vmatpush1.bf16.msra.mxu0 %v10127_v36  ;;  %v10176_v36 = vcombine.high %v1746_v12, %v1750_v30  ;;  %v1661_v12 = vld [vmem:[#allocation8 + $0x4d8] sm:$0xff] }
 0x255   :  { %3551 = vmatpush1.bf16.msra.mxu1 %v10129_v9  ;;  %3481 = vmatprep.subr.bf16.mxu0 %v10136_v58  ;;  %v10178_v9 = vcombine.high %v1747_v62, %v1751_v2  ;;  %v1754_v58 = vld [vmem:[#allocation8 + $0x7c0] sm:$0xff]  ;;  %v1665_v30 = vld [vmem:[#allocation8 + $0x4f8] sm:$0xff]  ;;  %v10085_v2 = vcombine.low %v1653_v34, %v1657_v1 }
 0x256   :  { %3552 = vmatprep.subr.bf16.mxu1 %v10138_v13  ;;  %v1758_v13 = vld [vmem:[#allocation8 + $0x7e0] sm:$0xff] }
 0x257   :  { %v10183_v27 = vcombine.low %v1754_v58, %v1758_v13 }
 0x258   :  { %3482 = vmatpush1.bf16.msra.mxu0 %v10135_v18  ;;  %v10184_v18 = vcombine.high %v1754_v58, %v1758_v13  ;;  %v14131_v58 = vld [vmem:[#allocation53_spill] sm:$0xff]  ;;  %v1669_v13 = vld [vmem:[#allocation8 + $0x518] sm:$0xff] }
 0x259   :  { %3553 = vmatpush1.bf16.msra.mxu1 %v10137_v47  ;;  %3483 = vmatprep.subr.bf16.mxu0 %v10144_v21  ;;  %v10186_v47 = vcombine.high %v1755_v60, %v1759_v26  ;;  %v1636_v21 = vld [vmem:[#allocation8 + $0x410] sm:$0xff]  ;;  %v1673_v60 = vld [vmem:[#allocation8 + $0x538] sm:$0xff] }
 0x25a   :  { %3554 = vmatprep.subr.bf16.mxu1 %v10146_v31  ;;  %v1640_v31 = vld [vmem:[#allocation8 + $0x430] sm:$0xff] }
 0x25b   :  { %v10067_v7 = vcombine.low %v1636_v21, %v1640_v31 }
 0x25c   :  { %3484 = vmatpush1.bf16.msra.mxu0 %v10143_v40  ;;  %v10068_v40 = vcombine.high %v1636_v21, %v1640_v31  ;;  %v1680_v21 = vld [vmem:[#allocation8 + $0x570] sm:$0xff]  ;;  %v1677_v31 = vld [vmem:[#allocation8 + $0x558] sm:$0xff] }
 0x25d   :  { %3555 = vmatpush1.bf16.msra.mxu1 %v10145_v37  ;;  %3485 = vmatprep.subr.bf16.mxu0 %v10152_v3  ;;  %v10070_v37 = vcombine.high %v1637_v39, %v1641_v45  ;;  %v1644_v3 = vld [vmem:[#allocation8 + $0x450] sm:$0xff]  ;;  %v1681_v39 = vld [vmem:[#allocation8 + $0x578] sm:$0xff] }
 0x25e   :  { %3556 = vmatprep.subr.bf16.mxu1 %v10154_v10  ;;  %v1648_v10 = vld [vmem:[#allocation8 + $0x470] sm:$0xff] }
 0x25f   :  { %v10075_v57 = vcombine.low %v1644_v3, %v1648_v10 }
 0x260   :  { %3486 = vmatpush1.bf16.msra.mxu0 %v10151_v44  ;;  %v10076_v44 = vcombine.high %v1644_v3, %v1648_v10  ;;  %v10110_v3 = vcombine.high %v1677_v31, %v1681_v39  ;;  %v1684_v10 = vld [vmem:[#allocation8 + $0x590] sm:$0xff] }
 0x261   :  { %3557 = vmatpush1.bf16.msra.mxu1 %v10153_v54  ;;  %3487 = vmatprep.subr.bf16.mxu0 %v10160_v11  ;;  %v10078_v54 = vcombine.high %v1645_v41, %v1649_v55  ;;  %v1652_v11 = vld [vmem:[#allocation8 + $0x490] sm:$0xff]  ;;  %v1685_v55 = vld [vmem:[#allocation8 + $0x598] sm:$0xff] }
 0x262   :  { %3558 = vmatprep.subr.bf16.mxu1 %v10162_v50  ;;  %v1656_v50 = vld [vmem:[#allocation8 + $0x4b0] sm:$0xff] }
 0x263   :  { %v10083_v62 = vcombine.low %v1652_v11, %v1656_v50  ;;  %v1688_v41 = vld [vmem:[#allocation8 + $0x5b0] sm:$0xff] }
 0x264   :  { %3488 = vmatpush1.bf16.msra.mxu0 %v10159_v53  ;;  %v10084_v53 = vcombine.high %v1652_v11, %v1656_v50  ;;  %v1692_v11 = vld [vmem:[#allocation8 + $0x5d0] sm:$0xff] }
 0x265   :  { %3559 = vmatpush1.bf16.msra.mxu1 %v10161_v28  ;;  %3489 = vmatprep.subr.bf16.mxu0 %v10168_v17  ;;  %v10086_v28 = vcombine.high %v1653_v34, %v1657_v1  ;;  %v1660_v17 = vld [vmem:[#allocation8 + $0x4d0] sm:$0xff]  ;;  %v1693_v34 = vld [vmem:[#allocation8 + $0x5d8] sm:$0xff] }
 0x266   :  { %3560 = vmatprep.subr.bf16.mxu1 %v10170_v61  ;;  %v1664_v61 = vld [vmem:[#allocation8 + $0x4f0] sm:$0xff]  ;;  %v1697_v1 = vld [vmem:[#allocation8 + $0x5f8] sm:$0xff] }
 0x267   :  { %v10091_v26 = vcombine.low %v1660_v17, %v1664_v61  ;;  %v1696_v50 = vld [vmem:[#allocation8 + $0x5f0] sm:$0xff] }
 0x268   :  { %3490 = vmatpush1.bf16.msra.mxu0 %v10167_v20  ;;  %v10092_v20 = vcombine.high %v1660_v17, %v1664_v61  ;;  %v10126_v17 = vcombine.high %v1693_v34, %v1697_v1  ;;  %v1700_v61 = vld [vmem:[#allocation8 + $0x610] sm:$0xff] }
 0x269   :  { %3561 = vmatpush1.bf16.msra.mxu1 %v10169_v5  ;;  %3491 = vmatprep.subr.bf16.mxu0 %v10176_v36  ;;  %v10094_v5 = vcombine.high %v1661_v12, %v1665_v30  ;;  %v1668_v36 = vld [vmem:[#allocation8 + $0x510] sm:$0xff] }
 0x26a   :  { %3562 = vmatprep.subr.bf16.mxu1 %v10178_v9  ;;  %v1672_v9 = vld [vmem:[#allocation8 + $0x530] sm:$0xff] }
 0x26b   :  { %v10099_v45 = vcombine.low %v1668_v36, %v1672_v9 }
 0x26c   :  { %3492 = vmatpush1.bf16.msra.mxu0 %v10175_v15  ;;  %v10093_v15 = vcombine.low %v1661_v12, %v1665_v30  ;;  %v1704_v12 = vld [vmem:[#allocation8 + $0x630] sm:$0xff]  ;;  %v1701_v30 = vld [vmem:[#allocation8 + $0x618] sm:$0xff] }
 0x26d   :  { %3563 = vmatpush1.bf16.msra.mxu1 %v10177_v63  ;;  %3493 = vmatprep.subr.bf16.mxu0 %v10184_v18  ;;  %v10100_v63 = vcombine.high %v1668_v36, %v1672_v9  ;;  %v10102_v18 = vcombine.high %v1669_v13, %v1673_v60  ;;  %v1708_v36 = vld [vmem:[#allocation8 + $0x650] sm:$0xff] }
 0x26e   :  { %3564 = vmatprep.subr.bf16.mxu1 %v10186_v47  ;;  %v1676_v47 = vld [vmem:[#allocation8 + $0x550] sm:$0xff] }
 0x26f   :  { %v1712_v9 = vld [vmem:[#allocation8 + $0x670] sm:$0xff] }
 0x270   :  { %3494 = vmatpush1.bf16.msra.mxu0 %v10183_v27  ;;  %v10101_v27 = vcombine.low %v1669_v13, %v1673_v60  ;;  %v1709_v13 = vld [vmem:[#allocation8 + $0x658] sm:$0xff] }
 0x271   :  { %3565 = vmatpush1.bf16.msra.mxu1 %v10185_v46  ;;  %3605 = vmatprep.subr.bf16.mxu0 %v10068_v40  ;;  %v12526_v46 = vpack.c.bf16 %v12441_v23, %v12441_v23  ;;  %v10108_v40 = vcombine.high %v1676_v47, %v1680_v21  ;;  %v10109_v23 = vcombine.low %v1677_v31, %v1681_v39  ;;  %v1713_v60 = vld [vmem:[#allocation8 + $0x678] sm:$0xff] }
 0x272   :  { %3676 = vmatprep.subr.bf16.mxu1 %v10070_v37  ;;  %v14132_v37 = vld [vmem:[#allocation52_spill] sm:$0xff]  ;;  %v1717_v31 = vld [vmem:[#allocation8 + $0x698] sm:$0xff] }
 0x273   :  { %3496 = vmatmul.mubr.bf16.vlgmr.msra.gmra.mrb[56].mxu0 %v12055_v0  ;;  %v1721_v39 = vld [vmem:[#allocation8 + $0x6b8] sm:$0xff] }
 0x274   :  { %3567 = vmatmul.mubr.bf16.vlgmr.msra.gmra.mrb[56].mxu1 %v12055_v0  ;;  %3505 = vmatprep.mubr.bf16.mxu0 %v12117_v22 }
 0x275   :  { %3576 = vmatprep.mubr.bf16.mxu1 %v12117_v22  ;;  %3606 = vmatpush1.bf16.msra.mxu0 %v10067_v7  ;;  %v1689_v7 = vld [vmem:[#allocation8 + $0x5b8] sm:$0xff] }
 0x276   :  { %3677 = vmatpush1.bf16.msra.mxu1 %v10069_v29  ;;  %3607 = vmatprep.subr.bf16.mxu0 %v10076_v44  ;;  %v10107_v29 = vcombine.low %v1676_v47, %v1680_v21  ;;  %v10116_v44 = vcombine.high %v1684_v10, %v1688_v41  ;;  %v1716_v47 = vld [vmem:[#allocation8 + $0x690] sm:$0xff] }
 0x277   :  { %3678 = vmatprep.subr.bf16.mxu1 %v10078_v54  ;;  %v10118_v54 = vcombine.high %v1685_v55, %v1689_v7  ;;  %v1720_v21 = vld [vmem:[#allocation8 + $0x6b0] sm:$0xff] }
 0x279   :  { %3608 = vmatpush1.bf16.msra.mxu0 %v10075_v57  ;;  %v12534_v57 = vpack.c.bf16 %v12438_v52, %v12438_v52  ;;  %v10123_v52 = vcombine.low %v1692_v11, %v1696_v50 }
 0x27a   :  { %3679 = vmatpush1.bf16.msra.mxu1 %v10077_v16  ;;  %3609 = vmatprep.subr.bf16.mxu0 %v10084_v53  ;;  %v10115_v16 = vcombine.low %v1684_v10, %v1688_v41  ;;  %v10117_v53 = vcombine.low %v1685_v55, %v1689_v7  ;;  %v1724_v10 = vld [vmem:[#allocation8 + $0x6d0] sm:$0xff]  ;;  %v1725_v55 = vld [vmem:[#allocation8 + $0x6d8] sm:$0xff] }
 0x27b   :  { %3506 = vmatmul.mubr.bf16.gmra.mrb[60].mxu0 %v12109_v43  ;;  %3680 = vmatprep.subr.bf16.mxu1 %v10086_v28  ;;  %v10124_v28 = vcombine.high %v1692_v11, %v1696_v50  ;;  %v1728_v41 = vld [vmem:[#allocation8 + $0x6f0] sm:$0xff]  ;;  %v1729_v7 = vld [vmem:[#allocation8 + $0x6f8] sm:$0xff] }
 0x27c   :  { %3577 = vmatmul.mubr.bf16.gmra.mrb[60].mxu1 %v12109_v43  ;;  %3515 = vmatprep.mubr.bf16.mxu0 %v14131_v58  ;;  %v1732_v11 = vld [vmem:[#allocation8 + $0x710] sm:$0xff] }
 0x27d   :  { %3586 = vmatprep.mubr.bf16.mxu1 %v14131_v58  ;;  %3610 = vmatpush1.bf16.msra.mxu0 %v10083_v62  ;;  %v1705_v62 = vld [vmem:[#allocation8 + $0x638] sm:$0xff]  ;;  %v1736_v50 = vld [vmem:[#allocation8 + $0x730] sm:$0xff] }
 0x27e   :  { %3681 = vmatpush1.bf16.msra.mxu1 %v10085_v2  ;;  %3611 = vmatprep.subr.bf16.mxu0 %v10092_v20  ;;  %v10125_v2 = vcombine.low %v1693_v34, %v1697_v1  ;;  %v10132_v20 = vcombine.high %v1700_v61, %v1704_v12  ;;  %v1733_v34 = vld [vmem:[#allocation8 + $0x718] sm:$0xff] }
 0x27f   :  { %3682 = vmatprep.subr.bf16.mxu1 %v10094_v5  ;;  %v10134_v5 = vcombine.high %v1701_v30, %v1705_v62  ;;  %v1737_v1 = vld [vmem:[#allocation8 + $0x738] sm:$0xff] }
 0x281   :  { %3612 = vmatpush1.bf16.msra.mxu0 %v10091_v26  ;;  %v10131_v26 = vcombine.low %v1700_v61, %v1704_v12  ;;  %v1740_v61 = vld [vmem:[#allocation8 + $0x750] sm:$0xff] }
 0x282   :  { %3683 = vmatpush1.bf16.msra.mxu1 %v10093_v15  ;;  %3613 = vmatprep.subr.bf16.mxu0 %v10100_v63  ;;  %v10133_v15 = vcombine.low %v1701_v30, %v1705_v62  ;;  %v10140_v63 = vcombine.high %v1708_v36, %v1712_v9  ;;  %v1744_v12 = vld [vmem:[#allocation8 + $0x770] sm:$0xff]  ;;  %v1741_v30 = vld [vmem:[#allocation8 + $0x758] sm:$0xff] }
 0x283   :  { %3516 = vmatmul.mubr.bf16.gmra.mrb[64].mxu0 %v14132_v37  ;;  %3684 = vmatprep.subr.bf16.mxu1 %v10102_v18  ;;  %v10142_v18 = vcombine.high %v1709_v13, %v1713_v60  ;;  %v1745_v62 = vld [vmem:[#allocation8 + $0x778] sm:$0xff] }
 0x284   :  { %3587 = vmatmul.mubr.bf16.gmra.mrb[64].mxu1 %v14132_v37  ;;  %3525 = vmatprep.mubr.bf16.mxu0 %v12526_v46 }
 0x285   :  { %3596 = vmatprep.mubr.bf16.mxu1 %v12526_v46  ;;  %3614 = vmatpush1.bf16.msra.mxu0 %v10099_v45  ;;  %v10139_v45 = vcombine.low %v1708_v36, %v1712_v9  ;;  %v1748_v36 = vld [vmem:[#allocation8 + $0x790] sm:$0xff] }
 0x286   :  { %3685 = vmatpush1.bf16.msra.mxu1 %v10101_v27  ;;  %3615 = vmatprep.subr.bf16.mxu0 %v10108_v40  ;;  %v10141_v27 = vcombine.low %v1709_v13, %v1713_v60  ;;  %v10148_v40 = vcombine.high %v1716_v47, %v1720_v21  ;;  %v1752_v9 = vld [vmem:[#allocation8 + $0x7b0] sm:$0xff]  ;;  %v1749_v13 = vld [vmem:[#allocation8 + $0x798] sm:$0xff] }
 0x287   :  { %3686 = vmatprep.subr.bf16.mxu1 %v10110_v3  ;;  %v10150_v3 = vcombine.high %v1717_v31, %v1721_v39  ;;  %v1753_v60 = vld [vmem:[#allocation8 + $0x7b8] sm:$0xff] }
 0x289   :  { %3616 = vmatpush1.bf16.msra.mxu0 %v10107_v29  ;;  %v10147_v29 = vcombine.low %v1716_v47, %v1720_v21  ;;  %v1756_v47 = vld [vmem:[#allocation8 + $0x7d0] sm:$0xff] }
 0x28a   :  { %3687 = vmatpush1.bf16.msra.mxu1 %v10109_v23  ;;  %3617 = vmatprep.subr.bf16.mxu0 %v10116_v44  ;;  %v10149_v23 = vcombine.low %v1717_v31, %v1721_v39  ;;  %v10156_v44 = vcombine.high %v1724_v10, %v1728_v41  ;;  %v1760_v21 = vld [vmem:[#allocation8 + $0x7f0] sm:$0xff]  ;;  %v1757_v31 = vld [vmem:[#allocation8 + $0x7d8] sm:$0xff] }
 0x28b   :  { %3526 = vmatmul.mubr.bf16.gmra.mrb[68].mxu0 %v12534_v57  ;;  %3688 = vmatprep.subr.bf16.mxu1 %v10118_v54  ;;  %v10158_v54 = vcombine.high %v1725_v55, %v1729_v7  ;;  %v1761_v39 = vld [vmem:[#allocation8 + $0x7f8] sm:$0xff] }
 0x28c   :  { %3597 = vmatmul.mubr.bf16.gmra.mrb[68].mxu1 %v12534_v57  ;;  %3637 = vmatprep.mubr.bf16.mxu0 %v12065_v32 }
 0x28d   :  { %3618 = vmatpush1.bf16.msra.mxu0 %v10115_v16  ;;  %3708 = vmatprep.mubr.bf16.mxu1 %v12065_v32  ;;  %v10155_v16 = vcombine.low %v1724_v10, %v1728_v41  ;;  %v3851_v10 = vld [vmem:[#allocation8] sm:$0xff] }
 0x28e   :  { %3689 = vmatpush1.bf16.msra.mxu1 %v10117_v53  ;;  %3619 = vmatprep.subr.bf16.mxu0 %v10124_v28  ;;  %v10157_v53 = vcombine.low %v1725_v55, %v1729_v7  ;;  %v10164_v28 = vcombine.high %v1732_v11, %v1736_v50  ;;  %v3855_v41 = vld [vmem:[#allocation8 + $0x20] sm:$0xff]  ;;  %v3852_v55 = vld [vmem:[#allocation8 + $0x8] sm:$0xff] }
 0x28f   :  { %3690 = vmatprep.subr.bf16.mxu1 %v10126_v17  ;;  %v10166_v17 = vcombine.high %v1733_v34, %v1737_v1  ;;  %v3856_v7 = vld [vmem:[#allocation8 + $0x28] sm:$0xff] }
 0x291   :  { %3620 = vmatpush1.bf16.msra.mxu0 %v10123_v52  ;;  %v10163_v52 = vcombine.low %v1732_v11, %v1736_v50  ;;  %v3859_v11 = vld [vmem:[#allocation8 + $0x40] sm:$0xff] }
 0x292   :  { %3691 = vmatpush1.bf16.msra.mxu1 %v10125_v2  ;;  %3621 = vmatprep.subr.bf16.mxu0 %v10132_v20  ;;  %v10165_v2 = vcombine.low %v1733_v34, %v1737_v1  ;;  %v10172_v20 = vcombine.high %v1740_v61, %v1744_v12  ;;  %v3863_v50 = vld [vmem:[#allocation8 + $0x60] sm:$0xff]  ;;  %v3860_v34 = vld [vmem:[#allocation8 + $0x48] sm:$0xff] }
 0x293   :  { %3692 = vmatprep.subr.bf16.mxu1 %v10134_v5  ;;  %v10174_v5 = vcombine.high %v1741_v30, %v1745_v62  ;;  %v3864_v1 = vld [vmem:[#allocation8 + $0x68] sm:$0xff] }
 0x295   :  { %3622 = vmatpush1.bf16.msra.mxu0 %v10131_v26  ;;  %v10171_v26 = vcombine.low %v1740_v61, %v1744_v12  ;;  %v3867_v61 = vld [vmem:[#allocation8 + $0x80] sm:$0xff] }
 0x296   :  { %3693 = vmatpush1.bf16.msra.mxu1 %v10133_v15  ;;  %3623 = vmatprep.subr.bf16.mxu0 %v10140_v63  ;;  %v10173_v15 = vcombine.low %v1741_v30, %v1745_v62  ;;  %v10180_v63 = vcombine.high %v1748_v36, %v1752_v9  ;;  %v3871_v12 = vld [vmem:[#allocation8 + $0xa0] sm:$0xff]  ;;  %v3868_v30 = vld [vmem:[#allocation8 + $0x88] sm:$0xff] }
 0x297   :  { %3694 = vmatprep.subr.bf16.mxu1 %v10142_v18  ;;  %v10182_v18 = vcombine.high %v1749_v13, %v1753_v60  ;;  %v3872_v62 = vld [vmem:[#allocation8 + $0xa8] sm:$0xff] }
 0x299   :  { %3624 = vmatpush1.bf16.msra.mxu0 %v10139_v45  ;;  %v10179_v45 = vcombine.low %v1748_v36, %v1752_v9  ;;  %v3875_v36 = vld [vmem:[#allocation8 + $0xc0] sm:$0xff] }
 0x29a   :  { %3695 = vmatpush1.bf16.msra.mxu1 %v10141_v27  ;;  %3625 = vmatprep.subr.bf16.mxu0 %v10148_v40  ;;  %v10181_v27 = vcombine.low %v1749_v13, %v1753_v60  ;;  %v10188_v40 = vcombine.high %v1756_v47, %v1760_v21  ;;  %v3879_v9 = vld [vmem:[#allocation8 + $0xe0] sm:$0xff]  ;;  %v3876_v13 = vld [vmem:[#allocation8 + $0xc8] sm:$0xff] }
 0x29b   :  { %3696 = vmatprep.subr.bf16.mxu1 %v10150_v3  ;;  %v10190_v3 = vcombine.high %v1757_v31, %v1761_v39  ;;  %v3880_v60 = vld [vmem:[#allocation8 + $0xe8] sm:$0xff] }
 0x29d   :  { %3626 = vmatpush1.bf16.msra.mxu0 %v10147_v29  ;;  %v10187_v29 = vcombine.low %v1756_v47, %v1760_v21  ;;  %v3883_v47 = vld [vmem:[#allocation8 + $0x100] sm:$0xff] }
 0x29e   :  { %3697 = vmatpush1.bf16.msra.mxu1 %v10149_v23  ;;  %3627 = vmatprep.subr.bf16.mxu0 %v10156_v44  ;;  %v10189_v23 = vcombine.low %v1757_v31, %v1761_v39  ;;  %v10192_v44 = vcombine.high %v3851_v10, %v3855_v41  ;;  %v3887_v21 = vld [vmem:[#allocation8 + $0x120] sm:$0xff]  ;;  %v3884_v31 = vld [vmem:[#allocation8 + $0x108] sm:$0xff] }
 0x29f   :  { %3698 = vmatprep.subr.bf16.mxu1 %v10158_v54  ;;  %v10194_v54 = vcombine.high %v3852_v55, %v3856_v7  ;;  %v3888_v39 = vld [vmem:[#allocation8 + $0x128] sm:$0xff] }
 0x2a1   :  { %3628 = vmatpush1.bf16.msra.mxu0 %v10155_v16  ;;  %v10191_v16 = vcombine.low %v3851_v10, %v3855_v41  ;;  %v3891_v10 = vld [vmem:[#allocation8 + $0x140] sm:$0xff] }
 0x2a2   :  { %3699 = vmatpush1.bf16.msra.mxu1 %v10157_v53  ;;  %3629 = vmatprep.subr.bf16.mxu0 %v10164_v28  ;;  %v10193_v53 = vcombine.low %v3852_v55, %v3856_v7  ;;  %v10200_v28 = vcombine.high %v3859_v11, %v3863_v50  ;;  %v3895_v41 = vld [vmem:[#allocation8 + $0x160] sm:$0xff]  ;;  %v3892_v55 = vld [vmem:[#allocation8 + $0x148] sm:$0xff] }
 0x2a3   :  { %3700 = vmatprep.subr.bf16.mxu1 %v10166_v17  ;;  %v10202_v17 = vcombine.high %v3860_v34, %v3864_v1  ;;  %v3896_v7 = vld [vmem:[#allocation8 + $0x168] sm:$0xff] }
 0x2a5   :  { %3630 = vmatpush1.bf16.msra.mxu0 %v10163_v52  ;;  %v10199_v52 = vcombine.low %v3859_v11, %v3863_v50  ;;  %v3899_v11 = vld [vmem:[#allocation8 + $0x180] sm:$0xff] }
 0x2a6   :  { %3701 = vmatpush1.bf16.msra.mxu1 %v10165_v2  ;;  %3631 = vmatprep.subr.bf16.mxu0 %v10172_v20  ;;  %v10201_v2 = vcombine.low %v3860_v34, %v3864_v1  ;;  %v10208_v20 = vcombine.high %v3867_v61, %v3871_v12  ;;  %v3903_v50 = vld [vmem:[#allocation8 + $0x1a0] sm:$0xff]  ;;  %v3900_v34 = vld [vmem:[#allocation8 + $0x188] sm:$0xff] }
 0x2a7   :  { %3702 = vmatprep.subr.bf16.mxu1 %v10174_v5  ;;  %v10210_v5 = vcombine.high %v3868_v30, %v3872_v62  ;;  %v3904_v1 = vld [vmem:[#allocation8 + $0x1a8] sm:$0xff] }
 0x2a9   :  { %3632 = vmatpush1.bf16.msra.mxu0 %v10171_v26  ;;  %v10207_v26 = vcombine.low %v3867_v61, %v3871_v12  ;;  %v3907_v61 = vld [vmem:[#allocation8 + $0x1c0] sm:$0xff] }
 0x2aa   :  { %3703 = vmatpush1.bf16.msra.mxu1 %v10173_v15  ;;  %3633 = vmatprep.subr.bf16.mxu0 %v10180_v63  ;;  %v10209_v15 = vcombine.low %v3868_v30, %v3872_v62  ;;  %v10216_v63 = vcombine.high %v3875_v36, %v3879_v9  ;;  %v3911_v12 = vld [vmem:[#allocation8 + $0x1e0] sm:$0xff]  ;;  %v3908_v30 = vld [vmem:[#allocation8 + $0x1c8] sm:$0xff] }
 0x2ab   :  { %3704 = vmatprep.subr.bf16.mxu1 %v10182_v18  ;;  %v10218_v18 = vcombine.high %v3876_v13, %v3880_v60  ;;  %v3912_v62 = vld [vmem:[#allocation8 + $0x1e8] sm:$0xff] }
 0x2ad   :  { %3634 = vmatpush1.bf16.msra.mxu0 %v10179_v45  ;;  %v10215_v45 = vcombine.low %v3875_v36, %v3879_v9  ;;  %v3919_v36 = vld [vmem:[#allocation8 + $0x220] sm:$0xff]  ;;  %v3916_v9 = vld [vmem:[#allocation8 + $0x208] sm:$0xff] }
 0x2ae   :  { %3705 = vmatpush1.bf16.msra.mxu1 %v10181_v27  ;;  %3635 = vmatprep.subr.bf16.mxu0 %v10188_v40  ;;  %v10217_v27 = vcombine.low %v3876_v13, %v3880_v60  ;;  %v10224_v40 = vcombine.high %v3883_v47, %v3887_v21  ;;  %v3920_v13 = vld [vmem:[#allocation8 + $0x228] sm:$0xff]  ;;  %v10247_v60 = vcombine.low %v3907_v61, %v3911_v12 }
 0x2af   :  { %3706 = vmatprep.subr.bf16.mxu1 %v10190_v3  ;;  %v10226_v3 = vcombine.high %v3884_v31, %v3888_v39 }
 0x2b1   :  { %3636 = vmatpush1.bf16.msra.mxu0 %v10187_v29  ;;  %v10223_v29 = vcombine.low %v3883_v47, %v3887_v21  ;;  %v3927_v47 = vld [vmem:[#allocation8 + $0x260] sm:$0xff]  ;;  %v3924_v21 = vld [vmem:[#allocation8 + $0x248] sm:$0xff] }
 0x2b2   :  { %3707 = vmatpush1.bf16.msra.mxu1 %v10189_v23  ;;  %4619 = vmatprep.subr.bf16.mxu0 %v10192_v44  ;;  %v10225_v23 = vcombine.low %v3884_v31, %v3888_v39  ;;  %v10232_v44 = vcombine.high %v3891_v10, %v3895_v41  ;;  %v3928_v31 = vld [vmem:[#allocation8 + $0x268] sm:$0xff]  ;;  %v10257_v39 = vcombine.low %v3916_v9, %v3920_v13 }
 0x2b3   :  { %4682 = vmatprep.subr.bf16.mxu1 %v10194_v54  ;;  %v10234_v54 = vcombine.high %v3892_v55, %v3896_v7 }
 0x2b4   :  { %3638 = vmatmul.mubr.bf16.vlgmr.msra.gmra.mrb[72].mxu0 %v12055_v0 }
 0x2b5   :  { %3709 = vmatmul.mubr.bf16.vlgmr.msra.gmra.mrb[72].mxu1 %v12055_v0  ;;  %3647 = vmatprep.mubr.bf16.mxu0 %v12117_v22 }
 0x2b6   :  { %3718 = vmatprep.mubr.bf16.mxu1 %v12117_v22  ;;  %4620 = vmatpush1.bf16.msra.mxu0 %v10191_v16  ;;  %v10231_v16 = vcombine.low %v3891_v10, %v3895_v41  ;;  %v3932_v10 = vld [vmem:[#allocation8 + $0x288] sm:$0xff] }
 0x2b7   :  { %4683 = vmatpush1.bf16.msra.mxu1 %v10193_v53  ;;  %4621 = vmatprep.subr.bf16.mxu0 %v10200_v28  ;;  %v10233_v53 = vcombine.low %v3892_v55, %v3896_v7  ;;  %v10240_v28 = vcombine.high %v3899_v11, %v3903_v50  ;;  %v3936_v41 = vld [vmem:[#allocation8 + $0x2a8] sm:$0xff]  ;;  %v10265_v7 = vcombine.low %v3924_v21, %v3928_v31 }
 0x2b8   :  { %4684 = vmatprep.subr.bf16.mxu1 %v10202_v17  ;;  %v10242_v17 = vcombine.high %v3900_v34, %v3904_v1 }
 0x2ba   :  { %4622 = vmatpush1.bf16.msra.mxu0 %v10199_v52  ;;  %v10239_v52 = vcombine.low %v3899_v11, %v3903_v50  ;;  %v3940_v11 = vld [vmem:[#allocation8 + $0x2c8] sm:$0xff] }
 0x2bb   :  { %4685 = vmatpush1.bf16.msra.mxu1 %v10201_v2  ;;  %4623 = vmatprep.subr.bf16.mxu0 %v10208_v20  ;;  %v10241_v2 = vcombine.low %v3900_v34, %v3904_v1  ;;  %v10248_v20 = vcombine.high %v3907_v61, %v3911_v12  ;;  %v3944_v50 = vld [vmem:[#allocation8 + $0x2e8] sm:$0xff]  ;;  %v10273_v1 = vcombine.low %v3932_v10, %v3936_v41 }
 0x2bc   :  { %3648 = vmatmul.mubr.bf16.gmra.mrb[76].mxu0 %v12109_v43  ;;  %4686 = vmatprep.subr.bf16.mxu1 %v10210_v5  ;;  %v3915_v5 = vld [vmem:[#allocation8 + $0x200] sm:$0xff]  ;;  %v3948_v61 = vld [vmem:[#allocation8 + $0x308] sm:$0xff] }
 0x2bd   :  { %3719 = vmatmul.mubr.bf16.gmra.mrb[76].mxu1 %v12109_v43  ;;  %3657 = vmatprep.mubr.bf16.mxu0 %v14131_v58  ;;  %v3952_v12 = vld [vmem:[#allocation8 + $0x328] sm:$0xff] }
 0x2be   :  { %3728 = vmatprep.mubr.bf16.mxu1 %v14131_v58  ;;  %4624 = vmatpush1.bf16.msra.mxu0 %v10207_v26  ;;  %v10249_v26 = vcombine.low %v3908_v30, %v3912_v62 }
 0x2bf   :  { %4687 = vmatpush1.bf16.msra.mxu1 %v10209_v15  ;;  %4625 = vmatprep.subr.bf16.mxu0 %v10216_v63  ;;  %v10256_v15 = vcombine.high %v3915_v5, %v3919_v36  ;;  %v10258_v63 = vcombine.high %v3916_v9, %v3920_v13  ;;  %v10289_v13 = vcombine.low %v3948_v61, %v3952_v12 }
 0x2c0   :  { %4688 = vmatprep.subr.bf16.mxu1 %v10218_v18  ;;  %v3923_v18 = vld [vmem:[#allocation8 + $0x240] sm:$0xff] }
 0x2c1   :  { %v10263_v55 = vcombine.low %v3923_v18, %v3927_v47 }
 0x2c2   :  { %4626 = vmatpush1.bf16.msra.mxu0 %v10215_v45  ;;  %v10264_v45 = vcombine.high %v3923_v18, %v3927_v47  ;;  %v3964_v18 = vld [vmem:[#allocation8 + $0x388] sm:$0xff] }
 0x2c3   :  { %4689 = vmatpush1.bf16.msra.mxu1 %v10217_v27  ;;  %4627 = vmatprep.subr.bf16.mxu0 %v10224_v40  ;;  %v10266_v27 = vcombine.high %v3924_v21, %v3928_v31  ;;  %v3931_v40 = vld [vmem:[#allocation8 + $0x280] sm:$0xff]  ;;  %v3968_v47 = vld [vmem:[#allocation8 + $0x3a8] sm:$0xff] }
 0x2c4   :  { %3658 = vmatmul.mubr.bf16.gmra.mrb[80].mxu0 %v14132_v37  ;;  %4690 = vmatprep.subr.bf16.mxu1 %v10226_v3  ;;  %v3935_v3 = vld [vmem:[#allocation8 + $0x2a0] sm:$0xff] }
 0x2c5   :  { %3729 = vmatmul.mubr.bf16.gmra.mrb[80].mxu1 %v14132_v37  ;;  %3667 = vmatprep.mubr.bf16.mxu0 %v12526_v46  ;;  %v10271_v34 = vcombine.low %v3931_v40, %v3935_v3 }
 0x2c6   :  { %3738 = vmatprep.mubr.bf16.mxu1 %v12526_v46  ;;  %4628 = vmatpush1.bf16.msra.mxu0 %v10223_v29  ;;  %v10250_v46 = vcombine.high %v3908_v30, %v3912_v62  ;;  %v10272_v29 = vcombine.high %v3931_v40, %v3935_v3  ;;  %v10281_v62 = vcombine.low %v3940_v11, %v3944_v50  ;;  %v3972_v40 = vld [vmem:[#allocation8 + $0x3c8] sm:$0xff] }
 0x2c7   :  { %4691 = vmatpush1.bf16.msra.mxu1 %v10225_v23  ;;  %4629 = vmatprep.subr.bf16.mxu0 %v10232_v44  ;;  %v10274_v23 = vcombine.high %v3932_v10, %v3936_v41  ;;  %v3939_v44 = vld [vmem:[#allocation8 + $0x2c0] sm:$0xff]  ;;  %v3976_v3 = vld [vmem:[#allocation8 + $0x3e8] sm:$0xff]  ;;  %v10305_v41 = vcombine.low %v3964_v18, %v3968_v47 }
 0x2c8   :  { %4692 = vmatprep.subr.bf16.mxu1 %v10234_v54  ;;  %v3943_v54 = vld [vmem:[#allocation8 + $0x2e0] sm:$0xff] }
 0x2c9   :  { %v10279_v30 = vcombine.low %v3939_v44, %v3943_v54 }
 0x2ca   :  { %4630 = vmatpush1.bf16.msra.mxu0 %v10231_v16  ;;  %v10280_v16 = vcombine.high %v3939_v44, %v3943_v54  ;;  %v3854_v44 = vld [vmem:[#allocation8 + $0x18] sm:$0xff] }
 0x2cb   :  { %4693 = vmatpush1.bf16.msra.mxu1 %v10233_v53  ;;  %4631 = vmatprep.subr.bf16.mxu0 %v10240_v28  ;;  %v10282_v53 = vcombine.high %v3940_v11, %v3944_v50  ;;  %v3947_v28 = vld [vmem:[#allocation8 + $0x300] sm:$0xff]  ;;  %v3858_v54 = vld [vmem:[#allocation8 + $0x38] sm:$0xff]  ;;  %v10313_v50 = vcombine.low %v3972_v40, %v3976_v3 }
 0x2cc   :  { %3668 = vmatmul.mubr.bf16.gmra.mrb[84].mxu0 %v12534_v57  ;;  %4694 = vmatprep.subr.bf16.mxu1 %v10242_v17  ;;  %v3951_v17 = vld [vmem:[#allocation8 + $0x320] sm:$0xff] }
 0x2cd   :  { %3739 = vmatmul.mubr.bf16.gmra.mrb[84].mxu1 %v12534_v57  ;;  %4651 = vmatprep.mubr.bf16.mxu0 %v12065_v32  ;;  %v10255_v57 = vcombine.low %v3915_v5, %v3919_v36  ;;  %v3956_v5 = vld [vmem:[#allocation8 + $0x348] sm:$0xff]  ;;  %v10287_v9 = vcombine.low %v3947_v28, %v3951_v17 }
 0x2ce   :  { %4632 = vmatpush1.bf16.msra.mxu0 %v10239_v52  ;;  %4714 = vmatprep.mubr.bf16.mxu1 %v12065_v32  ;;  %v10288_v52 = vcombine.high %v3947_v28, %v3951_v17  ;;  %v3960_v36 = vld [vmem:[#allocation8 + $0x368] sm:$0xff]  ;;  %v3862_v28 = vld [vmem:[#allocation8 + $0x58] sm:$0xff] }
 0x2cf   :  { %4695 = vmatpush1.bf16.msra.mxu1 %v10241_v2  ;;  %4633 = vmatprep.subr.bf16.mxu0 %v10248_v20  ;;  %v10290_v2 = vcombine.high %v3948_v61, %v3952_v12  ;;  %v3955_v20 = vld [vmem:[#allocation8 + $0x340] sm:$0xff]  ;;  %v10297_v31 = vcombine.low %v3956_v5, %v3960_v36  ;;  %v3866_v17 = vld [vmem:[#allocation8 + $0x78] sm:$0xff]  ;;  %v10197_v12 = vcombine.low %v3854_v44, %v3858_v54 }
 0x2d0   :  { %4696 = vmatprep.subr.bf16.mxu1 %v10250_v46  ;;  %v3959_v46 = vld [vmem:[#allocation8 + $0x360] sm:$0xff] }
 0x2d1   :  { %v10295_v21 = vcombine.low %v3955_v20, %v3959_v46 }
 0x2d2   :  { %4634 = vmatpush1.bf16.msra.mxu0 %v10247_v60  ;;  %v10296_v60 = vcombine.high %v3955_v20, %v3959_v46  ;;  %v3870_v20 = vld [vmem:[#allocation8 + $0x98] sm:$0xff] }
 0x2d3   :  { %4697 = vmatpush1.bf16.msra.mxu1 %v10249_v26  ;;  %4635 = vmatprep.subr.bf16.mxu0 %v10256_v15  ;;  %v10298_v26 = vcombine.high %v3956_v5, %v3960_v36  ;;  %v3963_v15 = vld [vmem:[#allocation8 + $0x380] sm:$0xff]  ;;  %v3874_v46 = vld [vmem:[#allocation8 + $0xb8] sm:$0xff]  ;;  %v10205_v36 = vcombine.low %v3862_v28, %v3866_v17 }
 0x2d4   :  { %4698 = vmatprep.subr.bf16.mxu1 %v10258_v63  ;;  %v3967_v63 = vld [vmem:[#allocation8 + $0x3a0] sm:$0xff] }
 0x2d5   :  { %v10303_v10 = vcombine.low %v3963_v15, %v3967_v63 }
 0x2d6   :  { %4636 = vmatpush1.bf16.msra.mxu0 %v10255_v57  ;;  %v10304_v57 = vcombine.high %v3963_v15, %v3967_v63  ;;  %v3878_v15 = vld [vmem:[#allocation8 + $0xd8] sm:$0xff] }
 0x2d7   :  { %4699 = vmatpush1.bf16.msra.mxu1 %v10257_v39  ;;  %4637 = vmatprep.subr.bf16.mxu0 %v10264_v45  ;;  %v10306_v39 = vcombine.high %v3964_v18, %v3968_v47  ;;  %v3971_v45 = vld [vmem:[#allocation8 + $0x3c0] sm:$0xff]  ;;  %v3882_v63 = vld [vmem:[#allocation8 + $0xf8] sm:$0xff]  ;;  %v10213_v47 = vcombine.low %v3870_v20, %v3874_v46 }
 0x2d8   :  { %4700 = vmatprep.subr.bf16.mxu1 %v10266_v27  ;;  %v3975_v27 = vld [vmem:[#allocation8 + $0x3e0] sm:$0xff] }
 0x2d9   :  { %v10311_v11 = vcombine.low %v3971_v45, %v3975_v27 }
 0x2da   :  { %4638 = vmatpush1.bf16.msra.mxu0 %v10263_v55  ;;  %v10312_v55 = vcombine.high %v3971_v45, %v3975_v27  ;;  %v3886_v45 = vld [vmem:[#allocation8 + $0x118] sm:$0xff] }
 0x2db   :  { %4701 = vmatpush1.bf16.msra.mxu1 %v10265_v7  ;;  %4639 = vmatprep.subr.bf16.mxu0 %v10272_v29  ;;  %v10314_v7 = vcombine.high %v3972_v40, %v3976_v3  ;;  %v3853_v29 = vld [vmem:[#allocation8 + $0x10] sm:$0xff]  ;;  %v3890_v27 = vld [vmem:[#allocation8 + $0x138] sm:$0xff]  ;;  %v10221_v3 = vcombine.low %v3878_v15, %v3882_v63 }
 0x2dc   :  { %4702 = vmatprep.subr.bf16.mxu1 %v10274_v23  ;;  %v3857_v23 = vld [vmem:[#allocation8 + $0x30] sm:$0xff] }
 0x2dd   :  { %v10195_v61 = vcombine.low %v3853_v29, %v3857_v23 }
 0x2de   :  { %4640 = vmatpush1.bf16.msra.mxu0 %v10271_v34  ;;  %v10196_v34 = vcombine.high %v3853_v29, %v3857_v23  ;;  %v3894_v29 = vld [vmem:[#allocation8 + $0x158] sm:$0xff] }
 0x2df   :  { %4703 = vmatpush1.bf16.msra.mxu1 %v10273_v1  ;;  %4641 = vmatprep.subr.bf16.mxu0 %v10280_v16  ;;  %v10198_v1 = vcombine.high %v3854_v44, %v3858_v54  ;;  %v3861_v16 = vld [vmem:[#allocation8 + $0x50] sm:$0xff]  ;;  %v3898_v23 = vld [vmem:[#allocation8 + $0x178] sm:$0xff]  ;;  %v10229_v54 = vcombine.low %v3886_v45, %v3890_v27 }
 0x2e0   :  { %4704 = vmatprep.subr.bf16.mxu1 %v10282_v53  ;;  %v3865_v53 = vld [vmem:[#allocation8 + $0x70] sm:$0xff] }
 0x2e1   :  { %v10203_v5 = vcombine.low %v3861_v16, %v3865_v53 }
 0x2e2   :  { %4642 = vmatpush1.bf16.msra.mxu0 %v10279_v30  ;;  %v10204_v30 = vcombine.high %v3861_v16, %v3865_v53  ;;  %v3902_v16 = vld [vmem:[#allocation8 + $0x198] sm:$0xff] }
 0x2e3   :  { %4705 = vmatpush1.bf16.msra.mxu1 %v10281_v62  ;;  %4643 = vmatprep.subr.bf16.mxu0 %v10288_v52  ;;  %v10206_v62 = vcombine.high %v3862_v28, %v3866_v17  ;;  %v3869_v52 = vld [vmem:[#allocation8 + $0x90] sm:$0xff]  ;;  %v3906_v53 = vld [vmem:[#allocation8 + $0x1b8] sm:$0xff]  ;;  %v10237_v17 = vcombine.low %v3894_v29, %v3898_v23 }
 0x2e4   :  { %4706 = vmatprep.subr.bf16.mxu1 %v10290_v2  ;;  %v3873_v2 = vld [vmem:[#allocation8 + $0xb0] sm:$0xff] }
 0x2e5   :  { %v10211_v18 = vcombine.low %v3869_v52, %v3873_v2 }
 0x2e6   :  { %4644 = vmatpush1.bf16.msra.mxu0 %v10287_v9  ;;  %v10212_v9 = vcombine.high %v3869_v52, %v3873_v2  ;;  %v3910_v52 = vld [vmem:[#allocation8 + $0x1d8] sm:$0xff] }
 0x2e7   :  { %4707 = vmatpush1.bf16.msra.mxu1 %v10289_v13  ;;  %4645 = vmatprep.subr.bf16.mxu0 %v10296_v60  ;;  %v10214_v13 = vcombine.high %v3870_v20, %v3874_v46  ;;  %v3877_v60 = vld [vmem:[#allocation8 + $0xd0] sm:$0xff]  ;;  %v3914_v2 = vld [vmem:[#allocation8 + $0x1f8] sm:$0xff]  ;;  %v10245_v46 = vcombine.low %v3902_v16, %v3906_v53 }
 0x2e8   :  { %4708 = vmatprep.subr.bf16.mxu1 %v10298_v26  ;;  %v3881_v26 = vld [vmem:[#allocation8 + $0xf0] sm:$0xff] }
 0x2e9   :  { %v10219_v40 = vcombine.low %v3877_v60, %v3881_v26 }
 0x2ea   :  { %4646 = vmatpush1.bf16.msra.mxu0 %v10295_v21  ;;  %v10220_v21 = vcombine.high %v3877_v60, %v3881_v26  ;;  %v3922_v60 = vld [vmem:[#allocation8 + $0x238] sm:$0xff] }
 0x2eb   :  { %4709 = vmatpush1.bf16.msra.mxu1 %v10297_v31  ;;  %4647 = vmatprep.subr.bf16.mxu0 %v10304_v57  ;;  %v10222_v31 = vcombine.high %v3878_v15, %v3882_v63  ;;  %v3885_v57 = vld [vmem:[#allocation8 + $0x110] sm:$0xff]  ;;  %v10253_v15 = vcombine.low %v3910_v52, %v3914_v2 }
 0x2ec   :  { %4710 = vmatprep.subr.bf16.mxu1 %v10306_v39  ;;  %v3889_v39 = vld [vmem:[#allocation8 + $0x130] sm:$0xff] }
 0x2ed   :  { %v10227_v44 = vcombine.low %v3885_v57, %v3889_v39 }
 0x2ee   :  { %4648 = vmatpush1.bf16.msra.mxu0 %v10303_v10  ;;  %v10228_v10 = vcombine.high %v3885_v57, %v3889_v39  ;;  %v3930_v57 = vld [vmem:[#allocation8 + $0x278] sm:$0xff] }
 0x2ef   :  { %4711 = vmatpush1.bf16.msra.mxu1 %v10305_v41  ;;  %4649 = vmatprep.subr.bf16.mxu0 %v10312_v55  ;;  %v10230_v41 = vcombine.high %v3886_v45, %v3890_v27  ;;  %v3893_v55 = vld [vmem:[#allocation8 + $0x150] sm:$0xff] }
 0x2f0   :  { %4712 = vmatprep.subr.bf16.mxu1 %v10314_v7  ;;  %v3897_v7 = vld [vmem:[#allocation8 + $0x170] sm:$0xff] }
 0x2f1   :  { %v10235_v28 = vcombine.low %v3893_v55, %v3897_v7 }
 0x2f2   :  { %4650 = vmatpush1.bf16.msra.mxu0 %v10311_v11  ;;  %v10236_v11 = vcombine.high %v3893_v55, %v3897_v7  ;;  %v3938_v55 = vld [vmem:[#allocation8 + $0x2b8] sm:$0xff] }
 0x2f3   :  { %4713 = vmatpush1.bf16.msra.mxu1 %v10313_v50  ;;  %4745 = vmatprep.subr.bf16.mxu0 %v10196_v34  ;;  %v10238_v50 = vcombine.high %v3894_v29, %v3898_v23  ;;  %v3901_v34 = vld [vmem:[#allocation8 + $0x190] sm:$0xff] }
 0x2f4   :  { %4808 = vmatprep.subr.bf16.mxu1 %v10198_v1  ;;  %v3905_v1 = vld [vmem:[#allocation8 + $0x1b0] sm:$0xff] }
 0x2f5   :  { %4652 = vmatmul.mubr.bf16.vlgmr.msra.gmra.mrb[88].mxu0 %v12055_v0  ;;  %v10243_v20 = vcombine.low %v3901_v34, %v3905_v1 }
 0x2f6   :  { %4715 = vmatmul.mubr.bf16.vlgmr.msra.gmra.mrb[88].mxu1 %v12055_v0  ;;  %4661 = vmatprep.mubr.bf16.mxu0 %v12117_v22 }
 0x2f7   :  { %4724 = vmatprep.mubr.bf16.mxu1 %v12117_v22  ;;  %4746 = vmatpush1.bf16.msra.mxu0 %v10195_v61  ;;  %v10244_v61 = vcombine.high %v3901_v34, %v3905_v1  ;;  %v3946_v34 = vld [vmem:[#allocation8 + $0x2f8] sm:$0xff] }
 0x2f8   :  { %4809 = vmatpush1.bf16.msra.mxu1 %v10197_v12  ;;  %4747 = vmatprep.subr.bf16.mxu0 %v10204_v30  ;;  %v10246_v12 = vcombine.high %v3902_v16, %v3906_v53  ;;  %v3909_v30 = vld [vmem:[#allocation8 + $0x1d0] sm:$0xff] }
 0x2f9   :  { %4810 = vmatprep.subr.bf16.mxu1 %v10206_v62  ;;  %v3913_v62 = vld [vmem:[#allocation8 + $0x1f0] sm:$0xff] }
 0x2fa   :  { %v10251_v26 = vcombine.low %v3909_v30, %v3913_v62 }
 0x2fb   :  { %4748 = vmatpush1.bf16.msra.mxu0 %v10203_v5  ;;  %v10252_v5 = vcombine.high %v3909_v30, %v3913_v62  ;;  %v3954_v30 = vld [vmem:[#allocation8 + $0x338] sm:$0xff] }
 0x2fc   :  { %4811 = vmatpush1.bf16.msra.mxu1 %v10205_v36  ;;  %4749 = vmatprep.subr.bf16.mxu0 %v10212_v9  ;;  %v10254_v36 = vcombine.high %v3910_v52, %v3914_v2  ;;  %v3921_v9 = vld [vmem:[#allocation8 + $0x230] sm:$0xff] }
 0x2fd   :  { %4662 = vmatmul.mubr.bf16.gmra.mrb[92].mxu0 %v12109_v43  ;;  %4812 = vmatprep.subr.bf16.mxu1 %v10214_v13  ;;  %v3918_v13 = vld [vmem:[#allocation8 + $0x218] sm:$0xff] }
 0x2fe   :  { %4725 = vmatmul.mubr.bf16.gmra.mrb[92].mxu1 %v12109_v43  ;;  %4671 = vmatprep.mubr.bf16.mxu0 %v14131_v58  ;;  %v10261_v45 = vcombine.low %v3918_v13, %v3922_v60 }
 0x2ff   :  { %4734 = vmatprep.mubr.bf16.mxu1 %v14131_v58  ;;  %4750 = vmatpush1.bf16.msra.mxu0 %v10211_v18  ;;  %v10262_v18 = vcombine.high %v3918_v13, %v3922_v60 }
 0x300   :  { %4813 = vmatpush1.bf16.msra.mxu1 %v10213_v47  ;;  %4751 = vmatprep.subr.bf16.mxu0 %v10220_v21  ;;  %v3925_v47 = vld [vmem:[#allocation8 + $0x250] sm:$0xff] }
 0x301   :  { %4814 = vmatprep.subr.bf16.mxu1 %v10222_v31  ;;  %v3929_v21 = vld [vmem:[#allocation8 + $0x270] sm:$0xff]  ;;  %v3926_v31 = vld [vmem:[#allocation8 + $0x258] sm:$0xff] }
 0x302   :  { %v10268_v27 = vcombine.high %v3925_v47, %v3929_v21  ;;  %v10267_v7 = vcombine.low %v3925_v47, %v3929_v21  ;;  %v10269_v29 = vcombine.low %v3926_v31, %v3930_v57  ;;  %v3970_v47 = vld [vmem:[#allocation8 + $0x3b8] sm:$0xff] }
 0x303   :  { %4752 = vmatpush1.bf16.msra.mxu0 %v10219_v40  ;;  %v10270_v40 = vcombine.high %v3926_v31, %v3930_v57 }
 0x304   :  { %4815 = vmatpush1.bf16.msra.mxu1 %v10221_v3  ;;  %4753 = vmatprep.subr.bf16.mxu0 %v10228_v10  ;;  %v3933_v3 = vld [vmem:[#allocation8 + $0x290] sm:$0xff] }
 0x305   :  { %4672 = vmatmul.mubr.bf16.gmra.mrb[96].mxu0 %v14132_v37  ;;  %4816 = vmatprep.subr.bf16.mxu1 %v10230_v41  ;;  %v3937_v10 = vld [vmem:[#allocation8 + $0x2b0] sm:$0xff]  ;;  %v3934_v41 = vld [vmem:[#allocation8 + $0x298] sm:$0xff] }
 0x306   :  { %4735 = vmatmul.mubr.bf16.gmra.mrb[96].mxu1 %v14132_v37  ;;  %4777 = vmatprep.mubr.bf16.mxu0 %v12065_v32  ;;  %v10276_v23 = vcombine.high %v3933_v3, %v3937_v10  ;;  %v10275_v1 = vcombine.low %v3933_v3, %v3937_v10  ;;  %v10277_v16 = vcombine.low %v3934_v41, %v3938_v55  ;;  %v3978_v3 = vld [vmem:[#allocation8 + $0x3f8] sm:$0xff] }
 0x307   :  { %4754 = vmatpush1.bf16.msra.mxu0 %v10227_v44  ;;  %4840 = vmatprep.mubr.bf16.mxu1 %v12065_v32  ;;  %v3917_v32 = vld [vmem:[#allocation8 + $0x210] sm:$0xff]  ;;  %v10278_v44 = vcombine.high %v3934_v41, %v3938_v55 }
 0x308   :  { %4817 = vmatpush1.bf16.msra.mxu1 %v10229_v54  ;;  %4755 = vmatprep.subr.bf16.mxu0 %v10236_v11  ;;  %v10260_v63 = vcombine.high %v3917_v32, %v3921_v9  ;;  %v10259_v39 = vcombine.low %v3917_v32, %v3921_v9  ;;  %v3941_v54 = vld [vmem:[#allocation8 + $0x2d0] sm:$0xff]  ;;  %v3962_v32 = vld [vmem:[#allocation8 + $0x378] sm:$0xff] }
 0x309   :  { %4818 = vmatprep.subr.bf16.mxu1 %v10238_v50  ;;  %v3945_v11 = vld [vmem:[#allocation8 + $0x2f0] sm:$0xff]  ;;  %v3942_v50 = vld [vmem:[#allocation8 + $0x2d8] sm:$0xff] }
 0x30a   :  { %v10284_v53 = vcombine.high %v3941_v54, %v3945_v11  ;;  %v10283_v62 = vcombine.low %v3941_v54, %v3945_v11  ;;  %v10285_v52 = vcombine.low %v3942_v50, %v3946_v34  ;;  %v4925_v54 = vld [vmem:[#allocation8 + $0xc28] sm:$0xff] }
 0x30b   :  { %4756 = vmatpush1.bf16.msra.mxu0 %v10235_v28  ;;  %v10286_v28 = vcombine.high %v3942_v50, %v3946_v34 }
 0x30c   :  { %4819 = vmatpush1.bf16.msra.mxu1 %v10237_v17  ;;  %4757 = vmatprep.subr.bf16.mxu0 %v10244_v61  ;;  %v3949_v17 = vld [vmem:[#allocation8 + $0x310] sm:$0xff] }
 0x30d   :  { %4820 = vmatprep.subr.bf16.mxu1 %v10246_v12  ;;  %v3953_v61 = vld [vmem:[#allocation8 + $0x330] sm:$0xff]  ;;  %v3950_v12 = vld [vmem:[#allocation8 + $0x318] sm:$0xff] }
 0x30e   :  { %v10292_v2 = vcombine.high %v3949_v17, %v3953_v61  ;;  %v10291_v9 = vcombine.low %v3949_v17, %v3953_v61  ;;  %v10293_v13 = vcombine.low %v3950_v12, %v3954_v30  ;;  %v4933_v17 = vld [vmem:[#allocation8 + $0xc68] sm:$0xff] }
 0x30f   :  { %4758 = vmatpush1.bf16.msra.mxu0 %v10243_v20  ;;  %v10294_v20 = vcombine.high %v3950_v12, %v3954_v30 }
 0x310   :  { %4821 = vmatpush1.bf16.msra.mxu1 %v10245_v46  ;;  %4759 = vmatprep.subr.bf16.mxu0 %v10252_v5  ;;  %v3957_v46 = vld [vmem:[#allocation8 + $0x350] sm:$0xff] }
 0x311   :  { %4822 = vmatprep.subr.bf16.mxu1 %v10254_v36  ;;  %v3961_v5 = vld [vmem:[#allocation8 + $0x370] sm:$0xff]  ;;  %v3958_v36 = vld [vmem:[#allocation8 + $0x358] sm:$0xff] }
 0x312   :  { %v10300_v60 = vcombine.high %v3957_v46, %v3961_v5  ;;  %v10299_v21 = vcombine.low %v3957_v46, %v3961_v5  ;;  %v10301_v31 = vcombine.low %v3958_v36, %v3962_v32  ;;  %v4941_v46 = vld [vmem:[#allocation8 + $0xca8] sm:$0xff] }
 0x313   :  { %4760 = vmatpush1.bf16.msra.mxu0 %v10251_v26  ;;  %v10302_v26 = vcombine.high %v3958_v36, %v3962_v32 }
 0x314   :  { %4823 = vmatpush1.bf16.msra.mxu1 %v10253_v15  ;;  %4761 = vmatprep.subr.bf16.mxu0 %v10260_v63  ;;  %v3965_v15 = vld [vmem:[#allocation8 + $0x390] sm:$0xff] }
 0x315   :  { %4824 = vmatprep.subr.bf16.mxu1 %v10262_v18  ;;  %v3969_v63 = vld [vmem:[#allocation8 + $0x3b0] sm:$0xff]  ;;  %v3966_v18 = vld [vmem:[#allocation8 + $0x398] sm:$0xff] }
 0x316   :  { %v10308_v57 = vcombine.high %v3965_v15, %v3969_v63  ;;  %v10307_v10 = vcombine.low %v3965_v15, %v3969_v63  ;;  %v10309_v41 = vcombine.low %v3966_v18, %v3970_v47  ;;  %v4949_v15 = vld [vmem:[#allocation8 + $0xce8] sm:$0xff] }
 0x317   :  { %4762 = vmatpush1.bf16.msra.mxu0 %v10259_v39  ;;  %v10310_v39 = vcombine.high %v3966_v18, %v3970_v47  ;;  %v4952_v47 = vld [vmem:[#allocation8 + $0xd00] sm:$0xff] }
 0x318   :  { %4825 = vmatpush1.bf16.msra.mxu1 %v10261_v45  ;;  %4763 = vmatprep.subr.bf16.mxu0 %v10268_v27  ;;  %v3973_v45 = vld [vmem:[#allocation8 + $0x3d0] sm:$0xff] }
 0x319   :  { %4826 = vmatprep.subr.bf16.mxu1 %v10270_v40  ;;  %v3977_v27 = vld [vmem:[#allocation8 + $0x3f0] sm:$0xff]  ;;  %v3974_v40 = vld [vmem:[#allocation8 + $0x3d8] sm:$0xff] }
 0x31a   :  { %v10316_v55 = vcombine.high %v3973_v45, %v3977_v27  ;;  %v10315_v11 = vcombine.low %v3973_v45, %v3977_v27  ;;  %v10317_v50 = vcombine.low %v3974_v40, %v3978_v3 }
 0x31b   :  { %4764 = vmatpush1.bf16.msra.mxu0 %v10267_v7  ;;  %v10318_v7 = vcombine.high %v3974_v40, %v3978_v3  ;;  %v4960_v3 = vld [vmem:[#allocation8 + $0xd40] sm:$0xff] }
 0x31c   :  { %4827 = vmatpush1.bf16.msra.mxu1 %v10269_v29  ;;  %4765 = vmatprep.subr.bf16.mxu0 %v10276_v23  ;;  %v4920_v29 = vld [vmem:[#allocation8 + $0xc00] sm:$0xff] }
 0x31d   :  { %4828 = vmatprep.subr.bf16.mxu1 %v10278_v44  ;;  %v4924_v23 = vld [vmem:[#allocation8 + $0xc20] sm:$0xff]  ;;  %v4921_v44 = vld [vmem:[#allocation8 + $0xc08] sm:$0xff] }
 0x31e   :  { %v10320_v34 = vcombine.high %v4920_v29, %v4924_v23  ;;  %v10319_v61 = vcombine.low %v4920_v29, %v4924_v23  ;;  %v10321_v12 = vcombine.low %v4921_v44, %v4925_v54 }
 0x31f   :  { %4766 = vmatpush1.bf16.msra.mxu0 %v10275_v1  ;;  %v10322_v1 = vcombine.high %v4921_v44, %v4925_v54  ;;  %v4968_v44 = vld [vmem:[#allocation8 + $0xd80] sm:$0xff] }
 0x320   :  { %4829 = vmatpush1.bf16.msra.mxu1 %v10277_v16  ;;  %4767 = vmatprep.subr.bf16.mxu0 %v10284_v53  ;;  %v4928_v16 = vld [vmem:[#allocation8 + $0xc40] sm:$0xff] }
 0x321   :  { %4830 = vmatprep.subr.bf16.mxu1 %v10286_v28  ;;  %v4932_v53 = vld [vmem:[#allocation8 + $0xc60] sm:$0xff]  ;;  %v4929_v28 = vld [vmem:[#allocation8 + $0xc48] sm:$0xff] }
 0x322   :  { %v10328_v30 = vcombine.high %v4928_v16, %v4932_v53  ;;  %v10327_v5 = vcombine.low %v4928_v16, %v4932_v53  ;;  %v10329_v36 = vcombine.low %v4929_v28, %v4933_v17  ;;  %v4972_v54 = vld [vmem:[#allocation8 + $0xda0] sm:$0xff] }
 0x323   :  { %4768 = vmatpush1.bf16.msra.mxu0 %v10283_v62  ;;  %v10330_v62 = vcombine.high %v4929_v28, %v4933_v17 }
 0x324   :  { %4831 = vmatpush1.bf16.msra.mxu1 %v10285_v52  ;;  %4769 = vmatprep.subr.bf16.mxu0 %v10292_v2  ;;  %v4936_v52 = vld [vmem:[#allocation8 + $0xc80] sm:$0xff] }
 0x325   :  { %4832 = vmatprep.subr.bf16.mxu1 %v10294_v20  ;;  %v4940_v2 = vld [vmem:[#allocation8 + $0xca0] sm:$0xff]  ;;  %v4937_v20 = vld [vmem:[#allocation8 + $0xc88] sm:$0xff] }
 0x326   :  { %v10336_v32 = vcombine.high %v4936_v52, %v4940_v2  ;;  %v10337_v63 = vcombine.low %v4937_v20, %v4941_v46 }
 0x327   :  { %4770 = vmatpush1.bf16.msra.mxu0 %v10291_v9  ;;  %v10338_v9 = vcombine.high %v4937_v20, %v4941_v46  ;;  %v4977_v20 = vld [vmem:[#allocation8 + $0xdc8] sm:$0xff] }
 0x328   :  { %4833 = vmatpush1.bf16.msra.mxu1 %v10293_v13  ;;  %4771 = vmatprep.subr.bf16.mxu0 %v10300_v60  ;;  %v4944_v13 = vld [vmem:[#allocation8 + $0xcc0] sm:$0xff]  ;;  %v4981_v46 = vld [vmem:[#allocation8 + $0xde8] sm:$0xff] }
 0x329   :  { %4834 = vmatprep.subr.bf16.mxu1 %v10302_v26  ;;  %v4948_v60 = vld [vmem:[#allocation8 + $0xce0] sm:$0xff]  ;;  %v4945_v26 = vld [vmem:[#allocation8 + $0xcc8] sm:$0xff] }
 0x32a   :  { %v10344_v18 = vcombine.high %v4944_v13, %v4948_v60  ;;  %v10345_v45 = vcombine.low %v4945_v26, %v4949_v15 }
 0x32b   :  { %4772 = vmatpush1.bf16.msra.mxu0 %v10299_v21  ;;  %v4956_v21 = vld [vmem:[#allocation8 + $0xd20] sm:$0xff] }
 0x32c   :  { %4835 = vmatpush1.bf16.msra.mxu1 %v10301_v31  ;;  %4773 = vmatprep.subr.bf16.mxu0 %v10308_v57  ;;  %v4953_v31 = vld [vmem:[#allocation8 + $0xd08] sm:$0xff]  ;;  %v10352_v27 = vcombine.high %v4952_v47, %v4956_v21 }
 0x32d   :  { %4836 = vmatprep.subr.bf16.mxu1 %v10310_v39  ;;  %v4957_v57 = vld [vmem:[#allocation8 + $0xd28] sm:$0xff]  ;;  %v10343_v39 = vcombine.low %v4944_v13, %v4948_v60  ;;  %v10378_v13 = vcombine.high %v4977_v20, %v4981_v46  ;;  %v4984_v60 = vld [vmem:[#allocation8 + $0xe00] sm:$0xff] }
 0x32e   :  { %v10354_v40 = vcombine.high %v4953_v31, %v4957_v57 }
 0x32f   :  { %4774 = vmatpush1.bf16.msra.mxu0 %v10307_v10  ;;  %v4964_v10 = vld [vmem:[#allocation8 + $0xd60] sm:$0xff] }
 0x330   :  { %4837 = vmatpush1.bf16.msra.mxu1 %v10309_v41  ;;  %4775 = vmatprep.subr.bf16.mxu0 %v10316_v55  ;;  %v4961_v41 = vld [vmem:[#allocation8 + $0xd48] sm:$0xff]  ;;  %v10360_v29 = vcombine.high %v4960_v3, %v4964_v10  ;;  %v10359_v53 = vcombine.low %v4960_v3, %v4964_v10  ;;  %v4992_v3 = vld [vmem:[#allocation8 + $0xe40] sm:$0xff] }
 0x331   :  { %4838 = vmatprep.subr.bf16.mxu1 %v10318_v7  ;;  %v4965_v55 = vld [vmem:[#allocation8 + $0xd68] sm:$0xff]  ;;  %v10353_v7 = vcombine.low %v4953_v31, %v4957_v57  ;;  %v10377_v31 = vcombine.low %v4977_v20, %v4981_v46  ;;  %v4996_v10 = vld [vmem:[#allocation8 + $0xe60] sm:$0xff] }
 0x332   :  { %v10362_v23 = vcombine.high %v4961_v41, %v4965_v55  ;;  %v10361_v17 = vcombine.low %v4961_v41, %v4965_v55  ;;  %v4993_v41 = vld [vmem:[#allocation8 + $0xe48] sm:$0xff] }
 0x333   :  { %4776 = vmatpush1.bf16.msra.mxu0 %v10315_v11  ;;  %v4997_v55 = vld [vmem:[#allocation8 + $0xe68] sm:$0xff] }
 0x334   :  { %4839 = vmatpush1.bf16.msra.mxu1 %v10317_v50  ;;  %5688 = vmatprep.subr.bf16.mxu0 %v10320_v34  ;;  %v4969_v34 = vld [vmem:[#allocation8 + $0xd88] sm:$0xff]  ;;  %v10393_v20 = vcombine.low %v4993_v41, %v4997_v55 }
 0x335   :  { %5751 = vmatprep.subr.bf16.mxu1 %v10322_v1  ;;  %v4973_v1 = vld [vmem:[#allocation8 + $0xda8] sm:$0xff] }
 0x336   :  { %4778 = vmatmul.mubr.bf16.vlgmr.msra.gmra.mrb[100].mxu0 %v12055_v0 }
 0x337   :  { %4841 = vmatmul.mubr.bf16.vlgmr.msra.gmra.mrb[100].mxu1 %v12055_v0  ;;  %4787 = vmatprep.mubr.bf16.mxu0 %v12117_v22  ;;  %v10335_v0 = vcombine.low %v4936_v52, %v4940_v2  ;;  %v4976_v52 = vld [vmem:[#allocation8 + $0xdc0] sm:$0xff] }
 0x338   :  { %4850 = vmatprep.mubr.bf16.mxu1 %v12117_v22  ;;  %5689 = vmatpush1.bf16.msra.mxu0 %v10319_v61  ;;  %v10346_v22 = vcombine.high %v4945_v26, %v4949_v15  ;;  %v4980_v2 = vld [vmem:[#allocation8 + $0xde0] sm:$0xff] }
 0x339   :  { %5752 = vmatpush1.bf16.msra.mxu1 %v10321_v12  ;;  %5690 = vmatprep.subr.bf16.mxu0 %v10328_v30  ;;  %v10368_v12 = vcombine.high %v4968_v44, %v4972_v54  ;;  %v4988_v26 = vld [vmem:[#allocation8 + $0xe20] sm:$0xff] }
 0x33a   :  { %5753 = vmatprep.subr.bf16.mxu1 %v10330_v62  ;;  %v10370_v62 = vcombine.high %v4969_v34, %v4973_v1 }
 0x33c   :  { %5691 = vmatpush1.bf16.msra.mxu0 %v10327_v5  ;;  %v10367_v5 = vcombine.low %v4968_v44, %v4972_v54  ;;  %v10394_v44 = vcombine.high %v4993_v41, %v4997_v55  ;;  %v5000_v54 = vld [vmem:[#allocation8 + $0xe80] sm:$0xff] }
 0x33d   :  { %5754 = vmatpush1.bf16.msra.mxu1 %v10329_v36  ;;  %5692 = vmatprep.subr.bf16.mxu0 %v10336_v32  ;;  %v10369_v36 = vcombine.low %v4969_v34, %v4973_v1  ;;  %v10376_v32 = vcombine.high %v4976_v52, %v4980_v2  ;;  %v5004_v34 = vld [vmem:[#allocation8 + $0xea0] sm:$0xff] }
 0x33e   :  { %4788 = vmatmul.mubr.bf16.gmra.mrb[104].mxu0 %v12109_v43  ;;  %5755 = vmatprep.subr.bf16.mxu1 %v10338_v9  ;;  %v5020_v41 = vld [vmem:[#allocation8 + $0xf20] sm:$0xff] }
 0x33f   :  { %4851 = vmatmul.mubr.bf16.gmra.mrb[104].mxu1 %v12109_v43  ;;  %4797 = vmatprep.mubr.bf16.mxu0 %v14131_v58  ;;  %v10351_v43 = vcombine.low %v4952_v47, %v4956_v21  ;;  %v10375_v47 = vcombine.low %v4976_v52, %v4980_v2  ;;  %v10391_v52 = vcombine.low %v4992_v3, %v4996_v10 }
 0x340   :  { %4860 = vmatprep.mubr.bf16.mxu1 %v14131_v58  ;;  %5693 = vmatpush1.bf16.msra.mxu0 %v10335_v0 }
 0x341   :  { %5756 = vmatpush1.bf16.msra.mxu1 %v10337_v63  ;;  %5694 = vmatprep.subr.bf16.mxu0 %v10344_v18  ;;  %v4985_v63 = vld [vmem:[#allocation8 + $0xe08] sm:$0xff] }
 0x342   :  { %5757 = vmatprep.subr.bf16.mxu1 %v10346_v22  ;;  %v4989_v18 = vld [vmem:[#allocation8 + $0xe28] sm:$0xff] }
 0x344   :  { %5695 = vmatpush1.bf16.msra.mxu0 %v10343_v39 }
 0x345   :  { %5758 = vmatpush1.bf16.msra.mxu1 %v10345_v45  ;;  %5696 = vmatprep.subr.bf16.mxu0 %v10352_v27  ;;  %v10384_v45 = vcombine.high %v4984_v60, %v4988_v26 }
 0x346   :  { %4798 = vmatmul.mubr.bf16.gmra.mrb[108].mxu0 %v14132_v37  ;;  %5759 = vmatprep.subr.bf16.mxu1 %v10354_v40  ;;  %v12577_v58 = vpop.f32.mrb[56].mxu0  ;;  %v10386_v40 = vcombine.high %v4985_v63, %v4989_v18 }
 0x347   :  { %14133 = vst [vmem:[#allocation32_spill] sm:$0xff] %v12577_v58  ;;  %4861 = vmatmul.mubr.bf16.gmra.mrb[108].mxu1 %v14132_v37  ;;  %5720 = vmatprep.mubr.bf16.mxu0 %v12271_v35  ;;  %v12581_v11 = vpop.f32.mrb[56].mxu1  ;;  %v12583_v50 = vpop.f32.mrb[57].mxu0  ;;  %v5029_v58 = vld [vmem:[#allocation8 + $0xf68] sm:$0xff] }
 0x348   :  { %14134 = vst [vmem:[#allocation33_spill] sm:$0xff] %v12581_v11  ;;  %14135 = vst [vmem:[#allocation34_spill] sm:$0xff] %v12583_v50  ;;  %5697 = vmatpush1.bf16.msra.mxu0 %v10351_v43  ;;  %5783 = vmatprep.mubr.bf16.mxu1 %v12271_v35  ;;  %v12586_v16 = vpop.f32.mrb[57].mxu1  ;;  %v12588_v28 = vpop.f32.mrb[58].mxu0  ;;  %v10383_v43 = vcombine.low %v4984_v60, %v4988_v26  ;;  %v5008_v60 = vld [vmem:[#allocation8 + $0xec0] sm:$0xff]  ;;  %v5025_v11 = vld [vmem:[#allocation8 + $0xf48] sm:$0xff] }
 0x349   :  { %14136 = vst [vmem:[#allocation18_spill] sm:$0xff] %v12586_v16  ;;  %5760 = vmatpush1.bf16.msra.mxu1 %v10353_v7  ;;  %5698 = vmatprep.subr.bf16.mxu0 %v10360_v29  ;;  %v12590_v37 = vpop.f32.mrb[58].mxu1  ;;  %v12592_v61 = vpop.f32.mrb[59].mxu0  ;;  %v10385_v7 = vcombine.low %v4985_v63, %v4989_v18  ;;  %v10392_v29 = vcombine.high %v4992_v3, %v4996_v10  ;;  %v5012_v26 = vld [vmem:[#allocation8 + $0xee0] sm:$0xff]  ;;  %v5009_v63 = vld [vmem:[#allocation8 + $0xec8] sm:$0xff] }
 0x34a   :  { %5761 = vmatprep.subr.bf16.mxu1 %v10362_v23  ;;  %v12594_v30 = vpop.f32.mrb[59].mxu1  ;;  %v5013_v18 = vld [vmem:[#allocation8 + $0xee8] sm:$0xff]  ;;  %v5016_v10 = vld [vmem:[#allocation8 + $0xf00] sm:$0xff] }
 0x34b   :  { %v10410_v3 = vcombine.high %v5009_v63, %v5013_v18  ;;  %v5024_v16 = vld [vmem:[#allocation8 + $0xf40] sm:$0xff]  ;;  %v10415_v24 = vcombine.low %v5016_v10, %v5020_v41 }
 0x34c   :  { %5699 = vmatpush1.bf16.msra.mxu0 %v10359_v53  ;;  %v5028_v50 = vld [vmem:[#allocation8 + $0xf60] sm:$0xff] }
 0x34d   :  { %5762 = vmatpush1.bf16.msra.mxu1 %v10361_v17  ;;  %5700 = vmatprep.subr.bf16.mxu0 %v10368_v12  ;;  %v5001_v17 = vld [vmem:[#allocation8 + $0xe88] sm:$0xff] }
 0x34e   :  { %5763 = vmatprep.subr.bf16.mxu1 %v10370_v62  ;;  %v12596_v9 = vpop.f32.mrb[60].mxu0  ;;  %v5005_v12 = vld [vmem:[#allocation8 + $0xea8] sm:$0xff] }
 0x34f   :  { %v12598_v15 = vpop.f32.mrb[60].mxu1  ;;  %v12600_v0 = vpop.f32.mrb[61].mxu0 }
 0x350   :  { %5701 = vmatpush1.bf16.msra.mxu0 %v10367_v5  ;;  %v12602_v22 = vpop.f32.mrb[61].mxu1  ;;  %v12604_v21 = vpop.f32.mrb[62].mxu0 }
 0x351   :  { %5764 = vmatpush1.bf16.msra.mxu1 %v10369_v36  ;;  %5702 = vmatprep.subr.bf16.mxu0 %v10376_v32  ;;  %v12606_v57 = vpop.f32.mrb[62].mxu1  ;;  %v12608_v39 = vpop.f32.mrb[63].mxu0  ;;  %v10400_v36 = vcombine.high %v5000_v54, %v5004_v34 }
 0x352   :  { %5765 = vmatprep.subr.bf16.mxu1 %v10378_v13  ;;  %v12610_v27 = vpop.f32.mrb[63].mxu1  ;;  %v10402_v13 = vcombine.high %v5001_v17, %v5005_v12 }
 0x354   :  { %5703 = vmatpush1.bf16.msra.mxu0 %v10375_v47  ;;  %v10399_v47 = vcombine.low %v5000_v54, %v5004_v34  ;;  %v10407_v54 = vcombine.low %v5008_v60, %v5012_v26 }
 0x355   :  { %5766 = vmatpush1.bf16.msra.mxu1 %v10377_v31  ;;  %5704 = vmatprep.subr.bf16.mxu0 %v10384_v45  ;;  %v10401_v31 = vcombine.low %v5001_v17, %v5005_v12  ;;  %v10408_v45 = vcombine.high %v5008_v60, %v5012_v26  ;;  %v10409_v17 = vcombine.low %v5009_v63, %v5013_v18  ;;  %v5036_v63 = vld [vmem:[#allocation8 + $0xfa0] sm:$0xff]  ;;  %v5033_v18 = vld [vmem:[#allocation8 + $0xf88] sm:$0xff] }
 0x356   :  { %5767 = vmatprep.subr.bf16.mxu1 %v10386_v40  ;;  %v12612_v23 = vpop.f32.mrb[64].mxu0  ;;  %v10424_v60 = vcombine.high %v5024_v16, %v5028_v50  ;;  %v10426_v26 = vcombine.high %v5025_v11, %v5029_v58 }
 0x357   :  { %v12614_v1 = vpop.f32.mrb[64].mxu1  ;;  %v12616_v53 = vpop.f32.mrb[65].mxu0 }
 0x358   :  { %5705 = vmatpush1.bf16.msra.mxu0 %v10383_v43  ;;  %v12618_v62 = vpop.f32.mrb[65].mxu1  ;;  %v12620_v2 = vpop.f32.mrb[66].mxu0 }
 0x359   :  { %5768 = vmatpush1.bf16.msra.mxu1 %v10385_v7  ;;  %5706 = vmatprep.subr.bf16.mxu0 %v10392_v29  ;;  %v12622_v46 = vpop.f32.mrb[66].mxu1  ;;  %v12624_v5 = vpop.f32.mrb[67].mxu0  ;;  %v5017_v7 = vld [vmem:[#allocation8 + $0xf08] sm:$0xff] }
 0x35a   :  { %5769 = vmatprep.subr.bf16.mxu1 %v10394_v44  ;;  %v12626_v32 = vpop.f32.mrb[67].mxu1  ;;  %v5021_v29 = vld [vmem:[#allocation8 + $0xf28] sm:$0xff] }
 0x35c   :  { %5707 = vmatpush1.bf16.msra.mxu0 %v10391_v52 }
 0x35d   :  { %5770 = vmatpush1.bf16.msra.mxu1 %v10393_v20  ;;  %5708 = vmatprep.subr.bf16.mxu0 %v10400_v36  ;;  %v10416_v20 = vcombine.high %v5016_v10, %v5020_v41  ;;  %v5044_v10 = vld [vmem:[#allocation8 + $0xfe0] sm:$0xff]  ;;  %v5041_v41 = vld [vmem:[#allocation8 + $0xfc8] sm:$0xff] }
 0x35e   :  { %5771 = vmatprep.subr.bf16.mxu1 %v10402_v13  ;;  %v12628_v40 = vpop.f32.mrb[68].mxu0  ;;  %v10418_v13 = vcombine.high %v5017_v7, %v5021_v29 }
 0x35f   :  { %v12630_v55 = vpop.f32.mrb[68].mxu1  ;;  %v12632_v43 = vpop.f32.mrb[69].mxu0 }
 0x360   :  { %5709 = vmatpush1.bf16.msra.mxu0 %v10399_v47  ;;  %v12634_v44 = vpop.f32.mrb[69].mxu1  ;;  %v3531_v34 = vpop.f32.mrb[70].mxu0  ;;  %v10417_v47 = vcombine.low %v5017_v7, %v5021_v29 }
 0x361   :  { %5772 = vmatpush1.bf16.msra.mxu1 %v10401_v31  ;;  %5710 = vmatprep.subr.bf16.mxu0 %v10408_v45  ;;  %v3602_v12 = vpop.f32.mrb[70].mxu1  ;;  %v3532_v52 = vpop.f32.mrb[71].mxu0  ;;  %v5032_v31 = vld [vmem:[#allocation8 + $0xf80] sm:$0xff]  ;;  %v5037_v45 = vld [vmem:[#allocation8 + $0xfa8] sm:$0xff]  ;;  %v10425_v34 = vcombine.low %v5025_v11, %v5029_v58 }
 0x362   :  { %5773 = vmatprep.subr.bf16.mxu1 %v10410_v3  ;;  %v3603_v36 = vpop.f32.mrb[71].mxu1  ;;  %v10423_v3 = vcombine.low %v5024_v16, %v5028_v50  ;;  %v10432_v12 = vcombine.high %v5032_v31, %v5036_v63  ;;  %v10434_v52 = vcombine.high %v5033_v18, %v5037_v45  ;;  %v10431_v7 = vcombine.low %v5032_v31, %v5036_v63  ;;  %v4926_v50 = vld [vmem:[#allocation8 + $0xc30] sm:$0xff]  ;;  %v4923_v16 = vld [vmem:[#allocation8 + $0xc18] sm:$0xff] }
 0x363   :  { %v10433_v29 = vcombine.low %v5033_v18, %v5037_v45  ;;  %v4934_v31 = vld [vmem:[#allocation8 + $0xc70] sm:$0xff]  ;;  %v4931_v63 = vld [vmem:[#allocation8 + $0xc58] sm:$0xff] }
 0x364   :  { %5711 = vmatpush1.bf16.msra.mxu0 %v10407_v54  ;;  %v5040_v54 = vld [vmem:[#allocation8 + $0xfc0] sm:$0xff]  ;;  %v4935_v18 = vld [vmem:[#allocation8 + $0xc78] sm:$0xff] }
 0x365   :  { %5774 = vmatpush1.bf16.msra.mxu1 %v10409_v17  ;;  %5712 = vmatprep.subr.bf16.mxu0 %v10416_v20  ;;  %v5045_v17 = vld [vmem:[#allocation8 + $0xfe8] sm:$0xff]  ;;  %v10440_v20 = vcombine.high %v5040_v54, %v5044_v10  ;;  %v10439_v58 = vcombine.low %v5040_v54, %v5044_v10  ;;  %v4942_v54 = vld [vmem:[#allocation8 + $0xcb0] sm:$0xff]  ;;  %v4939_v10 = vld [vmem:[#allocation8 + $0xc98] sm:$0xff] }
 0x366   :  { %5775 = vmatprep.subr.bf16.mxu1 %v10418_v13  ;;  %v10442_v36 = vcombine.high %v5041_v41, %v5045_v17  ;;  %v4927_v13 = vld [vmem:[#allocation8 + $0xc38] sm:$0xff]  ;;  %v10441_v11 = vcombine.low %v5041_v41, %v5045_v17 }
 0x367   :  { %v4943_v41 = vld [vmem:[#allocation8 + $0xcb8] sm:$0xff] }
 0x368   :  { %5713 = vmatpush1.bf16.msra.mxu0 %v10415_v24  ;;  %v4922_v24 = vld [vmem:[#allocation8 + $0xc10] sm:$0xff] }
 0x369   :  { %5776 = vmatpush1.bf16.msra.mxu1 %v10417_v47  ;;  %5714 = vmatprep.subr.bf16.mxu0 %v10424_v60  ;;  %v10324_v47 = vcombine.high %v4922_v24, %v4926_v50  ;;  %v10326_v60 = vcombine.high %v4923_v16, %v4927_v13  ;;  %v10323_v45 = vcombine.low %v4922_v24, %v4926_v50  ;;  %v4950_v24 = vld [vmem:[#allocation8 + $0xcf0] sm:$0xff]  ;;  %v4947_v50 = vld [vmem:[#allocation8 + $0xcd8] sm:$0xff] }
 0x36a   :  { %5777 = vmatprep.subr.bf16.mxu1 %v10426_v26  ;;  %v4930_v26 = vld [vmem:[#allocation8 + $0xc50] sm:$0xff] }
 0x36b   :  { %v10331_v17 = vcombine.low %v4930_v26, %v4934_v31 }
 0x36c   :  { %5715 = vmatpush1.bf16.msra.mxu0 %v10423_v3  ;;  %v10325_v3 = vcombine.low %v4923_v16, %v4927_v13  ;;  %v4951_v16 = vld [vmem:[#allocation8 + $0xcf8] sm:$0xff] }
 0x36d   :  { %5778 = vmatpush1.bf16.msra.mxu1 %v10425_v34  ;;  %5716 = vmatprep.subr.bf16.mxu0 %v10432_v12  ;;  %v10332_v34 = vcombine.high %v4930_v26, %v4934_v31  ;;  %v10334_v12 = vcombine.high %v4931_v63, %v4935_v18  ;;  %v4958_v26 = vld [vmem:[#allocation8 + $0xd30] sm:$0xff]  ;;  %v4955_v31 = vld [vmem:[#allocation8 + $0xd18] sm:$0xff] }
 0x36e   :  { %5779 = vmatprep.subr.bf16.mxu1 %v10434_v52  ;;  %v4938_v52 = vld [vmem:[#allocation8 + $0xc90] sm:$0xff] }
 0x36f   :  { %v10339_v13 = vcombine.low %v4938_v52, %v4942_v54 }
 0x370   :  { %5717 = vmatpush1.bf16.msra.mxu0 %v10431_v7  ;;  %v10333_v7 = vcombine.low %v4931_v63, %v4935_v18  ;;  %v4959_v63 = vld [vmem:[#allocation8 + $0xd38] sm:$0xff] }
 0x371   :  { %5780 = vmatpush1.bf16.msra.mxu1 %v10433_v29  ;;  %5718 = vmatprep.subr.bf16.mxu0 %v10440_v20  ;;  %v10340_v29 = vcombine.high %v4938_v52, %v4942_v54  ;;  %v10342_v20 = vcombine.high %v4939_v10, %v4943_v41  ;;  %v4966_v52 = vld [vmem:[#allocation8 + $0xd70] sm:$0xff]  ;;  %v4963_v54 = vld [vmem:[#allocation8 + $0xd58] sm:$0xff] }
 0x372   :  { %5781 = vmatprep.subr.bf16.mxu1 %v10442_v36  ;;  %v4946_v36 = vld [vmem:[#allocation8 + $0xcd0] sm:$0xff] }
 0x373   :  { %v10347_v18 = vcombine.low %v4946_v36, %v4950_v24 }
 0x374   :  { %5719 = vmatpush1.bf16.msra.mxu0 %v10439_v58  ;;  %v10341_v58 = vcombine.low %v4939_v10, %v4943_v41  ;;  %v4967_v10 = vld [vmem:[#allocation8 + $0xd78] sm:$0xff] }
 0x375   :  { %5782 = vmatpush1.bf16.msra.mxu1 %v10441_v11  ;;  %5814 = vmatprep.subr.bf16.mxu0 %v10324_v47  ;;  %v10348_v11 = vcombine.high %v4946_v36, %v4950_v24  ;;  %v10350_v47 = vcombine.high %v4947_v50, %v4951_v16  ;;  %v4970_v36 = vld [vmem:[#allocation8 + $0xd90] sm:$0xff] }
 0x376   :  { %5877 = vmatprep.subr.bf16.mxu1 %v10326_v60  ;;  %v4954_v60 = vld [vmem:[#allocation8 + $0xd10] sm:$0xff] }
 0x377   :  { %5721 = vmatmul.mubr.bf16.vlgmr.msra.gmra.mrb[112].mxu0 %v12260_v4  ;;  %v10355_v41 = vcombine.low %v4954_v60, %v4958_v26  ;;  %v4974_v24 = vld [vmem:[#allocation8 + $0xdb0] sm:$0xff] }
 0x378   :  { %5784 = vmatmul.mubr.bf16.vlgmr.msra.gmra.mrb[112].mxu1 %v12260_v4  ;;  %5730 = vmatprep.mubr.bf16.mxu0 %v12335_v49 }
 0x379   :  { %5793 = vmatprep.mubr.bf16.mxu1 %v12335_v49  ;;  %5815 = vmatpush1.bf16.msra.mxu0 %v10323_v45  ;;  %v10349_v45 = vcombine.low %v4947_v50, %v4951_v16 }
 0x37a   :  { %5878 = vmatpush1.bf16.msra.mxu1 %v10325_v3  ;;  %5816 = vmatprep.subr.bf16.mxu0 %v10332_v34  ;;  %v10356_v3 = vcombine.high %v4954_v60, %v4958_v26  ;;  %v10358_v34 = vcombine.high %v4955_v31, %v4959_v63  ;;  %v10365_v26 = vcombine.low %v4963_v54, %v4967_v10 }
 0x37b   :  { %5879 = vmatprep.subr.bf16.mxu1 %v10334_v12  ;;  %v4962_v12 = vld [vmem:[#allocation8 + $0xd50] sm:$0xff] }
 0x37d   :  { %5817 = vmatpush1.bf16.msra.mxu0 %v10331_v17  ;;  %v10357_v17 = vcombine.low %v4955_v31, %v4959_v63 }
 0x37e   :  { %5880 = vmatpush1.bf16.msra.mxu1 %v10333_v7  ;;  %5818 = vmatprep.subr.bf16.mxu0 %v10340_v29  ;;  %v10364_v7 = vcombine.high %v4962_v12, %v4966_v52 }
 0x37f   :  { %5731 = vmatmul.mubr.bf16.gmra.mrb[116].mxu0 %v12322_v48  ;;  %5881 = vmatprep.subr.bf16.mxu1 %v10342_v20  ;;  %v10366_v20 = vcombine.high %v4963_v54, %v4967_v10 }
 0x380   :  { %5794 = vmatmul.mubr.bf16.gmra.mrb[116].mxu1 %v12322_v48  ;;  %5740 = vmatprep.mubr.bf16.mxu0 %v12408_v33 }
 0x381   :  { %5803 = vmatprep.mubr.bf16.mxu1 %v12408_v33  ;;  %5819 = vmatpush1.bf16.msra.mxu0 %v10339_v13  ;;  %v4971_v13 = vld [vmem:[#allocation8 + $0xd98] sm:$0xff] }
 0x382   :  { %5882 = vmatpush1.bf16.msra.mxu1 %v10341_v58  ;;  %5820 = vmatprep.subr.bf16.mxu0 %v10348_v11  ;;  %v4975_v58 = vld [vmem:[#allocation8 + $0xdb8] sm:$0xff] }
 0x383   :  { %5883 = vmatprep.subr.bf16.mxu1 %v10350_v47  ;;  %v10363_v47 = vcombine.low %v4962_v12, %v4966_v52  ;;  %v10371_v12 = vcombine.low %v4970_v36, %v4974_v24  ;;  %v10373_v52 = vcombine.low %v4971_v13, %v4975_v58 }
 0x385   :  { %5821 = vmatpush1.bf16.msra.mxu0 %v10347_v18  ;;  %v10372_v18 = vcombine.high %v4970_v36, %v4974_v24 }
 0x386   :  { %5884 = vmatpush1.bf16.msra.mxu1 %v10349_v45  ;;  %5822 = vmatprep.subr.bf16.mxu0 %v10356_v3  ;;  %v10374_v3 = vcombine.high %v4971_v13, %v4975_v58 }
 0x387   :  { %5741 = vmatmul.mubr.bf16.gmra.mrb[120].mxu0 %v12399_v19  ;;  %5885 = vmatprep.subr.bf16.mxu1 %v10358_v34  ;;  %v12645_v29 = vpop.f32.mrb[72].mxu0  ;;  %v4978_v34 = vld [vmem:[#allocation8 + $0xdd0] sm:$0xff] }
 0x388   :  { %14137 = vst [vmem:[#allocation19_spill] sm:$0xff] %v12645_v29  ;;  %5804 = vmatmul.mubr.bf16.gmra.mrb[120].mxu1 %v12399_v19  ;;  %5846 = vmatprep.mubr.bf16.mxu0 %v12271_v35  ;;  %v12649_v50 = vpop.f32.mrb[72].mxu1  ;;  %v12651_v16 = vpop.f32.mrb[73].mxu0  ;;  %v4987_v29 = vld [vmem:[#allocation8 + $0xe18] sm:$0xff] }
 0x389   :  { %14138 = vst [vmem:[#allocation20_spill] sm:$0xff] %v12649_v50  ;;  %14139 = vst [vmem:[#allocation21_spill] sm:$0xff] %v12651_v16  ;;  %5823 = vmatpush1.bf16.msra.mxu0 %v10355_v41  ;;  %5909 = vmatprep.mubr.bf16.mxu1 %v12271_v35  ;;  %v12654_v11 = vpop.f32.mrb[73].mxu1  ;;  %v12656_v60 = vpop.f32.mrb[74].mxu0  ;;  %v4982_v41 = vld [vmem:[#allocation8 + $0xdf0] sm:$0xff]  ;;  %v4979_v35 = vld [vmem:[#allocation8 + $0xdd8] sm:$0xff] }
 0x38a   :  { %14140 = vst [vmem:[#allocation35_spill] sm:$0xff] %v12654_v11  ;;  %5886 = vmatpush1.bf16.msra.mxu1 %v10357_v17  ;;  %5824 = vmatprep.subr.bf16.mxu0 %v10364_v7  ;;  %v12658_v31 = vpop.f32.mrb[74].mxu1  ;;  %v12660_v63 = vpop.f32.mrb[75].mxu0  ;;  %v4983_v16 = vld [vmem:[#allocation8 + $0xdf8] sm:$0xff]  ;;  %v10380_v17 = vcombine.high %v4978_v34, %v4982_v41  ;;  %v4986_v7 = vld [vmem:[#allocation8 + $0xe10] sm:$0xff]  ;;  %v10379_v36 = vcombine.low %v4978_v34, %v4982_v41 }
 0x38b   :  { %5887 = vmatprep.subr.bf16.mxu1 %v10366_v20  ;;  %v12662_v45 = vpop.f32.mrb[75].mxu1  ;;  %v10382_v10 = vcombine.high %v4979_v35, %v4983_v16  ;;  %v4990_v11 = vld [vmem:[#allocation8 + $0xe30] sm:$0xff]  ;;  %v10381_v13 = vcombine.low %v4979_v35, %v4983_v16  ;;  %v10389_v41 = vcombine.low %v4987_v29, %v4991_v14 }
 0x38c   :  { %v10387_v34 = vcombine.low %v4986_v7, %v4990_v11 }
 0x38d   :  { %5825 = vmatpush1.bf16.msra.mxu0 %v10363_v47 }
 0x38e   :  { %5888 = vmatpush1.bf16.msra.mxu1 %v10365_v26  ;;  %5826 = vmatprep.subr.bf16.mxu0 %v10372_v18  ;;  %v10388_v26 = vcombine.high %v4986_v7, %v4990_v11  ;;  %v10395_v11 = vcombine.low %v4994_v42, %v4998_v59 }
 0x38f   :  { %5889 = vmatprep.subr.bf16.mxu1 %v10374_v3  ;;  %v12664_v54 = vpop.f32.mrb[76].mxu0  ;;  %v10390_v3 = vcombine.high %v4987_v29, %v4991_v14 }
 0x390   :  { %14141 = vst [vmem:[#allocation36_spill] sm:$0xff] %v12664_v54  ;;  %v12666_v20 = vpop.f32.mrb[76].mxu1  ;;  %v12668_v50 = vpop.f32.mrb[77].mxu0 }
 0x391   :  { %14142 = vst [vmem:[#allocation37_spill] sm:$0xff] %v12666_v20  ;;  %14143 = vst [vmem:[#allocation38_spill] sm:$0xff] %v12668_v50  ;;  %5827 = vmatpush1.bf16.msra.mxu0 %v10371_v12  ;;  %v12670_v51 = vpop.f32.mrb[77].mxu1  ;;  %v12672_v24 = vpop.f32.mrb[78].mxu0  ;;  %v4995_v12 = vld [vmem:[#allocation8 + $0xe58] sm:$0xff] }
 0x392   :  { %14144 = vst [vmem:[#allocation43_spill] sm:$0xff] %v12670_v51  ;;  %14145 = vst [vmem:[#allocation44_spill] sm:$0xff] %v12672_v24  ;;  %5890 = vmatpush1.bf16.msra.mxu1 %v10373_v52  ;;  %5828 = vmatprep.subr.bf16.mxu0 %v10380_v17  ;;  %v12674_v58 = vpop.f32.mrb[78].mxu1  ;;  %v12676_v47 = vpop.f32.mrb[79].mxu0  ;;  %v4999_v50 = vld [vmem:[#allocation8 + $0xe78] sm:$0xff]  ;;  %v10396_v52 = vcombine.high %v4994_v42, %v4998_v59  ;;  %v5002_v17 = vld [vmem:[#allocation8 + $0xe90] sm:$0xff] }
 0x393   :  { %14146 = vst [vmem:[#allocation45_spill] sm:$0xff] %v12674_v58  ;;  %14147 = vst [vmem:[#allocation46_spill] sm:$0xff] %v12676_v47  ;;  %5891 = vmatprep.subr.bf16.mxu1 %v10382_v10  ;;  %v12678_v18 = vpop.f32.mrb[79].mxu1  ;;  %v10398_v35 = vcombine.high %v4995_v12, %v4999_v50  ;;  %v5006_v47 = vld [vmem:[#allocation8 + $0xeb0] sm:$0xff]  ;;  %v5003_v58 = vld [vmem:[#allocation8 + $0xe98] sm:$0xff]  ;;  %v10397_v14 = vcombine.low %v4995_v12, %v4999_v50 }
 0x394   :  { %14148 = vst [vmem:[#allocation47_spill] sm:$0xff] %v12678_v18  ;;  %v5007_v24 = vld [vmem:[#allocation8 + $0xeb8] sm:$0xff]  ;;  %v10403_v59 = vcombine.low %v5002_v17, %v5006_v47 }
 0x395   :  { %5829 = vmatpush1.bf16.msra.mxu0 %v10379_v36  ;;  %v10405_v42 = vcombine.low %v5003_v58, %v5007_v24  ;;  %v5027_v20 = vld [vmem:[#allocation8 + $0xf58] sm:$0xff] }
 0x396   :  { %5892 = vmatpush1.bf16.msra.mxu1 %v10381_v13  ;;  %5830 = vmatprep.subr.bf16.mxu0 %v10388_v26  ;;  %v10404_v13 = vcombine.high %v5002_v17, %v5006_v47 }
 0x397   :  { %5893 = vmatprep.subr.bf16.mxu1 %v10390_v3  ;;  %v12680_v16 = vpop.f32.mrb[80].mxu0  ;;  %v10406_v3 = vcombine.high %v5003_v58, %v5007_v24 }
 0x398   :  { %14149 = vst [vmem:[#allocation48_spill] sm:$0xff] %v12680_v16  ;;  %v12682_v10 = vpop.f32.mrb[80].mxu1  ;;  %v12684_v18 = vpop.f32.mrb[81].mxu0  ;;  %v5015_v16 = vld [vmem:[#allocation8 + $0xef8] sm:$0xff] }
 0x399   :  { %14150 = vst [vmem:[#allocation49_spill] sm:$0xff] %v12682_v10  ;;  %14151 = vst [vmem:[#allocation50_spill] sm:$0xff] %v12684_v18  ;;  %5831 = vmatpush1.bf16.msra.mxu0 %v10387_v34  ;;  %v12686_v51 = vpop.f32.mrb[81].mxu1  ;;  %v12688_v7 = vpop.f32.mrb[82].mxu0  ;;  %v5010_v18 = vld [vmem:[#allocation8 + $0xed0] sm:$0xff]  ;;  %v5011_v34 = vld [vmem:[#allocation8 + $0xed8] sm:$0xff] }
 0x39a   :  { %14152 = vst [vmem:[#allocation53_spill] sm:$0xff] %v12686_v51  ;;  %14153 = vst [vmem:[#allocation52_spill] sm:$0xff] %v12688_v7  ;;  %5894 = vmatpush1.bf16.msra.mxu1 %v10389_v41  ;;  %5832 = vmatprep.subr.bf16.mxu0 %v10396_v52  ;;  %v12690_v29 = vpop.f32.mrb[82].mxu1  ;;  %v12692_v36 = vpop.f32.mrb[83].mxu0  ;;  %v5014_v10 = vld [vmem:[#allocation8 + $0xef0] sm:$0xff]  ;;  %v10414_v12 = vcombine.high %v5011_v34, %v5015_v16  ;;  %v5023_v7 = vld [vmem:[#allocation8 + $0xf38] sm:$0xff]  ;;  %v10413_v24 = vcombine.low %v5011_v34, %v5015_v16 }
 0x39b   :  { %14154 = vst [vmem:[#allocation54_spill] sm:$0xff] %v12690_v29  ;;  %14155 = vst [vmem:[#allocation55_spill] sm:$0xff] %v12692_v36  ;;  %5895 = vmatprep.subr.bf16.mxu1 %v10398_v35  ;;  %v12694_v26 = vpop.f32.mrb[83].mxu1  ;;  %v10412_v41 = vcombine.high %v5010_v18, %v5014_v10  ;;  %v5018_v52 = vld [vmem:[#allocation8 + $0xf10] sm:$0xff]  ;;  %v5019_v29 = vld [vmem:[#allocation8 + $0xf18] sm:$0xff]  ;;  %v10411_v47 = vcombine.low %v5010_v18, %v5014_v10 }
 0x39c   :  { %14156 = vst [vmem:[#allocation56_spill] sm:$0xff] %v12694_v26  ;;  %v5022_v36 = vld [vmem:[#allocation8 + $0xf30] sm:$0xff]  ;;  %v5035_v34 = vld [vmem:[#allocation8 + $0xf98] sm:$0xff] }
 0x39d   :  { %5833 = vmatpush1.bf16.msra.mxu0 %v10395_v11  ;;  %v10419_v54 = vcombine.low %v5018_v52, %v5022_v36  ;;  %v5038_v16 = vld [vmem:[#allocation8 + $0xfb0] sm:$0xff] }
 0x39e   :  { %5896 = vmatpush1.bf16.msra.mxu1 %v10397_v14  ;;  %5834 = vmatprep.subr.bf16.mxu0 %v10404_v13  ;;  %v10420_v14 = vcombine.high %v5018_v52, %v5022_v36  ;;  %v5046_v36 = vld [vmem:[#allocation8 + $0xff0] sm:$0xff]  ;;  %v5043_v52 = vld [vmem:[#allocation8 + $0xfd8] sm:$0xff] }
 0x39f   :  { %5897 = vmatprep.subr.bf16.mxu1 %v10406_v3  ;;  %v12696_v50 = vpop.f32.mrb[84].mxu0  ;;  %v10422_v3 = vcombine.high %v5019_v29, %v5023_v7 }
 0x3a0   :  { %14157 = vst [vmem:[#allocation57_spill] sm:$0xff] %v12696_v50  ;;  %v12698_v35 = vpop.f32.mrb[84].mxu1  ;;  %v12700_v26 = vpop.f32.mrb[85].mxu0  ;;  %v5026_v50 = vld [vmem:[#allocation8 + $0xf50] sm:$0xff] }
 0x3a1   :  { %14158 = vst [vmem:[#allocation58_spill] sm:$0xff] %v12698_v35  ;;  %14159 = vst [vmem:[#allocation59_spill] sm:$0xff] %v12700_v26  ;;  %5835 = vmatpush1.bf16.msra.mxu0 %v10403_v59  ;;  %v12702_v51 = vpop.f32.mrb[85].mxu1  ;;  %v3673_v17 = vpop.f32.mrb[86].mxu0  ;;  %v5030_v35 = vld [vmem:[#allocation8 + $0xf70] sm:$0xff]  ;;  %v5031_v26 = vld [vmem:[#allocation8 + $0xf78] sm:$0xff]  ;;  %v10421_v59 = vcombine.low %v5019_v29, %v5023_v7 }
 0x3a2   :  { %5898 = vmatpush1.bf16.msra.mxu1 %v10405_v42  ;;  %5836 = vmatprep.subr.bf16.mxu0 %v10412_v41  ;;  %v3744_v58 = vpop.f32.mrb[86].mxu1  ;;  %v3674_v11 = vpop.f32.mrb[87].mxu0  ;;  %v10428_v18 = vcombine.high %v5026_v50, %v5030_v35  ;;  %v10430_v10 = vcombine.high %v5027_v20, %v5031_v26  ;;  %v5034_v42 = vld [vmem:[#allocation8 + $0xf90] sm:$0xff]  ;;  %v5039_v41 = vld [vmem:[#allocation8 + $0xfb8] sm:$0xff]  ;;  %v10429_v17 = vcombine.low %v5027_v20, %v5031_v26 }
 0x3a3   :  { %5899 = vmatprep.subr.bf16.mxu1 %v10414_v12  ;;  %v3745_v13 = vpop.f32.mrb[87].mxu1  ;;  %v10427_v12 = vcombine.low %v5026_v50, %v5030_v35  ;;  %v10436_v58 = vcombine.high %v5034_v42, %v5038_v16  ;;  %v10438_v11 = vcombine.high %v5035_v34, %v5039_v41  ;;  %v10435_v7 = vcombine.low %v5034_v42, %v5038_v16  ;;  %v6095_v50 = vld [vmem:[#allocation8 + $0x820] sm:$0xff]  ;;  %v6092_v35 = vld [vmem:[#allocation8 + $0x808] sm:$0xff] }
 0x3a4   :  { %v10437_v29 = vcombine.low %v5035_v34, %v5039_v41  ;;  %v6103_v42 = vld [vmem:[#allocation8 + $0x860] sm:$0xff]  ;;  %v6100_v16 = vld [vmem:[#allocation8 + $0x848] sm:$0xff] }
 0x3a5   :  { %5837 = vmatpush1.bf16.msra.mxu0 %v10411_v47  ;;  %v5042_v47 = vld [vmem:[#allocation8 + $0xfd0] sm:$0xff]  ;;  %v6104_v34 = vld [vmem:[#allocation8 + $0x868] sm:$0xff] }
 0x3a6   :  { %5900 = vmatpush1.bf16.msra.mxu1 %v10413_v24  ;;  %5838 = vmatprep.subr.bf16.mxu0 %v10420_v14  ;;  %v5047_v24 = vld [vmem:[#allocation8 + $0xff8] sm:$0xff]  ;;  %v10444_v14 = vcombine.high %v5042_v47, %v5046_v36  ;;  %v10443_v20 = vcombine.low %v5042_v47, %v5046_v36  ;;  %v6111_v47 = vld [vmem:[#allocation8 + $0x8a0] sm:$0xff]  ;;  %v6108_v36 = vld [vmem:[#allocation8 + $0x888] sm:$0xff] }
 0x3a7   :  { %5901 = vmatprep.subr.bf16.mxu1 %v10422_v3  ;;  %v10446_v13 = vcombine.high %v5043_v52, %v5047_v24  ;;  %v6096_v3 = vld [vmem:[#allocation8 + $0x828] sm:$0xff]  ;;  %v10445_v26 = vcombine.low %v5043_v52, %v5047_v24 }
 0x3a8   :  { %v6112_v52 = vld [vmem:[#allocation8 + $0x8a8] sm:$0xff] }
 0x3a9   :  { %5839 = vmatpush1.bf16.msra.mxu0 %v10419_v54  ;;  %v6091_v54 = vld [vmem:[#allocation8 + $0x800] sm:$0xff] }
 0x3aa   :  { %5902 = vmatpush1.bf16.msra.mxu1 %v10421_v59  ;;  %5840 = vmatprep.subr.bf16.mxu0 %v10428_v18  ;;  %v10448_v59 = vcombine.high %v6091_v54, %v6095_v50  ;;  %v10450_v18 = vcombine.high %v6092_v35, %v6096_v3  ;;  %v10447_v41 = vcombine.low %v6091_v54, %v6095_v50  ;;  %v6119_v54 = vld [vmem:[#allocation8 + $0x8e0] sm:$0xff]  ;;  %v6116_v50 = vld [vmem:[#allocation8 + $0x8c8] sm:$0xff] }
 0x3ab   :  { %5903 = vmatprep.subr.bf16.mxu1 %v10430_v10  ;;  %v6099_v10 = vld [vmem:[#allocation8 + $0x840] sm:$0xff] }
 0x3ac   :  { %v10455_v24 = vcombine.low %v6099_v10, %v6103_v42 }
 0x3ad   :  { %5841 = vmatpush1.bf16.msra.mxu0 %v10427_v12  ;;  %v10449_v12 = vcombine.low %v6092_v35, %v6096_v3  ;;  %v6120_v35 = vld [vmem:[#allocation8 + $0x8e8] sm:$0xff]  ;;  %v10465_v3 = vcombine.low %v6108_v36, %v6112_v52 }
 0x3ae   :  { %5904 = vmatpush1.bf16.msra.mxu1 %v10429_v17  ;;  %5842 = vmatprep.subr.bf16.mxu0 %v10436_v58  ;;  %v10456_v17 = vcombine.high %v6099_v10, %v6103_v42  ;;  %v10458_v58 = vcombine.high %v6100_v16, %v6104_v34  ;;  %v6128_v10 = vld [vmem:[#allocation8 + $0x928] sm:$0xff] }
 0x3af   :  { %5905 = vmatprep.subr.bf16.mxu1 %v10438_v11  ;;  %v6107_v11 = vld [vmem:[#allocation8 + $0x880] sm:$0xff] }
 0x3b1   :  { %5843 = vmatpush1.bf16.msra.mxu0 %v10435_v7  ;;  %v10457_v7 = vcombine.low %v6100_v16, %v6104_v34  ;;  %v10473_v16 = vcombine.low %v6116_v50, %v6120_v35 }
 0x3b2   :  { %5906 = vmatpush1.bf16.msra.mxu1 %v10437_v29  ;;  %5844 = vmatprep.subr.bf16.mxu0 %v10444_v14  ;;  %v10464_v29 = vcombine.high %v6107_v11, %v6111_v47  ;;  %v10466_v14 = vcombine.high %v6108_v36, %v6112_v52 }
 0x3b3   :  { %5907 = vmatprep.subr.bf16.mxu1 %v10446_v13  ;;  %v6115_v13 = vld [vmem:[#allocation8 + $0x8c0] sm:$0xff] }
 0x3b4   :  { %v10471_v42 = vcombine.low %v6115_v13, %v6119_v54 }
 0x3b5   :  { %5845 = vmatpush1.bf16.msra.mxu0 %v10443_v20  ;;  %v10472_v20 = vcombine.high %v6115_v13, %v6119_v54 }
 0x3b6   :  { %5908 = vmatpush1.bf16.msra.mxu1 %v10445_v26  ;;  %6859 = vmatprep.subr.bf16.mxu0 %v10448_v59  ;;  %v6123_v26 = vld [vmem:[#allocation8 + $0x900] sm:$0xff] }
 0x3b7   :  { %6922 = vmatprep.subr.bf16.mxu1 %v10450_v18  ;;  %v6127_v59 = vld [vmem:[#allocation8 + $0x920] sm:$0xff]  ;;  %v6124_v18 = vld [vmem:[#allocation8 + $0x908] sm:$0xff] }
 0x3b8   :  { %5847 = vmatmul.mubr.bf16.vlgmr.msra.gmra.mrb[124].mxu0 %v12260_v4  ;;  %v10480_v34 = vcombine.high %v6123_v26, %v6127_v59 }
 0x3b9   :  { %5910 = vmatmul.mubr.bf16.vlgmr.msra.gmra.mrb[124].mxu1 %v12260_v4  ;;  %5856 = vmatprep.mubr.bf16.mxu0 %v12335_v49  ;;  %v10463_v4 = vcombine.low %v6107_v11, %v6111_v47  ;;  %v6136_v11 = vld [vmem:[#allocation8 + $0x968] sm:$0xff]  ;;  %v10481_v47 = vcombine.low %v6124_v18, %v6128_v10 }
 0x3ba   :  { %5919 = vmatprep.mubr.bf16.mxu1 %v12335_v49  ;;  %6860 = vmatpush1.bf16.msra.mxu0 %v10447_v41  ;;  %v10474_v49 = vcombine.high %v6116_v50, %v6120_v35  ;;  %v10482_v41 = vcombine.high %v6124_v18, %v6128_v10  ;;  %v6140_v50 = vld [vmem:[#allocation8 + $0x988] sm:$0xff] }
 0x3bb   :  { %6923 = vmatpush1.bf16.msra.mxu1 %v10449_v12  ;;  %6861 = vmatprep.subr.bf16.mxu0 %v10456_v17  ;;  %v6131_v12 = vld [vmem:[#allocation8 + $0x940] sm:$0xff]  ;;  %v6144_v35 = vld [vmem:[#allocation8 + $0x9a8] sm:$0xff] }
 0x3bc   :  { %6924 = vmatprep.subr.bf16.mxu1 %v10458_v58  ;;  %v6135_v17 = vld [vmem:[#allocation8 + $0x960] sm:$0xff]  ;;  %v6132_v58 = vld [vmem:[#allocation8 + $0x948] sm:$0xff] }
 0x3bd   :  { %v10488_v36 = vcombine.high %v6131_v12, %v6135_v17  ;;  %v10490_v52 = vcombine.high %v6132_v58, %v6136_v11  ;;  %v10487_v54 = vcombine.low %v6131_v12, %v6135_v17  ;;  %v6148_v12 = vld [vmem:[#allocation8 + $0x9c8] sm:$0xff] }
 0x3be   :  { %6862 = vmatpush1.bf16.msra.mxu0 %v10455_v24  ;;  %v6139_v24 = vld [vmem:[#allocation8 + $0x980] sm:$0xff] }
 0x3bf   :  { %6925 = vmatpush1.bf16.msra.mxu1 %v10457_v7  ;;  %6863 = vmatprep.subr.bf16.mxu0 %v10464_v29  ;;  %v6143_v7 = vld [vmem:[#allocation8 + $0x9a0] sm:$0xff] }
 0x3c0   :  { %5857 = vmatmul.mubr.bf16.gmra.mrb[128].mxu0 %v12322_v48  ;;  %6926 = vmatprep.subr.bf16.mxu1 %v10466_v14  ;;  %v10496_v10 = vcombine.high %v6139_v24, %v6143_v7  ;;  %v10495_v17 = vcombine.low %v6139_v24, %v6143_v7 }
 0x3c1   :  { %5920 = vmatmul.mubr.bf16.gmra.mrb[128].mxu1 %v12322_v48  ;;  %5866 = vmatprep.mubr.bf16.mxu0 %v12408_v33  ;;  %v10479_v48 = vcombine.low %v6123_v26, %v6127_v59 }
 0x3c2   :  { %5929 = vmatprep.mubr.bf16.mxu1 %v12408_v33  ;;  %6864 = vmatpush1.bf16.msra.mxu0 %v10463_v4 }
 0x3c3   :  { %6927 = vmatpush1.bf16.msra.mxu1 %v10465_v3  ;;  %6865 = vmatprep.subr.bf16.mxu0 %v10472_v20  ;;  %v10489_v20 = vcombine.low %v6132_v58, %v6136_v11  ;;  %v10497_v58 = vcombine.low %v6140_v50, %v6144_v35 }
 0x3c4   :  { %6928 = vmatprep.subr.bf16.mxu1 %v10474_v49 }
 0x3c6   :  { %6866 = vmatpush1.bf16.msra.mxu0 %v10471_v42 }
 0x3c7   :  { %6929 = vmatpush1.bf16.msra.mxu1 %v10473_v16  ;;  %6867 = vmatprep.subr.bf16.mxu0 %v10480_v34  ;;  %v10498_v16 = vcombine.high %v6140_v50, %v6144_v35  ;;  %v6147_v34 = vld [vmem:[#allocation8 + $0x9c0] sm:$0xff] }
 0x3c8   :  { %5867 = vmatmul.mubr.bf16.gmra.mrb[132].mxu0 %v12399_v19  ;;  %6930 = vmatprep.subr.bf16.mxu1 %v10482_v41  ;;  %v4653_v33 = vpop.f32.mrb[88].mxu0  ;;  %v6151_v41 = vld [vmem:[#allocation8 + $0x9e0] sm:$0xff] }
 0x3c9   :  { %5930 = vmatmul.mubr.bf16.gmra.mrb[132].mxu1 %v12399_v19  ;;  %6891 = vmatprep.mubr.bf16.mxu0 %v12448_v38  ;;  %v12716_v29 = vadd.f32 %v4653_v33, %v12588_v28  ;;  %v4716_v14 = vpop.f32.mrb[88].mxu1  ;;  %v4655_v13 = vpop.f32.mrb[89].mxu0  ;;  %v10504_v11 = vcombine.high %v6147_v34, %v6151_v41 }
 0x3ca   :  { %6868 = vmatpush1.bf16.msra.mxu0 %v10479_v48  ;;  %6954 = vmatprep.mubr.bf16.mxu1 %v12448_v38  ;;  %v12720_v4 = vadd.f32 %v4716_v14, %v12590_v37  ;;  %v12723_v3 = vadd.f32 %v4655_v13, %v12592_v61  ;;  %v4718_v19 = vpop.f32.mrb[89].mxu1  ;;  %v4657_v49 = vpop.f32.mrb[90].mxu0  ;;  %v6160_v14 = vld [vmem:[#allocation8 + $0xa28] sm:$0xff] }
 0x3cb   :  { %6931 = vmatpush1.bf16.msra.mxu1 %v10481_v47  ;;  %v12726_v28 = vadd.f32 %v4718_v19, %v12594_v30  ;;  %6869 = vmatprep.subr.bf16.mxu0 %v10488_v36  ;;  %v12729_v26 = vadd.f32 %v4657_v49, %v12596_v9  ;;  %v4720_v59 = vpop.f32.mrb[90].mxu1  ;;  %v4659_v18 = vpop.f32.mrb[91].mxu0  ;;  %v6152_v9 = vld [vmem:[#allocation8 + $0x9e8] sm:$0xff]  ;;  %v6159_v47 = vld [vmem:[#allocation8 + $0xa20] sm:$0xff] }
 0x3cc   :  { %6932 = vmatprep.subr.bf16.mxu1 %v10490_v52  ;;  %v12732_v37 = vadd.f32 %v4720_v59, %v12598_v15  ;;  %v12735_v61 = vadd.f32 %v4659_v18, %v12600_v0  ;;  %v4722_v42 = vpop.f32.mrb[91].mxu1  ;;  %v10506_v48 = vcombine.high %v6148_v12, %v6152_v9  ;;  %v6155_v0 = vld [vmem:[#allocation8 + $0xa00] sm:$0xff]  ;;  %v10505_v50 = vcombine.low %v6148_v12, %v6152_v9 }
 0x3cd   :  { %v12738_v30 = vadd.f32 %v4722_v42, %v12602_v22  ;;  %v6156_v22 = vld [vmem:[#allocation8 + $0xa08] sm:$0xff]  ;;  %v10512_v59 = vcombine.high %v6155_v0, %v6159_v47  ;;  %v6163_v42 = vld [vmem:[#allocation8 + $0xa40] sm:$0xff] }
 0x3ce   :  { %6870 = vmatpush1.bf16.msra.mxu0 %v10487_v54  ;;  %v10503_v54 = vcombine.low %v6147_v34, %v6151_v41  ;;  %v6164_v34 = vld [vmem:[#allocation8 + $0xa48] sm:$0xff]  ;;  %v10511_v41 = vcombine.low %v6155_v0, %v6159_v47  ;;  %v10513_v12 = vcombine.low %v6156_v22, %v6160_v14 }
 0x3cf   :  { %6933 = vmatpush1.bf16.msra.mxu1 %v10489_v20  ;;  %6871 = vmatprep.subr.bf16.mxu0 %v10496_v10  ;;  %v10514_v10 = vcombine.high %v6156_v22, %v6160_v14 }
 0x3d0   :  { %6934 = vmatprep.subr.bf16.mxu1 %v10498_v16  ;;  %v4663_v15 = vpop.f32.mrb[92].mxu0  ;;  %v6167_v16 = vld [vmem:[#allocation8 + $0xa60] sm:$0xff] }
 0x3d1   :  { %v12741_v36 = vadd.f32 %v4663_v15, %v12604_v21  ;;  %v4726_v33 = vpop.f32.mrb[92].mxu1  ;;  %v4665_v52 = vpop.f32.mrb[93].mxu0  ;;  %v10520_v9 = vcombine.high %v6163_v42, %v6167_v16  ;;  %v10519_v22 = vcombine.low %v6163_v42, %v6167_v16  ;;  %v6180_v42 = vld [vmem:[#allocation8 + $0xac8] sm:$0xff] }
 0x3d2   :  { %6872 = vmatpush1.bf16.msra.mxu0 %v10495_v17  ;;  %v12744_v13 = vadd.f32 %v4726_v33, %v12606_v57  ;;  %v12747_v24 = vadd.f32 %v4665_v52, %v12608_v39  ;;  %v4728_v7 = vpop.f32.mrb[93].mxu1  ;;  %v4667_v35 = vpop.f32.mrb[94].mxu0  ;;  %v6176_v33 = vld [vmem:[#allocation8 + $0xaa8] sm:$0xff] }
 0x3d3   :  { %6935 = vmatpush1.bf16.msra.mxu1 %v10497_v58  ;;  %v12750_v19 = vadd.f32 %v4728_v7, %v12610_v27  ;;  %6873 = vmatprep.subr.bf16.mxu0 %v10504_v11  ;;  %v12753_v21 = vadd.f32 %v4667_v35, %v12612_v23  ;;  %v4730_v20 = vpop.f32.mrb[94].mxu1  ;;  %v4669_v49 = vpop.f32.mrb[95].mxu0  ;;  %v6168_v23 = vld [vmem:[#allocation8 + $0xa68] sm:$0xff]  ;;  %v6175_v58 = vld [vmem:[#allocation8 + $0xaa0] sm:$0xff] }
 0x3d4   :  { %6936 = vmatprep.subr.bf16.mxu1 %v10506_v48  ;;  %v12756_v57 = vadd.f32 %v4730_v20, %v12614_v1  ;;  %v12759_v39 = vadd.f32 %v4669_v49, %v12616_v53  ;;  %v4732_v18 = vpop.f32.mrb[95].mxu1  ;;  %v10522_v17 = vcombine.high %v6164_v34, %v6168_v23  ;;  %v6171_v53 = vld [vmem:[#allocation8 + $0xa80] sm:$0xff]  ;;  %v10521_v14 = vcombine.low %v6164_v34, %v6168_v23 }
 0x3d5   :  { %v12762_v27 = vadd.f32 %v4732_v18, %v12618_v62  ;;  %v6172_v62 = vld [vmem:[#allocation8 + $0xa88] sm:$0xff]  ;;  %v10528_v20 = vcombine.high %v6171_v53, %v6175_v58  ;;  %v6179_v18 = vld [vmem:[#allocation8 + $0xac0] sm:$0xff]  ;;  %v10527_v16 = vcombine.low %v6171_v53, %v6175_v58 }
 0x3d6   :  { %6874 = vmatpush1.bf16.msra.mxu0 %v10503_v54  ;;  %v10529_v34 = vcombine.low %v6172_v62, %v6176_v33  ;;  %v6199_v53 = vld [vmem:[#allocation8 + $0xb60] sm:$0xff]  ;;  %v6196_v58 = vld [vmem:[#allocation8 + $0xb48] sm:$0xff] }
 0x3d7   :  { %6937 = vmatpush1.bf16.msra.mxu1 %v10505_v50  ;;  %6875 = vmatprep.subr.bf16.mxu0 %v10512_v59  ;;  %v10530_v59 = vcombine.high %v6172_v62, %v6176_v33 }
 0x3d8   :  { %6938 = vmatprep.subr.bf16.mxu1 %v10514_v10  ;;  %v4673_v1 = vpop.f32.mrb[96].mxu0  ;;  %v6183_v10 = vld [vmem:[#allocation8 + $0xae0] sm:$0xff] }
 0x3d9   :  { %v12765_v11 = vadd.f32 %v4673_v1, %v12620_v2  ;;  %v4736_v15 = vpop.f32.mrb[96].mxu1  ;;  %v4675_v48 = vpop.f32.mrb[97].mxu0  ;;  %v10536_v23 = vcombine.high %v6179_v18, %v6183_v10  ;;  %v10535_v1 = vcombine.low %v6179_v18, %v6183_v10 }
 0x3da   :  { %6876 = vmatpush1.bf16.msra.mxu0 %v10511_v41  ;;  %v12768_v52 = vadd.f32 %v4736_v15, %v12622_v46  ;;  %v12771_v0 = vadd.f32 %v4675_v48, %v12624_v5  ;;  %v4738_v47 = vpop.f32.mrb[97].mxu1  ;;  %v4677_v7 = vpop.f32.mrb[98].mxu0  ;;  %v6187_v41 = vld [vmem:[#allocation8 + $0xb00] sm:$0xff] }
 0x3db   :  { %6939 = vmatpush1.bf16.msra.mxu1 %v10513_v12  ;;  %v12774_v54 = vadd.f32 %v4738_v47, %v12626_v32  ;;  %6877 = vmatprep.subr.bf16.mxu0 %v10520_v9  ;;  %v12777_v2 = vadd.f32 %v4677_v7, %v12628_v40  ;;  %v4740_v50 = vpop.f32.mrb[98].mxu1  ;;  %v4679_v35 = vpop.f32.mrb[99].mxu0  ;;  %v6184_v40 = vld [vmem:[#allocation8 + $0xae8] sm:$0xff]  ;;  %v6195_v48 = vld [vmem:[#allocation8 + $0xb40] sm:$0xff] }
 0x3dc   :  { %6940 = vmatprep.subr.bf16.mxu1 %v10522_v17  ;;  %v12780_v46 = vadd.f32 %v4740_v50, %v12630_v55  ;;  %v12783_v5 = vadd.f32 %v4679_v35, %v12632_v43  ;;  %v4742_v49 = vpop.f32.mrb[99].mxu1  ;;  %v10538_v55 = vcombine.high %v6180_v42, %v6184_v40  ;;  %v6191_v43 = vld [vmem:[#allocation8 + $0xb20] sm:$0xff]  ;;  %v6188_v12 = vld [vmem:[#allocation8 + $0xb08] sm:$0xff] }
 0x3dd   :  { %v12786_v32 = vadd.f32 %v4742_v49, %v12634_v44  ;;  %v6192_v9 = vld [vmem:[#allocation8 + $0xb28] sm:$0xff]  ;;  %v10537_v44 = vcombine.low %v6180_v42, %v6184_v40  ;;  %v10544_v17 = vcombine.high %v6187_v41, %v6191_v43  ;;  %v10543_v62 = vcombine.low %v6187_v41, %v6191_v43  ;;  %v6203_v7 = vld [vmem:[#allocation8 + $0xb80] sm:$0xff] }
 0x3de   :  { %6878 = vmatpush1.bf16.msra.mxu0 %v10519_v22  ;;  %v10546_v15 = vcombine.high %v6188_v12, %v6192_v9  ;;  %v6200_v47 = vld [vmem:[#allocation8 + $0xb68] sm:$0xff]  ;;  %v10545_v33 = vcombine.low %v6188_v12, %v6192_v9  ;;  %v10552_v22 = vcombine.high %v6195_v48, %v6199_v53  ;;  %v6207_v50 = vld [vmem:[#allocation8 + $0xba0] sm:$0xff]  ;;  %v10551_v49 = vcombine.low %v6195_v48, %v6199_v53  ;;  %v6093_v12 = vld [vmem:[#allocation8 + $0x810] sm:$0xff] }
 0x3df   :  { %6941 = vmatpush1.bf16.msra.mxu1 %v10521_v14  ;;  %6879 = vmatprep.subr.bf16.mxu0 %v10528_v20  ;;  %v10554_v14 = vcombine.high %v6196_v58, %v6200_v47  ;;  %v6204_v35 = vld [vmem:[#allocation8 + $0xb88] sm:$0xff]  ;;  %v10560_v18 = vcombine.high %v6203_v7, %v6207_v50  ;;  %v6211_v42 = vld [vmem:[#allocation8 + $0xbc0] sm:$0xff]  ;;  %v6097_v9 = vld [vmem:[#allocation8 + $0x830] sm:$0xff] }
 0x3e0   :  { %6942 = vmatprep.subr.bf16.mxu1 %v10530_v59  ;;  %v6208_v20 = vld [vmem:[#allocation8 + $0xba8] sm:$0xff]  ;;  %v10553_v59 = vcombine.low %v6196_v58, %v6200_v47  ;;  %v6215_v40 = vld [vmem:[#allocation8 + $0xbe0] sm:$0xff]  ;;  %v10452_v48 = vcombine.high %v6093_v12, %v6097_v9  ;;  %v6101_v58 = vld [vmem:[#allocation8 + $0x850] sm:$0xff] }
 0x3e1   :  { %v10562_v10 = vcombine.high %v6204_v35, %v6208_v20  ;;  %v10568_v41 = vcombine.high %v6211_v42, %v6215_v40  ;;  %v6105_v47 = vld [vmem:[#allocation8 + $0x870] sm:$0xff] }
 0x3e2   :  { %6880 = vmatpush1.bf16.msra.mxu0 %v10527_v16  ;;  %v6212_v16 = vld [vmem:[#allocation8 + $0xbc8] sm:$0xff] }
 0x3e3   :  { %6943 = vmatpush1.bf16.msra.mxu1 %v10529_v34  ;;  %6881 = vmatprep.subr.bf16.mxu0 %v10536_v23  ;;  %v6216_v34 = vld [vmem:[#allocation8 + $0xbe8] sm:$0xff]  ;;  %v10559_v23 = vcombine.low %v6203_v7, %v6207_v50  ;;  %v10460_v7 = vcombine.high %v6101_v58, %v6105_v47  ;;  %v14160_v50 = vld [vmem:[#allocation51_spill] sm:$0xff] }
 0x3e4   :  { %6944 = vmatprep.subr.bf16.mxu1 %v10538_v55  ;;  %v10561_v55 = vcombine.low %v6204_v35, %v6208_v20  ;;  %v10570_v43 = vcombine.high %v6212_v16, %v6216_v34  ;;  %v6109_v20 = vld [vmem:[#allocation8 + $0x890] sm:$0xff] }
 0x3e6   :  { %6882 = vmatpush1.bf16.msra.mxu0 %v10535_v1  ;;  %v6094_v1 = vld [vmem:[#allocation8 + $0x818] sm:$0xff] }
 0x3e7   :  { %6945 = vmatpush1.bf16.msra.mxu1 %v10537_v44  ;;  %6883 = vmatprep.subr.bf16.mxu0 %v10544_v17  ;;  %v6098_v44 = vld [vmem:[#allocation8 + $0x838] sm:$0xff]  ;;  %v10567_v17 = vcombine.low %v6211_v42, %v6215_v40 }
 0x3e8   :  { %6946 = vmatprep.subr.bf16.mxu1 %v10546_v15  ;;  %v10569_v15 = vcombine.low %v6212_v16, %v6216_v34  ;;  %v10454_v53 = vcombine.high %v6094_v1, %v6098_v44  ;;  %v6117_v34 = vld [vmem:[#allocation8 + $0x8d0] sm:$0xff] }
 0x3ea   :  { %6884 = vmatpush1.bf16.msra.mxu0 %v10543_v62  ;;  %v6102_v62 = vld [vmem:[#allocation8 + $0x858] sm:$0xff] }
 0x3eb   :  { %6947 = vmatpush1.bf16.msra.mxu1 %v10545_v33  ;;  %6885 = vmatprep.subr.bf16.mxu0 %v10552_v22  ;;  %v6106_v33 = vld [vmem:[#allocation8 + $0x878] sm:$0xff]  ;;  %v10451_v22 = vcombine.low %v6093_v12, %v6097_v9 }
 0x3ec   :  { %6948 = vmatprep.subr.bf16.mxu1 %v10554_v14  ;;  %v10453_v14 = vcombine.low %v6094_v1, %v6098_v44  ;;  %v10462_v35 = vcombine.high %v6102_v62, %v6106_v33  ;;  %v10461_v42 = vcombine.low %v6102_v62, %v6106_v33  ;;  %v6125_v44 = vld [vmem:[#allocation8 + $0x910] sm:$0xff] }
 0x3ed   :  { %v6133_v33 = vld [vmem:[#allocation8 + $0x950] sm:$0xff] }
 0x3ee   :  { %6886 = vmatpush1.bf16.msra.mxu0 %v10551_v49  ;;  %v6113_v49 = vld [vmem:[#allocation8 + $0x8b0] sm:$0xff] }
 0x3ef   :  { %6949 = vmatpush1.bf16.msra.mxu1 %v10553_v59  ;;  %6887 = vmatprep.subr.bf16.mxu0 %v10560_v18  ;;  %v6110_v59 = vld [vmem:[#allocation8 + $0x898] sm:$0xff]  ;;  %v10468_v40 = vcombine.high %v6109_v20, %v6113_v49 }
 0x3f0   :  { %6950 = vmatprep.subr.bf16.mxu1 %v10562_v10  ;;  %v6114_v18 = vld [vmem:[#allocation8 + $0x8b8] sm:$0xff]  ;;  %v10459_v10 = vcombine.low %v6101_v58, %v6105_v47 }
 0x3f1   :  { %v10470_v16 = vcombine.high %v6110_v59, %v6114_v18  ;;  %v10469_v12 = vcombine.low %v6110_v59, %v6114_v18 }
 0x3f2   :  { %6888 = vmatpush1.bf16.msra.mxu0 %v10559_v23  ;;  %v6121_v23 = vld [vmem:[#allocation8 + $0x8f0] sm:$0xff] }
 0x3f3   :  { %6951 = vmatpush1.bf16.msra.mxu1 %v10561_v55  ;;  %6889 = vmatprep.subr.bf16.mxu0 %v10568_v41  ;;  %v6118_v55 = vld [vmem:[#allocation8 + $0x8d8] sm:$0xff]  ;;  %v10476_v9 = vcombine.high %v6117_v34, %v6121_v23 }
 0x3f4   :  { %6952 = vmatprep.subr.bf16.mxu1 %v10570_v43  ;;  %v6122_v41 = vld [vmem:[#allocation8 + $0x8f8] sm:$0xff]  ;;  %v10467_v43 = vcombine.low %v6109_v20, %v6113_v49 }
 0x3f5   :  { %v10478_v1 = vcombine.high %v6118_v55, %v6122_v41  ;;  %v10477_v58 = vcombine.low %v6118_v55, %v6122_v41  ;;  %v6142_v55 = vld [vmem:[#allocation8 + $0x998] sm:$0xff] }
 0x3f6   :  { %6890 = vmatpush1.bf16.msra.mxu0 %v10567_v17  ;;  %v6129_v17 = vld [vmem:[#allocation8 + $0x930] sm:$0xff]  ;;  %v6146_v41 = vld [vmem:[#allocation8 + $0x9b8] sm:$0xff] }
 0x3f7   :  { %6953 = vmatpush1.bf16.msra.mxu1 %v10569_v15  ;;  %6985 = vmatprep.subr.bf16.mxu0 %v10452_v48  ;;  %v6126_v15 = vld [vmem:[#allocation8 + $0x918] sm:$0xff]  ;;  %v10484_v47 = vcombine.high %v6125_v44, %v6129_v17 }
 0x3f8   :  { %7048 = vmatprep.subr.bf16.mxu1 %v10454_v53  ;;  %v6130_v48 = vld [vmem:[#allocation8 + $0x938] sm:$0xff]  ;;  %v10475_v53 = vcombine.low %v6117_v34, %v6121_v23 }
 0x3f9   :  { %6892 = vmatmul.mubr.bf16.vlgmr.msra.gmra.mrb[136].mxu0 %v14160_v50  ;;  %v10486_v62 = vcombine.high %v6126_v15, %v6130_v48  ;;  %v10485_v20 = vcombine.low %v6126_v15, %v6130_v48 }
 0x3fa   :  { %6955 = vmatmul.mubr.bf16.vlgmr.msra.gmra.mrb[136].mxu1 %v14160_v50  ;;  %6901 = vmatprep.mubr.bf16.mxu0 %v12454_v56 }
 0x3fb   :  { %6964 = vmatprep.mubr.bf16.mxu1 %v12454_v56  ;;  %6986 = vmatpush1.bf16.msra.mxu0 %v10451_v22  ;;  %v6137_v22 = vld [vmem:[#allocation8 + $0x970] sm:$0xff] }
 0x3fc   :  { %7049 = vmatpush1.bf16.msra.mxu1 %v10453_v14  ;;  %6987 = vmatprep.subr.bf16.mxu0 %v10460_v7  ;;  %v6134_v14 = vld [vmem:[#allocation8 + $0x958] sm:$0xff]  ;;  %v10492_v49 = vcombine.high %v6133_v33, %v6137_v22  ;;  %v10491_v23 = vcombine.low %v6133_v33, %v6137_v22  ;;  %v10502_v33 = vcombine.high %v6142_v55, %v6146_v41  ;;  %v6149_v22 = vld [vmem:[#allocation8 + $0x9d0] sm:$0xff] }
 0x3fd   :  { %7050 = vmatprep.subr.bf16.mxu1 %v10462_v35  ;;  %v6138_v7 = vld [vmem:[#allocation8 + $0x978] sm:$0xff]  ;;  %v10483_v35 = vcombine.low %v6125_v44, %v6129_v17  ;;  %v14161_v17 = vld [vmem:[#allocation36_spill] sm:$0xff] }
 0x3fe   :  { %v10494_v18 = vcombine.high %v6134_v14, %v6138_v7 }
 0x3ff   :  { %6988 = vmatpush1.bf16.msra.mxu0 %v10459_v10  ;;  %v6141_v10 = vld [vmem:[#allocation8 + $0x990] sm:$0xff] }
 0x400   :  { %7051 = vmatpush1.bf16.msra.mxu1 %v10461_v42  ;;  %6989 = vmatprep.subr.bf16.mxu0 %v10468_v40  ;;  %v6145_v42 = vld [vmem:[#allocation8 + $0x9b0] sm:$0xff] }
 0x401   :  { %6902 = vmatmul.mubr.bf16.gmra.mrb[140].mxu0 %v12460_v25  ;;  %7052 = vmatprep.subr.bf16.mxu1 %v10470_v16 }
 0x402   :  { %6965 = vmatmul.mubr.bf16.gmra.mrb[140].mxu1 %v12460_v25  ;;  %6911 = vmatprep.mubr.bf16.mxu0 %v12465_v8 }
 0x403   :  { %6974 = vmatprep.mubr.bf16.mxu1 %v12465_v8  ;;  %6990 = vmatpush1.bf16.msra.mxu0 %v10467_v43 }
 0x404   :  { %7053 = vmatpush1.bf16.msra.mxu1 %v10469_v12  ;;  %6991 = vmatprep.subr.bf16.mxu0 %v10476_v9 }
 0x405   :  { %7054 = vmatprep.subr.bf16.mxu1 %v10478_v1  ;;  %v10493_v1 = vcombine.low %v6134_v14, %v6138_v7  ;;  %v6153_v14 = vld [vmem:[#allocation8 + $0x9f0] sm:$0xff] }
 0x407   :  { %6992 = vmatpush1.bf16.msra.mxu0 %v10475_v53 }
 0x408   :  { %7055 = vmatpush1.bf16.msra.mxu1 %v10477_v58  ;;  %6993 = vmatprep.subr.bf16.mxu0 %v10484_v47 }
 0x409   :  { %6912 = vmatmul.mubr.bf16.gmra.mrb[144].mxu0 %v12470_v6  ;;  %7056 = vmatprep.subr.bf16.mxu1 %v10486_v62  ;;  %v4779_v59 = vpop.f32.mrb[100].mxu0 }
 0x40a   :  { %6975 = vmatmul.mubr.bf16.gmra.mrb[144].mxu1 %v12470_v6  ;;  %7017 = vmatprep.mubr.bf16.mxu0 %v12448_v38  ;;  %v12800_v40 = vadd.f32 %v4779_v59, %v12656_v60  ;;  %v4842_v16 = vpop.f32.mrb[100].mxu1  ;;  %v4781_v34 = vpop.f32.mrb[101].mxu0  ;;  %v10501_v59 = vcombine.low %v6142_v55, %v6146_v41  ;;  %v10507_v41 = vcombine.low %v6149_v22, %v6153_v14 }
 0x40b   :  { %6994 = vmatpush1.bf16.msra.mxu0 %v10483_v35  ;;  %7080 = vmatprep.mubr.bf16.mxu1 %v12448_v38  ;;  %v12804_v43 = vadd.f32 %v4842_v16, %v12658_v31  ;;  %v12807_v12 = vadd.f32 %v4781_v34, %v12660_v63  ;;  %v4844_v9 = vpop.f32.mrb[101].mxu1  ;;  %v4783_v44 = vpop.f32.mrb[102].mxu0  ;;  %v10500_v38 = vcombine.high %v6141_v10, %v6145_v42  ;;  %v14162_v31 = vld [vmem:[#allocation37_spill] sm:$0xff]  ;;  %v14163_v63 = vld [vmem:[#allocation38_spill] sm:$0xff] }
 0x40c   :  { %7057 = vmatpush1.bf16.msra.mxu1 %v10485_v20  ;;  %v12810_v60 = vadd.f32 %v4844_v9, %v12662_v45  ;;  %6995 = vmatprep.subr.bf16.mxu0 %v10492_v49  ;;  %v12813_v15 = vadd.f32 %v4783_v44, %v14161_v17  ;;  %v4846_v48 = vpop.f32.mrb[102].mxu1  ;;  %v4785_v53 = vpop.f32.mrb[103].mxu0  ;;  %v14165_v45 = vld [vmem:[#allocation43_spill] sm:$0xff]  ;;  %v10499_v49 = vcombine.low %v6141_v10, %v6145_v42  ;;  %v6157_v9 = vld [vmem:[#allocation8 + $0xa10] sm:$0xff]  ;;  %v14167_v17 = vld [vmem:[#allocation44_spill] sm:$0xff] }
 0x40d   :  { %7058 = vmatprep.subr.bf16.mxu1 %v10494_v18  ;;  %v12816_v58 = vadd.f32 %v4846_v48, %v14162_v31  ;;  %v12819_v47 = vadd.f32 %v4785_v53, %v14163_v63  ;;  %v4848_v62 = vpop.f32.mrb[103].mxu1  ;;  %v6150_v35 = vld [vmem:[#allocation8 + $0x9d8] sm:$0xff]  ;;  %v10508_v18 = vcombine.high %v6149_v22, %v6153_v14  ;;  %v6161_v44 = vld [vmem:[#allocation8 + $0xa30] sm:$0xff] }
 0x40e   :  { %v12822_v7 = vadd.f32 %v4848_v62, %v14165_v45  ;;  %v6154_v20 = vld [vmem:[#allocation8 + $0x9f8] sm:$0xff]  ;;  %v14169_v45 = vld [vmem:[#allocation45_spill] sm:$0xff] }
 0x40f   :  { %14164 = vst [vmem:[#allocation51_spill] sm:$0xff] %v12819_v47  ;;  %6996 = vmatpush1.bf16.msra.mxu0 %v10491_v23  ;;  %v10510_v34 = vcombine.high %v6150_v35, %v6154_v20  ;;  %v6158_v63 = vld [vmem:[#allocation8 + $0xa18] sm:$0xff]  ;;  %v10516_v47 = vcombine.high %v6157_v9, %v6161_v44 }
 0x410   :  { %14166 = vst [vmem:[#allocation36_spill] sm:$0xff] %v12822_v7  ;;  %7059 = vmatpush1.bf16.msra.mxu1 %v10493_v1  ;;  %6997 = vmatprep.subr.bf16.mxu0 %v10500_v38  ;;  %v6162_v62 = vld [vmem:[#allocation8 + $0xa38] sm:$0xff]  ;;  %v10509_v1 = vcombine.low %v6150_v35, %v6154_v20  ;;  %v6165_v35 = vld [vmem:[#allocation8 + $0xa50] sm:$0xff] }
 0x411   :  { %7060 = vmatprep.subr.bf16.mxu1 %v10502_v33  ;;  %v4789_v16 = vpop.f32.mrb[104].mxu0  ;;  %v14171_v10 = vld [vmem:[#allocation46_spill] sm:$0xff]  ;;  %v14173_v33 = vld [vmem:[#allocation47_spill] sm:$0xff]  ;;  %v10518_v14 = vcombine.high %v6158_v63, %v6162_v62 }
 0x412   :  { %v12825_v48 = vadd.f32 %v4789_v16, %v14167_v17  ;;  %v4852_v53 = vpop.f32.mrb[104].mxu1  ;;  %v4791_v31 = vpop.f32.mrb[105].mxu0  ;;  %v14175_v16 = vld [vmem:[#allocation48_spill] sm:$0xff]  ;;  %v6169_v20 = vld [vmem:[#allocation8 + $0xa70] sm:$0xff] }
 0x413   :  { %6998 = vmatpush1.bf16.msra.mxu0 %v10499_v49  ;;  %v12828_v23 = vadd.f32 %v4852_v53, %v14169_v45  ;;  %v12831_v42 = vadd.f32 %v4791_v31, %v14171_v10  ;;  %v4854_v55 = vpop.f32.mrb[105].mxu1  ;;  %v4793_v38 = vpop.f32.mrb[106].mxu0  ;;  %v14177_v53 = vld [vmem:[#allocation49_spill] sm:$0xff]  ;;  %v14179_v31 = vld [vmem:[#allocation50_spill] sm:$0xff] }
 0x414   :  { %14168 = vst [vmem:[#allocation37_spill] sm:$0xff] %v12825_v48  ;;  %7061 = vmatpush1.bf16.msra.mxu1 %v10501_v59  ;;  %v12834_v7 = vadd.f32 %v4854_v55, %v14173_v33  ;;  %6999 = vmatprep.subr.bf16.mxu0 %v10508_v18  ;;  %v12837_v17 = vadd.f32 %v4793_v38, %v14175_v16  ;;  %v4856_v48 = vpop.f32.mrb[106].mxu1  ;;  %v4795_v49 = vpop.f32.mrb[107].mxu0  ;;  %v14181_v59 = vld [vmem:[#allocation53_spill] sm:$0xff]  ;;  %v6166_v18 = vld [vmem:[#allocation8 + $0xa58] sm:$0xff] }
 0x415   :  { %14170 = vst [vmem:[#allocation38_spill] sm:$0xff] %v12828_v23  ;;  %14172 = vst [vmem:[#allocation43_spill] sm:$0xff] %v12831_v42  ;;  %7062 = vmatprep.subr.bf16.mxu1 %v10510_v34  ;;  %v12840_v45 = vadd.f32 %v4856_v48, %v14177_v53  ;;  %v12843_v10 = vadd.f32 %v4795_v49, %v14179_v31  ;;  %v4858_v22 = vpop.f32.mrb[107].mxu1  ;;  %v6170_v38 = vld [vmem:[#allocation8 + $0xa78] sm:$0xff]  ;;  %v10515_v33 = vcombine.low %v6157_v9, %v6161_v44  ;;  %v6173_v49 = vld [vmem:[#allocation8 + $0xa90] sm:$0xff] }
 0x416   :  { %14174 = vst [vmem:[#allocation44_spill] sm:$0xff] %v12834_v7  ;;  %14176 = vst [vmem:[#allocation45_spill] sm:$0xff] %v12837_v17  ;;  %v12846_v55 = vadd.f32 %v4858_v22, %v14181_v59  ;;  %v10517_v34 = vcombine.low %v6158_v63, %v6162_v62  ;;  %v10524_v16 = vcombine.high %v6165_v35, %v6169_v20  ;;  %v6177_v31 = vld [vmem:[#allocation8 + $0xab0] sm:$0xff]  ;;  %v6174_v22 = vld [vmem:[#allocation8 + $0xa98] sm:$0xff] }
 0x417   :  { %14178 = vst [vmem:[#allocation46_spill] sm:$0xff] %v12840_v45  ;;  %14180 = vst [vmem:[#allocation47_spill] sm:$0xff] %v12843_v10  ;;  %7000 = vmatpush1.bf16.msra.mxu0 %v10507_v41  ;;  %v10526_v53 = vcombine.high %v6166_v18, %v6170_v38  ;;  %v14183_v10 = vld [vmem:[#allocation52_spill] sm:$0xff]  ;;  %v6178_v59 = vld [vmem:[#allocation8 + $0xab8] sm:$0xff]  ;;  %v10523_v63 = vcombine.low %v6165_v35, %v6169_v20  ;;  %v10525_v62 = vcombine.low %v6166_v18, %v6170_v38 }
 0x418   :  { %14182 = vst [vmem:[#allocation48_spill] sm:$0xff] %v12846_v55  ;;  %7063 = vmatpush1.bf16.msra.mxu1 %v10509_v1  ;;  %7001 = vmatprep.subr.bf16.mxu0 %v10516_v47  ;;  %v14185_v55 = vld [vmem:[#allocation54_spill] sm:$0xff]  ;;  %v14186_v9 = vld [vmem:[#allocation55_spill] sm:$0xff]  ;;  %v10532_v23 = vcombine.high %v6173_v49, %v6177_v31  ;;  %v10534_v20 = vcombine.high %v6174_v22, %v6178_v59 }
 0x419   :  { %7064 = vmatprep.subr.bf16.mxu1 %v10518_v14  ;;  %v4799_v48 = vpop.f32.mrb[108].mxu0  ;;  %v14187_v14 = vld [vmem:[#allocation56_spill] sm:$0xff]  ;;  %v6181_v18 = vld [vmem:[#allocation8 + $0xad0] sm:$0xff] }
 0x41a   :  { %v12849_v45 = vadd.f32 %v4799_v48, %v14183_v10  ;;  %v4862_v17 = vpop.f32.mrb[108].mxu1  ;;  %v4801_v7 = vpop.f32.mrb[109].mxu0  ;;  %v14188_v10 = vld [vmem:[#allocation57_spill] sm:$0xff] }
 0x41b   :  { %7002 = vmatpush1.bf16.msra.mxu0 %v10515_v33  ;;  %v12852_v41 = vadd.f32 %v4862_v17, %v14185_v55  ;;  %v12855_v47 = vadd.f32 %v4801_v7, %v14186_v9  ;;  %v4864_v44 = vpop.f32.mrb[109].mxu1  ;;  %v4803_v1 = vpop.f32.mrb[110].mxu0  ;;  %v14189_v17 = vld [vmem:[#allocation58_spill] sm:$0xff]  ;;  %v14190_v7 = vld [vmem:[#allocation59_spill] sm:$0xff] }
 0x41c   :  { %14184 = vst [vmem:[#allocation49_spill] sm:$0xff] %v12849_v45  ;;  %7065 = vmatpush1.bf16.msra.mxu1 %v10517_v34  ;;  %v12858_v42 = vadd.f32 %v4864_v44, %v14187_v14  ;;  %7003 = vmatprep.subr.bf16.mxu0 %v10524_v16  ;;  %v12861_v48 = vadd.f32 %v4803_v1, %v14188_v10  ;;  %v4866_v45 = vpop.f32.mrb[110].mxu1  ;;  %v4805_v33 = vpop.f32.mrb[111].mxu0  ;;  %v6185_v38 = vld [vmem:[#allocation8 + $0xaf0] sm:$0xff]  ;;  %v6182_v16 = vld [vmem:[#allocation8 + $0xad8] sm:$0xff] }
 0x41d   :  { %7066 = vmatprep.subr.bf16.mxu1 %v10526_v53  ;;  %v12864_v55 = vadd.f32 %v4866_v45, %v14189_v17  ;;  %v12867_v9 = vadd.f32 %v4805_v33, %v14190_v7  ;;  %v4868_v35 = vpop.f32.mrb[111].mxu1  ;;  %v6186_v44 = vld [vmem:[#allocation8 + $0xaf8] sm:$0xff]  ;;  %v10531_v1 = vcombine.low %v6173_v49, %v6177_v31  ;;  %v10533_v53 = vcombine.low %v6174_v22, %v6178_v59  ;;  %v6189_v10 = vld [vmem:[#allocation8 + $0xb10] sm:$0xff] }
 0x41e   :  { %v12870_v34 = vadd.f32 %v4868_v35, %v12702_v51  ;;  %v10540_v14 = vcombine.high %v6181_v18, %v6185_v38  ;;  %v10542_v45 = vcombine.high %v6182_v16, %v6186_v44  ;;  %v6193_v33 = vld [vmem:[#allocation8 + $0xb30] sm:$0xff]  ;;  %v6190_v17 = vld [vmem:[#allocation8 + $0xb18] sm:$0xff]  ;;  %v10541_v51 = vcombine.low %v6182_v16, %v6186_v44 }
 0x41f   :  { %14191 = vst [vmem:[#allocation50_spill] sm:$0xff] %v12867_v9  ;;  %7004 = vmatpush1.bf16.msra.mxu0 %v10523_v63  ;;  %v6194_v7 = vld [vmem:[#allocation8 + $0xb38] sm:$0xff]  ;;  %v10539_v9 = vcombine.low %v6181_v18, %v6185_v38  ;;  %v10548_v35 = vcombine.high %v6189_v10, %v6193_v33  ;;  %v6197_v63 = vld [vmem:[#allocation8 + $0xb50] sm:$0xff]  ;;  %v10547_v22 = vcombine.low %v6189_v10, %v6193_v33 }
 0x420   :  { %14192 = vst [vmem:[#allocation53_spill] sm:$0xff] %v12870_v34  ;;  %7067 = vmatpush1.bf16.msra.mxu1 %v10525_v62  ;;  %7005 = vmatprep.subr.bf16.mxu0 %v10532_v23  ;;  %v10550_v34 = vcombine.high %v6190_v17, %v6194_v7  ;;  %v6201_v49 = vld [vmem:[#allocation8 + $0xb70] sm:$0xff]  ;;  %v6198_v31 = vld [vmem:[#allocation8 + $0xb58] sm:$0xff]  ;;  %v10549_v59 = vcombine.low %v6190_v17, %v6194_v7 }
 0x421   :  { %7068 = vmatprep.subr.bf16.mxu1 %v10534_v20  ;;  %v6202_v23 = vld [vmem:[#allocation8 + $0xb78] sm:$0xff]  ;;  %v10556_v62 = vcombine.high %v6197_v63, %v6201_v49  ;;  %v6209_v18 = vld [vmem:[#allocation8 + $0xbb0] sm:$0xff]  ;;  %v10555_v16 = vcombine.low %v6197_v63, %v6201_v49  ;;  %v7170_v63 = vld [vmem:[#allocation8 + $0x1420] sm:$0xff] }
 0x422   :  { %v10558_v20 = vcombine.high %v6198_v31, %v6202_v23  ;;  %v6206_v38 = vld [vmem:[#allocation8 + $0xb98] sm:$0xff]  ;;  %v10557_v44 = vcombine.low %v6198_v31, %v6202_v23  ;;  %v6217_v10 = vld [vmem:[#allocation8 + $0xbf0] sm:$0xff]  ;;  %v7167_v49 = vld [vmem:[#allocation8 + $0x1408] sm:$0xff] }
 0x423   :  { %7006 = vmatpush1.bf16.msra.mxu0 %v10531_v1  ;;  %v6205_v1 = vld [vmem:[#allocation8 + $0xb90] sm:$0xff]  ;;  %v6214_v33 = vld [vmem:[#allocation8 + $0xbd8] sm:$0xff] }
 0x424   :  { %7069 = vmatpush1.bf16.msra.mxu1 %v10533_v53  ;;  %7007 = vmatprep.subr.bf16.mxu0 %v10540_v14  ;;  %v6210_v53 = vld [vmem:[#allocation8 + $0xbb8] sm:$0xff]  ;;  %v10564_v14 = vcombine.high %v6205_v1, %v6209_v18  ;;  %v10563_v17 = vcombine.low %v6205_v1, %v6209_v18  ;;  %v7178_v1 = vld [vmem:[#allocation8 + $0x1460] sm:$0xff]  ;;  %v7175_v18 = vld [vmem:[#allocation8 + $0x1448] sm:$0xff] }
 0x425   :  { %7070 = vmatprep.subr.bf16.mxu1 %v10542_v45  ;;  %v10566_v45 = vcombine.high %v6206_v38, %v6210_v53 }
 0x427   :  { %7008 = vmatpush1.bf16.msra.mxu0 %v10539_v9  ;;  %v6213_v9 = vld [vmem:[#allocation8 + $0xbd0] sm:$0xff] }
 0x428   :  { %7071 = vmatpush1.bf16.msra.mxu1 %v10541_v51  ;;  %7009 = vmatprep.subr.bf16.mxu0 %v10548_v35  ;;  %v6218_v51 = vld [vmem:[#allocation8 + $0xbf8] sm:$0xff]  ;;  %v10572_v7 = vcombine.high %v6213_v9, %v6217_v10  ;;  %v10571_v31 = vcombine.low %v6213_v9, %v6217_v10  ;;  %v7182_v9 = vld [vmem:[#allocation8 + $0x1480] sm:$0xff] }
 0x429   :  { %7072 = vmatprep.subr.bf16.mxu1 %v10550_v34  ;;  %v10565_v34 = vcombine.low %v6206_v38, %v6210_v53  ;;  %v10574_v35 = vcombine.high %v6214_v33, %v6218_v51  ;;  %v10573_v23 = vcombine.low %v6214_v33, %v6218_v51  ;;  %v7179_v38 = vld [vmem:[#allocation8 + $0x1468] sm:$0xff]  ;;  %v7186_v10 = vld [vmem:[#allocation8 + $0x14a0] sm:$0xff] }
 0x42a   :  { %v7183_v33 = vld [vmem:[#allocation8 + $0x1488] sm:$0xff] }
 0x42b   :  { %7010 = vmatpush1.bf16.msra.mxu0 %v10547_v22  ;;  %v7166_v22 = vld [vmem:[#allocation8 + $0x1400] sm:$0xff]  ;;  %v7187_v51 = vld [vmem:[#allocation8 + $0x14a8] sm:$0xff] }
 0x42c   :  { %7073 = vmatpush1.bf16.msra.mxu1 %v10549_v59  ;;  %7011 = vmatprep.subr.bf16.mxu0 %v10556_v62  ;;  %v7171_v59 = vld [vmem:[#allocation8 + $0x1428] sm:$0xff]  ;;  %v10576_v62 = vcombine.high %v7166_v22, %v7170_v63  ;;  %v10575_v53 = vcombine.low %v7166_v22, %v7170_v63  ;;  %v7190_v22 = vld [vmem:[#allocation8 + $0x14c0] sm:$0xff] }
 0x42d   :  { %7074 = vmatprep.subr.bf16.mxu1 %v10558_v20  ;;  %v10578_v20 = vcombine.high %v7167_v49, %v7171_v59  ;;  %v7194_v63 = vld [vmem:[#allocation8 + $0x14e0] sm:$0xff] }
 0x42f   :  { %7012 = vmatpush1.bf16.msra.mxu0 %v10555_v16  ;;  %v7174_v16 = vld [vmem:[#allocation8 + $0x1440] sm:$0xff] }
 0x430   :  { %7075 = vmatpush1.bf16.msra.mxu1 %v10557_v44  ;;  %7013 = vmatprep.subr.bf16.mxu0 %v10564_v14  ;;  %v10577_v44 = vcombine.low %v7167_v49, %v7171_v59  ;;  %v10584_v14 = vcombine.high %v7174_v16, %v7178_v1  ;;  %v7191_v49 = vld [vmem:[#allocation8 + $0x14c8] sm:$0xff] }
 0x431   :  { %7076 = vmatprep.subr.bf16.mxu1 %v10566_v45  ;;  %v10586_v45 = vcombine.high %v7175_v18, %v7179_v38  ;;  %v7195_v59 = vld [vmem:[#allocation8 + $0x14e8] sm:$0xff] }
 0x433   :  { %7014 = vmatpush1.bf16.msra.mxu0 %v10563_v17  ;;  %v10583_v17 = vcombine.low %v7174_v16, %v7178_v1  ;;  %v7199_v16 = vld [vmem:[#allocation8 + $0x1508] sm:$0xff] }
 0x434   :  { %7077 = vmatpush1.bf16.msra.mxu1 %v10565_v34  ;;  %7015 = vmatprep.subr.bf16.mxu0 %v10572_v7  ;;  %v10585_v34 = vcombine.low %v7175_v18, %v7179_v38  ;;  %v10592_v7 = vcombine.high %v7182_v9, %v7186_v10  ;;  %v7203_v1 = vld [vmem:[#allocation8 + $0x1528] sm:$0xff]  ;;  %v10599_v18 = vcombine.low %v7190_v22, %v7194_v63 }
 0x435   :  { %7078 = vmatprep.subr.bf16.mxu1 %v10574_v35  ;;  %v10594_v35 = vcombine.high %v7183_v33, %v7187_v51  ;;  %v10601_v38 = vcombine.low %v7191_v49, %v7195_v59 }
 0x437   :  { %7016 = vmatpush1.bf16.msra.mxu0 %v10571_v31  ;;  %v10593_v31 = vcombine.low %v7183_v33, %v7187_v51  ;;  %v10609_v33 = vcombine.low %v7199_v16, %v7203_v1 }
 0x438   :  { %7079 = vmatpush1.bf16.msra.mxu1 %v10573_v23  ;;  %7934 = vmatprep.subr.bf16.mxu0 %v10576_v62  ;;  %v10600_v23 = vcombine.high %v7190_v22, %v7194_v63  ;;  %v7198_v62 = vld [vmem:[#allocation8 + $0x1500] sm:$0xff] }
 0x439   :  { %7997 = vmatprep.subr.bf16.mxu1 %v10578_v20  ;;  %v7202_v20 = vld [vmem:[#allocation8 + $0x1520] sm:$0xff] }
 0x43a   :  { %7018 = vmatmul.mubr.bf16.vlgmr.msra.gmra.mrb[148].mxu0 %v14160_v50 }
 0x43b   :  { %7081 = vmatmul.mubr.bf16.vlgmr.msra.gmra.mrb[148].mxu1 %v14160_v50  ;;  %7027 = vmatprep.mubr.bf16.mxu0 %v12454_v56  ;;  %v10591_v50 = vcombine.low %v7182_v9, %v7186_v10  ;;  %v7207_v9 = vld [vmem:[#allocation8 + $0x1548] sm:$0xff] }
 0x43c   :  { %7090 = vmatprep.mubr.bf16.mxu1 %v12454_v56  ;;  %7935 = vmatpush1.bf16.msra.mxu0 %v10575_v53  ;;  %v10602_v56 = vcombine.high %v7191_v49, %v7195_v59  ;;  %v10608_v53 = vcombine.high %v7198_v62, %v7202_v20  ;;  %v7211_v10 = vld [vmem:[#allocation8 + $0x1568] sm:$0xff] }
 0x43d   :  { %7998 = vmatpush1.bf16.msra.mxu1 %v10577_v44  ;;  %7936 = vmatprep.subr.bf16.mxu0 %v10584_v14  ;;  %v10610_v44 = vcombine.high %v7199_v16, %v7203_v1  ;;  %v7206_v14 = vld [vmem:[#allocation8 + $0x1540] sm:$0xff] }
 0x43e   :  { %7999 = vmatprep.subr.bf16.mxu1 %v10586_v45  ;;  %v7210_v45 = vld [vmem:[#allocation8 + $0x1560] sm:$0xff] }
 0x43f   :  { %v10616_v51 = vcombine.high %v7206_v14, %v7210_v45  ;;  %v10615_v59 = vcombine.low %v7206_v14, %v7210_v45  ;;  %v7222_v14 = vld [vmem:[#allocation8 + $0x15c0] sm:$0xff] }
 0x440   :  { %7937 = vmatpush1.bf16.msra.mxu0 %v10583_v17  ;;  %v10618_v17 = vcombine.high %v7207_v9, %v7211_v10  ;;  %v7226_v45 = vld [vmem:[#allocation8 + $0x15e0] sm:$0xff] }
 0x441   :  { %8000 = vmatpush1.bf16.msra.mxu1 %v10585_v34  ;;  %7938 = vmatprep.subr.bf16.mxu0 %v10592_v7  ;;  %v7214_v34 = vld [vmem:[#allocation8 + $0x1580] sm:$0xff] }
 0x442   :  { %7028 = vmatmul.mubr.bf16.gmra.mrb[152].mxu0 %v12460_v25  ;;  %8001 = vmatprep.subr.bf16.mxu1 %v10594_v35  ;;  %v7218_v7 = vld [vmem:[#allocation8 + $0x15a0] sm:$0xff] }
 0x443   :  { %7091 = vmatmul.mubr.bf16.gmra.mrb[152].mxu1 %v12460_v25  ;;  %7037 = vmatprep.mubr.bf16.mxu0 %v12465_v8  ;;  %v10607_v25 = vcombine.low %v7198_v62, %v7202_v20  ;;  %v14193_v35 = vld [vmem:[#allocation27_spill] sm:$0xff]  ;;  %v10617_v62 = vcombine.low %v7207_v9, %v7211_v10  ;;  %v7223_v9 = vld [vmem:[#allocation8 + $0x15c8] sm:$0xff]  ;;  %v10623_v10 = vcombine.low %v7214_v34, %v7218_v7 }
 0x444   :  { %7100 = vmatprep.mubr.bf16.mxu1 %v12465_v8  ;;  %7939 = vmatpush1.bf16.msra.mxu0 %v10591_v50  ;;  %v7215_v50 = vld [vmem:[#allocation8 + $0x1588] sm:$0xff] }
 0x445   :  { %8002 = vmatpush1.bf16.msra.mxu1 %v10593_v31  ;;  %7940 = vmatprep.subr.bf16.mxu0 %v10600_v23  ;;  %v7219_v31 = vld [vmem:[#allocation8 + $0x15a8] sm:$0xff] }
 0x446   :  { %8003 = vmatprep.subr.bf16.mxu1 %v10602_v56 }
 0x448   :  { %7941 = vmatpush1.bf16.msra.mxu0 %v10599_v18 }
 0x449   :  { %8004 = vmatpush1.bf16.msra.mxu1 %v10601_v38  ;;  %7942 = vmatprep.subr.bf16.mxu0 %v10608_v53  ;;  %v10624_v38 = vcombine.high %v7214_v34, %v7218_v7 }
 0x44a   :  { %7038 = vmatmul.mubr.bf16.gmra.mrb[156].mxu0 %v12470_v6  ;;  %8005 = vmatprep.subr.bf16.mxu1 %v10610_v44  ;;  %v5722_v8 = vpop.f32.mrb[112].mxu0  ;;  %v10626_v44 = vcombine.high %v7215_v50, %v7219_v31 }
 0x44b   :  { %7101 = vmatmul.mubr.bf16.gmra.mrb[156].mxu1 %v12470_v6  ;;  %7966 = vmatprep.mubr.bf16.mxu0 %v14193_v35  ;;  %v12884_v22 = vadd.f32 %v5722_v8, %v12716_v29  ;;  %v5785_v63 = vpop.f32.mrb[112].mxu1  ;;  %v5724_v49 = vpop.f32.mrb[113].mxu0  ;;  %v7234_v8 = vld [vmem:[#allocation8 + $0x1620] sm:$0xff] }
 0x44c   :  { %7943 = vmatpush1.bf16.msra.mxu0 %v10607_v25  ;;  %8029 = vmatprep.mubr.bf16.mxu1 %v14193_v35  ;;  %v12888_v23 = vadd.f32 %v5785_v63, %v12720_v4  ;;  %v12891_v56 = vadd.f32 %v5724_v49, %v12723_v3  ;;  %v5787_v6 = vpop.f32.mrb[113].mxu1  ;;  %v5726_v20 = vpop.f32.mrb[114].mxu0  ;;  %v10625_v25 = vcombine.low %v7215_v50, %v7219_v31 }
 0x44d   :  { %8006 = vmatpush1.bf16.msra.mxu1 %v10609_v33  ;;  %v12894_v29 = vadd.f32 %v5787_v6, %v12726_v28  ;;  %7944 = vmatprep.subr.bf16.mxu0 %v10616_v51  ;;  %v12897_v16 = vadd.f32 %v5726_v20, %v12729_v26  ;;  %v5789_v1 = vpop.f32.mrb[114].mxu1  ;;  %v5728_v18 = vpop.f32.mrb[115].mxu0  ;;  %v7227_v26 = vld [vmem:[#allocation8 + $0x15e8] sm:$0xff]  ;;  %v10632_v33 = vcombine.high %v7222_v14, %v7226_v45 }
 0x44e   :  { %8007 = vmatprep.subr.bf16.mxu1 %v10618_v17  ;;  %v12900_v4 = vadd.f32 %v5789_v1, %v12732_v37  ;;  %v12903_v3 = vadd.f32 %v5728_v18, %v12735_v61  ;;  %v5791_v53 = vpop.f32.mrb[115].mxu1  ;;  %v10634_v51 = vcombine.high %v7223_v9, %v7227_v26  ;;  %v7230_v61 = vld [vmem:[#allocation8 + $0x1600] sm:$0xff]  ;;  %v7235_v6 = vld [vmem:[#allocation8 + $0x1628] sm:$0xff]  ;;  %v10631_v50 = vcombine.low %v7222_v14, %v7226_v45 }
 0x44f   :  { %v12906_v28 = vadd.f32 %v5791_v53, %v12738_v30  ;;  %v7231_v30 = vld [vmem:[#allocation8 + $0x1608] sm:$0xff]  ;;  %v10633_v31 = vcombine.low %v7223_v9, %v7227_v26  ;;  %v7238_v14 = vld [vmem:[#allocation8 + $0x1640] sm:$0xff] }
 0x450   :  { %7945 = vmatpush1.bf16.msra.mxu0 %v10615_v59  ;;  %v7242_v45 = vld [vmem:[#allocation8 + $0x1660] sm:$0xff]  ;;  %v7239_v9 = vld [vmem:[#allocation8 + $0x1648] sm:$0xff] }
 0x451   :  { %8008 = vmatpush1.bf16.msra.mxu1 %v10617_v62  ;;  %7946 = vmatprep.subr.bf16.mxu0 %v10624_v38  ;;  %v10640_v38 = vcombine.high %v7230_v61, %v7234_v8  ;;  %v12932_v26 = vld [vmem:[#allocation10] sm:$0xff] }
 0x452   :  { %8009 = vmatprep.subr.bf16.mxu1 %v10626_v44  ;;  %v5732_v37 = vpop.f32.mrb[116].mxu0  ;;  %v10642_v44 = vcombine.high %v7231_v30, %v7235_v6 }
 0x453   :  { %v12909_v17 = vadd.f32 %v5732_v37, %v12741_v36  ;;  %v5795_v63 = vpop.f32.mrb[116].mxu1  ;;  %v5734_v49 = vpop.f32.mrb[117].mxu0  ;;  %v10647_v37 = vcombine.low %v7238_v14, %v7242_v45 }
 0x454   :  { %7947 = vmatpush1.bf16.msra.mxu0 %v10623_v10  ;;  %v12912_v59 = vadd.f32 %v5795_v63, %v12744_v13  ;;  %v12915_v34 = vadd.f32 %v5734_v49, %v12747_v24  ;;  %v5797_v7 = vpop.f32.mrb[117].mxu1  ;;  %v5736_v62 = vpop.f32.mrb[118].mxu0  ;;  %v10639_v10 = vcombine.low %v7230_v61, %v7234_v8  ;;  %v14194_v49 = vld [vmem:[#allocation22_spill] sm:$0xff] }
 0x455   :  { %8010 = vmatpush1.bf16.msra.mxu1 %v10625_v25  ;;  %v12918_v20 = vadd.f32 %v5797_v7, %v12750_v19  ;;  %7948 = vmatprep.subr.bf16.mxu0 %v10632_v33  ;;  %v12921_v36 = vadd.f32 %v5736_v62, %v12753_v21  ;;  %v5799_v1 = vpop.f32.mrb[118].mxu1  ;;  %v5738_v18 = vpop.f32.mrb[119].mxu0  ;;  %v7243_v21 = vld [vmem:[#allocation8 + $0x1668] sm:$0xff]  ;;  %v7246_v7 = vld [vmem:[#allocation8 + $0x1680] sm:$0xff] }
 0x456   :  { %8011 = vmatprep.subr.bf16.mxu1 %v10634_v51  ;;  %v12924_v13 = vadd.f32 %v5799_v1, %v12756_v57  ;;  %v12927_v24 = vadd.f32 %v5738_v18, %v12759_v39  ;;  %v5801_v53 = vpop.f32.mrb[119].mxu1  ;;  %v12934_v25 = vld [vmem:[#allocation11] sm:$0xff]  ;;  %v10641_v57 = vcombine.low %v7231_v30, %v7235_v6  ;;  %v10648_v39 = vcombine.high %v7238_v14, %v7242_v45  ;;  %v7250_v62 = vld [vmem:[#allocation8 + $0x16a0] sm:$0xff] }
 0x457   :  { %v12930_v19 = vadd.f32 %v5801_v53, %v12762_v27  ;;  %v10649_v51 = vcombine.low %v7239_v9, %v7243_v21  ;;  %v10650_v63 = vcombine.high %v7239_v9, %v7243_v21  ;;  %v12938_v27 = vrot.slane %v12932_v26, %v14194_v49  ;;  %v14198_v6 = vld [vmem:[#allocation23_spill] sm:$0xff]  ;;  %v7247_v18 = vld [vmem:[#allocation8 + $0x1688] sm:$0xff] }
 0x458   :  { %7949 = vmatpush1.bf16.msra.mxu0 %v10631_v50  ;;  %v12945_v30 = vrot.slane %v12934_v25, %v14194_v49  ;;  %v12953_v1 = vrot.slane %v12934_v25, %v14198_v6  ;;  %v14203_v45 = vld [vmem:[#allocation24_spill] sm:$0xff]  ;;  %v14205_v21 = vld [vmem:[#allocation25_spill] sm:$0xff] }
 0x459   :  { %8012 = vmatpush1.bf16.msra.mxu1 %v10633_v31  ;;  %7950 = vmatprep.subr.bf16.mxu0 %v10640_v38  ;;  %14195 = vst [vmem:[#allocation52_spill] sm:$0xff] %v12938_v27  ;;  %v12949_v31 = vrot.slane %v12932_v26, %v14198_v6  ;;  %v7251_v38 = vld [vmem:[#allocation8 + $0x16a8] sm:$0xff]  ;;  %v12963_v9 = vrot.slane %v12932_v26, %v14203_v45 }
 0x45a   :  { %8013 = vmatprep.subr.bf16.mxu1 %v10642_v44  ;;  %v5742_v33 = vpop.f32.mrb[120].mxu0  ;;  %14197 = vst [vmem:[#allocation55_spill] sm:$0xff] %v12945_v30  ;;  %14200 = vst [vmem:[#allocation57_spill] sm:$0xff] %v12953_v1 }
 0x45b   :  { %v12941_v50 = vadd.f32 %v5742_v33, %v12765_v11  ;;  %v5805_v61 = vpop.f32.mrb[120].mxu1  ;;  %v5744_v8 = vpop.f32.mrb[121].mxu0  ;;  %14199 = vst [vmem:[#allocation56_spill] sm:$0xff] %v12949_v31  ;;  %14204 = vst [vmem:[#allocation27_spill] sm:$0xff] %v12963_v9  ;;  %v12967_v33 = vrot.slane %v12932_v26, %v14205_v21 }
 0x45c   :  { %7951 = vmatpush1.bf16.msra.mxu0 %v10639_v10  ;;  %v12956_v11 = vadd.f32 %v5805_v61, %v12768_v52  ;;  %v12959_v53 = vadd.f32 %v5744_v8, %v12771_v0  ;;  %v5807_v44 = vpop.f32.mrb[121].mxu1  ;;  %v5746_v14 = vpop.f32.mrb[122].mxu0  ;;  %v10656_v61 = vcombine.high %v7246_v7, %v7250_v62 }
 0x45d   :  { %14196 = vst [vmem:[#allocation54_spill] sm:$0xff] %v12941_v50  ;;  %14206 = vst [vmem:[#allocation22_spill] sm:$0xff] %v12967_v33  ;;  %8014 = vmatpush1.bf16.msra.mxu1 %v10641_v57  ;;  %v12970_v49 = vadd.f32 %v5807_v44, %v12774_v54  ;;  %7952 = vmatprep.subr.bf16.mxu0 %v10648_v39  ;;  %v5980_v52 = vadd.f32 %v5746_v14, %v12777_v2  ;;  %v5809_v10 = vpop.f32.mrb[122].mxu1  ;;  %v5748_v0 = vpop.f32.mrb[123].mxu0  ;;  %v7254_v50 = vld [vmem:[#allocation8 + $0x16c0] sm:$0xff] }
 0x45e   :  { %14201 = vst [vmem:[#allocation58_spill] sm:$0xff] %v12956_v11  ;;  %14202 = vst [vmem:[#allocation59_spill] sm:$0xff] %v12959_v53  ;;  %8015 = vmatprep.subr.bf16.mxu1 %v10650_v63  ;;  %v5982_v8 = vadd.f32 %v5809_v10, %v12780_v46  ;;  %v5981_v6 = vadd.f32 %v5748_v0, %v12783_v5  ;;  %v12977_v53 = vrot.slane %v12934_v25, %v14203_v45  ;;  %v5811_v11 = vpop.f32.mrb[123].mxu1  ;;  %v7258_v54 = vld [vmem:[#allocation8 + $0x16e0] sm:$0xff]  ;;  %v7255_v63 = vld [vmem:[#allocation8 + $0x16c8] sm:$0xff] }
 0x45f   :  { %v10658_v57 = vcombine.high %v7247_v18, %v7251_v38  ;;  %v8428_v39 = vmul.f32 %v12938_v27, %v5980_v52  ;;  %v5983_v2 = vadd.f32 %v5811_v11, %v12786_v32  ;;  %v12983_v44 = vrot.slane %v12934_v25, %v14205_v21  ;;  %v7259_v46 = vld [vmem:[#allocation8 + $0x16e8] sm:$0xff] }
 0x460   :  { %14207 = vst [vmem:[#allocation23_spill] sm:$0xff] %v12977_v53  ;;  %v8430_v5 = vmul.f32 %v12949_v31, %v5982_v8  ;;  %7953 = vmatpush1.bf16.msra.mxu0 %v10647_v37  ;;  %v8429_v14 = vmul.f32 %v12963_v9, %v5981_v6  ;;  %v10655_v45 = vcombine.low %v7246_v7, %v7250_v62  ;;  %v7262_v8 = vld [vmem:[#allocation8 + $0x1700] sm:$0xff]  ;;  %v7263_v62 = vld [vmem:[#allocation8 + $0x1708] sm:$0xff] }
 0x461   :  { %14208 = vst [vmem:[#allocation24_spill] sm:$0xff] %v12983_v44  ;;  %v10657_v10 = vcombine.low %v7247_v18, %v7251_v38  ;;  %v12988_v0 = vadd.f32 %v12945_v30, %v8428_v39  ;;  %8016 = vmatpush1.bf16.msra.mxu1 %v10649_v51  ;;  %v8431_v52 = vmul.f32 %v12967_v33, %v5983_v2  ;;  %v7266_v6 = vld [vmem:[#allocation8 + $0x1720] sm:$0xff]  ;;  %v7267_v18 = vld [vmem:[#allocation8 + $0x1728] sm:$0xff] }
 0x462   :  { %7954 = vmatprep.subr.bf16.mxu0 %v10656_v61  ;;  %v10664_v32 = vcombine.high %v7254_v50, %v7258_v54  ;;  %v12992_v11 = vadd.f32 %v12953_v1, %v8430_v5  ;;  %v12995_v21 = vadd.f32 %v12977_v53, %v8429_v14  ;;  %8017 = vmatprep.subr.bf16.mxu1 %v10658_v57  ;;  %v7270_v5 = vld [vmem:[#allocation8 + $0x1740] sm:$0xff]  ;;  %v14211_v30 = vld [vmem:[#allocation29_spill] sm:$0xff] }
 0x463   :  { %v10666_v37 = vcombine.high %v7255_v63, %v7259_v46  ;;  %v12998_v7 = vadd.f32 %v12983_v44, %v8431_v52  ;;  %v10663_v38 = vcombine.low %v7254_v50, %v7258_v54  ;;  %v10665_v39 = vcombine.low %v7255_v63, %v7259_v46  ;;  %v7274_v14 = vld [vmem:[#allocation8 + $0x1760] sm:$0xff]  ;;  %v7271_v52 = vld [vmem:[#allocation8 + $0x1748] sm:$0xff] }
 0x464   :  { %7955 = vmatpush1.bf16.msra.mxu0 %v10655_v45  ;;  %v10672_v57 = vcombine.high %v7262_v8, %v7266_v6  ;;  %v10674_v2 = vcombine.high %v7263_v62, %v7267_v18  ;;  %v7275_v44 = vld [vmem:[#allocation8 + $0x1768] sm:$0xff]  ;;  %v10671_v53 = vcombine.low %v7262_v8, %v7266_v6  ;;  %v10673_v51 = vcombine.low %v7263_v62, %v7267_v18  ;;  %v7278_v54 = vld [vmem:[#allocation8 + $0x1780] sm:$0xff] }
 0x465   :  { %8018 = vmatpush1.bf16.msra.mxu1 %v10657_v10  ;;  %7956 = vmatprep.subr.bf16.mxu0 %v10664_v32  ;;  %v10680_v45 = vcombine.high %v7270_v5, %v7274_v14  ;;  %v10682_v50 = vcombine.high %v7271_v52, %v7275_v44  ;;  %v7282_v61 = vld [vmem:[#allocation8 + $0x17a0] sm:$0xff]  ;;  %v7279_v10 = vld [vmem:[#allocation8 + $0x1788] sm:$0xff]  ;;  %v10679_v63 = vcombine.low %v7270_v5, %v7274_v14  ;;  %v7172_v5 = vld [vmem:[#allocation8 + $0x1430] sm:$0xff] }
 0x466   :  { %8019 = vmatprep.subr.bf16.mxu1 %v10666_v37  ;;  %v7283_v32 = vld [vmem:[#allocation8 + $0x17a8] sm:$0xff]  ;;  %v10681_v46 = vcombine.low %v7271_v52, %v7275_v44  ;;  %v10688_v37 = vcombine.high %v7278_v54, %v7282_v61  ;;  %v7290_v8 = vld [vmem:[#allocation8 + $0x17e0] sm:$0xff]  ;;  %v10687_v62 = vcombine.low %v7278_v54, %v7282_v61  ;;  %v7173_v14 = vld [vmem:[#allocation8 + $0x1438] sm:$0xff] }
 0x467   :  { %v10690_v1 = vcombine.high %v7279_v10, %v7283_v32  ;;  %v7287_v6 = vld [vmem:[#allocation8 + $0x17c8] sm:$0xff]  ;;  %v10689_v18 = vcombine.low %v7279_v10, %v7283_v32  ;;  %v7180_v61 = vld [vmem:[#allocation8 + $0x1470] sm:$0xff]  ;;  %v7177_v54 = vld [vmem:[#allocation8 + $0x1458] sm:$0xff] }
 0x468   :  { %7957 = vmatpush1.bf16.msra.mxu0 %v10663_v38  ;;  %v7286_v38 = vld [vmem:[#allocation8 + $0x17c0] sm:$0xff]  ;;  %v7181_v10 = vld [vmem:[#allocation8 + $0x1478] sm:$0xff] }
 0x469   :  { %8020 = vmatpush1.bf16.msra.mxu1 %v10665_v39  ;;  %7958 = vmatprep.subr.bf16.mxu0 %v10672_v57  ;;  %v7291_v39 = vld [vmem:[#allocation8 + $0x17e8] sm:$0xff]  ;;  %v10696_v57 = vcombine.high %v7286_v38, %v7290_v8  ;;  %v10695_v44 = vcombine.low %v7286_v38, %v7290_v8  ;;  %v10590_v38 = vcombine.high %v7177_v54, %v7181_v10  ;;  %v7184_v8 = vld [vmem:[#allocation8 + $0x1490] sm:$0xff]  ;;  %v14213_v31 = vld [vmem:[#allocation31_spill] sm:$0xff] }
 0x46a   :  { %8021 = vmatprep.subr.bf16.mxu1 %v10674_v2  ;;  %v10698_v2 = vcombine.high %v7287_v6, %v7291_v39  ;;  %v10697_v52 = vcombine.low %v7287_v6, %v7291_v39  ;;  %v14210_v6 = vld [vmem:[#allocation28_spill] sm:$0xff]  ;;  %v7185_v39 = vld [vmem:[#allocation8 + $0x1498] sm:$0xff] }
 0x46c   :  { %7959 = vmatpush1.bf16.msra.mxu0 %v10671_v53  ;;  %v7168_v53 = vld [vmem:[#allocation8 + $0x1410] sm:$0xff] }
 0x46d   :  { %8022 = vmatpush1.bf16.msra.mxu1 %v10673_v51  ;;  %7960 = vmatprep.subr.bf16.mxu0 %v10680_v45  ;;  %v7169_v51 = vld [vmem:[#allocation8 + $0x1418] sm:$0xff]  ;;  %v10580_v45 = vcombine.high %v7168_v53, %v7172_v5 }
 0x46e   :  { %8023 = vmatprep.subr.bf16.mxu1 %v10682_v50  ;;  %v10582_v50 = vcombine.high %v7169_v51, %v7173_v14  ;;  %v10581_v32 = vcombine.low %v7169_v51, %v7173_v14  ;;  %v7192_v51 = vld [vmem:[#allocation8 + $0x14d0] sm:$0xff] }
 0x46f   :  { %v7196_v14 = vld [vmem:[#allocation8 + $0x14f0] sm:$0xff] }
 0x470   :  { %7961 = vmatpush1.bf16.msra.mxu0 %v10679_v63  ;;  %v7176_v63 = vld [vmem:[#allocation8 + $0x1450] sm:$0xff]  ;;  %v10604_v33 = vcombine.high %v7192_v51, %v7196_v14 }
 0x471   :  { %8024 = vmatpush1.bf16.msra.mxu1 %v10681_v46  ;;  %7962 = vmatprep.subr.bf16.mxu0 %v10688_v37  ;;  %v10588_v46 = vcombine.high %v7176_v63, %v7180_v61  ;;  %v14209_v37 = vld [vmem:[#allocation26_spill] sm:$0xff] }
 0x472   :  { %8025 = vmatprep.subr.bf16.mxu1 %v10690_v1  ;;  %v10579_v1 = vcombine.low %v7168_v53, %v7172_v5 }
 0x474   :  { %7963 = vmatpush1.bf16.msra.mxu0 %v10687_v62  ;;  %v7188_v62 = vld [vmem:[#allocation8 + $0x14b0] sm:$0xff] }
 0x475   :  { %8026 = vmatpush1.bf16.msra.mxu1 %v10689_v18  ;;  %7964 = vmatprep.subr.bf16.mxu0 %v10696_v57  ;;  %v7189_v18 = vld [vmem:[#allocation8 + $0x14b8] sm:$0xff]  ;;  %v10587_v57 = vcombine.low %v7176_v63, %v7180_v61  ;;  %v10596_v53 = vcombine.high %v7184_v8, %v7188_v62  ;;  %v7200_v61 = vld [vmem:[#allocation8 + $0x1510] sm:$0xff] }
 0x476   :  { %8027 = vmatprep.subr.bf16.mxu1 %v10698_v2  ;;  %v10589_v2 = vcombine.low %v7177_v54, %v7181_v10  ;;  %v10598_v5 = vcombine.high %v7185_v39, %v7189_v18  ;;  %v14212_v54 = vld [vmem:[#allocation30_spill] sm:$0xff] }
 0x477   :  { %v7201_v10 = vld [vmem:[#allocation8 + $0x1518] sm:$0xff] }
 0x478   :  { %7965 = vmatpush1.bf16.msra.mxu0 %v10695_v44  ;;  %v7193_v44 = vld [vmem:[#allocation8 + $0x14d8] sm:$0xff] }
 0x479   :  { %8028 = vmatpush1.bf16.msra.mxu1 %v10697_v52  ;;  %8060 = vmatprep.subr.bf16.mxu0 %v10580_v45  ;;  %v7197_v52 = vld [vmem:[#allocation8 + $0x14f8] sm:$0xff]  ;;  %v10595_v45 = vcombine.low %v7184_v8, %v7188_v62 }
 0x47a   :  { %8123 = vmatprep.subr.bf16.mxu1 %v10582_v50  ;;  %v10597_v50 = vcombine.low %v7185_v39, %v7189_v18  ;;  %v10606_v63 = vcombine.high %v7193_v44, %v7197_v52  ;;  %v7208_v39 = vld [vmem:[#allocation8 + $0x1550] sm:$0xff] }
 0x47b   :  { %7967 = vmatmul.mubr.bf16.vlgmr.msra.gmra.mrb[160].mxu0 %v14209_v37  ;;  %v7212_v18 = vld [vmem:[#allocation8 + $0x1570] sm:$0xff] }
 0x47c   :  { %8030 = vmatmul.mubr.bf16.vlgmr.msra.gmra.mrb[160].mxu1 %v14209_v37  ;;  %7976 = vmatprep.mubr.bf16.mxu0 %v14210_v6  ;;  %v10620_v9 = vcombine.high %v7208_v39, %v7212_v18 }
 0x47d   :  { %8039 = vmatprep.mubr.bf16.mxu1 %v14210_v6  ;;  %8061 = vmatpush1.bf16.msra.mxu0 %v10579_v1  ;;  %v7204_v1 = vld [vmem:[#allocation8 + $0x1530] sm:$0xff] }
 0x47e   :  { %8124 = vmatpush1.bf16.msra.mxu1 %v10581_v32  ;;  %8062 = vmatprep.subr.bf16.mxu0 %v10588_v46  ;;  %v7205_v32 = vld [vmem:[#allocation8 + $0x1538] sm:$0xff]  ;;  %v10603_v46 = vcombine.low %v7192_v51, %v7196_v14  ;;  %v10612_v8 = vcombine.high %v7200_v61, %v7204_v1 }
 0x47f   :  { %8125 = vmatprep.subr.bf16.mxu1 %v10590_v38  ;;  %v10605_v38 = vcombine.low %v7193_v44, %v7197_v52  ;;  %v10614_v62 = vcombine.high %v7201_v10, %v7205_v32  ;;  %v7220_v44 = vld [vmem:[#allocation8 + $0x15b0] sm:$0xff] }
 0x481   :  { %8063 = vmatpush1.bf16.msra.mxu0 %v10587_v57  ;;  %v7209_v57 = vld [vmem:[#allocation8 + $0x1558] sm:$0xff] }
 0x482   :  { %8126 = vmatpush1.bf16.msra.mxu1 %v10589_v2  ;;  %8064 = vmatprep.subr.bf16.mxu0 %v10596_v53  ;;  %v7213_v2 = vld [vmem:[#allocation8 + $0x1578] sm:$0xff]  ;;  %v10611_v53 = vcombine.low %v7200_v61, %v7204_v1 }
 0x483   :  { %7977 = vmatmul.mubr.bf16.gmra.mrb[164].mxu0 %v14211_v30  ;;  %8127 = vmatprep.subr.bf16.mxu1 %v10598_v5  ;;  %v10613_v5 = vcombine.low %v7201_v10, %v7205_v32  ;;  %v10622_v14 = vcombine.high %v7209_v57, %v7213_v2  ;;  %v7217_v61 = vld [vmem:[#allocation8 + $0x1598] sm:$0xff] }
 0x484   :  { %8040 = vmatmul.mubr.bf16.gmra.mrb[164].mxu1 %v14211_v30  ;;  %7986 = vmatprep.mubr.bf16.mxu0 %v14212_v54  ;;  %v7221_v1 = vld [vmem:[#allocation8 + $0x15b8] sm:$0xff] }
 0x485   :  { %8049 = vmatprep.mubr.bf16.mxu1 %v14212_v54  ;;  %8065 = vmatpush1.bf16.msra.mxu0 %v10595_v45 }
 0x486   :  { %8128 = vmatpush1.bf16.msra.mxu1 %v10597_v50  ;;  %8066 = vmatprep.subr.bf16.mxu0 %v10604_v33  ;;  %v7216_v33 = vld [vmem:[#allocation8 + $0x1590] sm:$0xff] }
 0x487   :  { %8129 = vmatprep.subr.bf16.mxu1 %v10606_v63  ;;  %v10619_v63 = vcombine.low %v7208_v39, %v7212_v18 }
 0x489   :  { %8067 = vmatpush1.bf16.msra.mxu0 %v10603_v46 }
 0x48a   :  { %8130 = vmatpush1.bf16.msra.mxu1 %v10605_v38  ;;  %8068 = vmatprep.subr.bf16.mxu0 %v10612_v8  ;;  %v10621_v38 = vcombine.low %v7209_v57, %v7213_v2  ;;  %v10630_v2 = vcombine.high %v7217_v61, %v7221_v1 }
 0x48b   :  { %7987 = vmatmul.mubr.bf16.gmra.mrb[168].mxu0 %v14213_v31  ;;  %8131 = vmatprep.subr.bf16.mxu1 %v10614_v62  ;;  %v5848_v51 = vpop.f32.mrb[124].mxu0 }
 0x48c   :  { %8050 = vmatmul.mubr.bf16.gmra.mrb[168].mxu1 %v14213_v31  ;;  %8092 = vmatprep.mubr.bf16.mxu0 %v14193_v35  ;;  %v13016_v52 = vadd.f32 %v5848_v51, %v12800_v40  ;;  %v5911_v45 = vpop.f32.mrb[124].mxu1  ;;  %v5850_v50 = vpop.f32.mrb[125].mxu0  ;;  %v7228_v51 = vld [vmem:[#allocation8 + $0x15f0] sm:$0xff] }
 0x48d   :  { %8069 = vmatpush1.bf16.msra.mxu0 %v10611_v53  ;;  %8155 = vmatprep.mubr.bf16.mxu1 %v14193_v35  ;;  %v13020_v10 = vadd.f32 %v5911_v45, %v12804_v43  ;;  %v13023_v32 = vadd.f32 %v5850_v50, %v12807_v12  ;;  %v5913_v46 = vpop.f32.mrb[125].mxu1  ;;  %v5852_v8 = vpop.f32.mrb[126].mxu0  ;;  %v10628_v35 = vcombine.high %v7216_v33, %v7220_v44  ;;  %v14217_v12 = vld [vmem:[#allocation51_spill] sm:$0xff] }
 0x48e   :  { %8132 = vmatpush1.bf16.msra.mxu1 %v10613_v5  ;;  %v13026_v40 = vadd.f32 %v5913_v46, %v12810_v60  ;;  %8070 = vmatprep.subr.bf16.mxu0 %v10620_v9  ;;  %v13029_v62 = vadd.f32 %v5852_v8, %v12813_v15  ;;  %v5915_v39 = vpop.f32.mrb[126].mxu1  ;;  %v5854_v18 = vpop.f32.mrb[127].mxu0  ;;  %v7224_v5 = vld [vmem:[#allocation8 + $0x15d0] sm:$0xff]  ;;  %v14219_v60 = vld [vmem:[#allocation36_spill] sm:$0xff]  ;;  %v7225_v9 = vld [vmem:[#allocation8 + $0x15d8] sm:$0xff]  ;;  %v10627_v50 = vcombine.low %v7216_v33, %v7220_v44 }
 0x48f   :  { %8133 = vmatprep.subr.bf16.mxu1 %v10622_v14  ;;  %v13032_v43 = vadd.f32 %v5915_v39, %v12816_v58  ;;  %v13035_v53 = vadd.f32 %v5854_v18, %v14217_v12  ;;  %v5917_v57 = vpop.f32.mrb[127].mxu1  ;;  %v7229_v15 = vld [vmem:[#allocation8 + $0x15f8] sm:$0xff]  ;;  %v10629_v14 = vcombine.low %v7217_v61, %v7221_v1  ;;  %v10636_v46 = vcombine.high %v7224_v5, %v7228_v51  ;;  %v7232_v39 = vld [vmem:[#allocation8 + $0x1610] sm:$0xff] }
 0x490   :  { %14214 = vst [vmem:[#allocation25_spill] sm:$0xff] %v13026_v40  ;;  %14215 = vst [vmem:[#allocation26_spill] sm:$0xff] %v13029_v62  ;;  %v13038_v45 = vadd.f32 %v5917_v57, %v14219_v60  ;;  %v10638_v8 = vcombine.high %v7225_v9, %v7229_v15  ;;  %v7236_v18 = vld [vmem:[#allocation8 + $0x1630] sm:$0xff]  ;;  %v7233_v57 = vld [vmem:[#allocation8 + $0x1618] sm:$0xff]  ;;  %v10635_v1 = vcombine.low %v7224_v5, %v7228_v51 }
 0x491   :  { %14216 = vst [vmem:[#allocation28_spill] sm:$0xff] %v13032_v43  ;;  %14218 = vst [vmem:[#allocation29_spill] sm:$0xff] %v13035_v53  ;;  %8071 = vmatpush1.bf16.msra.mxu0 %v10619_v63  ;;  %v14221_v12 = vld [vmem:[#allocation37_spill] sm:$0xff]  ;;  %v7237_v60 = vld [vmem:[#allocation8 + $0x1638] sm:$0xff]  ;;  %v10644_v40 = vcombine.high %v7232_v39, %v7236_v18 }
 0x492   :  { %14220 = vst [vmem:[#allocation30_spill] sm:$0xff] %v13038_v45  ;;  %8134 = vmatpush1.bf16.msra.mxu1 %v10621_v38  ;;  %8072 = vmatprep.subr.bf16.mxu0 %v10628_v35  ;;  %v14223_v45 = vld [vmem:[#allocation38_spill] sm:$0xff]  ;;  %v14224_v33 = vld [vmem:[#allocation43_spill] sm:$0xff]  ;;  %v10637_v38 = vcombine.low %v7225_v9, %v7229_v15  ;;  %v10646_v51 = vcombine.high %v7233_v57, %v7237_v60 }
 0x493   :  { %8135 = vmatprep.subr.bf16.mxu1 %v10630_v2  ;;  %v5858_v58 = vpop.f32.mrb[128].mxu0  ;;  %v14226_v2 = vld [vmem:[#allocation44_spill] sm:$0xff]  ;;  %v7240_v9 = vld [vmem:[#allocation8 + $0x1650] sm:$0xff] }
 0x494   :  { %v13041_v27 = vadd.f32 %v5858_v58, %v14221_v12  ;;  %v5921_v53 = vpop.f32.mrb[128].mxu1  ;;  %v5860_v43 = vpop.f32.mrb[129].mxu0  ;;  %v14228_v58 = vld [vmem:[#allocation45_spill] sm:$0xff] }
 0x495   :  { %8073 = vmatpush1.bf16.msra.mxu0 %v10627_v50  ;;  %v13044_v63 = vadd.f32 %v5921_v53, %v14223_v45  ;;  %v13047_v44 = vadd.f32 %v5860_v43, %v14224_v33  ;;  %v5923_v61 = vpop.f32.mrb[129].mxu1  ;;  %v5862_v35 = vpop.f32.mrb[130].mxu0  ;;  %v14230_v53 = vld [vmem:[#allocation46_spill] sm:$0xff]  ;;  %v14232_v43 = vld [vmem:[#allocation47_spill] sm:$0xff] }
 0x496   :  { %14222 = vst [vmem:[#allocation31_spill] sm:$0xff] %v13041_v27  ;;  %8136 = vmatpush1.bf16.msra.mxu1 %v10629_v14  ;;  %v13050_v62 = vadd.f32 %v5923_v61, %v14226_v2  ;;  %8074 = vmatprep.subr.bf16.mxu0 %v10636_v46  ;;  %v13053_v12 = vadd.f32 %v5862_v35, %v14228_v58  ;;  %v5925_v27 = vpop.f32.mrb[130].mxu1  ;;  %v5864_v50 = vpop.f32.mrb[131].mxu0  ;;  %v7244_v15 = vld [vmem:[#allocation8 + $0x1670] sm:$0xff]  ;;  %v14234_v14 = vld [vmem:[#allocation48_spill] sm:$0xff]  ;;  %v7241_v46 = vld [vmem:[#allocation8 + $0x1658] sm:$0xff] }
 0x497   :  { %14225 = vst [vmem:[#allocation51_spill] sm:$0xff] %v13047_v44  ;;  %8137 = vmatprep.subr.bf16.mxu1 %v10638_v8  ;;  %v13056_v45 = vadd.f32 %v5925_v27, %v14230_v53  ;;  %v13059_v33 = vadd.f32 %v5864_v50, %v14232_v43  ;;  %v5927_v5 = vpop.f32.mrb[131].mxu1  ;;  %v7245_v35 = vld [vmem:[#allocation8 + $0x1678] sm:$0xff]  ;;  %v10643_v2 = vcombine.low %v7232_v39, %v7236_v18  ;;  %v14240_v18 = vld [vmem:[#allocation40_spill] sm:$0xff]  ;;  %v7256_v44 = vld [vmem:[#allocation8 + $0x16d0] sm:$0xff] }
 0x498   :  { %14227 = vst [vmem:[#allocation36_spill] sm:$0xff] %v13050_v62  ;;  %14229 = vst [vmem:[#allocation37_spill] sm:$0xff] %v13053_v12  ;;  %v13062_v61 = vadd.f32 %v5927_v5, %v14234_v14  ;;  %v10645_v8 = vcombine.low %v7233_v57, %v7237_v60  ;;  %v10652_v58 = vcombine.high %v7240_v9, %v7244_v15  ;;  %v7248_v12 = vld [vmem:[#allocation8 + $0x1690] sm:$0xff] }
 0x499   :  { %14231 = vst [vmem:[#allocation38_spill] sm:$0xff] %v13056_v45  ;;  %14233 = vst [vmem:[#allocation43_spill] sm:$0xff] %v13059_v33  ;;  %8075 = vmatpush1.bf16.msra.mxu0 %v10635_v1  ;;  %v10651_v53 = vcombine.low %v7240_v9, %v7244_v15  ;;  %v10653_v50 = vcombine.low %v7241_v46, %v7245_v35  ;;  %v10654_v43 = vcombine.high %v7241_v46, %v7245_v35  ;;  %v14236_v33 = vld [vmem:[#allocation39_spill] sm:$0xff]  ;;  %v7252_v5 = vld [vmem:[#allocation8 + $0x16b0] sm:$0xff] }
 0x49a   :  { %14235 = vst [vmem:[#allocation44_spill] sm:$0xff] %v13062_v61  ;;  %8138 = vmatpush1.bf16.msra.mxu1 %v10637_v38  ;;  %8076 = vmatprep.subr.bf16.mxu0 %v10644_v40  ;;  %v13066_v45 = vrot.slane %v12932_v26, %v14236_v33  ;;  %v14238_v14 = vld [vmem:[#allocation49_spill] sm:$0xff]  ;;  %v13073_v40 = vrot.slane %v12934_v25, %v14236_v33  ;;  %v7249_v38 = vld [vmem:[#allocation8 + $0x1698] sm:$0xff] }
 0x49b   :  { %8139 = vmatprep.subr.bf16.mxu1 %v10646_v51  ;;  %v5868_v27 = vpop.f32.mrb[132].mxu0  ;;  %v13077_v57 = vrot.slane %v12932_v26, %v14240_v18  ;;  %v13081_v60 = vrot.slane %v12934_v25, %v14240_v18  ;;  %v7253_v51 = vld [vmem:[#allocation8 + $0x16b8] sm:$0xff]  ;;  %v14243_v35 = vld [vmem:[#allocation41_spill] sm:$0xff] }
 0x49c   :  { %14237 = vst [vmem:[#allocation45_spill] sm:$0xff] %v13066_v45  ;;  %v13069_v61 = vadd.f32 %v5868_v27, %v14238_v14  ;;  %v5931_v1 = vpop.f32.mrb[132].mxu1  ;;  %v5870_v39 = vpop.f32.mrb[133].mxu0  ;;  %v13091_v27 = vrot.slane %v12932_v26, %v14243_v35  ;;  %v14244_v14 = vld [vmem:[#allocation42_spill] sm:$0xff]  ;;  %v13105_v62 = vrot.slane %v12934_v25, %v14243_v35 }
 0x49d   :  { %8077 = vmatpush1.bf16.msra.mxu0 %v10643_v2  ;;  %v13084_v9 = vadd.f32 %v5931_v1, %v12852_v41  ;;  %v13087_v15 = vadd.f32 %v5870_v39, %v12855_v47  ;;  %v5933_v46 = vpop.f32.mrb[133].mxu1  ;;  %v5872_v33 = vpop.f32.mrb[134].mxu0  ;;  %v10660_v1 = vcombine.high %v7248_v12, %v7252_v5 }
 0x49e   :  { %14239 = vst [vmem:[#allocation46_spill] sm:$0xff] %v13069_v61  ;;  %v13095_v61 = vrot.slane %v12932_v26, %v14244_v14  ;;  %8140 = vmatpush1.bf16.msra.mxu1 %v10645_v8  ;;  %v13098_v18 = vadd.f32 %v5933_v46, %v12858_v42  ;;  %8078 = vmatprep.subr.bf16.mxu0 %v10652_v58  ;;  %v5935_v2 = vpop.f32.mrb[134].mxu1  ;;  %v5874_v47 = vpop.f32.mrb[135].mxu0  ;;  %v7260_v42 = vld [vmem:[#allocation8 + $0x16f0] sm:$0xff] }
 0x49f   :  { %14241 = vst [vmem:[#allocation47_spill] sm:$0xff] %v13084_v9  ;;  %14242 = vst [vmem:[#allocation48_spill] sm:$0xff] %v13087_v15  ;;  %v5984_v41 = vadd.f32 %v5872_v33, %v12861_v48  ;;  %8141 = vmatprep.subr.bf16.mxu1 %v10654_v43  ;;  %v5986_v39 = vadd.f32 %v5935_v2, %v12864_v55  ;;  %v14246_v15 = vld [vmem:[#allocation50_spill] sm:$0xff]  ;;  %v5937_v26 = vpop.f32.mrb[135].mxu1  ;;  %v10662_v8 = vcombine.high %v7249_v38, %v7253_v51  ;;  %v14247_v46 = vld [vmem:[#allocation53_spill] sm:$0xff] }
 0x4a0   :  { %14245 = vst [vmem:[#allocation39_spill] sm:$0xff] %v13098_v18  ;;  %v5985_v9 = vadd.f32 %v5874_v47, %v14246_v15  ;;  %v5987_v48 = vadd.f32 %v5937_v26, %v14247_v46  ;;  %v13111_v33 = vrot.slane %v12934_v25, %v14244_v14  ;;  %v7257_v43 = vld [vmem:[#allocation8 + $0x16d8] sm:$0xff]  ;;  %v10659_v2 = vcombine.low %v7248_v12, %v7252_v5 }
 0x4a1   :  { %v8432_v58 = vmul.f32 %v13066_v45, %v5984_v41  ;;  %v7261_v55 = vld [vmem:[#allocation8 + $0x16f8] sm:$0xff]  ;;  %v8434_v15 = vmul.f32 %v13077_v57, %v5986_v39  ;;  %8079 = vmatpush1.bf16.msra.mxu0 %v10651_v53  ;;  %v10661_v47 = vcombine.low %v7249_v38, %v7253_v51  ;;  %v10668_v26 = vcombine.high %v7256_v44, %v7260_v42  ;;  %v7264_v45 = vld [vmem:[#allocation8 + $0x1710] sm:$0xff] }
 0x4a2   :  { %14248 = vst [vmem:[#allocation49_spill] sm:$0xff] %v13111_v33  ;;  %v8433_v35 = vmul.f32 %v13091_v27, %v5985_v9  ;;  %8142 = vmatpush1.bf16.msra.mxu1 %v10653_v50  ;;  %v8435_v41 = vmul.f32 %v13095_v61, %v5987_v48  ;;  %8080 = vmatprep.subr.bf16.mxu0 %v10660_v1  ;;  %v7268_v39 = vld [vmem:[#allocation8 + $0x1730] sm:$0xff]  ;;  %v7265_v9 = vld [vmem:[#allocation8 + $0x1718] sm:$0xff] }
 0x4a3   :  { %v8530_v18 = vadd.f32 %v13073_v40, %v8432_v58  ;;  %v8532_v46 = vadd.f32 %v13081_v60, %v8434_v15  ;;  %8143 = vmatprep.subr.bf16.mxu1 %v10662_v8  ;;  %v10670_v14 = vcombine.high %v7257_v43, %v7261_v55  ;;  %v7269_v12 = vld [vmem:[#allocation8 + $0x1738] sm:$0xff]  ;;  %v10667_v38 = vcombine.low %v7256_v44, %v7260_v42  ;;  %v7272_v48 = vld [vmem:[#allocation8 + $0x1750] sm:$0xff] }
 0x4a4   :  { %v8531_v25 = vadd.f32 %v13105_v62, %v8433_v35  ;;  %v8533_v53 = vadd.f32 %v13111_v33, %v8435_v41  ;;  %v10669_v51 = vcombine.low %v7257_v43, %v7261_v55  ;;  %v10676_v1 = vcombine.high %v7264_v45, %v7268_v39  ;;  %v7276_v15 = vld [vmem:[#allocation8 + $0x1770] sm:$0xff]  ;;  %v7273_v41 = vld [vmem:[#allocation8 + $0x1758] sm:$0xff] }
 0x4a5   :  { %v8560_v5 = vmax.f32 %v8530_v18, %v8532_v46  ;;  %8081 = vmatpush1.bf16.msra.mxu0 %v10659_v2  ;;  %v10678_v58 = vcombine.high %v7265_v9, %v7269_v12  ;;  %v14249_v8 = vmax.f32 %v12988_v0, %v12992_v11  ;;  %v7277_v33 = vld [vmem:[#allocation8 + $0x1778] sm:$0xff]  ;;  %v14251_v18 = vmax.f32 %v12995_v21, %v12998_v7 }
 0x4a6   :  { %v8561_v50 = vmax.f32 %v8531_v25, %v8533_v53  ;;  %8144 = vmatpush1.bf16.msra.mxu1 %v10661_v47  ;;  %8082 = vmatprep.subr.bf16.mxu0 %v10668_v26  ;;  %v10675_v42 = vcombine.low %v7264_v45, %v7268_v39  ;;  %v10677_v43 = vcombine.low %v7265_v9, %v7269_v12  ;;  %v7280_v47 = vld [vmem:[#allocation8 + $0x1790] sm:$0xff]  ;;  %v7281_v0 = vld [vmem:[#allocation8 + $0x1798] sm:$0xff] }
 0x4a7   :  { %8145 = vmatprep.subr.bf16.mxu1 %v10670_v14  ;;  %v13123_v35 = vmax.f32 %v14249_v8, %v8560_v5  ;;  %v10684_v55 = vcombine.high %v7272_v48, %v7276_v15  ;;  %v10686_v2 = vcombine.high %v7273_v41, %v7277_v33  ;;  %v7284_v26 = vld [vmem:[#allocation8 + $0x17b0] sm:$0xff]  ;;  %v7285_v11 = vld [vmem:[#allocation8 + $0x17b8] sm:$0xff]  ;;  %v10683_v46 = vcombine.low %v7272_v48, %v7276_v15 }
 0x4a8   :  { %v13128_v44 = vmax.f32 %v14251_v18, %v8561_v50  ;;  %v10685_v25 = vcombine.low %v7273_v41, %v7277_v33  ;;  %v10692_v21 = vcombine.high %v7280_v47, %v7284_v26  ;;  %v10694_v7 = vcombine.high %v7281_v0, %v7285_v11  ;;  %v7288_v14 = vld [vmem:[#allocation8 + $0x17d0] sm:$0xff]  ;;  %v7289_v39 = vld [vmem:[#allocation8 + $0x17d8] sm:$0xff] }
 0x4a9   :  { %14250 = vst [vmem:[#allocation40_spill] sm:$0xff] %v13123_v35  ;;  %8083 = vmatpush1.bf16.msra.mxu0 %v10667_v38  ;;  %v7292_v45 = vld [vmem:[#allocation8 + $0x17f0] sm:$0xff]  ;;  %v7293_v53 = vld [vmem:[#allocation8 + $0x17f8] sm:$0xff]  ;;  %v10691_v9 = vcombine.low %v7280_v47, %v7284_v26  ;;  %v10693_v12 = vcombine.low %v7281_v0, %v7285_v11 }
 0x4aa   :  { %14252 = vst [vmem:[#allocation41_spill] sm:$0xff] %v13128_v44  ;;  %8146 = vmatpush1.bf16.msra.mxu1 %v10669_v51  ;;  %8084 = vmatprep.subr.bf16.mxu0 %v10676_v1  ;;  %v10700_v5 = vcombine.high %v7288_v14, %v7292_v45  ;;  %v10702_v38 = vcombine.high %v7289_v39, %v7293_v53  ;;  %v14253_v1 = vld [vmem:[#allocation32_spill] sm:$0xff]  ;;  %v14254_v15 = vld [vmem:[#allocation33_spill] sm:$0xff]  ;;  %v14255_v8 = vld [vmem:[#allocation34_spill] sm:$0xff] }
 0x4ab   :  { %8147 = vmatprep.subr.bf16.mxu1 %v10678_v58  ;;  %v10699_v50 = vcombine.low %v7288_v14, %v7292_v45  ;;  %v10701_v33 = vcombine.low %v7289_v39, %v7293_v53  ;;  %v11086_v35 = vld [vmem:[%s13926_s7 + $0xe8] sm:$0xff]  }
 0x4ac   :  { %v14284_v44 = vld [vmem:[#allocation47_spill] sm:$0xff] }
 0x4ad   :  { %8085 = vmatpush1.bf16.msra.mxu0 %v10675_v42  ;;  %v14256_v42 = vld [vmem:[#allocation18_spill] sm:$0xff] }
 0x4ae   :  { %8148 = vmatpush1.bf16.msra.mxu1 %v10677_v43  ;;  %8086 = vmatprep.subr.bf16.mxu0 %v10684_v55 }
 0x4af   :  { %8149 = vmatprep.subr.bf16.mxu1 %v10686_v2 }
 0x4b1   :  { %8087 = vmatpush1.bf16.msra.mxu0 %v10683_v46 }
 0x4b2   :  { %8150 = vmatpush1.bf16.msra.mxu1 %v10685_v25  ;;  %8088 = vmatprep.subr.bf16.mxu0 %v10692_v21 }
 0x4b3   :  { %8151 = vmatprep.subr.bf16.mxu1 %v10694_v7 }
 0x4b5   :  { %8089 = vmatpush1.bf16.msra.mxu0 %v10691_v9 }
 0x4b6   :  { %8152 = vmatpush1.bf16.msra.mxu1 %v10693_v12  ;;  %8090 = vmatprep.subr.bf16.mxu0 %v10700_v5 }
 0x4b7   :  { %8153 = vmatprep.subr.bf16.mxu1 %v10702_v38 }
 0x4b9   :  { %8091 = vmatpush1.bf16.msra.mxu0 %v10699_v50 }
 0x4ba   :  { %8154 = vmatpush1.bf16.msra.mxu1 %v10701_v33  ;;  %v14257_v33 = vld [vmem:[#allocation54_spill] sm:$0xff] }
 0x4bc   :  { %8093 = vmatmul.mubr.bf16.vlgmr.msra.gmra.mrb[172].mxu0 %v14209_v37 }
 0x4bd   :  { %8156 = vmatmul.mubr.bf16.vlgmr.msra.gmra.mrb[172].mxu1 %v14209_v37  ;;  %8102 = vmatprep.mubr.bf16.mxu0 %v14210_v6 }
 0x4be   :  { %8165 = vmatprep.mubr.bf16.mxu1 %v14210_v6 }
 0x4c4   :  { %8103 = vmatmul.mubr.bf16.gmra.mrb[176].mxu0 %v14211_v30 }
 0x4c5   :  { %8166 = vmatmul.mubr.bf16.gmra.mrb[176].mxu1 %v14211_v30  ;;  %8112 = vmatprep.mubr.bf16.mxu0 %v14212_v54 }
 0x4c6   :  { %8175 = vmatprep.mubr.bf16.mxu1 %v14212_v54 }
 0x4cc   :  { %8113 = vmatmul.mubr.bf16.gmra.mrb[180].mxu0 %v14213_v31  ;;  %v6893_v51 = vpop.f32.mrb[136].mxu0 }
 0x4cd   :  { %8176 = vmatmul.mubr.bf16.gmra.mrb[180].mxu1 %v14213_v31  ;;  %v13141_v58 = vadd.f32 %v6893_v51, %v14253_v1  ;;  %v6956_v37 = vpop.f32.mrb[136].mxu1  ;;  %v6895_v48 = vpop.f32.mrb[137].mxu0 }
 0x4ce   :  { %v13144_v6 = vadd.f32 %v6956_v37, %v14254_v15  ;;  %v13147_v41 = vadd.f32 %v6895_v48, %v14255_v8  ;;  %v6958_v30 = vpop.f32.mrb[137].mxu1  ;;  %v6897_v18 = vpop.f32.mrb[138].mxu0  ;;  %v14259_v48 = vld [vmem:[#allocation59_spill] sm:$0xff]  ;;  %v11065_v8 = vld [vmem:[%s13926_s7] sm:$0xff]  }
 0x4cf   :  { %v13150_v54 = vadd.f32 %v6958_v30, %v14256_v42  ;;  %v13153_v43 = vadd.f32 %v6897_v18, %v12884_v22  ;;  %v6960_v31 = vpop.f32.mrb[138].mxu1  ;;  %v6899_v55 = vpop.f32.mrb[139].mxu0  ;;  %v11066_v30 = vld [vmem:[%s13926_s7 + $0xc0] sm:$0xff]   ;;  %v11070_v42 = vld [vmem:[%s13926_s7 + $0xc8] sm:$0xff]  }
 0x4d0   :  { %v13156_v2 = vadd.f32 %v6960_v31, %v12888_v23  ;;  %v13159_v47 = vadd.f32 %v6899_v55, %v12891_v56  ;;  %v6962_v26 = vpop.f32.mrb[139].mxu1  ;;  %v11067_v18 = vld [vmem:[%s13926_s7 + $0x80] sm:$0xff]   ;;  %10838 = vmatprep.subr.bf16.mxu1 %v11066_v30  ;;  %v11069_v31 = vld [vmem:[%s13926_s7 + $0x8] sm:$0xff]  }
 0x4d1   :  { %v13162_v0 = vadd.f32 %v6962_v26, %v12894_v29  ;;  %10839 = vmatpush3.bf16.msra.mxu1 %v11067_v18  ;;  %v11071_v55 = vld [vmem:[%s13926_s7 + $0x88] sm:$0xff]   ;;  %v11072_v26 = vld [vmem:[%s13926_s7 + $0x50] sm:$0xff]  }
 0x4d2   :  { %10840 = vmatprep.subr.bf16.mxu1 %v11070_v42 }
 0x4d4   :  { %v6903_v11 = vpop.f32.mrb[140].mxu0 }
 0x4d5   :  { %v13165_v46 = vadd.f32 %v6903_v11, %v12897_v16  ;;  %v6966_v25 = vpop.f32.mrb[140].mxu1  ;;  %v6905_v21 = vpop.f32.mrb[141].mxu0  ;;  %v11074_v11 = vld [vmem:[%s13926_s7 + $0xd0] sm:$0xff]   ;;  %10841 = vmatpush3.bf16.msra.mxu1 %v11071_v55  ;;  %v14264_v55 = vld [vmem:[#allocation25_spill] sm:$0xff] }
 0x4d6   :  { %v13168_v22 = vadd.f32 %v6966_v25, %v12900_v4  ;;  %v13171_v7 = vadd.f32 %v6905_v21, %v12903_v3  ;;  %v6968_v23 = vpop.f32.mrb[141].mxu1  ;;  %v6907_v14 = vpop.f32.mrb[142].mxu0  ;;  %v11073_v25 = vld [vmem:[%s13926_s7 + $0x10] sm:$0xff]   ;;  %10842 = vmatprep.subr.bf16.mxu1 %v11074_v11 }
 0x4d7   :  { %v13174_v56 = vadd.f32 %v6968_v23, %v12906_v28  ;;  %v13177_v29 = vadd.f32 %v6907_v14, %v12909_v17  ;;  %v6970_v45 = vpop.f32.mrb[142].mxu1  ;;  %v6909_v39 = vpop.f32.mrb[143].mxu0  ;;  %v11075_v21 = vld [vmem:[%s13926_s7 + $0x90] sm:$0xff]   ;;  %v11076_v23 = vld [vmem:[%s13926_s7 + $0x58] sm:$0xff]  }
 0x4d8   :  { %v13180_v16 = vadd.f32 %v6970_v45, %v12912_v59  ;;  %v13183_v53 = vadd.f32 %v6909_v39, %v12915_v34  ;;  %v6972_v4 = vpop.f32.mrb[143].mxu1  ;;  %v11078_v14 = vld [vmem:[%s13926_s7 + $0xd8] sm:$0xff]  }
 0x4d9   :  { %v13186_v3 = vadd.f32 %v6972_v4, %v12918_v20  ;;  %10843 = vmatpush3.bf16.msra.mxu1 %v11075_v21  ;;  %v11077_v45 = vld [vmem:[%s13926_s7 + $0x18] sm:$0xff]  }
 0x4da   :  { %v11079_v39 = vld [vmem:[%s13926_s7 + $0x98] sm:$0xff]   ;;  %10844 = vmatprep.subr.bf16.mxu1 %v11078_v14 }
 0x4dc   :  { %v6913_v9 = vpop.f32.mrb[144].mxu0 }
 0x4dd   :  { %v13189_v12 = vadd.f32 %v6913_v9, %v12921_v36  ;;  %v6976_v28 = vpop.f32.mrb[144].mxu1  ;;  %v6915_v5 = vpop.f32.mrb[145].mxu0  ;;  %v14258_v36 = vld [vmem:[#allocation58_spill] sm:$0xff]  ;;  %10845 = vmatpush3.bf16.msra.mxu1 %v11079_v39  ;;  %v14260_v9 = vld [vmem:[#allocation19_spill] sm:$0xff]  ;;  %v14267_v39 = vld [vmem:[#allocation29_spill] sm:$0xff] }
 0x4de   :  { %v13192_v17 = vadd.f32 %v6976_v28, %v12924_v13  ;;  %v13195_v38 = vadd.f32 %v6915_v5, %v12927_v24  ;;  %v6978_v59 = vpop.f32.mrb[145].mxu1  ;;  %v6917_v50 = vpop.f32.mrb[146].mxu0 }
 0x4df   :  { %v13198_v34 = vadd.f32 %v6978_v59, %v12930_v19  ;;  %v13201_v20 = vadd.f32 %v6917_v50, %v14257_v33  ;;  %v6980_v51 = vpop.f32.mrb[146].mxu1  ;;  %v6919_v1 = vpop.f32.mrb[147].mxu0  ;;  %v11064_v19 = vld [vmem:[%s13926_s7 + $0x40] sm:$0xff]   ;;  %v14261_v50 = vld [vmem:[#allocation20_spill] sm:$0xff] }
 0x4e0   :  { %v13204_v37 = vadd.f32 %v6980_v51, %v14258_v36  ;;  %v13207_v15 = vadd.f32 %v6919_v1, %v14259_v48  ;;  %v6982_v13 = vpop.f32.mrb[147].mxu1  ;;  %10816 = vmatprep.subr.bf16.mxu0 %v11064_v19  ;;  %v14262_v51 = vld [vmem:[#allocation21_spill] sm:$0xff] }
 0x4e1   :  { %v13210_v24 = vadd.f32 %v6982_v13, %v12970_v49  ;;  %v11068_v49 = vld [vmem:[%s13926_s7 + $0x48] sm:$0xff]   ;;  %10817 = vmatpush3.bf16.msra.mxu0 %v11065_v8 }
 0x4e2   :  { %10818 = vmatprep.subr.bf16.mxu0 %v11068_v49  ;;  %v14263_v13 = vld [vmem:[#allocation35_spill] sm:$0xff] }
 0x4e5   :  { %10819 = vmatpush3.bf16.msra.mxu0 %v11069_v31 }
 0x4e6   :  { %10820 = vmatprep.subr.bf16.mxu0 %v11072_v26 }
 0x4e9   :  { %10821 = vmatpush3.bf16.msra.mxu0 %v11073_v25  ;;  %v14265_v25 = vld [vmem:[#allocation26_spill] sm:$0xff] }
 0x4ea   :  { %10822 = vmatprep.subr.bf16.mxu0 %v11076_v23 }
 0x4ed   :  { %10823 = vmatpush3.bf16.msra.mxu0 %v11077_v45 }
 0x50d   :  { %v7019_v4 = vpop.f32.mrb[148].mxu0 }
 0x50e   :  { %v13261_v28 = vadd.f32 %v7019_v4, %v14260_v9  ;;  %v7082_v5 = vpop.f32.mrb[148].mxu1  ;;  %v7021_v59 = vpop.f32.mrb[149].mxu0 }
 0x50f   :  { %v13264_v33 = vadd.f32 %v7082_v5, %v14261_v50  ;;  %v13267_v1 = vadd.f32 %v7021_v59, %v14262_v51  ;;  %v7084_v36 = vpop.f32.mrb[149].mxu1  ;;  %v7023_v48 = vpop.f32.mrb[150].mxu0  ;;  %v14269_v59 = vld [vmem:[#allocation31_spill] sm:$0xff] }
 0x510   :  { %v13270_v19 = vadd.f32 %v7084_v36, %v14263_v13  ;;  %v13273_v8 = vadd.f32 %v7023_v48, %v13016_v52  ;;  %v7086_v30 = vpop.f32.mrb[150].mxu1  ;;  %v7025_v18 = vpop.f32.mrb[151].mxu0  ;;  %v14266_v52 = vld [vmem:[#allocation28_spill] sm:$0xff]  ;;  %v14270_v13 = vld [vmem:[#allocation51_spill] sm:$0xff] }
 0x511   :  { %v13276_v49 = vadd.f32 %v7086_v30, %v13020_v10  ;;  %v13279_v42 = vadd.f32 %v7025_v18, %v13023_v32  ;;  %v7088_v31 = vpop.f32.mrb[151].mxu1  ;;  %v14268_v32 = vld [vmem:[#allocation30_spill] sm:$0xff] }
 0x512   :  { %v13282_v26 = vadd.f32 %v7088_v31, %v14264_v55  ;;  %v14272_v31 = vld [vmem:[#allocation36_spill] sm:$0xff] }
 0x515   :  { %v7029_v11 = vpop.f32.mrb[152].mxu0 }
 0x516   :  { %v13285_v21 = vadd.f32 %v7029_v11, %v14265_v25  ;;  %v7092_v23 = vpop.f32.mrb[152].mxu1  ;;  %v7031_v14 = vpop.f32.mrb[153].mxu0  ;;  %v11080_v25 = vld [vmem:[%s13926_s7 + $0x60] sm:$0xff]  }
 0x517   :  { %v13288_v45 = vadd.f32 %v7092_v23, %v14266_v52  ;;  %v13291_v4 = vadd.f32 %v7031_v14, %v14267_v39  ;;  %v7094_v10 = vpop.f32.mrb[153].mxu1  ;;  %v7033_v9 = vpop.f32.mrb[154].mxu0  ;;  %v11081_v23 = vld [vmem:[%s13926_s7 + $0x20] sm:$0xff]   ;;  %10824 = vmatprep.subr.bf16.mxu0 %v11080_v25 }
 0x518   :  { %v13294_v5 = vadd.f32 %v7094_v10, %v14268_v32  ;;  %v13297_v50 = vadd.f32 %v7033_v9, %v14269_v59  ;;  %v7096_v51 = vpop.f32.mrb[154].mxu1  ;;  %v7035_v36 = vpop.f32.mrb[155].mxu0  ;;  %v14274_v14 = vld [vmem:[#allocation37_spill] sm:$0xff]  ;;  %v14276_v10 = vld [vmem:[#allocation38_spill] sm:$0xff]  ;;  %v14278_v32 = vld [vmem:[#allocation43_spill] sm:$0xff]  ;;  %10825 = vmatpush3.bf16.msra.mxu0 %v11081_v23 }
 0x519   :  { %v13300_v48 = vadd.f32 %v7096_v51, %v13044_v63  ;;  %v13303_v30 = vadd.f32 %v7035_v36, %v14270_v13  ;;  %v7098_v18 = vpop.f32.mrb[155].mxu1  ;;  %v11082_v13 = vld [vmem:[%s13926_s7 + $0xe0] sm:$0xff]   ;;  %v11088_v23 = vld [vmem:[%s13926_s7 + $0x70] sm:$0xff]  }
 0x51a   :  { %v13306_v55 = vadd.f32 %v7098_v18, %v14272_v31  ;;  %v11083_v18 = vld [vmem:[%s13926_s7 + $0xa0] sm:$0xff]   ;;  %v11084_v31 = vld [vmem:[%s13926_s7 + $0x68] sm:$0xff]   ;;  %10846 = vmatprep.subr.bf16.mxu1 %v11082_v13  ;;  %v11092_v13 = vld [vmem:[%s13926_s7 + $0x78] sm:$0xff]  }
 0x51b   :  { %14271 = vst [vmem:[#allocation42_spill] sm:$0xff] %v13303_v30  ;;  %10826 = vmatprep.subr.bf16.mxu0 %v11084_v31  ;;  %10847 = vmatpush3.bf16.msra.mxu1 %v11083_v18  ;;  %v11091_v18 = vld [vmem:[%s13926_s7 + $0xb0] sm:$0xff]   ;;  %v11093_v31 = vld [vmem:[%s13926_s7 + $0x38] sm:$0xff]  }
 0x51c   :  { %14273 = vst [vmem:[#allocation50_spill] sm:$0xff] %v13306_v55  ;;  %10848 = vmatprep.subr.bf16.mxu1 %v11086_v35  ;;  %v11094_v35 = vld [vmem:[%s13926_s7 + $0xf8] sm:$0xff]  }
 0x51d   :  { %v7039_v11 = vpop.f32.mrb[156].mxu0 }
 0x51e   :  { %v13315_v52 = vadd.f32 %v7039_v11, %v14274_v14  ;;  %v7102_v63 = vpop.f32.mrb[156].mxu1  ;;  %v7041_v39 = vpop.f32.mrb[157].mxu0  ;;  %v14280_v11 = vld [vmem:[#allocation44_spill] sm:$0xff] }
 0x51f   :  { %v13318_v9 = vadd.f32 %v7102_v63, %v14276_v10  ;;  %v13321_v59 = vadd.f32 %v7041_v39, %v14278_v32  ;;  %v7104_v51 = vpop.f32.mrb[157].mxu1  ;;  %v7043_v36 = vpop.f32.mrb[158].mxu0  ;;  %v14282_v63 = vld [vmem:[#allocation46_spill] sm:$0xff] }
 0x520   :  { %14275 = vst [vmem:[#allocation53_spill] sm:$0xff] %v13315_v52  ;;  %v13333_v14 = vadd.f32 %v7104_v51, %v14280_v11  ;;  %v13336_v39 = vadd.f32 %v7043_v36, %v14282_v63  ;;  %v7106_v10 = vpop.f32.mrb[158].mxu1  ;;  %v7045_v25 = vpop.f32.mrb[159].mxu0  ;;  %v11085_v32 = vld [vmem:[%s13926_s7 + $0x28] sm:$0xff]  }
 0x521   :  { %14277 = vst [vmem:[#allocation32_spill] sm:$0xff] %v13318_v9  ;;  %14279 = vst [vmem:[#allocation33_spill] sm:$0xff] %v13321_v59  ;;  %v13345_v59 = vadd.f32 %v7106_v10, %v14284_v44  ;;  %v14286_v9 = vld [vmem:[#allocation48_spill] sm:$0xff]  ;;  %v7108_v11 = vpop.f32.mrb[159].mxu1  ;;  %v14288_v36 = vld [vmem:[#allocation39_spill] sm:$0xff]  ;;  %10827 = vmatpush3.bf16.msra.mxu0 %v11085_v32 }
 0x522   :  { %14281 = vst [vmem:[#allocation34_spill] sm:$0xff] %v13333_v14  ;;  %14283 = vst [vmem:[#allocation18_spill] sm:$0xff] %v13336_v39  ;;  %v13348_v51 = vadd.f32 %v7045_v25, %v14286_v9  ;;  %v13354_v63 = vadd.f32 %v7108_v11, %v14288_v36  ;;  %v11087_v39 = vld [vmem:[%s13926_s7 + $0xa8] sm:$0xff]   ;;  %v11090_v44 = vld [vmem:[%s13926_s7 + $0xf0] sm:$0xff]   ;;  %10828 = vmatprep.subr.bf16.mxu0 %v11088_v23 }
 0x523   :  { %14285 = vst [vmem:[#allocation54_spill] sm:$0xff] %v13345_v59  ;;  %v11089_v9 = vld [vmem:[%s13926_s7 + $0x30] sm:$0xff]   ;;  %10849 = vmatpush3.bf16.msra.mxu1 %v11087_v39  ;;  %v11096_v10 = vld [vmem:[%s13926_s7 + $0x140] sm:$0xff]   ;;  %v11095_v39 = vld [vmem:[%s13926_s7 + $0xb8] sm:$0xff]  }
 0x524   :  { %14287 = vst [vmem:[#allocation58_spill] sm:$0xff] %v13348_v51  ;;  %14289 = vst [vmem:[#allocation59_spill] sm:$0xff] %v13354_v63  ;;  %10850 = vmatprep.subr.bf16.mxu1 %v11090_v44  ;;  %v11098_v25 = vld [vmem:[%s13926_s7 + $0x1c0] sm:$0xff]   ;;  %v14292_v14 = vld [vmem:[#allocation27_spill] sm:$0xff] }
 0x525   :  { %10829 = vmatpush3.bf16.msra.mxu0 %v11089_v9  ;;  %v14294_v52 = vld [vmem:[#allocation22_spill] sm:$0xff] }
 0x526   :  { %10830 = vmatprep.subr.bf16.mxu0 %v11092_v13 }
 0x527   :  { %10851 = vmatpush3.bf16.msra.mxu1 %v11091_v18 }
 0x528   :  { %10852 = vmatprep.subr.bf16.mxu1 %v11094_v35  ;;  %v14290_v35 = vld [vmem:[#allocation52_spill] sm:$0xff] }
 0x529   :  { %10831 = vmatpush3.bf16.msra.mxu0 %v11093_v31 }
 0x52a   :  { %10860 = vmatprep.subr.bf16.mxu0 %v11096_v10 }
 0x52b   :  { %10853 = vmatpush3.bf16.msra.mxu1 %v11095_v39 }
 0x52c   :  { %10882 = vmatprep.subr.bf16.mxu1 %v11098_v25  ;;  %v14291_v25 = vld [vmem:[#allocation56_spill] sm:$0xff] }
 0x54e   :  { %v7968_v32 = vpop.f32.mrb[160].mxu0 }
 0x54f   :  { %v8186_v11 = vadd.f32 %v7968_v32, %v13141_v58  ;;  %v8031_v23 = vpop.f32.mrb[160].mxu1  ;;  %v7970_v36 = vpop.f32.mrb[161].mxu0 }
 0x550   :  { %v8188_v44 = vadd.f32 %v8031_v23, %v13144_v6  ;;  %v8187_v9 = vadd.f32 %v7970_v36, %v13147_v41  ;;  %v8033_v13 = vpop.f32.mrb[161].mxu1  ;;  %v7972_v18 = vpop.f32.mrb[162].mxu0  ;;  %v14293_v41 = vld [vmem:[#allocation55_spill] sm:$0xff] }
 0x551   :  { %v8380_v63 = vmul.f32 %v14290_v35, %v8186_v11  ;;  %v8189_v51 = vadd.f32 %v8033_v13, %v13150_v54  ;;  %v8194_v31 = vadd.f32 %v7972_v18, %v13153_v43  ;;  %v8035_v10 = vpop.f32.mrb[162].mxu1  ;;  %v7974_v39 = vpop.f32.mrb[163].mxu0  ;;  %v14295_v13 = vld [vmem:[#allocation57_spill] sm:$0xff] }
 0x552   :  { %v8382_v59 = vmul.f32 %v14291_v25, %v8188_v44  ;;  %v8381_v58 = vmul.f32 %v14292_v14, %v8187_v9  ;;  %v8196_v32 = vadd.f32 %v8035_v10, %v13156_v2  ;;  %v8195_v6 = vadd.f32 %v7974_v39, %v13159_v47  ;;  %v8037_v23 = vpop.f32.mrb[163].mxu1  ;;  %v14296_v44 = vld [vmem:[#allocation23_spill] sm:$0xff]  ;;  %v14298_v9 = vld [vmem:[#allocation24_spill] sm:$0xff] }
 0x553   :  { %v13397_v36 = vadd.f32 %v14293_v41, %v8380_v63  ;;  %v8383_v11 = vmul.f32 %v14294_v52, %v8189_v51  ;;  %v8388_v54 = vmul.f32 %v14290_v35, %v8194_v31  ;;  %v8197_v43 = vadd.f32 %v8037_v23, %v13162_v0 }
 0x554   :  { %v13403_v18 = vadd.f32 %v14295_v13, %v8382_v59  ;;  %v13406_v55 = vadd.f32 %v14296_v44, %v8381_v58  ;;  %v8390_v2 = vmul.f32 %v14291_v25, %v8196_v32  ;;  %v8389_v47 = vmul.f32 %v14292_v14, %v8195_v6 }
 0x555   :  { %v13411_v10 = vadd.f32 %v14298_v9, %v8383_v11  ;;  %v13414_v63 = vadd.f32 %v14293_v41, %v8388_v54  ;;  %v8391_v51 = vmul.f32 %v14294_v52, %v8197_v43 }
 0x556   :  { %14297 = vst [vmem:[#allocation19_spill] sm:$0xff] %v13406_v55  ;;  %v13420_v59 = vadd.f32 %v14295_v13, %v8390_v2  ;;  %v13423_v31 = vadd.f32 %v14296_v44, %v8389_v47  ;;  %v7978_v39 = vpop.f32.mrb[164].mxu0 }
 0x557   :  { %14299 = vst [vmem:[#allocation20_spill] sm:$0xff] %v13411_v10  ;;  %v13428_v32 = vadd.f32 %v14298_v9, %v8391_v51  ;;  %v8202_v6 = vadd.f32 %v7978_v39, %v13165_v46  ;;  %v8041_v23 = vpop.f32.mrb[164].mxu1  ;;  %v7980_v11 = vpop.f32.mrb[165].mxu0 }
 0x558   :  { %v8204_v43 = vadd.f32 %v8041_v23, %v13168_v22  ;;  %v8203_v2 = vadd.f32 %v7980_v11, %v13171_v7  ;;  %v8043_v47 = vpop.f32.mrb[165].mxu1  ;;  %v7982_v0 = vpop.f32.mrb[166].mxu0 }
 0x559   :  { %v8396_v58 = vmul.f32 %v14290_v35, %v8202_v6  ;;  %v8205_v51 = vadd.f32 %v8043_v47, %v13174_v56  ;;  %v8210_v46 = vadd.f32 %v7982_v0, %v13177_v29  ;;  %v8045_v39 = vpop.f32.mrb[166].mxu1  ;;  %v7984_v10 = vpop.f32.mrb[167].mxu0 }
 0x55a   :  { %v8398_v55 = vmul.f32 %v14291_v25, %v8204_v43  ;;  %v8397_v54 = vmul.f32 %v14292_v14, %v8203_v2  ;;  %v8212_v22 = vadd.f32 %v8045_v39, %v13180_v16  ;;  %v8211_v7 = vadd.f32 %v7984_v10, %v13183_v53  ;;  %v8047_v23 = vpop.f32.mrb[167].mxu1 }
 0x55b   :  { %v13445_v11 = vadd.f32 %v14293_v41, %v8396_v58  ;;  %v8399_v6 = vmul.f32 %v14294_v52, %v8205_v51  ;;  %v8404_v56 = vmul.f32 %v14290_v35, %v8210_v46  ;;  %v8213_v29 = vadd.f32 %v8047_v23, %v13186_v3 }
 0x55c   :  { %v13451_v0 = vadd.f32 %v14295_v13, %v8398_v55  ;;  %v13454_v43 = vadd.f32 %v14296_v44, %v8397_v54  ;;  %v8406_v16 = vmul.f32 %v14291_v25, %v8212_v22  ;;  %v8405_v53 = vmul.f32 %v14292_v14, %v8211_v7 }
 0x55d   :  { %v13459_v10 = vadd.f32 %v14298_v9, %v8399_v6  ;;  %v13462_v58 = vadd.f32 %v14293_v41, %v8404_v56  ;;  %v8407_v2 = vmul.f32 %v14294_v52, %v8213_v29 }
 0x55e   :  { %v13468_v55 = vadd.f32 %v14295_v13, %v8406_v16  ;;  %v13471_v54 = vadd.f32 %v14296_v44, %v8405_v53  ;;  %v7988_v47 = vpop.f32.mrb[168].mxu0 }
 0x55f   :  { %v13476_v46 = vadd.f32 %v14298_v9, %v8407_v2  ;;  %v8218_v39 = vadd.f32 %v7988_v47, %v13189_v12  ;;  %v8051_v22 = vpop.f32.mrb[168].mxu1  ;;  %v7990_v7 = vpop.f32.mrb[169].mxu0 }
 0x560   :  { %v8220_v6 = vadd.f32 %v8051_v22, %v13192_v17  ;;  %v8219_v56 = vadd.f32 %v7990_v7, %v13195_v38  ;;  %v8053_v29 = vpop.f32.mrb[169].mxu1  ;;  %v7992_v16 = vpop.f32.mrb[170].mxu0 }
 0x561   :  { %v8541_v53 = vmax.f32 %v13471_v54, %v13476_v46  ;;  %v8412_v3 = vmul.f32 %v14290_v35, %v8218_v39  ;;  %v8221_v2 = vadd.f32 %v8053_v29, %v13198_v34  ;;  %v8226_v12 = vadd.f32 %v7992_v16, %v13201_v20  ;;  %v8055_v47 = vpop.f32.mrb[170].mxu1  ;;  %v7994_v51 = vpop.f32.mrb[171].mxu0 }
 0x562   :  { %v8414_v30 = vmul.f32 %v14291_v25, %v8220_v6  ;;  %v8413_v23 = vmul.f32 %v14292_v14, %v8219_v56  ;;  %v8228_v17 = vadd.f32 %v8055_v47, %v13204_v37  ;;  %v8227_v38 = vadd.f32 %v7994_v51, %v13207_v15  ;;  %v8057_v22 = vpop.f32.mrb[171].mxu1 }
 0x563   :  { %v13493_v7 = vadd.f32 %v14293_v41, %v8412_v3  ;;  %v8415_v39 = vmul.f32 %v14294_v52, %v8221_v2  ;;  %v8420_v34 = vmul.f32 %v14290_v35, %v8226_v12  ;;  %v8229_v20 = vadd.f32 %v8057_v22, %v13210_v24 }
 0x564   :  { %v13499_v29 = vadd.f32 %v14295_v13, %v8414_v30  ;;  %v13502_v6 = vadd.f32 %v14296_v44, %v8413_v23  ;;  %v8422_v37 = vmul.f32 %v14291_v25, %v8228_v17  ;;  %v8421_v15 = vmul.f32 %v14292_v14, %v8227_v38  ;;  %v14300_v38 = vld [vmem:[#allocation45_spill] sm:$0xff] }
 0x565   :  { %v13507_v51 = vadd.f32 %v14298_v9, %v8415_v39  ;;  %v13510_v3 = vadd.f32 %v14293_v41, %v8420_v34  ;;  %v8423_v35 = vmul.f32 %v14294_v52, %v8229_v20 }
 0x566   :  { %v8542_v24 = vmax.f32 %v13493_v7, %v13499_v29  ;;  %v13516_v30 = vadd.f32 %v14295_v13, %v8422_v37  ;;  %v13519_v23 = vadd.f32 %v14296_v44, %v8421_v15  ;;  %v11106_v7 = vld [vmem:[%s13926_s7 + $0x1d0] sm:$0xff]   ;;  %v11109_v29 = vld [vmem:[%s13926_s7 + $0x118] sm:$0xff]  }
 0x567   :  { %v8543_v14 = vmax.f32 %v13502_v6, %v13507_v51  ;;  %v13524_v25 = vadd.f32 %v14298_v9, %v8423_v35  ;;  %v11108_v6 = vld [vmem:[%s13926_s7 + $0x158] sm:$0xff]  }
 0x568   :  { %v8544_v41 = vmax.f32 %v13510_v3, %v13516_v30  ;;  %v11107_v30 = vld [vmem:[%s13926_s7 + $0x190] sm:$0xff]  }
 0x569   :  { %v8545_v52 = vmax.f32 %v13519_v23, %v13524_v25  ;;  %v11113_v23 = vld [vmem:[%s13926_s7 + $0x120] sm:$0xff]   ;;  %v11116_v25 = vld [vmem:[%s13926_s7 + $0x168] sm:$0xff]  }
 0x58f   :  { %v8094_v56 = vpop.f32.mrb[172].mxu0 }
 0x590   :  { %v8190_v16 = vadd.f32 %v8094_v56, %v13261_v28  ;;  %v8157_v13 = vpop.f32.mrb[172].mxu1  ;;  %v8096_v2 = vpop.f32.mrb[173].mxu0 }
 0x591   :  { %v8192_v44 = vadd.f32 %v8157_v13, %v13264_v33  ;;  %v8191_v12 = vadd.f32 %v8096_v2, %v13267_v1  ;;  %v8159_v47 = vpop.f32.mrb[173].mxu1  ;;  %v8098_v17 = vpop.f32.mrb[174].mxu0 }
 0x592   :  { %v8384_v9 = vmul.f32 %v14300_v38, %v8190_v16  ;;  %v8193_v22 = vadd.f32 %v8159_v47, %v13270_v19  ;;  %v8198_v39 = vadd.f32 %v8098_v17, %v13273_v8  ;;  %v8161_v34 = vpop.f32.mrb[174].mxu1  ;;  %v8100_v20 = vpop.f32.mrb[175].mxu0 }
 0x593   :  { %v8386_v37 = vmul.f32 %v13077_v57, %v8192_v44  ;;  %v8385_v28 = vmul.f32 %v13091_v27, %v8191_v12  ;;  %v8200_v15 = vadd.f32 %v8161_v34, %v13276_v49  ;;  %v8199_v33 = vadd.f32 %v8100_v20, %v13279_v42  ;;  %v8163_v35 = vpop.f32.mrb[175].mxu1  ;;  %v14301_v49 = vld [vmem:[#allocation49_spill] sm:$0xff] }
 0x594   :  { %v8482_v1 = vadd.f32 %v13073_v40, %v8384_v9  ;;  %v8387_v56 = vmul.f32 %v13095_v61, %v8193_v22  ;;  %v8392_v16 = vmul.f32 %v14300_v38, %v8198_v39  ;;  %v8201_v19 = vadd.f32 %v8163_v35, %v13282_v26 }
 0x595   :  { %v8484_v8 = vadd.f32 %v13081_v60, %v8386_v37  ;;  %v8483_v13 = vadd.f32 %v13105_v62, %v8385_v28  ;;  %v8394_v2 = vmul.f32 %v13077_v57, %v8200_v15  ;;  %v8393_v44 = vmul.f32 %v13091_v27, %v8199_v33 }
 0x596   :  { %v8485_v12 = vadd.f32 %v14301_v49, %v8387_v56  ;;  %v8490_v42 = vadd.f32 %v13073_v40, %v8392_v16  ;;  %v8395_v47 = vmul.f32 %v13095_v61, %v8201_v19  ;;  %v14302_v15 = vmax.f32 %v13397_v36, %v13403_v18 }
 0x597   :  { %v8548_v17 = vmax.f32 %v8482_v1, %v8484_v8  ;;  %v8492_v9 = vadd.f32 %v13081_v60, %v8394_v2  ;;  %v13553_v22 = vadd.f32 %v13105_v62, %v8393_v44  ;;  %v8104_v26 = vpop.f32.mrb[176].mxu0  ;;  %v14303_v18 = vmax.f32 %v13414_v63, %v13420_v59 }
 0x598   :  { %v8549_v39 = vmax.f32 %v8483_v13, %v8485_v12  ;;  %v13556_v34 = vadd.f32 %v14301_v49, %v8395_v47  ;;  %v8206_v20 = vadd.f32 %v8104_v26, %v13285_v21  ;;  %v8167_v37 = vpop.f32.mrb[176].mxu1  ;;  %v8106_v28 = vpop.f32.mrb[177].mxu0 }
 0x599   :  { %v8562_v33 = vmax.f32 %v14302_v15, %v8548_v17  ;;  %v8550_v35 = vmax.f32 %v8490_v42, %v8492_v9  ;;  %v8208_v1 = vadd.f32 %v8167_v37, %v13288_v45  ;;  %v8207_v56 = vadd.f32 %v8106_v28, %v13291_v4  ;;  %v8169_v16 = vpop.f32.mrb[177].mxu1  ;;  %v8108_v19 = vpop.f32.mrb[178].mxu0  ;;  %v14304_v28 = vld [vmem:[#allocation42_spill] sm:$0xff] }
 0x59a   :  { %v8551_v8 = vmax.f32 %v13553_v22, %v13556_v34  ;;  %v8400_v13 = vmul.f32 %v14300_v38, %v8206_v20  ;;  %v8209_v21 = vadd.f32 %v8169_v16, %v13294_v5  ;;  %v8214_v2 = vadd.f32 %v8108_v19, %v13297_v50  ;;  %v8171_v44 = vpop.f32.mrb[178].mxu1  ;;  %v8110_v12 = vpop.f32.mrb[179].mxu0  ;;  %v14306_v16 = vld [vmem:[#allocation19_spill] sm:$0xff]  ;;  %v14307_v19 = vld [vmem:[#allocation20_spill] sm:$0xff] }
 0x59b   :  { %v8576_v36 = vmax.f32 %v8562_v33, 0.0  ;;  %v8564_v45 = vmax.f32 %v14303_v18, %v8550_v35  ;;  %v8402_v4 = vmul.f32 %v13077_v57, %v8208_v1  ;;  %v8401_v42 = vmul.f32 %v13091_v27, %v8207_v56  ;;  %v8173_v47 = vpop.f32.mrb[179].mxu1  ;;  %v14305_v35 = vld [vmem:[#allocation50_spill] sm:$0xff]  ;;  %v14309_v18 = vld [vmem:[#allocation53_spill] sm:$0xff] }
 0x59c   :  { %v13575_v17 = vadd.f32 %v13073_v40, %v8400_v13  ;;  %v8403_v9 = vmul.f32 %v13095_v61, %v8209_v21  ;;  %v8408_v5 = vmul.f32 %v14300_v38, %v8214_v2  ;;  %v8216_v50 = vadd.f32 %v8171_v44, %v13300_v48 }
 0x59d   :  { %v8590_v22 = vpack.c.bf16 %v8576_v36, %v8576_v36  ;;  %v8578_v26 = vmax.f32 %v8564_v45, 0.0  ;;  %v13581_v34 = vadd.f32 %v13081_v60, %v8402_v4  ;;  %v8499_v63 = vadd.f32 %v13105_v62, %v8401_v42 }
 0x59e   :  { %v8501_v59 = vadd.f32 %v14301_v49, %v8403_v9  ;;  %v13586_v20 = vadd.f32 %v13073_v40, %v8408_v5  ;;  %v8410_v37 = vmul.f32 %v13077_v57, %v8216_v50  ;;  %v8215_v15 = vadd.f32 %v8110_v12, %v14304_v28  ;;  %v14310_v9 = vld [vmem:[#allocation32_spill] sm:$0xff]  ;;  %v14311_v50 = vld [vmem:[#allocation33_spill] sm:$0xff] }
 0x59f   :  { %v13590_v33 = vpack.c.bf16 %v8578_v26, %v8578_v26  ;;  %v8552_v48 = vmax.f32 %v13575_v17, %v13581_v34  ;;  %v8217_v1 = vadd.f32 %v8173_v47, %v14305_v35  ;;  %v8114_v56 = vpop.f32.mrb[180].mxu0  ;;  %v14308_v13 = vmax.f32 %v14306_v16, %v14307_v19  ;;  %v11114_v34 = vld [vmem:[%s13926_s7 + $0x1e0] sm:$0xff]  }
 0x5a0   :  { %v8553_v2 = vmax.f32 %v8499_v63, %v8501_v59  ;;  %v13599_v44 = vadd.f32 %v13081_v60, %v8410_v37  ;;  %v8409_v36 = vmul.f32 %v13091_v27, %v8215_v15  ;;  %v8222_v12 = vadd.f32 %v8114_v56, %v14309_v18  ;;  %v8177_v45 = vpop.f32.mrb[180].mxu1  ;;  %v8116_v4 = vpop.f32.mrb[181].mxu0  ;;  %v14312_v37 = vld [vmem:[#allocation34_spill] sm:$0xff] }
 0x5a1   :  { %v8563_v21 = vmax.f32 %v14308_v13, %v8549_v39  ;;  %v8411_v42 = vmul.f32 %v13095_v61, %v8217_v1  ;;  %v8224_v5 = vadd.f32 %v8177_v45, %v14310_v9  ;;  %v8223_v26 = vadd.f32 %v8116_v4, %v14311_v50  ;;  %v8179_v28 = vpop.f32.mrb[181].mxu1  ;;  %v8118_v35 = vpop.f32.mrb[182].mxu0  ;;  %v11097_v18 = vld [vmem:[%s13926_s7 + $0x100] sm:$0xff]  }
 0x5a2   :  { %v8554_v39 = vmax.f32 %v13586_v20, %v13599_v44  ;;  %v8507_v63 = vadd.f32 %v13105_v62, %v8409_v36  ;;  %v8416_v59 = vmul.f32 %v14300_v38, %v8222_v12  ;;  %v8225_v15 = vadd.f32 %v8179_v28, %v14312_v37  ;;  %v8181_v56 = vpop.f32.mrb[182].mxu1  ;;  %v8120_v16 = vpop.f32.mrb[183].mxu0  ;;  %v14313_v12 = vld [vmem:[#allocation18_spill] sm:$0xff] }
 0x5a3   :  { %v8577_v47 = vmax.f32 %v8563_v21, 0.0  ;;  %v8509_v1 = vadd.f32 %v14301_v49, %v8411_v42  ;;  %v8418_v19 = vmul.f32 %v13077_v57, %v8224_v5  ;;  %v8417_v21 = vmul.f32 %v13091_v27, %v8223_v26  ;;  %v8183_v20 = vpop.f32.mrb[183].mxu1  ;;  %v14314_v4 = vld [vmem:[#allocation54_spill] sm:$0xff] }
 0x5a4   :  { %v8514_v44 = vadd.f32 %v13073_v40, %v8416_v59  ;;  %v8419_v36 = vmul.f32 %v13095_v61, %v8225_v15  ;;  %v8230_v45 = vadd.f32 %v8118_v35, %v14313_v12  ;;  %v8232_v9 = vadd.f32 %v8181_v56, %v14314_v4  ;;  %v11100_v42 = vld [vmem:[%s13926_s7 + $0x148] sm:$0xff]  }
 0x5a5   :  { %v8591_v13 = vpack.c.bf16 %v8577_v47, %v8577_v47  ;;  %v8555_v5 = vmax.f32 %v8507_v63, %v8509_v1  ;;  %v8516_v47 = vadd.f32 %v13081_v60, %v8418_v19  ;;  %v8515_v50 = vadd.f32 %v13105_v62, %v8417_v21  ;;  %v14316_v15 = vld [vmem:[#allocation58_spill] sm:$0xff]  ;;  %v14317_v1 = vld [vmem:[#allocation59_spill] sm:$0xff] }
 0x5a6   :  { %v14315_v26 = vmax.f32 %v13423_v31, %v13428_v32  ;;  %v8517_v59 = vadd.f32 %v14301_v49, %v8419_v36  ;;  %v8424_v35 = vmul.f32 %v14300_v38, %v8230_v45  ;;  %v8426_v37 = vmul.f32 %v13077_v57, %v8232_v9  ;;  %v11121_v36 = vld [vmem:[%s13926_s7 + $0x130] sm:$0xff]   ;;  %v11124_v45 = vld [vmem:[%s13926_s7 + $0x178] sm:$0xff]   ;;  %v11119_v4 = vld [vmem:[%s13926_s7 + $0x1a8] sm:$0xff]  }
 0x5a7   :  { %9539 = vmatprep.mubr.bf16.mxu0 %v8591_v13  ;;  %v8231_v56 = vadd.f32 %v8120_v16, %v14316_v15  ;;  %v8556_v12 = vmax.f32 %v8514_v44, %v8516_v47  ;;  %v8233_v19 = vadd.f32 %v8183_v20, %v14317_v1  ;;  %v11101_v13 = vld [vmem:[%s13926_s7 + $0x108] sm:$0xff]   ;;  %v14318_v31 = vmax.f32 %v13454_v43, %v13459_v10  ;;  %v11104_v16 = vld [vmem:[%s13926_s7 + $0x150] sm:$0xff]   ;;  %v11099_v43 = vld [vmem:[%s13926_s7 + $0x180] sm:$0xff]  }
 0x5a8   :  { %v8565_v28 = vmax.f32 %v14315_v26, %v8551_v8  ;;  %9540 = vmatmul.mubr.bf16.vlgmr.msra.gmra.mrb[184].mxu0 %v8590_v22  ;;  %v8557_v8 = vmax.f32 %v8515_v50, %v8517_v59  ;;  %v8522_v38 = vadd.f32 %v13073_v40, %v8424_v35  ;;  %v8524_v57 = vadd.f32 %v13081_v60, %v8426_v37  ;;  %v11118_v44 = vld [vmem:[%s13926_s7 + $0x1e8] sm:$0xff]   ;;  %v11122_v9 = vld [vmem:[%s13926_s7 + $0x1f0] sm:$0xff]   ;;  %v11128_v47 = vld [vmem:[%s13926_s7 + $0x240] sm:$0xff]  }
 0x5a9   :  { %10861 = vmatpush3.bf16.msra.mxu0 %v11097_v18  ;;  %v8567_v32 = vmax.f32 %v14318_v31, %v8553_v2  ;;  %v8425_v22 = vmul.f32 %v13091_v27, %v8231_v56  ;;  %v8427_v18 = vmul.f32 %v13095_v61, %v8233_v19  ;;  %v8569_v40 = vmax.f32 %v8541_v53, %v8555_v5  ;;  %v11102_v2 = vld [vmem:[%s13926_s7 + $0x1c8] sm:$0xff]   ;;  %v11105_v53 = vld [vmem:[%s13926_s7 + $0x110] sm:$0xff]   ;;  %v11129_v59 = vld [vmem:[%s13926_s7 + $0x200] sm:$0xff]  }
 0x5aa   :  { %v8579_v63 = vmax.f32 %v8565_v28, 0.0  ;;  %10862 = vmatprep.subr.bf16.mxu0 %v11100_v42  ;;  %v8558_v60 = vmax.f32 %v8522_v38, %v8524_v57  ;;  %v14319_v61 = vmax.f32 %v13445_v11, %v13451_v0  ;;  %v13668_v54 = vmax.f32 %v8543_v14, %v8557_v8  ;;  %v11125_v42 = vld [vmem:[%s13926_s7 + $0x138] sm:$0xff]   ;;  %v11123_v50 = vld [vmem:[%s13926_s7 + $0x1b0] sm:$0xff]   ;;  %v11132_v37 = vld [vmem:[%s13926_s7 + $0x248] sm:$0xff]  }
 0x5ab   :  { %v8581_v10 = vmax.f32 %v8567_v32, 0.0  ;;  %v8523_v27 = vadd.f32 %v13105_v62, %v8425_v22  ;;  %v8525_v62 = vadd.f32 %v14301_v49, %v8427_v18  ;;  %v8583_v17 = vmax.f32 %v8569_v40, 0.0  ;;  %v11126_v28 = vld [vmem:[%s13926_s7 + $0x1f8] sm:$0xff]   ;;  %v11133_v19 = vld [vmem:[%s13926_s7 + $0x208] sm:$0xff]   ;;  %v11131_v31 = vld [vmem:[%s13926_s7 + $0x280] sm:$0xff]  }
 0x5ac   :  { %v8593_v21 = vpack.c.bf16 %v8579_v63, %v8579_v63  ;;  %v13663_v20 = vmax.f32 %v14319_v61, %v8552_v48  ;;  %v14320_v11 = vmax.f32 %v13462_v58, %v13468_v55  ;;  %v13686_v51 = vmax.f32 %v8542_v24, %v8556_v12  ;;  %v11103_v55 = vld [vmem:[%s13926_s7 + $0x188] sm:$0xff]   ;;  %v11112_v24 = vld [vmem:[%s13926_s7 + $0x160] sm:$0xff]   ;;  %v11120_v48 = vld [vmem:[%s13926_s7 + $0x170] sm:$0xff]  }
 0x5ad   :  { %10863 = vmatpush3.bf16.msra.mxu0 %v11101_v13  ;;  %v8595_v46 = vpack.c.bf16 %v8581_v10, %v8581_v10  ;;  %v13691_v14 = vmax.f32 %v8544_v41, %v8558_v60  ;;  %v8559_v58 = vmax.f32 %v8523_v27, %v8525_v62  ;;  %v8597_v49 = vpack.c.bf16 %v8583_v17, %v8583_v17  ;;  %v11110_v41 = vld [vmem:[%s13926_s7 + $0x1d8] sm:$0xff]   ;;  %v11130_v63 = vld [vmem:[%s13926_s7 + $0x2c0] sm:$0xff]   ;;  %v11136_v13 = vld [vmem:[%s13926_s7 + $0x250] sm:$0xff]  }
 0x5ae   :  { %9579 = vmatprep.mubr.bf16.mxu1 %v8593_v21  ;;  %v13677_v0 = vmax.f32 %v14320_v11, %v8554_v39  ;;  %10864 = vmatprep.subr.bf16.mxu0 %v11104_v16  ;;  %v11115_v39 = vld [vmem:[%s13926_s7 + $0x1a0] sm:$0xff]   ;;  %v8580_v5 = vmax.f32 %v13663_v20, 0.0  ;;  %v8585_v26 = vmax.f32 %v13668_v54, 0.0  ;;  %v11127_v15 = vld [vmem:[%s13926_s7 + $0x1b8] sm:$0xff]   ;;  %v11134_v8 = vld [vmem:[%s13926_s7 + $0x2c8] sm:$0xff]  }
 0x5af   :  { %9580 = vmatmul.mubr.bf16.vlgmr.msra.gmra.mrb[184].mxu1 %v13590_v33  ;;  %9619 = vmatprep.mubr.bf16.mxu0 %v8595_v46  ;;  %v13705_v3 = vmax.f32 %v8545_v52, %v8559_v58  ;;  %v11111_v52 = vld [vmem:[%s13926_s7 + $0x198] sm:$0xff]   ;;  %v11117_v33 = vld [vmem:[%s13926_s7 + $0x128] sm:$0xff]   ;;  %v11137_v57 = vld [vmem:[%s13926_s7 + $0x210] sm:$0xff]   ;;  %v8584_v58 = vmax.f32 %v13686_v51, 0.0 }
 0x5b0   :  { %10883 = vmatpush3.bf16.msra.mxu1 %v11099_v43  ;;  %9659 = vmatprep.mubr.bf16.mxu1 %v8597_v49  ;;  %v8594_v35 = vpack.c.bf16 %v8580_v5, %v8580_v5  ;;  %v8599_v56 = vpack.c.bf16 %v8585_v26, %v8585_v26  ;;  %v8582_v12 = vmax.f32 %v13677_v0, 0.0  ;;  %v11140_v22 = vld [vmem:[%s13926_s7 + $0x258] sm:$0xff]   ;;  %v11135_v16 = vld [vmem:[%s13926_s7 + $0x288] sm:$0xff]   ;;  %v11138_v21 = vld [vmem:[%s13926_s7 + $0x2d0] sm:$0xff]  }
 0x5b1   :  { %10884 = vmatprep.subr.bf16.mxu1 %v11102_v2  ;;  %10865 = vmatpush3.bf16.msra.mxu0 %v11105_v53  ;;  %v8587_v1 = vmax.f32 %v13705_v3, 0.0  ;;  %v11141_v18 = vld [vmem:[%s13926_s7 + $0x218] sm:$0xff]   ;;  %v11144_v43 = vld [vmem:[%s13926_s7 + $0x260] sm:$0xff]   ;;  %v11139_v10 = vld [vmem:[%s13926_s7 + $0x290] sm:$0xff]  }
 0x5b2   :  { %10866 = vmatprep.subr.bf16.mxu0 %v11108_v6  ;;  %v8596_v32 = vpack.c.bf16 %v8582_v12, %v8582_v12  ;;  %v11142_v40 = vld [vmem:[%s13926_s7 + $0x2d8] sm:$0xff]   ;;  %v11145_v60 = vld [vmem:[%s13926_s7 + $0x220] sm:$0xff]   ;;  %v11148_v27 = vld [vmem:[%s13926_s7 + $0x268] sm:$0xff]  }
 0x5b3   :  { %v8601_v38 = vpack.c.bf16 %v8587_v1, %v8587_v1  ;;  %v11143_v2 = vld [vmem:[%s13926_s7 + $0x298] sm:$0xff]   ;;  %v11146_v61 = vld [vmem:[%s13926_s7 + $0x2e0] sm:$0xff]   ;;  %v11149_v20 = vld [vmem:[%s13926_s7 + $0x228] sm:$0xff]  }
 0x5b4   :  { %10885 = vmatpush3.bf16.msra.mxu1 %v11103_v55  ;;  %v11152_v54 = vld [vmem:[%s13926_s7 + $0x270] sm:$0xff]   ;;  %v11147_v62 = vld [vmem:[%s13926_s7 + $0x2a0] sm:$0xff]   ;;  %v11150_v46 = vld [vmem:[%s13926_s7 + $0x2e8] sm:$0xff]  }
 0x5b5   :  { %10886 = vmatprep.subr.bf16.mxu1 %v11106_v7  ;;  %10867 = vmatpush3.bf16.msra.mxu0 %v11109_v29  ;;  %v11153_v53 = vld [vmem:[%s13926_s7 + $0x230] sm:$0xff]   ;;  %v11156_v17 = vld [vmem:[%s13926_s7 + $0x278] sm:$0xff]   ;;  %v11151_v11 = vld [vmem:[%s13926_s7 + $0x2a8] sm:$0xff]  }
 0x5b6   :  { %10868 = vmatprep.subr.bf16.mxu0 %v11112_v24  ;;  %v11154_v0 = vld [vmem:[%s13926_s7 + $0x2f0] sm:$0xff]   ;;  %v11157_v6 = vld [vmem:[%s13926_s7 + $0x238] sm:$0xff]   ;;  %v11160_v55 = vld [vmem:[%s13926_s7 + $0x340] sm:$0xff]   ;;  %v8598_v24 = vpack.c.bf16 %v8584_v58, %v8584_v58 }
 0x5b7   :  { %v11155_v49 = vld [vmem:[%s13926_s7 + $0x2b0] sm:$0xff]   ;;  %v14321_v7 = vld [vmem:[#allocation41_spill] sm:$0xff] }
 0x5b8   :  { %10887 = vmatpush3.bf16.msra.mxu1 %v11107_v30  ;;  %v8589_v29 = vmax.f32 %v14321_v7, 0.0  ;;  %v11158_v3 = vld [vmem:[%s13926_s7 + $0x2f8] sm:$0xff]   ;;  %v11161_v51 = vld [vmem:[%s13926_s7 + $0x300] sm:$0xff]   ;;  %v11162_v30 = vld [vmem:[%s13926_s7 + $0x348] sm:$0xff]  }
 0x5b9   :  { %10888 = vmatprep.subr.bf16.mxu1 %v11110_v41  ;;  %10869 = vmatpush3.bf16.msra.mxu0 %v11113_v23  ;;  %v11159_v41 = vld [vmem:[%s13926_s7 + $0x2b8] sm:$0xff]  }
 0x5ba   :  { %10870 = vmatprep.subr.bf16.mxu0 %v11116_v25  ;;  %v8603_v23 = vpack.c.bf16 %v8589_v29, %v8589_v29  ;;  %v8586_v25 = vmax.f32 %v13691_v14, 0.0  ;;  %v11166_v14 = vld [vmem:[%s13926_s7 + $0x358] sm:$0xff]  }
 0x5bb   :  { %v11174_v5 = vld [vmem:[%s13926_s7 + $0x378] sm:$0xff]  }
 0x5bc   :  { %10889 = vmatpush3.bf16.msra.mxu1 %v11111_v52  ;;  %v11163_v52 = vld [vmem:[%s13926_s7 + $0x308] sm:$0xff]  }
 0x5bd   :  { %10890 = vmatprep.subr.bf16.mxu1 %v11114_v34  ;;  %10871 = vmatpush3.bf16.msra.mxu0 %v11117_v33  ;;  %v11164_v34 = vld [vmem:[%s13926_s7 + $0x350] sm:$0xff]   ;;  %v8600_v33 = vpack.c.bf16 %v8586_v25, %v8586_v25 }
 0x5be   :  { %10872 = vmatprep.subr.bf16.mxu0 %v11120_v48  ;;  %v11165_v48 = vld [vmem:[%s13926_s7 + $0x310] sm:$0xff]  }
 0x5c0   :  { %10891 = vmatpush3.bf16.msra.mxu1 %v11115_v39  ;;  %v11167_v39 = vld [vmem:[%s13926_s7 + $0x318] sm:$0xff]  }
 0x5c1   :  { %10892 = vmatprep.subr.bf16.mxu1 %v11118_v44  ;;  %10873 = vmatpush3.bf16.msra.mxu0 %v11121_v36  ;;  %v11168_v44 = vld [vmem:[%s13926_s7 + $0x360] sm:$0xff]  }
 0x5c2   :  { %10874 = vmatprep.subr.bf16.mxu0 %v11124_v45  ;;  %v11169_v36 = vld [vmem:[%s13926_s7 + $0x320] sm:$0xff]   ;;  %v11170_v45 = vld [vmem:[%s13926_s7 + $0x368] sm:$0xff]  }
 0x5c4   :  { %10893 = vmatpush3.bf16.msra.mxu1 %v11119_v4  ;;  %v11171_v4 = vld [vmem:[%s13926_s7 + $0x328] sm:$0xff]  }
 0x5c5   :  { %10894 = vmatprep.subr.bf16.mxu1 %v11122_v9  ;;  %10875 = vmatpush3.bf16.msra.mxu0 %v11125_v42  ;;  %v11172_v9 = vld [vmem:[%s13926_s7 + $0x370] sm:$0xff]  }
 0x5c6   :  { %10904 = vmatprep.subr.bf16.mxu0 %v11128_v47  ;;  %v11173_v42 = vld [vmem:[%s13926_s7 + $0x330] sm:$0xff]   ;;  %v11175_v47 = vld [vmem:[%s13926_s7 + $0x338] sm:$0xff]  }
 0x5c8   :  { %10895 = vmatpush3.bf16.msra.mxu1 %v11123_v50  ;;  %9620 = vmatmul.mubr.bf16.vlgmr.msra.gmra.mrb[188].mxu0 %v8594_v35  ;;  %v14322_v50 = vld [vmem:[#allocation40_spill] sm:$0xff] }
 0x5c9   :  { %10896 = vmatprep.subr.bf16.mxu1 %v11126_v28  ;;  %10905 = vmatpush3.bf16.msra.mxu0 %v11129_v59  ;;  %v8588_v26 = vmax.f32 %v14322_v50, 0.0 }
 0x5ca   :  { %9699 = vmatprep.mubr.bf16.mxu0 %v8599_v56  ;;  %10906 = vmatprep.subr.bf16.mxu0 %v11132_v37  ;;  %v10703_v56 = vld [vmem:[#allocation13] ss:$0 sm:$0xff] }
 0x5cb   :  { %v8602_v28 = vpack.c.bf16 %v8588_v26, %v8588_v26 }
 0x5cc   :  { %10897 = vmatpush3.bf16.msra.mxu1 %v11127_v15 }
 0x5cd   :  { %10926 = vmatprep.subr.bf16.mxu1 %v11130_v63  ;;  %10907 = vmatpush3.bf16.msra.mxu0 %v11133_v19 }
 0x5ce   :  { %10908 = vmatprep.subr.bf16.mxu0 %v11136_v13 }
 0x5cf   :  { %9660 = vmatmul.mubr.bf16.vlgmr.msra.gmra.mrb[188].mxu1 %v8596_v32 }
 0x5d0   :  { %10927 = vmatpush3.bf16.msra.mxu1 %v11131_v31  ;;  %9739 = vmatprep.mubr.bf16.mxu1 %v8601_v38 }
 0x5d1   :  { %10928 = vmatprep.subr.bf16.mxu1 %v11134_v8  ;;  %10909 = vmatpush3.bf16.msra.mxu0 %v11137_v57 }
 0x5d2   :  { %10910 = vmatprep.subr.bf16.mxu0 %v11140_v22 }
 0x5d4   :  { %10929 = vmatpush3.bf16.msra.mxu1 %v11135_v16 }
 0x5d5   :  { %10930 = vmatprep.subr.bf16.mxu1 %v11138_v21  ;;  %10911 = vmatpush3.bf16.msra.mxu0 %v11141_v18 }
 0x5d6   :  { %10912 = vmatprep.subr.bf16.mxu0 %v11144_v43 }
 0x5d8   :  { %10931 = vmatpush3.bf16.msra.mxu1 %v11139_v10 }
 0x5d9   :  { %10932 = vmatprep.subr.bf16.mxu1 %v11142_v40  ;;  %10913 = vmatpush3.bf16.msra.mxu0 %v11145_v60 }
 0x5da   :  { %10914 = vmatprep.subr.bf16.mxu0 %v11148_v27 }
 0x5dc   :  { %10933 = vmatpush3.bf16.msra.mxu1 %v11143_v2 }
 0x5dd   :  { %10934 = vmatprep.subr.bf16.mxu1 %v11146_v61  ;;  %10915 = vmatpush3.bf16.msra.mxu0 %v11149_v20 }
 0x5de   :  { %10916 = vmatprep.subr.bf16.mxu0 %v11152_v54 }
 0x5e0   :  { %10935 = vmatpush3.bf16.msra.mxu1 %v11147_v62 }
 0x5e1   :  { %10936 = vmatprep.subr.bf16.mxu1 %v11150_v46  ;;  %10917 = vmatpush3.bf16.msra.mxu0 %v11153_v53 }
 0x5e2   :  { %10918 = vmatprep.subr.bf16.mxu0 %v11156_v17 }
 0x5e4   :  { %10937 = vmatpush3.bf16.msra.mxu1 %v11151_v11 }
 0x5e5   :  { %10938 = vmatprep.subr.bf16.mxu1 %v11154_v0  ;;  %10919 = vmatpush3.bf16.msra.mxu0 %v11157_v6 }
 0x5e6   :  { %10948 = vmatprep.subr.bf16.mxu0 %v11160_v55 }
 0x5e8   :  { %10939 = vmatpush3.bf16.msra.mxu1 %v11155_v49  ;;  %9700 = vmatmul.mubr.bf16.vlgmr.msra.gmra.mrb[192].mxu0 %v8598_v24 }
 0x5e9   :  { %10940 = vmatprep.subr.bf16.mxu1 %v11158_v3  ;;  %10949 = vmatpush3.bf16.msra.mxu0 %v11161_v51 }
 0x5ea   :  { %9779 = vmatprep.mubr.bf16.mxu0 %v8603_v23  ;;  %10950 = vmatprep.subr.bf16.mxu0 %v11162_v30 }
 0x5ec   :  { %10941 = vmatpush3.bf16.msra.mxu1 %v11159_v41 }
 0x5ed   :  { %10951 = vmatpush3.bf16.msra.mxu0 %v11163_v52 }
 0x5ee   :  { %10952 = vmatprep.subr.bf16.mxu0 %v11164_v34 }
 0x5ef   :  { %9740 = vmatmul.mubr.bf16.vlgmr.msra.gmra.mrb[192].mxu1 %v8600_v33 }
 0x5f1   :  { %10953 = vmatpush3.bf16.msra.mxu0 %v11165_v48 }
 0x5f2   :  { %10954 = vmatprep.subr.bf16.mxu0 %v11166_v14 }
 0x5f5   :  { %10955 = vmatpush3.bf16.msra.mxu0 %v11167_v39 }
 0x5f6   :  { %10956 = vmatprep.subr.bf16.mxu0 %v11168_v44 }
 0x5f9   :  { %10957 = vmatpush3.bf16.msra.mxu0 %v11169_v36 }
 0x5fa   :  { %10958 = vmatprep.subr.bf16.mxu0 %v11170_v45 }
 0x5fd   :  { %10959 = vmatpush3.bf16.msra.mxu0 %v11171_v4 }
 0x5fe   :  { %10960 = vmatprep.subr.bf16.mxu0 %v11172_v9 }
 0x601   :  { %10961 = vmatpush3.bf16.msra.mxu0 %v11173_v42 }
 0x602   :  { %10962 = vmatprep.subr.bf16.mxu0 %v11174_v5 }
 0x605   :  { %10963 = vmatpush3.bf16.msra.mxu0 %v11175_v47 }
 0x608   :  { %9780 = vmatmul.mubr.bf16.vlgmr.msra.gmra.mrb[196].mxu0 %v8602_v28 }
 0x67b   :  { %v10832_v59 = vpop.f32.mrb[184].mxu0 }
 0x67c   :  { %v10833_v35 = vpop.f32.mrb[185].mxu0 }
 0x67d   :  { %v10834_v37 = vadd.f32 %v10833_v35, %v10832_v59  ;;  %v10835_v15 = vpop.f32.mrb[186].mxu0 }
 0x67e   :  { %v10836_v12 = vpop.f32.mrb[187].mxu0 }
 0x67f   :  { %v9542_v63 = vadd.f32 %v10834_v37, %v10703_v56 }
 0x682   :  { %v10854_v1 = vpop.f32.mrb[184].mxu1 }
 0x683   :  { %v10855_v19 = vpop.f32.mrb[185].mxu1 }
 0x684   :  { %v10856_v13 = vadd.f32 %v10855_v19, %v10854_v1  ;;  %v10857_v31 = vpop.f32.mrb[186].mxu1 }
 0x685   :  { %v10858_v32 = vpop.f32.mrb[187].mxu1 }
 0x686   :  { %v9582_v8 = vadd.f32 %v10856_v13, %v9542_v63 }
 0x69b   :  { %v10876_v38 = vpop.f32.mrb[188].mxu0 }
 0x69c   :  { %v10877_v57 = vpop.f32.mrb[189].mxu0 }
 0x69d   :  { %v10878_v22 = vadd.f32 %v10877_v57, %v10876_v38  ;;  %v10879_v16 = vpop.f32.mrb[190].mxu0 }
 0x69e   :  { %v10880_v21 = vpop.f32.mrb[191].mxu0 }
 0x69f   :  { %v9622_v18 = vadd.f32 %v10878_v22, %v9582_v8 }
 0x6a2   :  { %v10898_v43 = vpop.f32.mrb[188].mxu1 }
 0x6a3   :  { %v10899_v10 = vpop.f32.mrb[189].mxu1 }
 0x6a4   :  { %v10900_v40 = vadd.f32 %v10899_v10, %v10898_v43  ;;  %v10901_v60 = vpop.f32.mrb[190].mxu1 }
 0x6a5   :  { %v10902_v27 = vpop.f32.mrb[191].mxu1 }
 0x6a6   :  { %v9662_v2 = vadd.f32 %v10900_v40, %v9622_v18 }
 0x6bb   :  { %v10920_v61 = vpop.f32.mrb[192].mxu0 }
 0x6bc   :  { %v10921_v20 = vpop.f32.mrb[193].mxu0 }
 0x6bd   :  { %v10922_v54 = vadd.f32 %v10921_v20, %v10920_v61  ;;  %v10923_v62 = vpop.f32.mrb[194].mxu0 }
 0x6be   :  { %v10924_v46 = vpop.f32.mrb[195].mxu0 }
 0x6bf   :  { %v9702_v53 = vadd.f32 %v10922_v54, %v9662_v2 }
 0x6c2   :  { %v10942_v17 = vpop.f32.mrb[192].mxu1 }
 0x6c3   :  { %v10943_v11 = vpop.f32.mrb[193].mxu1 }
 0x6c4   :  { %v10944_v0 = vadd.f32 %v10943_v11, %v10942_v17  ;;  %v10945_v6 = vpop.f32.mrb[194].mxu1 }
 0x6c5   :  { %v10946_v58 = vpop.f32.mrb[195].mxu1 }
 0x6c6   :  { %v9742_v55 = vadd.f32 %v10944_v0, %v9702_v53 }
 0x6db   :  { %v10964_v49 = vpop.f32.mrb[196].mxu0 }
 0x6dc   :  { %v10965_v7 = vpop.f32.mrb[197].mxu0 }
 0x6dd   :  { %v10966_v29 = vadd.f32 %v10965_v7, %v10964_v49  ;;  %v10967_v3 = vpop.f32.mrb[198].mxu0 }
 0x6de   :  { %v10968_v51 = vpop.f32.mrb[199].mxu0 }
 0x6df   :  { %v9782_v24 = vadd.f32 %v10966_v29, %v9742_v55 }
 0x6e1   :  { %9788 = vst.msk [vmem:[%s13928_s9] sm:$0xff] %vm9787_vm1, %v9782_v24 }
 0x6e2   :  { %9793 = vsyncpa [#allocation4], 1 }
 0x6e3   :  { %9794 = vsyncpa [#allocation6], 1 }
 0x6e4   :  { %9795 = vsyncpa [#allocation9], 1 }
 0x6e5   :  { %9796 = vsyncpa [#allocation12], 1 }

</bundles_post_ra>
